<compile_context>
chip_gen: v5e
topology: v5e:2x2
jax: 0.10.0
libtpu: 0.0.40
codegen_flags: <defaults>
</compile_context>

<pallas_src>
import functools
import math

import jax
import jax.numpy as jnp
from jax.experimental import pallas as pl
from jax.experimental.pallas import tpu as pltpu


# ============================================================================
# Fused whole-forward kernel (one invocation per batch element via grid)
# ============================================================================
def _fwd_kernel(
    # per-batch-element blocks
    x_ref, mcol_ref, nsrc_ref, y_ref, icol_ref, nimg_ref,
    # broadcast (weights / constants)
    pe_ref,
    lln_g_ref, lln_b_ref, wqkv_ref, bqkv_ref, wo_ref, bo_ref,
    fln_g_ref, fln_b_ref, w1_ref, b1_ref, w2_ref, b2_ref,
    tln_g_ref, tln_b_ref,
    icg_w_ref, icg_b_ref, srg_w_ref, srg_b_ref,
    wsc_ref, bsc_ref,
    # output
    out_ref,
    *, heads, num_inter, num_image):
    f32 = jnp.float32
    D = wo_ref.shape[-1]
    dh = D // heads

    def ln(x, g, b):
        # nn.LayerNorm(d, eps=1e-6), biased variance over last dim.
        mu = jnp.mean(x, axis=-1, keepdims=True)
        xc = x - mu
        var = jnp.mean(xc * xc, axis=-1, keepdims=True)
        return xc * jax.lax.rsqrt(var + 1e-6) * g + b

    def gelu(h):
        # PreSumm tanh-approx gelu.
        return 0.5 * h * (1.0 + jnp.tanh(0.7978845608028654 * (h + 0.044715 * h * h * h)))

    def attn_core(l, q, k, v, neg_bias):
        # q: [Sq, D], k/v: [Sk, D], neg_bias: [1, Sk] additive mask
        # (-1e18 on padded key positions, 0 elsewhere).
        # Head split, masked softmax and the output projection all stay
        # in-kernel; concat-over-heads is folded into per-head row slices
        # of W_o.  The 1/sqrt(dh) scale was folded into W_q at pack time.
        wo_l = wo_ref[l]                                               # [D, D]
        out = None
        for h in range(heads):
            sl = slice(h * dh, (h + 1) * dh)
            s = jax.lax.dot_general(q[:, sl], k[:, sl], (((1,), (1,)), ((), ())),
                                    preferred_element_type=f32)       # [Sq, Sk]
            s = s + neg_bias
            s = s - jnp.max(s, axis=-1, keepdims=True)
            e = jnp.exp(s)
            a = e * pl.reciprocal(jnp.sum(e, axis=-1, keepdims=True), approx=True)
            ch = jnp.dot(a, v[:, sl], preferred_element_type=f32)      # [Sq, dh]
            contrib = jnp.dot(ch, wo_l[sl, :], preferred_element_type=f32)
            out = contrib if out is None else out + contrib
        return out + bo_ref[l]

    def ffn(l, x):
        # PositionwiseFeedForward: x + W2(gelu(W1(LN(x))))   (dropout == identity)
        h = ln(x, fln_g_ref[l], fln_b_ref[l])
        h = jnp.dot(h, w1_ref[l], preferred_element_type=f32) + b1_ref[l]
        h = gelu(h)
        h = jnp.dot(h, w2_ref[l], preferred_element_type=f32) + b2_ref[l]
        return h + x

    def self_layer(l, it, x, neg_bias):
        # TransformerEncoderLayer.forward(iter, query, inputs, mask), query==inputs.
        xn = ln(x, lln_g_ref[l], lln_b_ref[l]) if it != 0 else x
        p = jnp.dot(xn, wqkv_ref[l], preferred_element_type=f32) + bqkv_ref[l]  # [S, 3D]
        ctx = attn_core(l, p[:, :D], p[:, D:2 * D], p[:, 2 * D:], neg_bias)
        return ffn(l, ctx + x)

    def cross_layer(l, it, kv_src, query, neg_bias):
        # ImageEncoderLayer.forward(iter, key, value, query, mask) with key==value.
        if it != 0:
            kv_n = ln(kv_src, lln_g_ref[l], lln_b_ref[l])   # LN(key)==LN(value): once
            q_n = ln(query, lln_g_ref[l], lln_b_ref[l])
        else:
            kv_n, q_n = kv_src, query
        W = wqkv_ref[l]                                     # [D, 3D]  ([wq | wk | wv])
        Bq = bqkv_ref[l]                                    # [1, 3D]
        q = jnp.dot(q_n, W[:, :D], preferred_element_type=f32) + Bq[:, :D]
        kv = jnp.dot(kv_n, W[:, D:], preferred_element_type=f32) + Bq[:, D:]
        ctx = attn_core(l, q, kv[:, :D], kv[:, D:], neg_bias)
        return ffn(l, ctx + query)

    tln_g = tln_g_ref[...]
    tln_b = tln_b_ref[...]
    neg_src = nsrc_ref[0]       # [1, S]   -1e18 on padded source sentences
    neg_img = nimg_ref[0]       # [1, Si]  -1e18 on padded image slots

    li = 0
    # --- source sentence self-attention stack --------------------------------
    x = x_ref[0] * mcol_ref[0] + pe_ref[...]
    for i in range(num_inter):
        x = self_layer(li, i, x, neg_src)
        li += 1
    x = ln(x, tln_g, tln_b)

    # --- image self-attention stack -------------------------------------------
    y = y_ref[0] * icol_ref[0]
    for i in range(num_image):
        y = self_layer(li, i, y, neg_img)
        li += 1
    y = ln(y, tln_g, tln_b)

    # --- image queries attend over text (context_inter) -----------------------
    res_y = y
    for i in range(num_image):
        res_y = cross_layer(li, i, x, res_y, neg_src)
        li += 1
    g_ic = jax.nn.sigmoid(
        jnp.dot(res_y, icg_w_ref[...], preferred_element_type=f32) + icg_b_ref[...])
    y = ln(y * g_ic, tln_g, tln_b)

    # --- text queries attend over image (context_inter2) ----------------------
    res_x = x
    for i in range(num_image):
        res_x = cross_layer(li, i, y, res_x, neg_img)
        li += 1
    g_src = jax.nn.sigmoid(
        jnp.dot(res_x, srg_w_ref[...], preferred_element_type=f32) + srg_b_ref[...])
    x = ln(x + res_x * g_src, tln_g, tln_b)

    # --- scorer head: (fused Linear(d,d)->Linear(d,1)) -> sigmoid, masked -----
    s = jnp.dot(x, wsc_ref[...], preferred_element_type=f32) + bsc_ref[...]
    out_ref[0] = jax.nn.sigmoid(s) * mcol_ref[0]


# ============================================================================
# Parameter packing: stack all encoder layers, fuse QKV weights, fold q-scale
# ============================================================================
def _pack_layer_params(params, num_inter, num_image, heads, d_model):
    layers = (list(params["inter"][:num_inter]) + list(params["img_inter"])
              + list(params["ctx1"]) + list(params["ctx2"]))
    q_scale = 1.0 / math.sqrt(d_model // heads)   # fold 1/sqrt(dh) into Wq/bq

    def stack(fn):
        return jnp.stack([fn(p) for p in layers], axis=0)

    return {
        "lln_g": stack(lambda p: p["ln_g"]),
        "lln_b": stack(lambda p: p["ln_b"]),
        "wqkv": stack(lambda p: jnp.concatenate(
            [p["attn"]["wq"] * q_scale, p["attn"]["wk"], p["attn"]["wv"]], axis=1)),
        "bqkv": stack(lambda p: jnp.concatenate(
            [p["attn"]["bq"] * q_scale, p["attn"]["bk"], p["attn"]["bv"]], axis=1)),
        "wo": stack(lambda p: p["attn"]["wo"]),
        "bo": stack(lambda p: p["attn"]["bo"]),
        "fln_g": stack(lambda p: p["ff"]["ln_g"]),
        "fln_b": stack(lambda p: p["ff"]["ln_b"]),
        "w1": stack(lambda p: p["ff"]["w1"]),
        "b1": stack(lambda p: p["ff"]["b1"]),
        "w2": stack(lambda p: p["ff"]["w2"]),
        "b2": stack(lambda p: p["ff"]["b2"]),
    }


# ============================================================================
# Wrapper: single pallas_call for the whole forward
# ============================================================================
def ext_image_transformer_encoder3(params, top_vecs, mask, ic_top_vecs, mask_ic,
                                   heads, num_inter_layers, num_image_layer=2):
    f32 = jnp.float32
    B, S, D = top_vecs.shape
    Si = ic_top_vecs.shape[1]

    maskf = mask.astype(f32)
    maskicf = mask_ic.astype(f32)
    mcol = maskf[:, :, None]                       # [B, S, 1]  keep-mask for multiplies
    icol = maskicf[:, :, None]                     # [B, Si, 1]
    nsrc = (maskf - 1.0)[:, None, :] * 1e18        # [B, 1, S]  additive: -1e18 on pad
    nimg = (maskicf - 1.0)[:, None, :] * 1e18      # [B, 1, Si]

    pe = params["pe"][:S]                          # [S, D]
    stk = _pack_layer_params(params, num_inter_layers, num_image_layer, heads, D)

    # Fold scorer Linear(d,d) -> Linear(d,1) into one Linear(d,1) (exact).
    w_sc = params["wo1"] @ params["wo2"]                       # [D, 1]
    b_sc = params["bo1"] @ params["wo2"] + params["bo2"]       # [1, 1]

    kernel = functools.partial(
        _fwd_kernel, heads=heads,
        num_inter=num_inter_layers, num_image=num_image_layer)

    def batch_spec(arr):    # slice the leading batch axis per grid step
        return pl.BlockSpec((1,) + tuple(arr.shape[1:]), lambda b: (b, 0, 0))

    def full_spec(arr):     # broadcast: same full block for every grid step
        return pl.BlockSpec(tuple(arr.shape), lambda b, n=arr.ndim: (0,) * n)

    args = (top_vecs, mcol, nsrc, ic_top_vecs, icol, nimg, pe,
            stk["lln_g"], stk["lln_b"], stk["wqkv"], stk["bqkv"],
            stk["wo"], stk["bo"], stk["fln_g"], stk["fln_b"],
            stk["w1"], stk["b1"], stk["w2"], stk["b2"],
            params["ln_g"], params["ln_b"],
            params["ic_gate_w"], params["ic_gate_b"],
            params["src_gate_w"], params["src_gate_b"],
            w_sc, b_sc)

    in_specs = [batch_spec(a) for a in args[:6]] + [full_spec(a) for a in args[6:]]

    out = pl.pallas_call(
        kernel,
        out_shape=jax.ShapeDtypeStruct((B, S, 1), f32),
        grid=(B,),
        in_specs=in_specs,
        out_specs=pl.BlockSpec((1, S, 1), lambda b: (b, 0, 0)),
        compiler_params=pltpu.CompilerParams(
            dimension_semantics=("parallel",)),   # shards batch across v7x TCs
    )(*args)
    return out[..., 0]                            # [B, S]


# ============================================================================
# Deterministic parameter construction (convention: y = x @ w + b)
# ============================================================================
def _init_linear(key, d_in, d_out, scale=0.05):
    kw, kb = jax.random.split(key)
    w = jax.random.normal(kw, (d_in, d_out), jnp.float32) * scale
    b = jax.random.normal(kb, (1, d_out), jnp.float32) * scale
    return w, b


def _init_mha(key, d):
    ks = jax.random.split(key, 4)
    p = {}
    for name, kk in zip(["q", "k", "v", "o"], ks):
        w, b = _init_linear(kk, d, d)
        p["w" + name] = w
        p["b" + name] = b
    return p


def _init_ffn(key, d, d_ff):
    k1, k2 = jax.random.split(key)
    w1, b1 = _init_linear(k1, d, d_ff)
    w2, b2 = _init_linear(k2, d_ff, d)
    return {"ln_g": jnp.ones((1, d), jnp.float32), "ln_b": jnp.zeros((1, d), jnp.float32),
            "w1": w1, "b1": b1, "w2": w2, "b2": b2}


def _init_layer(key, d, d_ff):
    k1, k2 = jax.random.split(key)
    return {"ln_g": jnp.ones((1, d), jnp.float32), "ln_b": jnp.zeros((1, d), jnp.float32),
            "attn": _init_mha(k1, d), "ff": _init_ffn(k2, d, d_ff)}


def _positional_encoding(d_model, max_len=64):
    position = jnp.arange(max_len, dtype=jnp.float32)[:, None]
    div_term = jnp.exp(
        jnp.arange(0, d_model, 2, dtype=jnp.float32) * -(math.log(10000.0) / d_model))
    pe = jnp.zeros((max_len, d_model), jnp.float32)
    pe = pe.at[:, 0::2].set(jnp.sin(position * div_term))
    pe = pe.at[:, 1::2].set(jnp.cos(position * div_term))
    return pe


def init_params(key, d_model, d_ff, num_inter_layers, num_image_layer=2):
    ks = jax.random.split(key, 8)
    params = {
        "pe": _positional_encoding(d_model),
        "ln_g": jnp.ones((1, d_model), jnp.float32),
        "ln_b": jnp.zeros((1, d_model), jnp.float32),
        "inter": [_init_layer(k, d_model, d_ff)
                  for k in jax.random.split(ks[0], max(num_inter_layers, 1))][:num_inter_layers],
        "img_inter": [_init_layer(k, d_model, d_ff)
                      for k in jax.random.split(ks[1], num_image_layer)],
        "ctx1": [_init_layer(k, d_model, d_ff)
                 for k in jax.random.split(ks[2], num_image_layer)],
        "ctx2": [_init_layer(k, d_model, d_ff)
                 for k in jax.random.split(ks[3], num_image_layer)],
    }
    wo1, bo1 = _init_linear(ks[4], d_model, d_model)
    wo2, bo2 = _init_linear(ks[5], d_model, 1)
    params.update({"wo1": wo1, "bo1": bo1, "wo2": wo2, "bo2": bo2})
    gw, gb = _init_linear(ks[6], d_model, 1)
    params.update({"ic_gate_w": gw, "ic_gate_b": gb})
    sw, sb = _init_linear(ks[7], d_model, 1)
    params.update({"src_gate_w": sw, "src_gate_b": sb})
    return params


# ============================================================================
# Pure-JAX reference (mirrors the PyTorch module, UNFUSED; verification only)
# ============================================================================
def _ref_forward(params, top_vecs, mask, ic_top_vecs, mask_ic,
                 heads, num_inter, num_image=2):
    f32 = jnp.float32

    def ln(x, g, b):
        mu = jnp.mean(x, -1, keepdims=True)
        var = jnp.mean((x - mu) ** 2, -1, keepdims=True)
        return (x - mu) * jax.lax.rsqrt(var + 1e-6) * g + b

    def gelu(x):
        return 0.5 * x * (1.0 + jnp.tanh(0.7978845608028654 * (x + 0.044715 * x ** 3)))

    def mha(p, key, value, query, padmask):
        B, Sk, D = key.shape
        Sq = query.shape[1]
        dh = D // heads

        def proj(x, w, b):
            return (x @ w + b).reshape(B, -1, heads, dh).transpose(0, 2, 1, 3)

        q = proj(query, p["wq"], p["bq"]) / math.sqrt(dh)
        k = proj(key, p["wk"], p["bk"])
        v = proj(value, p["wv"], p["bv"])
        s = jnp.einsum("bhqd,bhkd->bhqk", q, k)
        s = jnp.where(padmask[:, None, None, :] > 0.5, -1e18, s)
        a = jax.nn.softmax(s, axis=-1)
        ctx = jnp.einsum("bhqk,bhkd->bhqd", a, v).transpose(0, 2, 1, 3).reshape(B, Sq, D)
        return ctx @ p["wo"] + p["bo"]

    def ffn(p, x):
        h = ln(x, p["ln_g"], p["ln_b"])
        h = gelu(h @ p["w1"] + p["b1"])
        return h @ p["w2"] + p["b2"] + x

    def enc_layer(p, it, x, padmask):
        xn = ln(x, p["ln_g"], p["ln_b"]) if it != 0 else x
        ctx = mha(p["attn"], xn, xn, xn, padmask)
        return ffn(p["ff"], ctx + x)

    def img_layer(p, it, kv, q, padmask):
        if it != 0:
            kvn = ln(kv, p["ln_g"], p["ln_b"])
            qn = ln(q, p["ln_g"], p["ln_b"])
        else:
            kvn, qn = kv, q
        ctx = mha(p["attn"], kvn, kvn, qn, padmask)
        return ffn(p["ff"], ctx + q)

    maskf = mask.astype(f32)
    maskicf = mask_ic.astype(f32)
    pad = 1.0 - maskf
    padic = 1.0 - maskicf
    S = top_vecs.shape[1]

    x = top_vecs * maskf[:, :, None] + params["pe"][:S][None]
    for i in range(num_inter):
        x = enc_layer(params["inter"][i], i, x, pad)
    x = ln(x, params["ln_g"], params["ln_b"])

    y = ic_top_vecs * maskicf[:, :, None]
    for i in range(num_image):
        y = enc_layer(params["img_inter"][i], i, y, padic)
    y = ln(y, params["ln_g"], params["ln_b"])

    res_y = y
    for i in range(num_image):
        res_y = img_layer(params["ctx1"][i], i, x, res_y, pad)
    y = y * jax.nn.sigmoid(res_y @ params["ic_gate_w"] + params["ic_gate_b"])
    y = ln(y, params["ln_g"], params["ln_b"])

    res_x = x
    for i in range(num_image):
        res_x = img_layer(params["ctx2"][i], i, y, res_x, padic)
    res_x = res_x * jax.nn.sigmoid(res_x @ params["src_gate_w"] + params["src_gate_b"])
    x = ln(x + res_x, params["ln_g"], params["ln_b"])

    s = (x @ params["wo1"] + params["bo1"]) @ params["wo2"] + params["bo2"]
    return jax.nn.sigmoid(s)[..., 0] * maskf


# ============================================================================
# Demo
# ============================================================================
if __name__ == "__main__":
    D_MODEL, D_FF, HEADS, DROPOUT = 32, 64, 4, 0.1   # dropout == identity (eval)
    NUM_INTER_LAYERS = 1
    B, N_SENTS, N_IMG = 2, 8, 6

    root = jax.random.PRNGKey(0)
    k_params, k_src, k_img = jax.random.split(root, 3)

    params = init_params(k_params, D_MODEL, D_FF, NUM_INTER_LAYERS)

    top_vecs = jax.random.normal(k_src, (B, N_SENTS, D_MODEL), jnp.float32)
    ic_top_vecs = jax.random.normal(k_img, (B, N_IMG, D_MODEL), jnp.float32)
    mask = jnp.array([[True] * N_SENTS, [True] * 5 + [False] * (N_SENTS - 5)], dtype=bool)
    mask_ic = jnp.array([[True] * N_IMG, [True] * 3 + [False] * (N_IMG - 3)], dtype=bool)

    fwd = jax.jit(
        lambda p, tv, m, icv, mic: ext_image_transformer_encoder3(
            p, tv, m, icv, mic, HEADS, NUM_INTER_LAYERS))
    sent_scores = fwd(params, top_vecs, mask, ic_top_vecs, mask_ic)
    jax.block_until_ready(sent_scores)

    assert sent_scores.shape == (B, N_SENTS)
    assert bool(jnp.all(jnp.isfinite(sent_scores)))

    ref_scores = _ref_forward(params, top_vecs, mask, ic_top_vecs, mask_ic,
                              HEADS, NUM_INTER_LAYERS)
    max_diff = float(jnp.max(jnp.abs(sent_scores - ref_scores)))
    assert max_diff < 2e-2, f"kernel/reference mismatch: max diff {max_diff}"

    print("KERNEL_OK")
</pallas_src>

<mosaic_0001>
module attributes {stable_mosaic.version = 11 : i64} {
  func.func @_fwd_kernel(%arg0: i32, %arg1: memref<1x8x32xf32, #tpu.memory_space<vmem>>, %arg2: memref<1x8x1xf32, #tpu.memory_space<vmem>>, %arg3: memref<1x1x8xf32, #tpu.memory_space<vmem>>, %arg4: memref<1x6x32xf32, #tpu.memory_space<vmem>>, %arg5: memref<1x6x1xf32, #tpu.memory_space<vmem>>, %arg6: memref<1x1x6xf32, #tpu.memory_space<vmem>>, %arg7: memref<8x32xf32, #tpu.memory_space<vmem>>, %arg8: memref<7x1x32xf32, #tpu.memory_space<vmem>>, %arg9: memref<7x1x32xf32, #tpu.memory_space<vmem>>, %arg10: memref<7x32x96xf32, #tpu.memory_space<vmem>>, %arg11: memref<7x1x96xf32, #tpu.memory_space<vmem>>, %arg12: memref<7x32x32xf32, #tpu.memory_space<vmem>>, %arg13: memref<7x1x32xf32, #tpu.memory_space<vmem>>, %arg14: memref<7x1x32xf32, #tpu.memory_space<vmem>>, %arg15: memref<7x1x32xf32, #tpu.memory_space<vmem>>, %arg16: memref<7x32x64xf32, #tpu.memory_space<vmem>>, %arg17: memref<7x1x64xf32, #tpu.memory_space<vmem>>, %arg18: memref<7x64x32xf32, #tpu.memory_space<vmem>>, %arg19: memref<7x1x32xf32, #tpu.memory_space<vmem>>, %arg20: memref<1x32xf32, #tpu.memory_space<vmem>>, %arg21: memref<1x32xf32, #tpu.memory_space<vmem>>, %arg22: memref<32x1xf32, #tpu.memory_space<vmem>>, %arg23: memref<1x1xf32, #tpu.memory_space<vmem>>, %arg24: memref<32x1xf32, #tpu.memory_space<vmem>>, %arg25: memref<1x1xf32, #tpu.memory_space<vmem>>, %arg26: memref<32x1xf32, #tpu.memory_space<vmem>>, %arg27: memref<1x1xf32, #tpu.memory_space<vmem>>, %arg28: memref<1x8x1xf32, #tpu.memory_space<vmem>>) attributes {dimension_semantics = [#tpu.dimension_semantics<parallel>], iteration_bounds = array<i64: 2>, scalar_prefetch = 0 : i64, scratch_operands = 0 : i64, tpu.core_type = #tpu.core_type<tc>, window_params = [{transform_indices = @transform_0, window_bounds = array<i64: 1, 8, 32>}, {transform_indices = @transform_1, window_bounds = array<i64: 1, 8, 1>}, {transform_indices = @transform_2, window_bounds = array<i64: 1, 1, 8>}, {transform_indices = @transform_3, window_bounds = array<i64: 1, 6, 32>}, {transform_indices = @transform_4, window_bounds = array<i64: 1, 6, 1>}, {transform_indices = @transform_5, window_bounds = array<i64: 1, 1, 6>}, {pipeline_mode = #tpu.pipeline_mode<synchronous>, transform_indices = @transform_6, window_bounds = array<i64: 8, 32>}, {pipeline_mode = #tpu.pipeline_mode<synchronous>, transform_indices = @transform_7, window_bounds = array<i64: 7, 1, 32>}, {pipeline_mode = #tpu.pipeline_mode<synchronous>, transform_indices = @transform_8, window_bounds = array<i64: 7, 1, 32>}, {pipeline_mode = #tpu.pipeline_mode<synchronous>, transform_indices = @transform_9, window_bounds = array<i64: 7, 32, 96>}, {pipeline_mode = #tpu.pipeline_mode<synchronous>, transform_indices = @transform_10, window_bounds = array<i64: 7, 1, 96>}, {pipeline_mode = #tpu.pipeline_mode<synchronous>, transform_indices = @transform_11, window_bounds = array<i64: 7, 32, 32>}, {pipeline_mode = #tpu.pipeline_mode<synchronous>, transform_indices = @transform_12, window_bounds = array<i64: 7, 1, 32>}, {pipeline_mode = #tpu.pipeline_mode<synchronous>, transform_indices = @transform_13, window_bounds = array<i64: 7, 1, 32>}, {pipeline_mode = #tpu.pipeline_mode<synchronous>, transform_indices = @transform_14, window_bounds = array<i64: 7, 1, 32>}, {pipeline_mode = #tpu.pipeline_mode<synchronous>, transform_indices = @transform_15, window_bounds = array<i64: 7, 32, 64>}, {pipeline_mode = #tpu.pipeline_mode<synchronous>, transform_indices = @transform_16, window_bounds = array<i64: 7, 1, 64>}, {pipeline_mode = #tpu.pipeline_mode<synchronous>, transform_indices = @transform_17, window_bounds = array<i64: 7, 64, 32>}, {pipeline_mode = #tpu.pipeline_mode<synchronous>, transform_indices = @transform_18, window_bounds = array<i64: 7, 1, 32>}, {pipeline_mode = #tpu.pipeline_mode<synchronous>, transform_indices = @transform_19, window_bounds = array<i64: 1, 32>}, {pipeline_mode = #tpu.pipeline_mode<synchronous>, transform_indices = @transform_20, window_bounds = array<i64: 1, 32>}, {pipeline_mode = #tpu.pipeline_mode<synchronous>, transform_indices = @transform_21, window_bounds = array<i64: 32, 1>}, {pipeline_mode = #tpu.pipeline_mode<synchronous>, transform_indices = @transform_22, window_bounds = array<i64: 1, 1>}, {pipeline_mode = #tpu.pipeline_mode<synchronous>, transform_indices = @transform_23, window_bounds = array<i64: 32, 1>}, {pipeline_mode = #tpu.pipeline_mode<synchronous>, transform_indices = @transform_24, window_bounds = array<i64: 1, 1>}, {pipeline_mode = #tpu.pipeline_mode<synchronous>, transform_indices = @transform_25, window_bounds = array<i64: 32, 1>}, {pipeline_mode = #tpu.pipeline_mode<synchronous>, transform_indices = @transform_26, window_bounds = array<i64: 1, 1>}, {transform_indices = @transform_27, window_bounds = array<i64: 1, 8, 1>}]} {
    %c0 = arith.constant 0 : index
    %c0_0 = arith.constant 0 : index
    %0 = vector.load %arg20[%c0, %c0_0] : memref<1x32xf32, #tpu.memory_space<vmem>>, vector<1x32xf32>
    %c0_1 = arith.constant 0 : index
    %c0_2 = arith.constant 0 : index
    %1 = vector.load %arg21[%c0_1, %c0_2] : memref<1x32xf32, #tpu.memory_space<vmem>>, vector<1x32xf32>
    %c0_3 = arith.constant 0 : index
    %c0_4 = arith.constant 0 : index
    %c0_5 = arith.constant 0 : index
    %2 = vector.load %arg3[%c0_3, %c0_4, %c0_5] : memref<1x1x8xf32, #tpu.memory_space<vmem>>, vector<1x1x8xf32>
    %3 = vector.shape_cast %2 : vector<1x1x8xf32> to vector<1x8xf32>
    %c0_6 = arith.constant 0 : index
    %c0_7 = arith.constant 0 : index
    %c0_8 = arith.constant 0 : index
    %4 = vector.load %arg6[%c0_6, %c0_7, %c0_8] : memref<1x1x6xf32, #tpu.memory_space<vmem>>, vector<1x1x6xf32>
    %5 = vector.shape_cast %4 : vector<1x1x6xf32> to vector<1x6xf32>
    %c0_9 = arith.constant 0 : index
    %c0_10 = arith.constant 0 : index
    %c0_11 = arith.constant 0 : index
    %6 = vector.load %arg1[%c0_9, %c0_10, %c0_11] : memref<1x8x32xf32, #tpu.memory_space<vmem>>, vector<1x8x32xf32>
    %7 = vector.shape_cast %6 : vector<1x8x32xf32> to vector<8x32xf32>
    %c0_12 = arith.constant 0 : index
    %c0_13 = arith.constant 0 : index
    %c0_14 = arith.constant 0 : index
    %8 = vector.load %arg2[%c0_12, %c0_13, %c0_14] : memref<1x8x1xf32, #tpu.memory_space<vmem>>, vector<1x8x1xf32>
    %9 = vector.shape_cast %8 : vector<1x8x1xf32> to vector<8x1xf32>
    %10 = vector.broadcast %9 : vector<8x1xf32> to vector<8x32xf32>
    %11 = arith.mulf %7, %10 : vector<8x32xf32>
    %c0_15 = arith.constant 0 : index
    %c0_16 = arith.constant 0 : index
    %12 = vector.load %arg7[%c0_15, %c0_16] : memref<8x32xf32, #tpu.memory_space<vmem>>, vector<8x32xf32>
    %13 = arith.addf %11, %12 : vector<8x32xf32>
    %c0_17 = arith.constant 0 : index
    %c0_18 = arith.constant 0 : index
    %c0_19 = arith.constant 0 : index
    %14 = vector.load %arg10[%c0_17, %c0_18, %c0_19] : memref<7x32x96xf32, #tpu.memory_space<vmem>>, vector<1x32x96xf32>
    %15 = vector.shape_cast %14 : vector<1x32x96xf32> to vector<32x96xf32>
    %cst = arith.constant dense<0.000000e+00> : vector<8x96xf32>
    %16 = tpu.matmul %13, %15, %cst {dimension_numbers = #tpu.dot_dimension_numbers<[1], [0], [0], [1], [0, 0, 1, 1], [], []>} : vector<8x32xf32>, vector<32x96xf32>, vector<8x96xf32> -> vector<8x96xf32>
    %c0_20 = arith.constant 0 : index
    %c0_21 = arith.constant 0 : index
    %c0_22 = arith.constant 0 : index
    %17 = vector.load %arg11[%c0_20, %c0_21, %c0_22] : memref<7x1x96xf32, #tpu.memory_space<vmem>>, vector<1x1x96xf32>
    %18 = vector.shape_cast %17 : vector<1x1x96xf32> to vector<1x96xf32>
    %19 = vector.broadcast %18 : vector<1x96xf32> to vector<8x96xf32>
    %20 = arith.addf %16, %19 : vector<8x96xf32>
    %21 = vector.extract_strided_slice %20 {offsets = [0, 0], sizes = [8, 32], strides = [1, 1]} : vector<8x96xf32> to vector<8x32xf32>
    %22 = vector.extract_strided_slice %20 {offsets = [0, 32], sizes = [8, 32], strides = [1, 1]} : vector<8x96xf32> to vector<8x32xf32>
    %23 = vector.extract_strided_slice %20 {offsets = [0, 64], sizes = [8, 32], strides = [1, 1]} : vector<8x96xf32> to vector<8x32xf32>
    %c0_23 = arith.constant 0 : index
    %c0_24 = arith.constant 0 : index
    %c0_25 = arith.constant 0 : index
    %24 = vector.load %arg12[%c0_23, %c0_24, %c0_25] : memref<7x32x32xf32, #tpu.memory_space<vmem>>, vector<1x32x32xf32>
    %25 = vector.shape_cast %24 : vector<1x32x32xf32> to vector<32x32xf32>
    %26 = vector.extract_strided_slice %21 {offsets = [0, 0], sizes = [8, 8], strides = [1, 1]} : vector<8x32xf32> to vector<8x8xf32>
    %27 = vector.extract_strided_slice %22 {offsets = [0, 0], sizes = [8, 8], strides = [1, 1]} : vector<8x32xf32> to vector<8x8xf32>
    %cst_26 = arith.constant dense<0.000000e+00> : vector<8x8xf32>
    %28 = tpu.matmul %26, %27, %cst_26 {dimension_numbers = #tpu.dot_dimension_numbers<[1], [1], [0], [0], [0, 0, 1, 0], [], []>} : vector<8x8xf32>, vector<8x8xf32>, vector<8x8xf32> -> vector<8x8xf32>
    %29 = vector.broadcast %3 : vector<1x8xf32> to vector<8x8xf32>
    %30 = arith.addf %28, %29 : vector<8x8xf32>
    %cst_27 = arith.constant dense<0xFF800000> : vector<8xf32>
    %31 = vector.multi_reduction <maximumf>, %30, %cst_27 [1] : vector<8x8xf32> to vector<8xf32>
    %32 = vector.shape_cast %31 : vector<8xf32> to vector<8x1xf32>
    %33 = vector.broadcast %32 : vector<8x1xf32> to vector<8x8xf32>
    %34 = arith.subf %30, %33 : vector<8x8xf32>
    %35 = math.exp %34 : vector<8x8xf32>
    %cst_28 = arith.constant dense<0.000000e+00> : vector<8xf32>
    %36 = vector.multi_reduction <add>, %35, %cst_28 [1] : vector<8x8xf32> to vector<8xf32>
    %37 = vector.shape_cast %36 : vector<8xf32> to vector<8x1xf32>
    %38 = tpu.reciprocal %37 {approx = true} : vector<8x1xf32> -> vector<8x1xf32>
    %39 = vector.broadcast %38 : vector<8x1xf32> to vector<8x8xf32>
    %40 = arith.mulf %35, %39 : vector<8x8xf32>
    %41 = vector.extract_strided_slice %23 {offsets = [0, 0], sizes = [8, 8], strides = [1, 1]} : vector<8x32xf32> to vector<8x8xf32>
    %cst_29 = arith.constant dense<0.000000e+00> : vector<8x8xf32>
    %42 = tpu.matmul %40, %41, %cst_29 {dimension_numbers = #tpu.dot_dimension_numbers<[1], [0], [0], [1], [0, 0, 1, 1], [], []>} : vector<8x8xf32>, vector<8x8xf32>, vector<8x8xf32> -> vector<8x8xf32>
    %43 = vector.extract_strided_slice %25 {offsets = [0, 0], sizes = [8, 32], strides = [1, 1]} : vector<32x32xf32> to vector<8x32xf32>
    %cst_30 = arith.constant dense<0.000000e+00> : vector<8x32xf32>
    %44 = tpu.matmul %42, %43, %cst_30 {dimension_numbers = #tpu.dot_dimension_numbers<[1], [0], [0], [1], [0, 0, 1, 1], [], []>} : vector<8x8xf32>, vector<8x32xf32>, vector<8x32xf32> -> vector<8x32xf32>
    %45 = vector.extract_strided_slice %21 {offsets = [0, 8], sizes = [8, 8], strides = [1, 1]} : vector<8x32xf32> to vector<8x8xf32>
    %46 = vector.extract_strided_slice %22 {offsets = [0, 8], sizes = [8, 8], strides = [1, 1]} : vector<8x32xf32> to vector<8x8xf32>
    %cst_31 = arith.constant dense<0.000000e+00> : vector<8x8xf32>
    %47 = tpu.matmul %45, %46, %cst_31 {dimension_numbers = #tpu.dot_dimension_numbers<[1], [1], [0], [0], [0, 0, 1, 0], [], []>} : vector<8x8xf32>, vector<8x8xf32>, vector<8x8xf32> -> vector<8x8xf32>
    %48 = vector.broadcast %3 : vector<1x8xf32> to vector<8x8xf32>
    %49 = arith.addf %47, %48 : vector<8x8xf32>
    %cst_32 = arith.constant dense<0xFF800000> : vector<8xf32>
    %50 = vector.multi_reduction <maximumf>, %49, %cst_32 [1] : vector<8x8xf32> to vector<8xf32>
    %51 = vector.shape_cast %50 : vector<8xf32> to vector<8x1xf32>
    %52 = vector.broadcast %51 : vector<8x1xf32> to vector<8x8xf32>
    %53 = arith.subf %49, %52 : vector<8x8xf32>
    %54 = math.exp %53 : vector<8x8xf32>
    %cst_33 = arith.constant dense<0.000000e+00> : vector<8xf32>
    %55 = vector.multi_reduction <add>, %54, %cst_33 [1] : vector<8x8xf32> to vector<8xf32>
    %56 = vector.shape_cast %55 : vector<8xf32> to vector<8x1xf32>
    %57 = tpu.reciprocal %56 {approx = true} : vector<8x1xf32> -> vector<8x1xf32>
    %58 = vector.broadcast %57 : vector<8x1xf32> to vector<8x8xf32>
    %59 = arith.mulf %54, %58 : vector<8x8xf32>
    %60 = vector.extract_strided_slice %23 {offsets = [0, 8], sizes = [8, 8], strides = [1, 1]} : vector<8x32xf32> to vector<8x8xf32>
    %cst_34 = arith.constant dense<0.000000e+00> : vector<8x8xf32>
    %61 = tpu.matmul %59, %60, %cst_34 {dimension_numbers = #tpu.dot_dimension_numbers<[1], [0], [0], [1], [0, 0, 1, 1], [], []>} : vector<8x8xf32>, vector<8x8xf32>, vector<8x8xf32> -> vector<8x8xf32>
    %62 = vector.extract_strided_slice %25 {offsets = [8, 0], sizes = [8, 32], strides = [1, 1]} : vector<32x32xf32> to vector<8x32xf32>
    %cst_35 = arith.constant dense<0.000000e+00> : vector<8x32xf32>
    %63 = tpu.matmul %61, %62, %cst_35 {dimension_numbers = #tpu.dot_dimension_numbers<[1], [0], [0], [1], [0, 0, 1, 1], [], []>} : vector<8x8xf32>, vector<8x32xf32>, vector<8x32xf32> -> vector<8x32xf32>
    %64 = arith.addf %44, %63 : vector<8x32xf32>
    %65 = vector.extract_strided_slice %21 {offsets = [0, 16], sizes = [8, 8], strides = [1, 1]} : vector<8x32xf32> to vector<8x8xf32>
    %66 = vector.extract_strided_slice %22 {offsets = [0, 16], sizes = [8, 8], strides = [1, 1]} : vector<8x32xf32> to vector<8x8xf32>
    %cst_36 = arith.constant dense<0.000000e+00> : vector<8x8xf32>
    %67 = tpu.matmul %65, %66, %cst_36 {dimension_numbers = #tpu.dot_dimension_numbers<[1], [1], [0], [0], [0, 0, 1, 0], [], []>} : vector<8x8xf32>, vector<8x8xf32>, vector<8x8xf32> -> vector<8x8xf32>
    %68 = vector.broadcast %3 : vector<1x8xf32> to vector<8x8xf32>
    %69 = arith.addf %67, %68 : vector<8x8xf32>
    %cst_37 = arith.constant dense<0xFF800000> : vector<8xf32>
    %70 = vector.multi_reduction <maximumf>, %69, %cst_37 [1] : vector<8x8xf32> to vector<8xf32>
    %71 = vector.shape_cast %70 : vector<8xf32> to vector<8x1xf32>
    %72 = vector.broadcast %71 : vector<8x1xf32> to vector<8x8xf32>
    %73 = arith.subf %69, %72 : vector<8x8xf32>
    %74 = math.exp %73 : vector<8x8xf32>
    %cst_38 = arith.constant dense<0.000000e+00> : vector<8xf32>
    %75 = vector.multi_reduction <add>, %74, %cst_38 [1] : vector<8x8xf32> to vector<8xf32>
    %76 = vector.shape_cast %75 : vector<8xf32> to vector<8x1xf32>
    %77 = tpu.reciprocal %76 {approx = true} : vector<8x1xf32> -> vector<8x1xf32>
    %78 = vector.broadcast %77 : vector<8x1xf32> to vector<8x8xf32>
    %79 = arith.mulf %74, %78 : vector<8x8xf32>
    %80 = vector.extract_strided_slice %23 {offsets = [0, 16], sizes = [8, 8], strides = [1, 1]} : vector<8x32xf32> to vector<8x8xf32>
    %cst_39 = arith.constant dense<0.000000e+00> : vector<8x8xf32>
    %81 = tpu.matmul %79, %80, %cst_39 {dimension_numbers = #tpu.dot_dimension_numbers<[1], [0], [0], [1], [0, 0, 1, 1], [], []>} : vector<8x8xf32>, vector<8x8xf32>, vector<8x8xf32> -> vector<8x8xf32>
    %82 = vector.extract_strided_slice %25 {offsets = [16, 0], sizes = [8, 32], strides = [1, 1]} : vector<32x32xf32> to vector<8x32xf32>
    %cst_40 = arith.constant dense<0.000000e+00> : vector<8x32xf32>
    %83 = tpu.matmul %81, %82, %cst_40 {dimension_numbers = #tpu.dot_dimension_numbers<[1], [0], [0], [1], [0, 0, 1, 1], [], []>} : vector<8x8xf32>, vector<8x32xf32>, vector<8x32xf32> -> vector<8x32xf32>
    %84 = arith.addf %64, %83 : vector<8x32xf32>
    %85 = vector.extract_strided_slice %21 {offsets = [0, 24], sizes = [8, 8], strides = [1, 1]} : vector<8x32xf32> to vector<8x8xf32>
    %86 = vector.extract_strided_slice %22 {offsets = [0, 24], sizes = [8, 8], strides = [1, 1]} : vector<8x32xf32> to vector<8x8xf32>
    %cst_41 = arith.constant dense<0.000000e+00> : vector<8x8xf32>
    %87 = tpu.matmul %85, %86, %cst_41 {dimension_numbers = #tpu.dot_dimension_numbers<[1], [1], [0], [0], [0, 0, 1, 0], [], []>} : vector<8x8xf32>, vector<8x8xf32>, vector<8x8xf32> -> vector<8x8xf32>
    %88 = vector.broadcast %3 : vector<1x8xf32> to vector<8x8xf32>
    %89 = arith.addf %87, %88 : vector<8x8xf32>
    %cst_42 = arith.constant dense<0xFF800000> : vector<8xf32>
    %90 = vector.multi_reduction <maximumf>, %89, %cst_42 [1] : vector<8x8xf32> to vector<8xf32>
    %91 = vector.shape_cast %90 : vector<8xf32> to vector<8x1xf32>
    %92 = vector.broadcast %91 : vector<8x1xf32> to vector<8x8xf32>
    %93 = arith.subf %89, %92 : vector<8x8xf32>
    %94 = math.exp %93 : vector<8x8xf32>
    %cst_43 = arith.constant dense<0.000000e+00> : vector<8xf32>
    %95 = vector.multi_reduction <add>, %94, %cst_43 [1] : vector<8x8xf32> to vector<8xf32>
    %96 = vector.shape_cast %95 : vector<8xf32> to vector<8x1xf32>
    %97 = tpu.reciprocal %96 {approx = true} : vector<8x1xf32> -> vector<8x1xf32>
    %98 = vector.broadcast %97 : vector<8x1xf32> to vector<8x8xf32>
    %99 = arith.mulf %94, %98 : vector<8x8xf32>
    %100 = vector.extract_strided_slice %23 {offsets = [0, 24], sizes = [8, 8], strides = [1, 1]} : vector<8x32xf32> to vector<8x8xf32>
    %cst_44 = arith.constant dense<0.000000e+00> : vector<8x8xf32>
    %101 = tpu.matmul %99, %100, %cst_44 {dimension_numbers = #tpu.dot_dimension_numbers<[1], [0], [0], [1], [0, 0, 1, 1], [], []>} : vector<8x8xf32>, vector<8x8xf32>, vector<8x8xf32> -> vector<8x8xf32>
    %102 = vector.extract_strided_slice %25 {offsets = [24, 0], sizes = [8, 32], strides = [1, 1]} : vector<32x32xf32> to vector<8x32xf32>
    %cst_45 = arith.constant dense<0.000000e+00> : vector<8x32xf32>
    %103 = tpu.matmul %101, %102, %cst_45 {dimension_numbers = #tpu.dot_dimension_numbers<[1], [0], [0], [1], [0, 0, 1, 1], [], []>} : vector<8x8xf32>, vector<8x32xf32>, vector<8x32xf32> -> vector<8x32xf32>
    %104 = arith.addf %84, %103 : vector<8x32xf32>
    %c0_46 = arith.constant 0 : index
    %c0_47 = arith.constant 0 : index
    %c0_48 = arith.constant 0 : index
    %105 = vector.load %arg13[%c0_46, %c0_47, %c0_48] : memref<7x1x32xf32, #tpu.memory_space<vmem>>, vector<1x1x32xf32>
    %106 = vector.shape_cast %105 : vector<1x1x32xf32> to vector<1x32xf32>
    %107 = vector.broadcast %106 : vector<1x32xf32> to vector<8x32xf32>
    %108 = arith.addf %104, %107 : vector<8x32xf32>
    %109 = arith.addf %108, %13 : vector<8x32xf32>
    %c0_49 = arith.constant 0 : index
    %c0_50 = arith.constant 0 : index
    %c0_51 = arith.constant 0 : index
    %110 = vector.load %arg14[%c0_49, %c0_50, %c0_51] : memref<7x1x32xf32, #tpu.memory_space<vmem>>, vector<1x1x32xf32>
    %111 = vector.shape_cast %110 : vector<1x1x32xf32> to vector<1x32xf32>
    %c0_52 = arith.constant 0 : index
    %c0_53 = arith.constant 0 : index
    %c0_54 = arith.constant 0 : index
    %112 = vector.load %arg15[%c0_52, %c0_53, %c0_54] : memref<7x1x32xf32, #tpu.memory_space<vmem>>, vector<1x1x32xf32>
    %113 = vector.shape_cast %112 : vector<1x1x32xf32> to vector<1x32xf32>
    %cst_55 = arith.constant dense<0.000000e+00> : vector<8xf32>
    %114 = vector.multi_reduction <add>, %109, %cst_55 [1] : vector<8x32xf32> to vector<8xf32>
    %115 = vector.shape_cast %114 : vector<8xf32> to vector<8x1xf32>
    %cst_56 = arith.constant 3.200000e+01 : f32
    %116 = vector.broadcast %cst_56 : f32 to vector<8x1xf32>
    %117 = arith.divf %115, %116 : vector<8x1xf32>
    %118 = vector.broadcast %117 : vector<8x1xf32> to vector<8x32xf32>
    %119 = arith.subf %109, %118 : vector<8x32xf32>
    %120 = arith.mulf %119, %119 : vector<8x32xf32>
    %cst_57 = arith.constant dense<0.000000e+00> : vector<8xf32>
    %121 = vector.multi_reduction <add>, %120, %cst_57 [1] : vector<8x32xf32> to vector<8xf32>
    %122 = vector.shape_cast %121 : vector<8xf32> to vector<8x1xf32>
    %cst_58 = arith.constant 3.200000e+01 : f32
    %123 = vector.broadcast %cst_58 : f32 to vector<8x1xf32>
    %124 = arith.divf %122, %123 : vector<8x1xf32>
    %cst_59 = arith.constant 9.99999997E-7 : f32
    %125 = vector.broadcast %cst_59 : f32 to vector<8x1xf32>
    %126 = arith.addf %124, %125 : vector<8x1xf32>
    %127 = math.rsqrt %126 : vector<8x1xf32>
    %128 = vector.broadcast %127 : vector<8x1xf32> to vector<8x32xf32>
    %129 = arith.mulf %119, %128 : vector<8x32xf32>
    %130 = vector.broadcast %111 : vector<1x32xf32> to vector<8x32xf32>
    %131 = arith.mulf %129, %130 : vector<8x32xf32>
    %132 = vector.broadcast %113 : vector<1x32xf32> to vector<8x32xf32>
    %133 = arith.addf %131, %132 : vector<8x32xf32>
    %c0_60 = arith.constant 0 : index
    %c0_61 = arith.constant 0 : index
    %c0_62 = arith.constant 0 : index
    %134 = vector.load %arg16[%c0_60, %c0_61, %c0_62] : memref<7x32x64xf32, #tpu.memory_space<vmem>>, vector<1x32x64xf32>
    %135 = vector.shape_cast %134 : vector<1x32x64xf32> to vector<32x64xf32>
    %cst_63 = arith.constant dense<0.000000e+00> : vector<8x64xf32>
    %136 = tpu.matmul %133, %135, %cst_63 {dimension_numbers = #tpu.dot_dimension_numbers<[1], [0], [0], [1], [0, 0, 1, 1], [], []>} : vector<8x32xf32>, vector<32x64xf32>, vector<8x64xf32> -> vector<8x64xf32>
    %c0_64 = arith.constant 0 : index
    %c0_65 = arith.constant 0 : index
    %c0_66 = arith.constant 0 : index
    %137 = vector.load %arg17[%c0_64, %c0_65, %c0_66] : memref<7x1x64xf32, #tpu.memory_space<vmem>>, vector<1x1x64xf32>
    %138 = vector.shape_cast %137 : vector<1x1x64xf32> to vector<1x64xf32>
    %139 = vector.broadcast %138 : vector<1x64xf32> to vector<8x64xf32>
    %140 = arith.addf %136, %139 : vector<8x64xf32>
    %cst_67 = arith.constant 5.000000e-01 : f32
    %141 = vector.broadcast %cst_67 : f32 to vector<8x64xf32>
    %142 = arith.mulf %141, %140 : vector<8x64xf32>
    %cst_68 = arith.constant 4.471500e-02 : f32
    %143 = vector.broadcast %cst_68 : f32 to vector<8x64xf32>
    %144 = arith.mulf %143, %140 : vector<8x64xf32>
    %145 = arith.mulf %144, %140 : vector<8x64xf32>
    %146 = arith.mulf %145, %140 : vector<8x64xf32>
    %147 = arith.addf %140, %146 : vector<8x64xf32>
    %cst_69 = arith.constant 0.797884583 : f32
    %148 = vector.broadcast %cst_69 : f32 to vector<8x64xf32>
    %149 = arith.mulf %148, %147 : vector<8x64xf32>
    %150 = math.tanh %149 : vector<8x64xf32>
    %cst_70 = arith.constant 1.000000e+00 : f32
    %151 = vector.broadcast %cst_70 : f32 to vector<8x64xf32>
    %152 = arith.addf %151, %150 : vector<8x64xf32>
    %153 = arith.mulf %142, %152 : vector<8x64xf32>
    %c0_71 = arith.constant 0 : index
    %c0_72 = arith.constant 0 : index
    %c0_73 = arith.constant 0 : index
    %154 = vector.load %arg18[%c0_71, %c0_72, %c0_73] : memref<7x64x32xf32, #tpu.memory_space<vmem>>, vector<1x64x32xf32>
    %155 = vector.shape_cast %154 : vector<1x64x32xf32> to vector<64x32xf32>
    %cst_74 = arith.constant dense<0.000000e+00> : vector<8x32xf32>
    %156 = tpu.matmul %153, %155, %cst_74 {dimension_numbers = #tpu.dot_dimension_numbers<[1], [0], [0], [1], [0, 0, 1, 1], [], []>} : vector<8x64xf32>, vector<64x32xf32>, vector<8x32xf32> -> vector<8x32xf32>
    %c0_75 = arith.constant 0 : index
    %c0_76 = arith.constant 0 : index
    %c0_77 = arith.constant 0 : index
    %157 = vector.load %arg19[%c0_75, %c0_76, %c0_77] : memref<7x1x32xf32, #tpu.memory_space<vmem>>, vector<1x1x32xf32>
    %158 = vector.shape_cast %157 : vector<1x1x32xf32> to vector<1x32xf32>
    %159 = vector.broadcast %158 : vector<1x32xf32> to vector<8x32xf32>
    %160 = arith.addf %156, %159 : vector<8x32xf32>
    %161 = arith.addf %160, %109 : vector<8x32xf32>
    %cst_78 = arith.constant dense<0.000000e+00> : vector<8xf32>
    %162 = vector.multi_reduction <add>, %161, %cst_78 [1] : vector<8x32xf32> to vector<8xf32>
    %163 = vector.shape_cast %162 : vector<8xf32> to vector<8x1xf32>
    %cst_79 = arith.constant 3.200000e+01 : f32
    %164 = vector.broadcast %cst_79 : f32 to vector<8x1xf32>
    %165 = arith.divf %163, %164 : vector<8x1xf32>
    %166 = vector.broadcast %165 : vector<8x1xf32> to vector<8x32xf32>
    %167 = arith.subf %161, %166 : vector<8x32xf32>
    %168 = arith.mulf %167, %167 : vector<8x32xf32>
    %cst_80 = arith.constant dense<0.000000e+00> : vector<8xf32>
    %169 = vector.multi_reduction <add>, %168, %cst_80 [1] : vector<8x32xf32> to vector<8xf32>
    %170 = vector.shape_cast %169 : vector<8xf32> to vector<8x1xf32>
    %cst_81 = arith.constant 3.200000e+01 : f32
    %171 = vector.broadcast %cst_81 : f32 to vector<8x1xf32>
    %172 = arith.divf %170, %171 : vector<8x1xf32>
    %cst_82 = arith.constant 9.99999997E-7 : f32
    %173 = vector.broadcast %cst_82 : f32 to vector<8x1xf32>
    %174 = arith.addf %172, %173 : vector<8x1xf32>
    %175 = math.rsqrt %174 : vector<8x1xf32>
    %176 = vector.broadcast %175 : vector<8x1xf32> to vector<8x32xf32>
    %177 = arith.mulf %167, %176 : vector<8x32xf32>
    %178 = vector.broadcast %0 : vector<1x32xf32> to vector<8x32xf32>
    %179 = arith.mulf %177, %178 : vector<8x32xf32>
    %180 = vector.broadcast %1 : vector<1x32xf32> to vector<8x32xf32>
    %181 = arith.addf %179, %180 : vector<8x32xf32>
    %c0_83 = arith.constant 0 : index
    %c0_84 = arith.constant 0 : index
    %c0_85 = arith.constant 0 : index
    %182 = vector.load %arg4[%c0_83, %c0_84, %c0_85] : memref<1x6x32xf32, #tpu.memory_space<vmem>>, vector<1x6x32xf32>
    %183 = vector.shape_cast %182 : vector<1x6x32xf32> to vector<6x32xf32>
    %c0_86 = arith.constant 0 : index
    %c0_87 = arith.constant 0 : index
    %c0_88 = arith.constant 0 : index
    %184 = vector.load %arg5[%c0_86, %c0_87, %c0_88] : memref<1x6x1xf32, #tpu.memory_space<vmem>>, vector<1x6x1xf32>
    %185 = vector.shape_cast %184 : vector<1x6x1xf32> to vector<6x1xf32>
    %186 = vector.broadcast %185 : vector<6x1xf32> to vector<6x32xf32>
    %187 = arith.mulf %183, %186 : vector<6x32xf32>
    %c1 = arith.constant 1 : index
    %c0_89 = arith.constant 0 : index
    %c0_90 = arith.constant 0 : index
    %188 = vector.load %arg10[%c1, %c0_89, %c0_90] : memref<7x32x96xf32, #tpu.memory_space<vmem>>, vector<1x32x96xf32>
    %189 = vector.shape_cast %188 : vector<1x32x96xf32> to vector<32x96xf32>
    %cst_91 = arith.constant dense<0.000000e+00> : vector<6x96xf32>
    %190 = tpu.matmul %187, %189, %cst_91 {dimension_numbers = #tpu.dot_dimension_numbers<[1], [0], [0], [1], [0, 0, 1, 1], [], []>} : vector<6x32xf32>, vector<32x96xf32>, vector<6x96xf32> -> vector<6x96xf32>
    %c1_92 = arith.constant 1 : index
    %c0_93 = arith.constant 0 : index
    %c0_94 = arith.constant 0 : index
    %191 = vector.load %arg11[%c1_92, %c0_93, %c0_94] : memref<7x1x96xf32, #tpu.memory_space<vmem>>, vector<1x1x96xf32>
    %192 = vector.shape_cast %191 : vector<1x1x96xf32> to vector<1x96xf32>
    %193 = vector.broadcast %192 : vector<1x96xf32> to vector<6x96xf32>
    %194 = arith.addf %190, %193 : vector<6x96xf32>
    %195 = vector.extract_strided_slice %194 {offsets = [0, 0], sizes = [6, 32], strides = [1, 1]} : vector<6x96xf32> to vector<6x32xf32>
    %196 = vector.extract_strided_slice %194 {offsets = [0, 32], sizes = [6, 32], strides = [1, 1]} : vector<6x96xf32> to vector<6x32xf32>
    %197 = vector.extract_strided_slice %194 {offsets = [0, 64], sizes = [6, 32], strides = [1, 1]} : vector<6x96xf32> to vector<6x32xf32>
    %c1_95 = arith.constant 1 : index
    %c0_96 = arith.constant 0 : index
    %c0_97 = arith.constant 0 : index
    %198 = vector.load %arg12[%c1_95, %c0_96, %c0_97] : memref<7x32x32xf32, #tpu.memory_space<vmem>>, vector<1x32x32xf32>
    %199 = vector.shape_cast %198 : vector<1x32x32xf32> to vector<32x32xf32>
    %200 = vector.extract_strided_slice %195 {offsets = [0, 0], sizes = [6, 8], strides = [1, 1]} : vector<6x32xf32> to vector<6x8xf32>
    %201 = vector.extract_strided_slice %196 {offsets = [0, 0], sizes = [6, 8], strides = [1, 1]} : vector<6x32xf32> to vector<6x8xf32>
    %cst_98 = arith.constant dense<0.000000e+00> : vector<6x6xf32>
    %202 = tpu.matmul %200, %201, %cst_98 {dimension_numbers = #tpu.dot_dimension_numbers<[1], [1], [0], [0], [0, 0, 1, 0], [], []>} : vector<6x8xf32>, vector<6x8xf32>, vector<6x6xf32> -> vector<6x6xf32>
    %203 = vector.broadcast %5 : vector<1x6xf32> to vector<6x6xf32>
    %204 = arith.addf %202, %203 : vector<6x6xf32>
    %cst_99 = arith.constant dense<0xFF800000> : vector<6xf32>
    %205 = vector.multi_reduction <maximumf>, %204, %cst_99 [1] : vector<6x6xf32> to vector<6xf32>
    %206 = vector.shape_cast %205 : vector<6xf32> to vector<6x1xf32>
    %207 = vector.broadcast %206 : vector<6x1xf32> to vector<6x6xf32>
    %208 = arith.subf %204, %207 : vector<6x6xf32>
    %209 = math.exp %208 : vector<6x6xf32>
    %cst_100 = arith.constant dense<0.000000e+00> : vector<6xf32>
    %210 = vector.multi_reduction <add>, %209, %cst_100 [1] : vector<6x6xf32> to vector<6xf32>
    %211 = vector.shape_cast %210 : vector<6xf32> to vector<6x1xf32>
    %212 = tpu.reciprocal %211 {approx = true} : vector<6x1xf32> -> vector<6x1xf32>
    %213 = vector.broadcast %212 : vector<6x1xf32> to vector<6x6xf32>
    %214 = arith.mulf %209, %213 : vector<6x6xf32>
    %215 = vector.extract_strided_slice %197 {offsets = [0, 0], sizes = [6, 8], strides = [1, 1]} : vector<6x32xf32> to vector<6x8xf32>
    %cst_101 = arith.constant dense<0.000000e+00> : vector<6x8xf32>
    %216 = tpu.matmul %214, %215, %cst_101 {dimension_numbers = #tpu.dot_dimension_numbers<[1], [0], [0], [1], [0, 0, 1, 1], [], []>} : vector<6x6xf32>, vector<6x8xf32>, vector<6x8xf32> -> vector<6x8xf32>
    %217 = vector.extract_strided_slice %199 {offsets = [0, 0], sizes = [8, 32], strides = [1, 1]} : vector<32x32xf32> to vector<8x32xf32>
    %cst_102 = arith.constant dense<0.000000e+00> : vector<6x32xf32>
    %218 = tpu.matmul %216, %217, %cst_102 {dimension_numbers = #tpu.dot_dimension_numbers<[1], [0], [0], [1], [0, 0, 1, 1], [], []>} : vector<6x8xf32>, vector<8x32xf32>, vector<6x32xf32> -> vector<6x32xf32>
    %219 = vector.extract_strided_slice %195 {offsets = [0, 8], sizes = [6, 8], strides = [1, 1]} : vector<6x32xf32> to vector<6x8xf32>
    %220 = vector.extract_strided_slice %196 {offsets = [0, 8], sizes = [6, 8], strides = [1, 1]} : vector<6x32xf32> to vector<6x8xf32>
    %cst_103 = arith.constant dense<0.000000e+00> : vector<6x6xf32>
    %221 = tpu.matmul %219, %220, %cst_103 {dimension_numbers = #tpu.dot_dimension_numbers<[1], [1], [0], [0], [0, 0, 1, 0], [], []>} : vector<6x8xf32>, vector<6x8xf32>, vector<6x6xf32> -> vector<6x6xf32>
    %222 = vector.broadcast %5 : vector<1x6xf32> to vector<6x6xf32>
    %223 = arith.addf %221, %222 : vector<6x6xf32>
    %cst_104 = arith.constant dense<0xFF800000> : vector<6xf32>
    %224 = vector.multi_reduction <maximumf>, %223, %cst_104 [1] : vector<6x6xf32> to vector<6xf32>
    %225 = vector.shape_cast %224 : vector<6xf32> to vector<6x1xf32>
    %226 = vector.broadcast %225 : vector<6x1xf32> to vector<6x6xf32>
    %227 = arith.subf %223, %226 : vector<6x6xf32>
    %228 = math.exp %227 : vector<6x6xf32>
    %cst_105 = arith.constant dense<0.000000e+00> : vector<6xf32>
    %229 = vector.multi_reduction <add>, %228, %cst_105 [1] : vector<6x6xf32> to vector<6xf32>
    %230 = vector.shape_cast %229 : vector<6xf32> to vector<6x1xf32>
    %231 = tpu.reciprocal %230 {approx = true} : vector<6x1xf32> -> vector<6x1xf32>
    %232 = vector.broadcast %231 : vector<6x1xf32> to vector<6x6xf32>
    %233 = arith.mulf %228, %232 : vector<6x6xf32>
    %234 = vector.extract_strided_slice %197 {offsets = [0, 8], sizes = [6, 8], strides = [1, 1]} : vector<6x32xf32> to vector<6x8xf32>
    %cst_106 = arith.constant dense<0.000000e+00> : vector<6x8xf32>
    %235 = tpu.matmul %233, %234, %cst_106 {dimension_numbers = #tpu.dot_dimension_numbers<[1], [0], [0], [1], [0, 0, 1, 1], [], []>} : vector<6x6xf32>, vector<6x8xf32>, vector<6x8xf32> -> vector<6x8xf32>
    %236 = vector.extract_strided_slice %199 {offsets = [8, 0], sizes = [8, 32], strides = [1, 1]} : vector<32x32xf32> to vector<8x32xf32>
    %cst_107 = arith.constant dense<0.000000e+00> : vector<6x32xf32>
    %237 = tpu.matmul %235, %236, %cst_107 {dimension_numbers = #tpu.dot_dimension_numbers<[1], [0], [0], [1], [0, 0, 1, 1], [], []>} : vector<6x8xf32>, vector<8x32xf32>, vector<6x32xf32> -> vector<6x32xf32>
    %238 = arith.addf %218, %237 : vector<6x32xf32>
    %239 = vector.extract_strided_slice %195 {offsets = [0, 16], sizes = [6, 8], strides = [1, 1]} : vector<6x32xf32> to vector<6x8xf32>
    %240 = vector.extract_strided_slice %196 {offsets = [0, 16], sizes = [6, 8], strides = [1, 1]} : vector<6x32xf32> to vector<6x8xf32>
    %cst_108 = arith.constant dense<0.000000e+00> : vector<6x6xf32>
    %241 = tpu.matmul %239, %240, %cst_108 {dimension_numbers = #tpu.dot_dimension_numbers<[1], [1], [0], [0], [0, 0, 1, 0], [], []>} : vector<6x8xf32>, vector<6x8xf32>, vector<6x6xf32> -> vector<6x6xf32>
    %242 = vector.broadcast %5 : vector<1x6xf32> to vector<6x6xf32>
    %243 = arith.addf %241, %242 : vector<6x6xf32>
    %cst_109 = arith.constant dense<0xFF800000> : vector<6xf32>
    %244 = vector.multi_reduction <maximumf>, %243, %cst_109 [1] : vector<6x6xf32> to vector<6xf32>
    %245 = vector.shape_cast %244 : vector<6xf32> to vector<6x1xf32>
    %246 = vector.broadcast %245 : vector<6x1xf32> to vector<6x6xf32>
    %247 = arith.subf %243, %246 : vector<6x6xf32>
    %248 = math.exp %247 : vector<6x6xf32>
    %cst_110 = arith.constant dense<0.000000e+00> : vector<6xf32>
    %249 = vector.multi_reduction <add>, %248, %cst_110 [1] : vector<6x6xf32> to vector<6xf32>
    %250 = vector.shape_cast %249 : vector<6xf32> to vector<6x1xf32>
    %251 = tpu.reciprocal %250 {approx = true} : vector<6x1xf32> -> vector<6x1xf32>
    %252 = vector.broadcast %251 : vector<6x1xf32> to vector<6x6xf32>
    %253 = arith.mulf %248, %252 : vector<6x6xf32>
    %254 = vector.extract_strided_slice %197 {offsets = [0, 16], sizes = [6, 8], strides = [1, 1]} : vector<6x32xf32> to vector<6x8xf32>
    %cst_111 = arith.constant dense<0.000000e+00> : vector<6x8xf32>
    %255 = tpu.matmul %253, %254, %cst_111 {dimension_numbers = #tpu.dot_dimension_numbers<[1], [0], [0], [1], [0, 0, 1, 1], [], []>} : vector<6x6xf32>, vector<6x8xf32>, vector<6x8xf32> -> vector<6x8xf32>
    %256 = vector.extract_strided_slice %199 {offsets = [16, 0], sizes = [8, 32], strides = [1, 1]} : vector<32x32xf32> to vector<8x32xf32>
    %cst_112 = arith.constant dense<0.000000e+00> : vector<6x32xf32>
    %257 = tpu.matmul %255, %256, %cst_112 {dimension_numbers = #tpu.dot_dimension_numbers<[1], [0], [0], [1], [0, 0, 1, 1], [], []>} : vector<6x8xf32>, vector<8x32xf32>, vector<6x32xf32> -> vector<6x32xf32>
    %258 = arith.addf %238, %257 : vector<6x32xf32>
    %259 = vector.extract_strided_slice %195 {offsets = [0, 24], sizes = [6, 8], strides = [1, 1]} : vector<6x32xf32> to vector<6x8xf32>
    %260 = vector.extract_strided_slice %196 {offsets = [0, 24], sizes = [6, 8], strides = [1, 1]} : vector<6x32xf32> to vector<6x8xf32>
    %cst_113 = arith.constant dense<0.000000e+00> : vector<6x6xf32>
    %261 = tpu.matmul %259, %260, %cst_113 {dimension_numbers = #tpu.dot_dimension_numbers<[1], [1], [0], [0], [0, 0, 1, 0], [], []>} : vector<6x8xf32>, vector<6x8xf32>, vector<6x6xf32> -> vector<6x6xf32>
    %262 = vector.broadcast %5 : vector<1x6xf32> to vector<6x6xf32>
    %263 = arith.addf %261, %262 : vector<6x6xf32>
    %cst_114 = arith.constant dense<0xFF800000> : vector<6xf32>
    %264 = vector.multi_reduction <maximumf>, %263, %cst_114 [1] : vector<6x6xf32> to vector<6xf32>
    %265 = vector.shape_cast %264 : vector<6xf32> to vector<6x1xf32>
    %266 = vector.broadcast %265 : vector<6x1xf32> to vector<6x6xf32>
    %267 = arith.subf %263, %266 : vector<6x6xf32>
    %268 = math.exp %267 : vector<6x6xf32>
    %cst_115 = arith.constant dense<0.000000e+00> : vector<6xf32>
    %269 = vector.multi_reduction <add>, %268, %cst_115 [1] : vector<6x6xf32> to vector<6xf32>
    %270 = vector.shape_cast %269 : vector<6xf32> to vector<6x1xf32>
    %271 = tpu.reciprocal %270 {approx = true} : vector<6x1xf32> -> vector<6x1xf32>
    %272 = vector.broadcast %271 : vector<6x1xf32> to vector<6x6xf32>
    %273 = arith.mulf %268, %272 : vector<6x6xf32>
    %274 = vector.extract_strided_slice %197 {offsets = [0, 24], sizes = [6, 8], strides = [1, 1]} : vector<6x32xf32> to vector<6x8xf32>
    %cst_116 = arith.constant dense<0.000000e+00> : vector<6x8xf32>
    %275 = tpu.matmul %273, %274, %cst_116 {dimension_numbers = #tpu.dot_dimension_numbers<[1], [0], [0], [1], [0, 0, 1, 1], [], []>} : vector<6x6xf32>, vector<6x8xf32>, vector<6x8xf32> -> vector<6x8xf32>
    %276 = vector.extract_strided_slice %199 {offsets = [24, 0], sizes = [8, 32], strides = [1, 1]} : vector<32x32xf32> to vector<8x32xf32>
    %cst_117 = arith.constant dense<0.000000e+00> : vector<6x32xf32>
    %277 = tpu.matmul %275, %276, %cst_117 {dimension_numbers = #tpu.dot_dimension_numbers<[1], [0], [0], [1], [0, 0, 1, 1], [], []>} : vector<6x8xf32>, vector<8x32xf32>, vector<6x32xf32> -> vector<6x32xf32>
    %278 = arith.addf %258, %277 : vector<6x32xf32>
    %c1_118 = arith.constant 1 : index
    %c0_119 = arith.constant 0 : index
    %c0_120 = arith.constant 0 : index
    %279 = vector.load %arg13[%c1_118, %c0_119, %c0_120] : memref<7x1x32xf32, #tpu.memory_space<vmem>>, vector<1x1x32xf32>
    %280 = vector.shape_cast %279 : vector<1x1x32xf32> to vector<1x32xf32>
    %281 = vector.broadcast %280 : vector<1x32xf32> to vector<6x32xf32>
    %282 = arith.addf %278, %281 : vector<6x32xf32>
    %283 = arith.addf %282, %187 : vector<6x32xf32>
    %c1_121 = arith.constant 1 : index
    %c0_122 = arith.constant 0 : index
    %c0_123 = arith.constant 0 : index
    %284 = vector.load %arg14[%c1_121, %c0_122, %c0_123] : memref<7x1x32xf32, #tpu.memory_space<vmem>>, vector<1x1x32xf32>
    %285 = vector.shape_cast %284 : vector<1x1x32xf32> to vector<1x32xf32>
    %c1_124 = arith.constant 1 : index
    %c0_125 = arith.constant 0 : index
    %c0_126 = arith.constant 0 : index
    %286 = vector.load %arg15[%c1_124, %c0_125, %c0_126] : memref<7x1x32xf32, #tpu.memory_space<vmem>>, vector<1x1x32xf32>
    %287 = vector.shape_cast %286 : vector<1x1x32xf32> to vector<1x32xf32>
    %cst_127 = arith.constant dense<0.000000e+00> : vector<6xf32>
    %288 = vector.multi_reduction <add>, %283, %cst_127 [1] : vector<6x32xf32> to vector<6xf32>
    %289 = vector.shape_cast %288 : vector<6xf32> to vector<6x1xf32>
    %cst_128 = arith.constant 3.200000e+01 : f32
    %290 = vector.broadcast %cst_128 : f32 to vector<6x1xf32>
    %291 = arith.divf %289, %290 : vector<6x1xf32>
    %292 = vector.broadcast %291 : vector<6x1xf32> to vector<6x32xf32>
    %293 = arith.subf %283, %292 : vector<6x32xf32>
    %294 = arith.mulf %293, %293 : vector<6x32xf32>
    %cst_129 = arith.constant dense<0.000000e+00> : vector<6xf32>
    %295 = vector.multi_reduction <add>, %294, %cst_129 [1] : vector<6x32xf32> to vector<6xf32>
    %296 = vector.shape_cast %295 : vector<6xf32> to vector<6x1xf32>
    %cst_130 = arith.constant 3.200000e+01 : f32
    %297 = vector.broadcast %cst_130 : f32 to vector<6x1xf32>
    %298 = arith.divf %296, %297 : vector<6x1xf32>
    %cst_131 = arith.constant 9.99999997E-7 : f32
    %299 = vector.broadcast %cst_131 : f32 to vector<6x1xf32>
    %300 = arith.addf %298, %299 : vector<6x1xf32>
    %301 = math.rsqrt %300 : vector<6x1xf32>
    %302 = vector.broadcast %301 : vector<6x1xf32> to vector<6x32xf32>
    %303 = arith.mulf %293, %302 : vector<6x32xf32>
    %304 = vector.broadcast %285 : vector<1x32xf32> to vector<6x32xf32>
    %305 = arith.mulf %303, %304 : vector<6x32xf32>
    %306 = vector.broadcast %287 : vector<1x32xf32> to vector<6x32xf32>
    %307 = arith.addf %305, %306 : vector<6x32xf32>
    %c1_132 = arith.constant 1 : index
    %c0_133 = arith.constant 0 : index
    %c0_134 = arith.constant 0 : index
    %308 = vector.load %arg16[%c1_132, %c0_133, %c0_134] : memref<7x32x64xf32, #tpu.memory_space<vmem>>, vector<1x32x64xf32>
    %309 = vector.shape_cast %308 : vector<1x32x64xf32> to vector<32x64xf32>
    %cst_135 = arith.constant dense<0.000000e+00> : vector<6x64xf32>
    %310 = tpu.matmul %307, %309, %cst_135 {dimension_numbers = #tpu.dot_dimension_numbers<[1], [0], [0], [1], [0, 0, 1, 1], [], []>} : vector<6x32xf32>, vector<32x64xf32>, vector<6x64xf32> -> vector<6x64xf32>
    %c1_136 = arith.constant 1 : index
    %c0_137 = arith.constant 0 : index
    %c0_138 = arith.constant 0 : index
    %311 = vector.load %arg17[%c1_136, %c0_137, %c0_138] : memref<7x1x64xf32, #tpu.memory_space<vmem>>, vector<1x1x64xf32>
    %312 = vector.shape_cast %311 : vector<1x1x64xf32> to vector<1x64xf32>
    %313 = vector.broadcast %312 : vector<1x64xf32> to vector<6x64xf32>
    %314 = arith.addf %310, %313 : vector<6x64xf32>
    %cst_139 = arith.constant 5.000000e-01 : f32
    %315 = vector.broadcast %cst_139 : f32 to vector<6x64xf32>
    %316 = arith.mulf %315, %314 : vector<6x64xf32>
    %cst_140 = arith.constant 4.471500e-02 : f32
    %317 = vector.broadcast %cst_140 : f32 to vector<6x64xf32>
    %318 = arith.mulf %317, %314 : vector<6x64xf32>
    %319 = arith.mulf %318, %314 : vector<6x64xf32>
    %320 = arith.mulf %319, %314 : vector<6x64xf32>
    %321 = arith.addf %314, %320 : vector<6x64xf32>
    %cst_141 = arith.constant 0.797884583 : f32
    %322 = vector.broadcast %cst_141 : f32 to vector<6x64xf32>
    %323 = arith.mulf %322, %321 : vector<6x64xf32>
    %324 = math.tanh %323 : vector<6x64xf32>
    %cst_142 = arith.constant 1.000000e+00 : f32
    %325 = vector.broadcast %cst_142 : f32 to vector<6x64xf32>
    %326 = arith.addf %325, %324 : vector<6x64xf32>
    %327 = arith.mulf %316, %326 : vector<6x64xf32>
    %c1_143 = arith.constant 1 : index
    %c0_144 = arith.constant 0 : index
    %c0_145 = arith.constant 0 : index
    %328 = vector.load %arg18[%c1_143, %c0_144, %c0_145] : memref<7x64x32xf32, #tpu.memory_space<vmem>>, vector<1x64x32xf32>
    %329 = vector.shape_cast %328 : vector<1x64x32xf32> to vector<64x32xf32>
    %cst_146 = arith.constant dense<0.000000e+00> : vector<6x32xf32>
    %330 = tpu.matmul %327, %329, %cst_146 {dimension_numbers = #tpu.dot_dimension_numbers<[1], [0], [0], [1], [0, 0, 1, 1], [], []>} : vector<6x64xf32>, vector<64x32xf32>, vector<6x32xf32> -> vector<6x32xf32>
    %c1_147 = arith.constant 1 : index
    %c0_148 = arith.constant 0 : index
    %c0_149 = arith.constant 0 : index
    %331 = vector.load %arg19[%c1_147, %c0_148, %c0_149] : memref<7x1x32xf32, #tpu.memory_space<vmem>>, vector<1x1x32xf32>
    %332 = vector.shape_cast %331 : vector<1x1x32xf32> to vector<1x32xf32>
    %333 = vector.broadcast %332 : vector<1x32xf32> to vector<6x32xf32>
    %334 = arith.addf %330, %333 : vector<6x32xf32>
    %335 = arith.addf %334, %283 : vector<6x32xf32>
    %c2 = arith.constant 2 : index
    %c0_150 = arith.constant 0 : index
    %c0_151 = arith.constant 0 : index
    %336 = vector.load %arg8[%c2, %c0_150, %c0_151] : memref<7x1x32xf32, #tpu.memory_space<vmem>>, vector<1x1x32xf32>
    %337 = vector.shape_cast %336 : vector<1x1x32xf32> to vector<1x32xf32>
    %c2_152 = arith.constant 2 : index
    %c0_153 = arith.constant 0 : index
    %c0_154 = arith.constant 0 : index
    %338 = vector.load %arg9[%c2_152, %c0_153, %c0_154] : memref<7x1x32xf32, #tpu.memory_space<vmem>>, vector<1x1x32xf32>
    %339 = vector.shape_cast %338 : vector<1x1x32xf32> to vector<1x32xf32>
    %cst_155 = arith.constant dense<0.000000e+00> : vector<6xf32>
    %340 = vector.multi_reduction <add>, %335, %cst_155 [1] : vector<6x32xf32> to vector<6xf32>
    %341 = vector.shape_cast %340 : vector<6xf32> to vector<6x1xf32>
    %cst_156 = arith.constant 3.200000e+01 : f32
    %342 = vector.broadcast %cst_156 : f32 to vector<6x1xf32>
    %343 = arith.divf %341, %342 : vector<6x1xf32>
    %344 = vector.broadcast %343 : vector<6x1xf32> to vector<6x32xf32>
    %345 = arith.subf %335, %344 : vector<6x32xf32>
    %346 = arith.mulf %345, %345 : vector<6x32xf32>
    %cst_157 = arith.constant dense<0.000000e+00> : vector<6xf32>
    %347 = vector.multi_reduction <add>, %346, %cst_157 [1] : vector<6x32xf32> to vector<6xf32>
    %348 = vector.shape_cast %347 : vector<6xf32> to vector<6x1xf32>
    %cst_158 = arith.constant 3.200000e+01 : f32
    %349 = vector.broadcast %cst_158 : f32 to vector<6x1xf32>
    %350 = arith.divf %348, %349 : vector<6x1xf32>
    %cst_159 = arith.constant 9.99999997E-7 : f32
    %351 = vector.broadcast %cst_159 : f32 to vector<6x1xf32>
    %352 = arith.addf %350, %351 : vector<6x1xf32>
    %353 = math.rsqrt %352 : vector<6x1xf32>
    %354 = vector.broadcast %353 : vector<6x1xf32> to vector<6x32xf32>
    %355 = arith.mulf %345, %354 : vector<6x32xf32>
    %356 = vector.broadcast %337 : vector<1x32xf32> to vector<6x32xf32>
    %357 = arith.mulf %355, %356 : vector<6x32xf32>
    %358 = vector.broadcast %339 : vector<1x32xf32> to vector<6x32xf32>
    %359 = arith.addf %357, %358 : vector<6x32xf32>
    %c2_160 = arith.constant 2 : index
    %c0_161 = arith.constant 0 : index
    %c0_162 = arith.constant 0 : index
    %360 = vector.load %arg10[%c2_160, %c0_161, %c0_162] : memref<7x32x96xf32, #tpu.memory_space<vmem>>, vector<1x32x96xf32>
    %361 = vector.shape_cast %360 : vector<1x32x96xf32> to vector<32x96xf32>
    %cst_163 = arith.constant dense<0.000000e+00> : vector<6x96xf32>
    %362 = tpu.matmul %359, %361, %cst_163 {dimension_numbers = #tpu.dot_dimension_numbers<[1], [0], [0], [1], [0, 0, 1, 1], [], []>} : vector<6x32xf32>, vector<32x96xf32>, vector<6x96xf32> -> vector<6x96xf32>
    %c2_164 = arith.constant 2 : index
    %c0_165 = arith.constant 0 : index
    %c0_166 = arith.constant 0 : index
    %363 = vector.load %arg11[%c2_164, %c0_165, %c0_166] : memref<7x1x96xf32, #tpu.memory_space<vmem>>, vector<1x1x96xf32>
    %364 = vector.shape_cast %363 : vector<1x1x96xf32> to vector<1x96xf32>
    %365 = vector.broadcast %364 : vector<1x96xf32> to vector<6x96xf32>
    %366 = arith.addf %362, %365 : vector<6x96xf32>
    %367 = vector.extract_strided_slice %366 {offsets = [0, 0], sizes = [6, 32], strides = [1, 1]} : vector<6x96xf32> to vector<6x32xf32>
    %368 = vector.extract_strided_slice %366 {offsets = [0, 32], sizes = [6, 32], strides = [1, 1]} : vector<6x96xf32> to vector<6x32xf32>
    %369 = vector.extract_strided_slice %366 {offsets = [0, 64], sizes = [6, 32], strides = [1, 1]} : vector<6x96xf32> to vector<6x32xf32>
    %c2_167 = arith.constant 2 : index
    %c0_168 = arith.constant 0 : index
    %c0_169 = arith.constant 0 : index
    %370 = vector.load %arg12[%c2_167, %c0_168, %c0_169] : memref<7x32x32xf32, #tpu.memory_space<vmem>>, vector<1x32x32xf32>
    %371 = vector.shape_cast %370 : vector<1x32x32xf32> to vector<32x32xf32>
    %372 = vector.extract_strided_slice %367 {offsets = [0, 0], sizes = [6, 8], strides = [1, 1]} : vector<6x32xf32> to vector<6x8xf32>
    %373 = vector.extract_strided_slice %368 {offsets = [0, 0], sizes = [6, 8], strides = [1, 1]} : vector<6x32xf32> to vector<6x8xf32>
    %cst_170 = arith.constant dense<0.000000e+00> : vector<6x6xf32>
    %374 = tpu.matmul %372, %373, %cst_170 {dimension_numbers = #tpu.dot_dimension_numbers<[1], [1], [0], [0], [0, 0, 1, 0], [], []>} : vector<6x8xf32>, vector<6x8xf32>, vector<6x6xf32> -> vector<6x6xf32>
    %375 = vector.broadcast %5 : vector<1x6xf32> to vector<6x6xf32>
    %376 = arith.addf %374, %375 : vector<6x6xf32>
    %cst_171 = arith.constant dense<0xFF800000> : vector<6xf32>
    %377 = vector.multi_reduction <maximumf>, %376, %cst_171 [1] : vector<6x6xf32> to vector<6xf32>
    %378 = vector.shape_cast %377 : vector<6xf32> to vector<6x1xf32>
    %379 = vector.broadcast %378 : vector<6x1xf32> to vector<6x6xf32>
    %380 = arith.subf %376, %379 : vector<6x6xf32>
    %381 = math.exp %380 : vector<6x6xf32>
    %cst_172 = arith.constant dense<0.000000e+00> : vector<6xf32>
    %382 = vector.multi_reduction <add>, %381, %cst_172 [1] : vector<6x6xf32> to vector<6xf32>
    %383 = vector.shape_cast %382 : vector<6xf32> to vector<6x1xf32>
    %384 = tpu.reciprocal %383 {approx = true} : vector<6x1xf32> -> vector<6x1xf32>
    %385 = vector.broadcast %384 : vector<6x1xf32> to vector<6x6xf32>
    %386 = arith.mulf %381, %385 : vector<6x6xf32>
    %387 = vector.extract_strided_slice %369 {offsets = [0, 0], sizes = [6, 8], strides = [1, 1]} : vector<6x32xf32> to vector<6x8xf32>
    %cst_173 = arith.constant dense<0.000000e+00> : vector<6x8xf32>
    %388 = tpu.matmul %386, %387, %cst_173 {dimension_numbers = #tpu.dot_dimension_numbers<[1], [0], [0], [1], [0, 0, 1, 1], [], []>} : vector<6x6xf32>, vector<6x8xf32>, vector<6x8xf32> -> vector<6x8xf32>
    %389 = vector.extract_strided_slice %371 {offsets = [0, 0], sizes = [8, 32], strides = [1, 1]} : vector<32x32xf32> to vector<8x32xf32>
    %cst_174 = arith.constant dense<0.000000e+00> : vector<6x32xf32>
    %390 = tpu.matmul %388, %389, %cst_174 {dimension_numbers = #tpu.dot_dimension_numbers<[1], [0], [0], [1], [0, 0, 1, 1], [], []>} : vector<6x8xf32>, vector<8x32xf32>, vector<6x32xf32> -> vector<6x32xf32>
    %391 = vector.extract_strided_slice %367 {offsets = [0, 8], sizes = [6, 8], strides = [1, 1]} : vector<6x32xf32> to vector<6x8xf32>
    %392 = vector.extract_strided_slice %368 {offsets = [0, 8], sizes = [6, 8], strides = [1, 1]} : vector<6x32xf32> to vector<6x8xf32>
    %cst_175 = arith.constant dense<0.000000e+00> : vector<6x6xf32>
    %393 = tpu.matmul %391, %392, %cst_175 {dimension_numbers = #tpu.dot_dimension_numbers<[1], [1], [0], [0], [0, 0, 1, 0], [], []>} : vector<6x8xf32>, vector<6x8xf32>, vector<6x6xf32> -> vector<6x6xf32>
    %394 = vector.broadcast %5 : vector<1x6xf32> to vector<6x6xf32>
    %395 = arith.addf %393, %394 : vector<6x6xf32>
    %cst_176 = arith.constant dense<0xFF800000> : vector<6xf32>
    %396 = vector.multi_reduction <maximumf>, %395, %cst_176 [1] : vector<6x6xf32> to vector<6xf32>
    %397 = vector.shape_cast %396 : vector<6xf32> to vector<6x1xf32>
    %398 = vector.broadcast %397 : vector<6x1xf32> to vector<6x6xf32>
    %399 = arith.subf %395, %398 : vector<6x6xf32>
    %400 = math.exp %399 : vector<6x6xf32>
    %cst_177 = arith.constant dense<0.000000e+00> : vector<6xf32>
    %401 = vector.multi_reduction <add>, %400, %cst_177 [1] : vector<6x6xf32> to vector<6xf32>
    %402 = vector.shape_cast %401 : vector<6xf32> to vector<6x1xf32>
    %403 = tpu.reciprocal %402 {approx = true} : vector<6x1xf32> -> vector<6x1xf32>
    %404 = vector.broadcast %403 : vector<6x1xf32> to vector<6x6xf32>
    %405 = arith.mulf %400, %404 : vector<6x6xf32>
    %406 = vector.extract_strided_slice %369 {offsets = [0, 8], sizes = [6, 8], strides = [1, 1]} : vector<6x32xf32> to vector<6x8xf32>
    %cst_178 = arith.constant dense<0.000000e+00> : vector<6x8xf32>
    %407 = tpu.matmul %405, %406, %cst_178 {dimension_numbers = #tpu.dot_dimension_numbers<[1], [0], [0], [1], [0, 0, 1, 1], [], []>} : vector<6x6xf32>, vector<6x8xf32>, vector<6x8xf32> -> vector<6x8xf32>
    %408 = vector.extract_strided_slice %371 {offsets = [8, 0], sizes = [8, 32], strides = [1, 1]} : vector<32x32xf32> to vector<8x32xf32>
    %cst_179 = arith.constant dense<0.000000e+00> : vector<6x32xf32>
    %409 = tpu.matmul %407, %408, %cst_179 {dimension_numbers = #tpu.dot_dimension_numbers<[1], [0], [0], [1], [0, 0, 1, 1], [], []>} : vector<6x8xf32>, vector<8x32xf32>, vector<6x32xf32> -> vector<6x32xf32>
    %410 = arith.addf %390, %409 : vector<6x32xf32>
    %411 = vector.extract_strided_slice %367 {offsets = [0, 16], sizes = [6, 8], strides = [1, 1]} : vector<6x32xf32> to vector<6x8xf32>
    %412 = vector.extract_strided_slice %368 {offsets = [0, 16], sizes = [6, 8], strides = [1, 1]} : vector<6x32xf32> to vector<6x8xf32>
    %cst_180 = arith.constant dense<0.000000e+00> : vector<6x6xf32>
    %413 = tpu.matmul %411, %412, %cst_180 {dimension_numbers = #tpu.dot_dimension_numbers<[1], [1], [0], [0], [0, 0, 1, 0], [], []>} : vector<6x8xf32>, vector<6x8xf32>, vector<6x6xf32> -> vector<6x6xf32>
    %414 = vector.broadcast %5 : vector<1x6xf32> to vector<6x6xf32>
    %415 = arith.addf %413, %414 : vector<6x6xf32>
    %cst_181 = arith.constant dense<0xFF800000> : vector<6xf32>
    %416 = vector.multi_reduction <maximumf>, %415, %cst_181 [1] : vector<6x6xf32> to vector<6xf32>
    %417 = vector.shape_cast %416 : vector<6xf32> to vector<6x1xf32>
    %418 = vector.broadcast %417 : vector<6x1xf32> to vector<6x6xf32>
    %419 = arith.subf %415, %418 : vector<6x6xf32>
    %420 = math.exp %419 : vector<6x6xf32>
    %cst_182 = arith.constant dense<0.000000e+00> : vector<6xf32>
    %421 = vector.multi_reduction <add>, %420, %cst_182 [1] : vector<6x6xf32> to vector<6xf32>
    %422 = vector.shape_cast %421 : vector<6xf32> to vector<6x1xf32>
    %423 = tpu.reciprocal %422 {approx = true} : vector<6x1xf32> -> vector<6x1xf32>
    %424 = vector.broadcast %423 : vector<6x1xf32> to vector<6x6xf32>
    %425 = arith.mulf %420, %424 : vector<6x6xf32>
    %426 = vector.extract_strided_slice %369 {offsets = [0, 16], sizes = [6, 8], strides = [1, 1]} : vector<6x32xf32> to vector<6x8xf32>
    %cst_183 = arith.constant dense<0.000000e+00> : vector<6x8xf32>
    %427 = tpu.matmul %425, %426, %cst_183 {dimension_numbers = #tpu.dot_dimension_numbers<[1], [0], [0], [1], [0, 0, 1, 1], [], []>} : vector<6x6xf32>, vector<6x8xf32>, vector<6x8xf32> -> vector<6x8xf32>
    %428 = vector.extract_strided_slice %371 {offsets = [16, 0], sizes = [8, 32], strides = [1, 1]} : vector<32x32xf32> to vector<8x32xf32>
    %cst_184 = arith.constant dense<0.000000e+00> : vector<6x32xf32>
    %429 = tpu.matmul %427, %428, %cst_184 {dimension_numbers = #tpu.dot_dimension_numbers<[1], [0], [0], [1], [0, 0, 1, 1], [], []>} : vector<6x8xf32>, vector<8x32xf32>, vector<6x32xf32> -> vector<6x32xf32>
    %430 = arith.addf %410, %429 : vector<6x32xf32>
    %431 = vector.extract_strided_slice %367 {offsets = [0, 24], sizes = [6, 8], strides = [1, 1]} : vector<6x32xf32> to vector<6x8xf32>
    %432 = vector.extract_strided_slice %368 {offsets = [0, 24], sizes = [6, 8], strides = [1, 1]} : vector<6x32xf32> to vector<6x8xf32>
    %cst_185 = arith.constant dense<0.000000e+00> : vector<6x6xf32>
    %433 = tpu.matmul %431, %432, %cst_185 {dimension_numbers = #tpu.dot_dimension_numbers<[1], [1], [0], [0], [0, 0, 1, 0], [], []>} : vector<6x8xf32>, vector<6x8xf32>, vector<6x6xf32> -> vector<6x6xf32>
    %434 = vector.broadcast %5 : vector<1x6xf32> to vector<6x6xf32>
    %435 = arith.addf %433, %434 : vector<6x6xf32>
    %cst_186 = arith.constant dense<0xFF800000> : vector<6xf32>
    %436 = vector.multi_reduction <maximumf>, %435, %cst_186 [1] : vector<6x6xf32> to vector<6xf32>
    %437 = vector.shape_cast %436 : vector<6xf32> to vector<6x1xf32>
    %438 = vector.broadcast %437 : vector<6x1xf32> to vector<6x6xf32>
    %439 = arith.subf %435, %438 : vector<6x6xf32>
    %440 = math.exp %439 : vector<6x6xf32>
    %cst_187 = arith.constant dense<0.000000e+00> : vector<6xf32>
    %441 = vector.multi_reduction <add>, %440, %cst_187 [1] : vector<6x6xf32> to vector<6xf32>
    %442 = vector.shape_cast %441 : vector<6xf32> to vector<6x1xf32>
    %443 = tpu.reciprocal %442 {approx = true} : vector<6x1xf32> -> vector<6x1xf32>
    %444 = vector.broadcast %443 : vector<6x1xf32> to vector<6x6xf32>
    %445 = arith.mulf %440, %444 : vector<6x6xf32>
    %446 = vector.extract_strided_slice %369 {offsets = [0, 24], sizes = [6, 8], strides = [1, 1]} : vector<6x32xf32> to vector<6x8xf32>
    %cst_188 = arith.constant dense<0.000000e+00> : vector<6x8xf32>
    %447 = tpu.matmul %445, %446, %cst_188 {dimension_numbers = #tpu.dot_dimension_numbers<[1], [0], [0], [1], [0, 0, 1, 1], [], []>} : vector<6x6xf32>, vector<6x8xf32>, vector<6x8xf32> -> vector<6x8xf32>
    %448 = vector.extract_strided_slice %371 {offsets = [24, 0], sizes = [8, 32], strides = [1, 1]} : vector<32x32xf32> to vector<8x32xf32>
    %cst_189 = arith.constant dense<0.000000e+00> : vector<6x32xf32>
    %449 = tpu.matmul %447, %448, %cst_189 {dimension_numbers = #tpu.dot_dimension_numbers<[1], [0], [0], [1], [0, 0, 1, 1], [], []>} : vector<6x8xf32>, vector<8x32xf32>, vector<6x32xf32> -> vector<6x32xf32>
    %450 = arith.addf %430, %449 : vector<6x32xf32>
    %c2_190 = arith.constant 2 : index
    %c0_191 = arith.constant 0 : index
    %c0_192 = arith.constant 0 : index
    %451 = vector.load %arg13[%c2_190, %c0_191, %c0_192] : memref<7x1x32xf32, #tpu.memory_space<vmem>>, vector<1x1x32xf32>
    %452 = vector.shape_cast %451 : vector<1x1x32xf32> to vector<1x32xf32>
    %453 = vector.broadcast %452 : vector<1x32xf32> to vector<6x32xf32>
    %454 = arith.addf %450, %453 : vector<6x32xf32>
    %455 = arith.addf %454, %335 : vector<6x32xf32>
    %c2_193 = arith.constant 2 : index
    %c0_194 = arith.constant 0 : index
    %c0_195 = arith.constant 0 : index
    %456 = vector.load %arg14[%c2_193, %c0_194, %c0_195] : memref<7x1x32xf32, #tpu.memory_space<vmem>>, vector<1x1x32xf32>
    %457 = vector.shape_cast %456 : vector<1x1x32xf32> to vector<1x32xf32>
    %c2_196 = arith.constant 2 : index
    %c0_197 = arith.constant 0 : index
    %c0_198 = arith.constant 0 : index
    %458 = vector.load %arg15[%c2_196, %c0_197, %c0_198] : memref<7x1x32xf32, #tpu.memory_space<vmem>>, vector<1x1x32xf32>
    %459 = vector.shape_cast %458 : vector<1x1x32xf32> to vector<1x32xf32>
    %cst_199 = arith.constant dense<0.000000e+00> : vector<6xf32>
    %460 = vector.multi_reduction <add>, %455, %cst_199 [1] : vector<6x32xf32> to vector<6xf32>
    %461 = vector.shape_cast %460 : vector<6xf32> to vector<6x1xf32>
    %cst_200 = arith.constant 3.200000e+01 : f32
    %462 = vector.broadcast %cst_200 : f32 to vector<6x1xf32>
    %463 = arith.divf %461, %462 : vector<6x1xf32>
    %464 = vector.broadcast %463 : vector<6x1xf32> to vector<6x32xf32>
    %465 = arith.subf %455, %464 : vector<6x32xf32>
    %466 = arith.mulf %465, %465 : vector<6x32xf32>
    %cst_201 = arith.constant dense<0.000000e+00> : vector<6xf32>
    %467 = vector.multi_reduction <add>, %466, %cst_201 [1] : vector<6x32xf32> to vector<6xf32>
    %468 = vector.shape_cast %467 : vector<6xf32> to vector<6x1xf32>
    %cst_202 = arith.constant 3.200000e+01 : f32
    %469 = vector.broadcast %cst_202 : f32 to vector<6x1xf32>
    %470 = arith.divf %468, %469 : vector<6x1xf32>
    %cst_203 = arith.constant 9.99999997E-7 : f32
    %471 = vector.broadcast %cst_203 : f32 to vector<6x1xf32>
    %472 = arith.addf %470, %471 : vector<6x1xf32>
    %473 = math.rsqrt %472 : vector<6x1xf32>
    %474 = vector.broadcast %473 : vector<6x1xf32> to vector<6x32xf32>
    %475 = arith.mulf %465, %474 : vector<6x32xf32>
    %476 = vector.broadcast %457 : vector<1x32xf32> to vector<6x32xf32>
    %477 = arith.mulf %475, %476 : vector<6x32xf32>
    %478 = vector.broadcast %459 : vector<1x32xf32> to vector<6x32xf32>
    %479 = arith.addf %477, %478 : vector<6x32xf32>
    %c2_204 = arith.constant 2 : index
    %c0_205 = arith.constant 0 : index
    %c0_206 = arith.constant 0 : index
    %480 = vector.load %arg16[%c2_204, %c0_205, %c0_206] : memref<7x32x64xf32, #tpu.memory_space<vmem>>, vector<1x32x64xf32>
    %481 = vector.shape_cast %480 : vector<1x32x64xf32> to vector<32x64xf32>
    %cst_207 = arith.constant dense<0.000000e+00> : vector<6x64xf32>
    %482 = tpu.matmul %479, %481, %cst_207 {dimension_numbers = #tpu.dot_dimension_numbers<[1], [0], [0], [1], [0, 0, 1, 1], [], []>} : vector<6x32xf32>, vector<32x64xf32>, vector<6x64xf32> -> vector<6x64xf32>
    %c2_208 = arith.constant 2 : index
    %c0_209 = arith.constant 0 : index
    %c0_210 = arith.constant 0 : index
    %483 = vector.load %arg17[%c2_208, %c0_209, %c0_210] : memref<7x1x64xf32, #tpu.memory_space<vmem>>, vector<1x1x64xf32>
    %484 = vector.shape_cast %483 : vector<1x1x64xf32> to vector<1x64xf32>
    %485 = vector.broadcast %484 : vector<1x64xf32> to vector<6x64xf32>
    %486 = arith.addf %482, %485 : vector<6x64xf32>
    %cst_211 = arith.constant 5.000000e-01 : f32
    %487 = vector.broadcast %cst_211 : f32 to vector<6x64xf32>
    %488 = arith.mulf %487, %486 : vector<6x64xf32>
    %cst_212 = arith.constant 4.471500e-02 : f32
    %489 = vector.broadcast %cst_212 : f32 to vector<6x64xf32>
    %490 = arith.mulf %489, %486 : vector<6x64xf32>
    %491 = arith.mulf %490, %486 : vector<6x64xf32>
    %492 = arith.mulf %491, %486 : vector<6x64xf32>
    %493 = arith.addf %486, %492 : vector<6x64xf32>
    %cst_213 = arith.constant 0.797884583 : f32
    %494 = vector.broadcast %cst_213 : f32 to vector<6x64xf32>
    %495 = arith.mulf %494, %493 : vector<6x64xf32>
    %496 = math.tanh %495 : vector<6x64xf32>
    %cst_214 = arith.constant 1.000000e+00 : f32
    %497 = vector.broadcast %cst_214 : f32 to vector<6x64xf32>
    %498 = arith.addf %497, %496 : vector<6x64xf32>
    %499 = arith.mulf %488, %498 : vector<6x64xf32>
    %c2_215 = arith.constant 2 : index
    %c0_216 = arith.constant 0 : index
    %c0_217 = arith.constant 0 : index
    %500 = vector.load %arg18[%c2_215, %c0_216, %c0_217] : memref<7x64x32xf32, #tpu.memory_space<vmem>>, vector<1x64x32xf32>
    %501 = vector.shape_cast %500 : vector<1x64x32xf32> to vector<64x32xf32>
    %cst_218 = arith.constant dense<0.000000e+00> : vector<6x32xf32>
    %502 = tpu.matmul %499, %501, %cst_218 {dimension_numbers = #tpu.dot_dimension_numbers<[1], [0], [0], [1], [0, 0, 1, 1], [], []>} : vector<6x64xf32>, vector<64x32xf32>, vector<6x32xf32> -> vector<6x32xf32>
    %c2_219 = arith.constant 2 : index
    %c0_220 = arith.constant 0 : index
    %c0_221 = arith.constant 0 : index
    %503 = vector.load %arg19[%c2_219, %c0_220, %c0_221] : memref<7x1x32xf32, #tpu.memory_space<vmem>>, vector<1x1x32xf32>
    %504 = vector.shape_cast %503 : vector<1x1x32xf32> to vector<1x32xf32>
    %505 = vector.broadcast %504 : vector<1x32xf32> to vector<6x32xf32>
    %506 = arith.addf %502, %505 : vector<6x32xf32>
    %507 = arith.addf %506, %455 : vector<6x32xf32>
    %cst_222 = arith.constant dense<0.000000e+00> : vector<6xf32>
    %508 = vector.multi_reduction <add>, %507, %cst_222 [1] : vector<6x32xf32> to vector<6xf32>
    %509 = vector.shape_cast %508 : vector<6xf32> to vector<6x1xf32>
    %cst_223 = arith.constant 3.200000e+01 : f32
    %510 = vector.broadcast %cst_223 : f32 to vector<6x1xf32>
    %511 = arith.divf %509, %510 : vector<6x1xf32>
    %512 = vector.broadcast %511 : vector<6x1xf32> to vector<6x32xf32>
    %513 = arith.subf %507, %512 : vector<6x32xf32>
    %514 = arith.mulf %513, %513 : vector<6x32xf32>
    %cst_224 = arith.constant dense<0.000000e+00> : vector<6xf32>
    %515 = vector.multi_reduction <add>, %514, %cst_224 [1] : vector<6x32xf32> to vector<6xf32>
    %516 = vector.shape_cast %515 : vector<6xf32> to vector<6x1xf32>
    %cst_225 = arith.constant 3.200000e+01 : f32
    %517 = vector.broadcast %cst_225 : f32 to vector<6x1xf32>
    %518 = arith.divf %516, %517 : vector<6x1xf32>
    %cst_226 = arith.constant 9.99999997E-7 : f32
    %519 = vector.broadcast %cst_226 : f32 to vector<6x1xf32>
    %520 = arith.addf %518, %519 : vector<6x1xf32>
    %521 = math.rsqrt %520 : vector<6x1xf32>
    %522 = vector.broadcast %521 : vector<6x1xf32> to vector<6x32xf32>
    %523 = arith.mulf %513, %522 : vector<6x32xf32>
    %524 = vector.broadcast %0 : vector<1x32xf32> to vector<6x32xf32>
    %525 = arith.mulf %523, %524 : vector<6x32xf32>
    %526 = vector.broadcast %1 : vector<1x32xf32> to vector<6x32xf32>
    %527 = arith.addf %525, %526 : vector<6x32xf32>
    %c3 = arith.constant 3 : index
    %c0_227 = arith.constant 0 : index
    %c0_228 = arith.constant 0 : index
    %528 = vector.load %arg10[%c3, %c0_227, %c0_228] : memref<7x32x96xf32, #tpu.memory_space<vmem>>, vector<1x32x96xf32>
    %529 = vector.shape_cast %528 : vector<1x32x96xf32> to vector<32x96xf32>
    %c3_229 = arith.constant 3 : index
    %c0_230 = arith.constant 0 : index
    %c0_231 = arith.constant 0 : index
    %530 = vector.load %arg11[%c3_229, %c0_230, %c0_231] : memref<7x1x96xf32, #tpu.memory_space<vmem>>, vector<1x1x96xf32>
    %531 = vector.shape_cast %530 : vector<1x1x96xf32> to vector<1x96xf32>
    %532 = vector.extract_strided_slice %529 {offsets = [0, 0], sizes = [32, 32], strides = [1, 1]} : vector<32x96xf32> to vector<32x32xf32>
    %cst_232 = arith.constant dense<0.000000e+00> : vector<6x32xf32>
    %533 = tpu.matmul %527, %532, %cst_232 {dimension_numbers = #tpu.dot_dimension_numbers<[1], [0], [0], [1], [0, 0, 1, 1], [], []>} : vector<6x32xf32>, vector<32x32xf32>, vector<6x32xf32> -> vector<6x32xf32>
    %534 = vector.extract_strided_slice %531 {offsets = [0, 0], sizes = [1, 32], strides = [1, 1]} : vector<1x96xf32> to vector<1x32xf32>
    %535 = vector.broadcast %534 : vector<1x32xf32> to vector<6x32xf32>
    %536 = arith.addf %533, %535 : vector<6x32xf32>
    %537 = vector.extract_strided_slice %529 {offsets = [0, 32], sizes = [32, 64], strides = [1, 1]} : vector<32x96xf32> to vector<32x64xf32>
    %cst_233 = arith.constant dense<0.000000e+00> : vector<8x64xf32>
    %538 = tpu.matmul %181, %537, %cst_233 {dimension_numbers = #tpu.dot_dimension_numbers<[1], [0], [0], [1], [0, 0, 1, 1], [], []>} : vector<8x32xf32>, vector<32x64xf32>, vector<8x64xf32> -> vector<8x64xf32>
    %539 = vector.extract_strided_slice %531 {offsets = [0, 32], sizes = [1, 64], strides = [1, 1]} : vector<1x96xf32> to vector<1x64xf32>
    %540 = vector.broadcast %539 : vector<1x64xf32> to vector<8x64xf32>
    %541 = arith.addf %538, %540 : vector<8x64xf32>
    %542 = vector.extract_strided_slice %541 {offsets = [0, 0], sizes = [8, 32], strides = [1, 1]} : vector<8x64xf32> to vector<8x32xf32>
    %543 = vector.extract_strided_slice %541 {offsets = [0, 32], sizes = [8, 32], strides = [1, 1]} : vector<8x64xf32> to vector<8x32xf32>
    %c3_234 = arith.constant 3 : index
    %c0_235 = arith.constant 0 : index
    %c0_236 = arith.constant 0 : index
    %544 = vector.load %arg12[%c3_234, %c0_235, %c0_236] : memref<7x32x32xf32, #tpu.memory_space<vmem>>, vector<1x32x32xf32>
    %545 = vector.shape_cast %544 : vector<1x32x32xf32> to vector<32x32xf32>
    %546 = vector.extract_strided_slice %536 {offsets = [0, 0], sizes = [6, 8], strides = [1, 1]} : vector<6x32xf32> to vector<6x8xf32>
    %547 = vector.extract_strided_slice %542 {offsets = [0, 0], sizes = [8, 8], strides = [1, 1]} : vector<8x32xf32> to vector<8x8xf32>
    %cst_237 = arith.constant dense<0.000000e+00> : vector<6x8xf32>
    %548 = tpu.matmul %546, %547, %cst_237 {dimension_numbers = #tpu.dot_dimension_numbers<[1], [1], [0], [0], [0, 0, 1, 0], [], []>} : vector<6x8xf32>, vector<8x8xf32>, vector<6x8xf32> -> vector<6x8xf32>
    %549 = vector.broadcast %3 : vector<1x8xf32> to vector<6x8xf32>
    %550 = arith.addf %548, %549 : vector<6x8xf32>
    %cst_238 = arith.constant dense<0xFF800000> : vector<6xf32>
    %551 = vector.multi_reduction <maximumf>, %550, %cst_238 [1] : vector<6x8xf32> to vector<6xf32>
    %552 = vector.shape_cast %551 : vector<6xf32> to vector<6x1xf32>
    %553 = vector.broadcast %552 : vector<6x1xf32> to vector<6x8xf32>
    %554 = arith.subf %550, %553 : vector<6x8xf32>
    %555 = math.exp %554 : vector<6x8xf32>
    %cst_239 = arith.constant dense<0.000000e+00> : vector<6xf32>
    %556 = vector.multi_reduction <add>, %555, %cst_239 [1] : vector<6x8xf32> to vector<6xf32>
    %557 = vector.shape_cast %556 : vector<6xf32> to vector<6x1xf32>
    %558 = tpu.reciprocal %557 {approx = true} : vector<6x1xf32> -> vector<6x1xf32>
    %559 = vector.broadcast %558 : vector<6x1xf32> to vector<6x8xf32>
    %560 = arith.mulf %555, %559 : vector<6x8xf32>
    %561 = vector.extract_strided_slice %543 {offsets = [0, 0], sizes = [8, 8], strides = [1, 1]} : vector<8x32xf32> to vector<8x8xf32>
    %cst_240 = arith.constant dense<0.000000e+00> : vector<6x8xf32>
    %562 = tpu.matmul %560, %561, %cst_240 {dimension_numbers = #tpu.dot_dimension_numbers<[1], [0], [0], [1], [0, 0, 1, 1], [], []>} : vector<6x8xf32>, vector<8x8xf32>, vector<6x8xf32> -> vector<6x8xf32>
    %563 = vector.extract_strided_slice %545 {offsets = [0, 0], sizes = [8, 32], strides = [1, 1]} : vector<32x32xf32> to vector<8x32xf32>
    %cst_241 = arith.constant dense<0.000000e+00> : vector<6x32xf32>
    %564 = tpu.matmul %562, %563, %cst_241 {dimension_numbers = #tpu.dot_dimension_numbers<[1], [0], [0], [1], [0, 0, 1, 1], [], []>} : vector<6x8xf32>, vector<8x32xf32>, vector<6x32xf32> -> vector<6x32xf32>
    %565 = vector.extract_strided_slice %536 {offsets = [0, 8], sizes = [6, 8], strides = [1, 1]} : vector<6x32xf32> to vector<6x8xf32>
    %566 = vector.extract_strided_slice %542 {offsets = [0, 8], sizes = [8, 8], strides = [1, 1]} : vector<8x32xf32> to vector<8x8xf32>
    %cst_242 = arith.constant dense<0.000000e+00> : vector<6x8xf32>
    %567 = tpu.matmul %565, %566, %cst_242 {dimension_numbers = #tpu.dot_dimension_numbers<[1], [1], [0], [0], [0, 0, 1, 0], [], []>} : vector<6x8xf32>, vector<8x8xf32>, vector<6x8xf32> -> vector<6x8xf32>
    %568 = vector.broadcast %3 : vector<1x8xf32> to vector<6x8xf32>
    %569 = arith.addf %567, %568 : vector<6x8xf32>
    %cst_243 = arith.constant dense<0xFF800000> : vector<6xf32>
    %570 = vector.multi_reduction <maximumf>, %569, %cst_243 [1] : vector<6x8xf32> to vector<6xf32>
    %571 = vector.shape_cast %570 : vector<6xf32> to vector<6x1xf32>
    %572 = vector.broadcast %571 : vector<6x1xf32> to vector<6x8xf32>
    %573 = arith.subf %569, %572 : vector<6x8xf32>
    %574 = math.exp %573 : vector<6x8xf32>
    %cst_244 = arith.constant dense<0.000000e+00> : vector<6xf32>
    %575 = vector.multi_reduction <add>, %574, %cst_244 [1] : vector<6x8xf32> to vector<6xf32>
    %576 = vector.shape_cast %575 : vector<6xf32> to vector<6x1xf32>
    %577 = tpu.reciprocal %576 {approx = true} : vector<6x1xf32> -> vector<6x1xf32>
    %578 = vector.broadcast %577 : vector<6x1xf32> to vector<6x8xf32>
    %579 = arith.mulf %574, %578 : vector<6x8xf32>
    %580 = vector.extract_strided_slice %543 {offsets = [0, 8], sizes = [8, 8], strides = [1, 1]} : vector<8x32xf32> to vector<8x8xf32>
    %cst_245 = arith.constant dense<0.000000e+00> : vector<6x8xf32>
    %581 = tpu.matmul %579, %580, %cst_245 {dimension_numbers = #tpu.dot_dimension_numbers<[1], [0], [0], [1], [0, 0, 1, 1], [], []>} : vector<6x8xf32>, vector<8x8xf32>, vector<6x8xf32> -> vector<6x8xf32>
    %582 = vector.extract_strided_slice %545 {offsets = [8, 0], sizes = [8, 32], strides = [1, 1]} : vector<32x32xf32> to vector<8x32xf32>
    %cst_246 = arith.constant dense<0.000000e+00> : vector<6x32xf32>
    %583 = tpu.matmul %581, %582, %cst_246 {dimension_numbers = #tpu.dot_dimension_numbers<[1], [0], [0], [1], [0, 0, 1, 1], [], []>} : vector<6x8xf32>, vector<8x32xf32>, vector<6x32xf32> -> vector<6x32xf32>
    %584 = arith.addf %564, %583 : vector<6x32xf32>
    %585 = vector.extract_strided_slice %536 {offsets = [0, 16], sizes = [6, 8], strides = [1, 1]} : vector<6x32xf32> to vector<6x8xf32>
    %586 = vector.extract_strided_slice %542 {offsets = [0, 16], sizes = [8, 8], strides = [1, 1]} : vector<8x32xf32> to vector<8x8xf32>
    %cst_247 = arith.constant dense<0.000000e+00> : vector<6x8xf32>
    %587 = tpu.matmul %585, %586, %cst_247 {dimension_numbers = #tpu.dot_dimension_numbers<[1], [1], [0], [0], [0, 0, 1, 0], [], []>} : vector<6x8xf32>, vector<8x8xf32>, vector<6x8xf32> -> vector<6x8xf32>
    %588 = vector.broadcast %3 : vector<1x8xf32> to vector<6x8xf32>
    %589 = arith.addf %587, %588 : vector<6x8xf32>
    %cst_248 = arith.constant dense<0xFF800000> : vector<6xf32>
    %590 = vector.multi_reduction <maximumf>, %589, %cst_248 [1] : vector<6x8xf32> to vector<6xf32>
    %591 = vector.shape_cast %590 : vector<6xf32> to vector<6x1xf32>
    %592 = vector.broadcast %591 : vector<6x1xf32> to vector<6x8xf32>
    %593 = arith.subf %589, %592 : vector<6x8xf32>
    %594 = math.exp %593 : vector<6x8xf32>
    %cst_249 = arith.constant dense<0.000000e+00> : vector<6xf32>
    %595 = vector.multi_reduction <add>, %594, %cst_249 [1] : vector<6x8xf32> to vector<6xf32>
    %596 = vector.shape_cast %595 : vector<6xf32> to vector<6x1xf32>
    %597 = tpu.reciprocal %596 {approx = true} : vector<6x1xf32> -> vector<6x1xf32>
    %598 = vector.broadcast %597 : vector<6x1xf32> to vector<6x8xf32>
    %599 = arith.mulf %594, %598 : vector<6x8xf32>
    %600 = vector.extract_strided_slice %543 {offsets = [0, 16], sizes = [8, 8], strides = [1, 1]} : vector<8x32xf32> to vector<8x8xf32>
    %cst_250 = arith.constant dense<0.000000e+00> : vector<6x8xf32>
    %601 = tpu.matmul %599, %600, %cst_250 {dimension_numbers = #tpu.dot_dimension_numbers<[1], [0], [0], [1], [0, 0, 1, 1], [], []>} : vector<6x8xf32>, vector<8x8xf32>, vector<6x8xf32> -> vector<6x8xf32>
    %602 = vector.extract_strided_slice %545 {offsets = [16, 0], sizes = [8, 32], strides = [1, 1]} : vector<32x32xf32> to vector<8x32xf32>
    %cst_251 = arith.constant dense<0.000000e+00> : vector<6x32xf32>
    %603 = tpu.matmul %601, %602, %cst_251 {dimension_numbers = #tpu.dot_dimension_numbers<[1], [0], [0], [1], [0, 0, 1, 1], [], []>} : vector<6x8xf32>, vector<8x32xf32>, vector<6x32xf32> -> vector<6x32xf32>
    %604 = arith.addf %584, %603 : vector<6x32xf32>
    %605 = vector.extract_strided_slice %536 {offsets = [0, 24], sizes = [6, 8], strides = [1, 1]} : vector<6x32xf32> to vector<6x8xf32>
    %606 = vector.extract_strided_slice %542 {offsets = [0, 24], sizes = [8, 8], strides = [1, 1]} : vector<8x32xf32> to vector<8x8xf32>
    %cst_252 = arith.constant dense<0.000000e+00> : vector<6x8xf32>
    %607 = tpu.matmul %605, %606, %cst_252 {dimension_numbers = #tpu.dot_dimension_numbers<[1], [1], [0], [0], [0, 0, 1, 0], [], []>} : vector<6x8xf32>, vector<8x8xf32>, vector<6x8xf32> -> vector<6x8xf32>
    %608 = vector.broadcast %3 : vector<1x8xf32> to vector<6x8xf32>
    %609 = arith.addf %607, %608 : vector<6x8xf32>
    %cst_253 = arith.constant dense<0xFF800000> : vector<6xf32>
    %610 = vector.multi_reduction <maximumf>, %609, %cst_253 [1] : vector<6x8xf32> to vector<6xf32>
    %611 = vector.shape_cast %610 : vector<6xf32> to vector<6x1xf32>
    %612 = vector.broadcast %611 : vector<6x1xf32> to vector<6x8xf32>
    %613 = arith.subf %609, %612 : vector<6x8xf32>
    %614 = math.exp %613 : vector<6x8xf32>
    %cst_254 = arith.constant dense<0.000000e+00> : vector<6xf32>
    %615 = vector.multi_reduction <add>, %614, %cst_254 [1] : vector<6x8xf32> to vector<6xf32>
    %616 = vector.shape_cast %615 : vector<6xf32> to vector<6x1xf32>
    %617 = tpu.reciprocal %616 {approx = true} : vector<6x1xf32> -> vector<6x1xf32>
    %618 = vector.broadcast %617 : vector<6x1xf32> to vector<6x8xf32>
    %619 = arith.mulf %614, %618 : vector<6x8xf32>
    %620 = vector.extract_strided_slice %543 {offsets = [0, 24], sizes = [8, 8], strides = [1, 1]} : vector<8x32xf32> to vector<8x8xf32>
    %cst_255 = arith.constant dense<0.000000e+00> : vector<6x8xf32>
    %621 = tpu.matmul %619, %620, %cst_255 {dimension_numbers = #tpu.dot_dimension_numbers<[1], [0], [0], [1], [0, 0, 1, 1], [], []>} : vector<6x8xf32>, vector<8x8xf32>, vector<6x8xf32> -> vector<6x8xf32>
    %622 = vector.extract_strided_slice %545 {offsets = [24, 0], sizes = [8, 32], strides = [1, 1]} : vector<32x32xf32> to vector<8x32xf32>
    %cst_256 = arith.constant dense<0.000000e+00> : vector<6x32xf32>
    %623 = tpu.matmul %621, %622, %cst_256 {dimension_numbers = #tpu.dot_dimension_numbers<[1], [0], [0], [1], [0, 0, 1, 1], [], []>} : vector<6x8xf32>, vector<8x32xf32>, vector<6x32xf32> -> vector<6x32xf32>
    %624 = arith.addf %604, %623 : vector<6x32xf32>
    %c3_257 = arith.constant 3 : index
    %c0_258 = arith.constant 0 : index
    %c0_259 = arith.constant 0 : index
    %625 = vector.load %arg13[%c3_257, %c0_258, %c0_259] : memref<7x1x32xf32, #tpu.memory_space<vmem>>, vector<1x1x32xf32>
    %626 = vector.shape_cast %625 : vector<1x1x32xf32> to vector<1x32xf32>
    %627 = vector.broadcast %626 : vector<1x32xf32> to vector<6x32xf32>
    %628 = arith.addf %624, %627 : vector<6x32xf32>
    %629 = arith.addf %628, %527 : vector<6x32xf32>
    %c3_260 = arith.constant 3 : index
    %c0_261 = arith.constant 0 : index
    %c0_262 = arith.constant 0 : index
    %630 = vector.load %arg14[%c3_260, %c0_261, %c0_262] : memref<7x1x32xf32, #tpu.memory_space<vmem>>, vector<1x1x32xf32>
    %631 = vector.shape_cast %630 : vector<1x1x32xf32> to vector<1x32xf32>
    %c3_263 = arith.constant 3 : index
    %c0_264 = arith.constant 0 : index
    %c0_265 = arith.constant 0 : index
    %632 = vector.load %arg15[%c3_263, %c0_264, %c0_265] : memref<7x1x32xf32, #tpu.memory_space<vmem>>, vector<1x1x32xf32>
    %633 = vector.shape_cast %632 : vector<1x1x32xf32> to vector<1x32xf32>
    %cst_266 = arith.constant dense<0.000000e+00> : vector<6xf32>
    %634 = vector.multi_reduction <add>, %629, %cst_266 [1] : vector<6x32xf32> to vector<6xf32>
    %635 = vector.shape_cast %634 : vector<6xf32> to vector<6x1xf32>
    %cst_267 = arith.constant 3.200000e+01 : f32
    %636 = vector.broadcast %cst_267 : f32 to vector<6x1xf32>
    %637 = arith.divf %635, %636 : vector<6x1xf32>
    %638 = vector.broadcast %637 : vector<6x1xf32> to vector<6x32xf32>
    %639 = arith.subf %629, %638 : vector<6x32xf32>
    %640 = arith.mulf %639, %639 : vector<6x32xf32>
    %cst_268 = arith.constant dense<0.000000e+00> : vector<6xf32>
    %641 = vector.multi_reduction <add>, %640, %cst_268 [1] : vector<6x32xf32> to vector<6xf32>
    %642 = vector.shape_cast %641 : vector<6xf32> to vector<6x1xf32>
    %cst_269 = arith.constant 3.200000e+01 : f32
    %643 = vector.broadcast %cst_269 : f32 to vector<6x1xf32>
    %644 = arith.divf %642, %643 : vector<6x1xf32>
    %cst_270 = arith.constant 9.99999997E-7 : f32
    %645 = vector.broadcast %cst_270 : f32 to vector<6x1xf32>
    %646 = arith.addf %644, %645 : vector<6x1xf32>
    %647 = math.rsqrt %646 : vector<6x1xf32>
    %648 = vector.broadcast %647 : vector<6x1xf32> to vector<6x32xf32>
    %649 = arith.mulf %639, %648 : vector<6x32xf32>
    %650 = vector.broadcast %631 : vector<1x32xf32> to vector<6x32xf32>
    %651 = arith.mulf %649, %650 : vector<6x32xf32>
    %652 = vector.broadcast %633 : vector<1x32xf32> to vector<6x32xf32>
    %653 = arith.addf %651, %652 : vector<6x32xf32>
    %c3_271 = arith.constant 3 : index
    %c0_272 = arith.constant 0 : index
    %c0_273 = arith.constant 0 : index
    %654 = vector.load %arg16[%c3_271, %c0_272, %c0_273] : memref<7x32x64xf32, #tpu.memory_space<vmem>>, vector<1x32x64xf32>
    %655 = vector.shape_cast %654 : vector<1x32x64xf32> to vector<32x64xf32>
    %cst_274 = arith.constant dense<0.000000e+00> : vector<6x64xf32>
    %656 = tpu.matmul %653, %655, %cst_274 {dimension_numbers = #tpu.dot_dimension_numbers<[1], [0], [0], [1], [0, 0, 1, 1], [], []>} : vector<6x32xf32>, vector<32x64xf32>, vector<6x64xf32> -> vector<6x64xf32>
    %c3_275 = arith.constant 3 : index
    %c0_276 = arith.constant 0 : index
    %c0_277 = arith.constant 0 : index
    %657 = vector.load %arg17[%c3_275, %c0_276, %c0_277] : memref<7x1x64xf32, #tpu.memory_space<vmem>>, vector<1x1x64xf32>
    %658 = vector.shape_cast %657 : vector<1x1x64xf32> to vector<1x64xf32>
    %659 = vector.broadcast %658 : vector<1x64xf32> to vector<6x64xf32>
    %660 = arith.addf %656, %659 : vector<6x64xf32>
    %cst_278 = arith.constant 5.000000e-01 : f32
    %661 = vector.broadcast %cst_278 : f32 to vector<6x64xf32>
    %662 = arith.mulf %661, %660 : vector<6x64xf32>
    %cst_279 = arith.constant 4.471500e-02 : f32
    %663 = vector.broadcast %cst_279 : f32 to vector<6x64xf32>
    %664 = arith.mulf %663, %660 : vector<6x64xf32>
    %665 = arith.mulf %664, %660 : vector<6x64xf32>
    %666 = arith.mulf %665, %660 : vector<6x64xf32>
    %667 = arith.addf %660, %666 : vector<6x64xf32>
    %cst_280 = arith.constant 0.797884583 : f32
    %668 = vector.broadcast %cst_280 : f32 to vector<6x64xf32>
    %669 = arith.mulf %668, %667 : vector<6x64xf32>
    %670 = math.tanh %669 : vector<6x64xf32>
    %cst_281 = arith.constant 1.000000e+00 : f32
    %671 = vector.broadcast %cst_281 : f32 to vector<6x64xf32>
    %672 = arith.addf %671, %670 : vector<6x64xf32>
    %673 = arith.mulf %662, %672 : vector<6x64xf32>
    %c3_282 = arith.constant 3 : index
    %c0_283 = arith.constant 0 : index
    %c0_284 = arith.constant 0 : index
    %674 = vector.load %arg18[%c3_282, %c0_283, %c0_284] : memref<7x64x32xf32, #tpu.memory_space<vmem>>, vector<1x64x32xf32>
    %675 = vector.shape_cast %674 : vector<1x64x32xf32> to vector<64x32xf32>
    %cst_285 = arith.constant dense<0.000000e+00> : vector<6x32xf32>
    %676 = tpu.matmul %673, %675, %cst_285 {dimension_numbers = #tpu.dot_dimension_numbers<[1], [0], [0], [1], [0, 0, 1, 1], [], []>} : vector<6x64xf32>, vector<64x32xf32>, vector<6x32xf32> -> vector<6x32xf32>
    %c3_286 = arith.constant 3 : index
    %c0_287 = arith.constant 0 : index
    %c0_288 = arith.constant 0 : index
    %677 = vector.load %arg19[%c3_286, %c0_287, %c0_288] : memref<7x1x32xf32, #tpu.memory_space<vmem>>, vector<1x1x32xf32>
    %678 = vector.shape_cast %677 : vector<1x1x32xf32> to vector<1x32xf32>
    %679 = vector.broadcast %678 : vector<1x32xf32> to vector<6x32xf32>
    %680 = arith.addf %676, %679 : vector<6x32xf32>
    %681 = arith.addf %680, %629 : vector<6x32xf32>
    %c4 = arith.constant 4 : index
    %c0_289 = arith.constant 0 : index
    %c0_290 = arith.constant 0 : index
    %682 = vector.load %arg8[%c4, %c0_289, %c0_290] : memref<7x1x32xf32, #tpu.memory_space<vmem>>, vector<1x1x32xf32>
    %683 = vector.shape_cast %682 : vector<1x1x32xf32> to vector<1x32xf32>
    %c4_291 = arith.constant 4 : index
    %c0_292 = arith.constant 0 : index
    %c0_293 = arith.constant 0 : index
    %684 = vector.load %arg9[%c4_291, %c0_292, %c0_293] : memref<7x1x32xf32, #tpu.memory_space<vmem>>, vector<1x1x32xf32>
    %685 = vector.shape_cast %684 : vector<1x1x32xf32> to vector<1x32xf32>
    %cst_294 = arith.constant dense<0.000000e+00> : vector<8xf32>
    %686 = vector.multi_reduction <add>, %181, %cst_294 [1] : vector<8x32xf32> to vector<8xf32>
    %687 = vector.shape_cast %686 : vector<8xf32> to vector<8x1xf32>
    %cst_295 = arith.constant 3.200000e+01 : f32
    %688 = vector.broadcast %cst_295 : f32 to vector<8x1xf32>
    %689 = arith.divf %687, %688 : vector<8x1xf32>
    %690 = vector.broadcast %689 : vector<8x1xf32> to vector<8x32xf32>
    %691 = arith.subf %181, %690 : vector<8x32xf32>
    %692 = arith.mulf %691, %691 : vector<8x32xf32>
    %cst_296 = arith.constant dense<0.000000e+00> : vector<8xf32>
    %693 = vector.multi_reduction <add>, %692, %cst_296 [1] : vector<8x32xf32> to vector<8xf32>
    %694 = vector.shape_cast %693 : vector<8xf32> to vector<8x1xf32>
    %cst_297 = arith.constant 3.200000e+01 : f32
    %695 = vector.broadcast %cst_297 : f32 to vector<8x1xf32>
    %696 = arith.divf %694, %695 : vector<8x1xf32>
    %cst_298 = arith.constant 9.99999997E-7 : f32
    %697 = vector.broadcast %cst_298 : f32 to vector<8x1xf32>
    %698 = arith.addf %696, %697 : vector<8x1xf32>
    %699 = math.rsqrt %698 : vector<8x1xf32>
    %700 = vector.broadcast %699 : vector<8x1xf32> to vector<8x32xf32>
    %701 = arith.mulf %691, %700 : vector<8x32xf32>
    %702 = vector.broadcast %683 : vector<1x32xf32> to vector<8x32xf32>
    %703 = arith.mulf %701, %702 : vector<8x32xf32>
    %704 = vector.broadcast %685 : vector<1x32xf32> to vector<8x32xf32>
    %705 = arith.addf %703, %704 : vector<8x32xf32>
    %c4_299 = arith.constant 4 : index
    %c0_300 = arith.constant 0 : index
    %c0_301 = arith.constant 0 : index
    %706 = vector.load %arg8[%c4_299, %c0_300, %c0_301] : memref<7x1x32xf32, #tpu.memory_space<vmem>>, vector<1x1x32xf32>
    %707 = vector.shape_cast %706 : vector<1x1x32xf32> to vector<1x32xf32>
    %c4_302 = arith.constant 4 : index
    %c0_303 = arith.constant 0 : index
    %c0_304 = arith.constant 0 : index
    %708 = vector.load %arg9[%c4_302, %c0_303, %c0_304] : memref<7x1x32xf32, #tpu.memory_space<vmem>>, vector<1x1x32xf32>
    %709 = vector.shape_cast %708 : vector<1x1x32xf32> to vector<1x32xf32>
    %cst_305 = arith.constant dense<0.000000e+00> : vector<6xf32>
    %710 = vector.multi_reduction <add>, %681, %cst_305 [1] : vector<6x32xf32> to vector<6xf32>
    %711 = vector.shape_cast %710 : vector<6xf32> to vector<6x1xf32>
    %cst_306 = arith.constant 3.200000e+01 : f32
    %712 = vector.broadcast %cst_306 : f32 to vector<6x1xf32>
    %713 = arith.divf %711, %712 : vector<6x1xf32>
    %714 = vector.broadcast %713 : vector<6x1xf32> to vector<6x32xf32>
    %715 = arith.subf %681, %714 : vector<6x32xf32>
    %716 = arith.mulf %715, %715 : vector<6x32xf32>
    %cst_307 = arith.constant dense<0.000000e+00> : vector<6xf32>
    %717 = vector.multi_reduction <add>, %716, %cst_307 [1] : vector<6x32xf32> to vector<6xf32>
    %718 = vector.shape_cast %717 : vector<6xf32> to vector<6x1xf32>
    %cst_308 = arith.constant 3.200000e+01 : f32
    %719 = vector.broadcast %cst_308 : f32 to vector<6x1xf32>
    %720 = arith.divf %718, %719 : vector<6x1xf32>
    %cst_309 = arith.constant 9.99999997E-7 : f32
    %721 = vector.broadcast %cst_309 : f32 to vector<6x1xf32>
    %722 = arith.addf %720, %721 : vector<6x1xf32>
    %723 = math.rsqrt %722 : vector<6x1xf32>
    %724 = vector.broadcast %723 : vector<6x1xf32> to vector<6x32xf32>
    %725 = arith.mulf %715, %724 : vector<6x32xf32>
    %726 = vector.broadcast %707 : vector<1x32xf32> to vector<6x32xf32>
    %727 = arith.mulf %725, %726 : vector<6x32xf32>
    %728 = vector.broadcast %709 : vector<1x32xf32> to vector<6x32xf32>
    %729 = arith.addf %727, %728 : vector<6x32xf32>
    %c4_310 = arith.constant 4 : index
    %c0_311 = arith.constant 0 : index
    %c0_312 = arith.constant 0 : index
    %730 = vector.load %arg10[%c4_310, %c0_311, %c0_312] : memref<7x32x96xf32, #tpu.memory_space<vmem>>, vector<1x32x96xf32>
    %731 = vector.shape_cast %730 : vector<1x32x96xf32> to vector<32x96xf32>
    %c4_313 = arith.constant 4 : index
    %c0_314 = arith.constant 0 : index
    %c0_315 = arith.constant 0 : index
    %732 = vector.load %arg11[%c4_313, %c0_314, %c0_315] : memref<7x1x96xf32, #tpu.memory_space<vmem>>, vector<1x1x96xf32>
    %733 = vector.shape_cast %732 : vector<1x1x96xf32> to vector<1x96xf32>
    %734 = vector.extract_strided_slice %731 {offsets = [0, 0], sizes = [32, 32], strides = [1, 1]} : vector<32x96xf32> to vector<32x32xf32>
    %cst_316 = arith.constant dense<0.000000e+00> : vector<6x32xf32>
    %735 = tpu.matmul %729, %734, %cst_316 {dimension_numbers = #tpu.dot_dimension_numbers<[1], [0], [0], [1], [0, 0, 1, 1], [], []>} : vector<6x32xf32>, vector<32x32xf32>, vector<6x32xf32> -> vector<6x32xf32>
    %736 = vector.extract_strided_slice %733 {offsets = [0, 0], sizes = [1, 32], strides = [1, 1]} : vector<1x96xf32> to vector<1x32xf32>
    %737 = vector.broadcast %736 : vector<1x32xf32> to vector<6x32xf32>
    %738 = arith.addf %735, %737 : vector<6x32xf32>
    %739 = vector.extract_strided_slice %731 {offsets = [0, 32], sizes = [32, 64], strides = [1, 1]} : vector<32x96xf32> to vector<32x64xf32>
    %cst_317 = arith.constant dense<0.000000e+00> : vector<8x64xf32>
    %740 = tpu.matmul %705, %739, %cst_317 {dimension_numbers = #tpu.dot_dimension_numbers<[1], [0], [0], [1], [0, 0, 1, 1], [], []>} : vector<8x32xf32>, vector<32x64xf32>, vector<8x64xf32> -> vector<8x64xf32>
    %741 = vector.extract_strided_slice %733 {offsets = [0, 32], sizes = [1, 64], strides = [1, 1]} : vector<1x96xf32> to vector<1x64xf32>
    %742 = vector.broadcast %741 : vector<1x64xf32> to vector<8x64xf32>
    %743 = arith.addf %740, %742 : vector<8x64xf32>
    %744 = vector.extract_strided_slice %743 {offsets = [0, 0], sizes = [8, 32], strides = [1, 1]} : vector<8x64xf32> to vector<8x32xf32>
    %745 = vector.extract_strided_slice %743 {offsets = [0, 32], sizes = [8, 32], strides = [1, 1]} : vector<8x64xf32> to vector<8x32xf32>
    %c4_318 = arith.constant 4 : index
    %c0_319 = arith.constant 0 : index
    %c0_320 = arith.constant 0 : index
    %746 = vector.load %arg12[%c4_318, %c0_319, %c0_320] : memref<7x32x32xf32, #tpu.memory_space<vmem>>, vector<1x32x32xf32>
    %747 = vector.shape_cast %746 : vector<1x32x32xf32> to vector<32x32xf32>
    %748 = vector.extract_strided_slice %738 {offsets = [0, 0], sizes = [6, 8], strides = [1, 1]} : vector<6x32xf32> to vector<6x8xf32>
    %749 = vector.extract_strided_slice %744 {offsets = [0, 0], sizes = [8, 8], strides = [1, 1]} : vector<8x32xf32> to vector<8x8xf32>
    %cst_321 = arith.constant dense<0.000000e+00> : vector<6x8xf32>
    %750 = tpu.matmul %748, %749, %cst_321 {dimension_numbers = #tpu.dot_dimension_numbers<[1], [1], [0], [0], [0, 0, 1, 0], [], []>} : vector<6x8xf32>, vector<8x8xf32>, vector<6x8xf32> -> vector<6x8xf32>
    %751 = vector.broadcast %3 : vector<1x8xf32> to vector<6x8xf32>
    %752 = arith.addf %750, %751 : vector<6x8xf32>
    %cst_322 = arith.constant dense<0xFF800000> : vector<6xf32>
    %753 = vector.multi_reduction <maximumf>, %752, %cst_322 [1] : vector<6x8xf32> to vector<6xf32>
    %754 = vector.shape_cast %753 : vector<6xf32> to vector<6x1xf32>
    %755 = vector.broadcast %754 : vector<6x1xf32> to vector<6x8xf32>
    %756 = arith.subf %752, %755 : vector<6x8xf32>
    %757 = math.exp %756 : vector<6x8xf32>
    %cst_323 = arith.constant dense<0.000000e+00> : vector<6xf32>
    %758 = vector.multi_reduction <add>, %757, %cst_323 [1] : vector<6x8xf32> to vector<6xf32>
    %759 = vector.shape_cast %758 : vector<6xf32> to vector<6x1xf32>
    %760 = tpu.reciprocal %759 {approx = true} : vector<6x1xf32> -> vector<6x1xf32>
    %761 = vector.broadcast %760 : vector<6x1xf32> to vector<6x8xf32>
    %762 = arith.mulf %757, %761 : vector<6x8xf32>
    %763 = vector.extract_strided_slice %745 {offsets = [0, 0], sizes = [8, 8], strides = [1, 1]} : vector<8x32xf32> to vector<8x8xf32>
    %cst_324 = arith.constant dense<0.000000e+00> : vector<6x8xf32>
    %764 = tpu.matmul %762, %763, %cst_324 {dimension_numbers = #tpu.dot_dimension_numbers<[1], [0], [0], [1], [0, 0, 1, 1], [], []>} : vector<6x8xf32>, vector<8x8xf32>, vector<6x8xf32> -> vector<6x8xf32>
    %765 = vector.extract_strided_slice %747 {offsets = [0, 0], sizes = [8, 32], strides = [1, 1]} : vector<32x32xf32> to vector<8x32xf32>
    %cst_325 = arith.constant dense<0.000000e+00> : vector<6x32xf32>
    %766 = tpu.matmul %764, %765, %cst_325 {dimension_numbers = #tpu.dot_dimension_numbers<[1], [0], [0], [1], [0, 0, 1, 1], [], []>} : vector<6x8xf32>, vector<8x32xf32>, vector<6x32xf32> -> vector<6x32xf32>
    %767 = vector.extract_strided_slice %738 {offsets = [0, 8], sizes = [6, 8], strides = [1, 1]} : vector<6x32xf32> to vector<6x8xf32>
    %768 = vector.extract_strided_slice %744 {offsets = [0, 8], sizes = [8, 8], strides = [1, 1]} : vector<8x32xf32> to vector<8x8xf32>
    %cst_326 = arith.constant dense<0.000000e+00> : vector<6x8xf32>
    %769 = tpu.matmul %767, %768, %cst_326 {dimension_numbers = #tpu.dot_dimension_numbers<[1], [1], [0], [0], [0, 0, 1, 0], [], []>} : vector<6x8xf32>, vector<8x8xf32>, vector<6x8xf32> -> vector<6x8xf32>
    %770 = vector.broadcast %3 : vector<1x8xf32> to vector<6x8xf32>
    %771 = arith.addf %769, %770 : vector<6x8xf32>
    %cst_327 = arith.constant dense<0xFF800000> : vector<6xf32>
    %772 = vector.multi_reduction <maximumf>, %771, %cst_327 [1] : vector<6x8xf32> to vector<6xf32>
    %773 = vector.shape_cast %772 : vector<6xf32> to vector<6x1xf32>
    %774 = vector.broadcast %773 : vector<6x1xf32> to vector<6x8xf32>
    %775 = arith.subf %771, %774 : vector<6x8xf32>
    %776 = math.exp %775 : vector<6x8xf32>
    %cst_328 = arith.constant dense<0.000000e+00> : vector<6xf32>
    %777 = vector.multi_reduction <add>, %776, %cst_328 [1] : vector<6x8xf32> to vector<6xf32>
    %778 = vector.shape_cast %777 : vector<6xf32> to vector<6x1xf32>
    %779 = tpu.reciprocal %778 {approx = true} : vector<6x1xf32> -> vector<6x1xf32>
    %780 = vector.broadcast %779 : vector<6x1xf32> to vector<6x8xf32>
    %781 = arith.mulf %776, %780 : vector<6x8xf32>
    %782 = vector.extract_strided_slice %745 {offsets = [0, 8], sizes = [8, 8], strides = [1, 1]} : vector<8x32xf32> to vector<8x8xf32>
    %cst_329 = arith.constant dense<0.000000e+00> : vector<6x8xf32>
    %783 = tpu.matmul %781, %782, %cst_329 {dimension_numbers = #tpu.dot_dimension_numbers<[1], [0], [0], [1], [0, 0, 1, 1], [], []>} : vector<6x8xf32>, vector<8x8xf32>, vector<6x8xf32> -> vector<6x8xf32>
    %784 = vector.extract_strided_slice %747 {offsets = [8, 0], sizes = [8, 32], strides = [1, 1]} : vector<32x32xf32> to vector<8x32xf32>
    %cst_330 = arith.constant dense<0.000000e+00> : vector<6x32xf32>
    %785 = tpu.matmul %783, %784, %cst_330 {dimension_numbers = #tpu.dot_dimension_numbers<[1], [0], [0], [1], [0, 0, 1, 1], [], []>} : vector<6x8xf32>, vector<8x32xf32>, vector<6x32xf32> -> vector<6x32xf32>
    %786 = arith.addf %766, %785 : vector<6x32xf32>
    %787 = vector.extract_strided_slice %738 {offsets = [0, 16], sizes = [6, 8], strides = [1, 1]} : vector<6x32xf32> to vector<6x8xf32>
    %788 = vector.extract_strided_slice %744 {offsets = [0, 16], sizes = [8, 8], strides = [1, 1]} : vector<8x32xf32> to vector<8x8xf32>
    %cst_331 = arith.constant dense<0.000000e+00> : vector<6x8xf32>
    %789 = tpu.matmul %787, %788, %cst_331 {dimension_numbers = #tpu.dot_dimension_numbers<[1], [1], [0], [0], [0, 0, 1, 0], [], []>} : vector<6x8xf32>, vector<8x8xf32>, vector<6x8xf32> -> vector<6x8xf32>
    %790 = vector.broadcast %3 : vector<1x8xf32> to vector<6x8xf32>
    %791 = arith.addf %789, %790 : vector<6x8xf32>
    %cst_332 = arith.constant dense<0xFF800000> : vector<6xf32>
    %792 = vector.multi_reduction <maximumf>, %791, %cst_332 [1] : vector<6x8xf32> to vector<6xf32>
    %793 = vector.shape_cast %792 : vector<6xf32> to vector<6x1xf32>
    %794 = vector.broadcast %793 : vector<6x1xf32> to vector<6x8xf32>
    %795 = arith.subf %791, %794 : vector<6x8xf32>
    %796 = math.exp %795 : vector<6x8xf32>
    %cst_333 = arith.constant dense<0.000000e+00> : vector<6xf32>
    %797 = vector.multi_reduction <add>, %796, %cst_333 [1] : vector<6x8xf32> to vector<6xf32>
    %798 = vector.shape_cast %797 : vector<6xf32> to vector<6x1xf32>
    %799 = tpu.reciprocal %798 {approx = true} : vector<6x1xf32> -> vector<6x1xf32>
    %800 = vector.broadcast %799 : vector<6x1xf32> to vector<6x8xf32>
    %801 = arith.mulf %796, %800 : vector<6x8xf32>
    %802 = vector.extract_strided_slice %745 {offsets = [0, 16], sizes = [8, 8], strides = [1, 1]} : vector<8x32xf32> to vector<8x8xf32>
    %cst_334 = arith.constant dense<0.000000e+00> : vector<6x8xf32>
    %803 = tpu.matmul %801, %802, %cst_334 {dimension_numbers = #tpu.dot_dimension_numbers<[1], [0], [0], [1], [0, 0, 1, 1], [], []>} : vector<6x8xf32>, vector<8x8xf32>, vector<6x8xf32> -> vector<6x8xf32>
    %804 = vector.extract_strided_slice %747 {offsets = [16, 0], sizes = [8, 32], strides = [1, 1]} : vector<32x32xf32> to vector<8x32xf32>
    %cst_335 = arith.constant dense<0.000000e+00> : vector<6x32xf32>
    %805 = tpu.matmul %803, %804, %cst_335 {dimension_numbers = #tpu.dot_dimension_numbers<[1], [0], [0], [1], [0, 0, 1, 1], [], []>} : vector<6x8xf32>, vector<8x32xf32>, vector<6x32xf32> -> vector<6x32xf32>
    %806 = arith.addf %786, %805 : vector<6x32xf32>
    %807 = vector.extract_strided_slice %738 {offsets = [0, 24], sizes = [6, 8], strides = [1, 1]} : vector<6x32xf32> to vector<6x8xf32>
    %808 = vector.extract_strided_slice %744 {offsets = [0, 24], sizes = [8, 8], strides = [1, 1]} : vector<8x32xf32> to vector<8x8xf32>
    %cst_336 = arith.constant dense<0.000000e+00> : vector<6x8xf32>
    %809 = tpu.matmul %807, %808, %cst_336 {dimension_numbers = #tpu.dot_dimension_numbers<[1], [1], [0], [0], [0, 0, 1, 0], [], []>} : vector<6x8xf32>, vector<8x8xf32>, vector<6x8xf32> -> vector<6x8xf32>
    %810 = vector.broadcast %3 : vector<1x8xf32> to vector<6x8xf32>
    %811 = arith.addf %809, %810 : vector<6x8xf32>
    %cst_337 = arith.constant dense<0xFF800000> : vector<6xf32>
    %812 = vector.multi_reduction <maximumf>, %811, %cst_337 [1] : vector<6x8xf32> to vector<6xf32>
    %813 = vector.shape_cast %812 : vector<6xf32> to vector<6x1xf32>
    %814 = vector.broadcast %813 : vector<6x1xf32> to vector<6x8xf32>
    %815 = arith.subf %811, %814 : vector<6x8xf32>
    %816 = math.exp %815 : vector<6x8xf32>
    %cst_338 = arith.constant dense<0.000000e+00> : vector<6xf32>
    %817 = vector.multi_reduction <add>, %816, %cst_338 [1] : vector<6x8xf32> to vector<6xf32>
    %818 = vector.shape_cast %817 : vector<6xf32> to vector<6x1xf32>
    %819 = tpu.reciprocal %818 {approx = true} : vector<6x1xf32> -> vector<6x1xf32>
    %820 = vector.broadcast %819 : vector<6x1xf32> to vector<6x8xf32>
    %821 = arith.mulf %816, %820 : vector<6x8xf32>
    %822 = vector.extract_strided_slice %745 {offsets = [0, 24], sizes = [8, 8], strides = [1, 1]} : vector<8x32xf32> to vector<8x8xf32>
    %cst_339 = arith.constant dense<0.000000e+00> : vector<6x8xf32>
    %823 = tpu.matmul %821, %822, %cst_339 {dimension_numbers = #tpu.dot_dimension_numbers<[1], [0], [0], [1], [0, 0, 1, 1], [], []>} : vector<6x8xf32>, vector<8x8xf32>, vector<6x8xf32> -> vector<6x8xf32>
    %824 = vector.extract_strided_slice %747 {offsets = [24, 0], sizes = [8, 32], strides = [1, 1]} : vector<32x32xf32> to vector<8x32xf32>
    %cst_340 = arith.constant dense<0.000000e+00> : vector<6x32xf32>
    %825 = tpu.matmul %823, %824, %cst_340 {dimension_numbers = #tpu.dot_dimension_numbers<[1], [0], [0], [1], [0, 0, 1, 1], [], []>} : vector<6x8xf32>, vector<8x32xf32>, vector<6x32xf32> -> vector<6x32xf32>
    %826 = arith.addf %806, %825 : vector<6x32xf32>
    %c4_341 = arith.constant 4 : index
    %c0_342 = arith.constant 0 : index
    %c0_343 = arith.constant 0 : index
    %827 = vector.load %arg13[%c4_341, %c0_342, %c0_343] : memref<7x1x32xf32, #tpu.memory_space<vmem>>, vector<1x1x32xf32>
    %828 = vector.shape_cast %827 : vector<1x1x32xf32> to vector<1x32xf32>
    %829 = vector.broadcast %828 : vector<1x32xf32> to vector<6x32xf32>
    %830 = arith.addf %826, %829 : vector<6x32xf32>
    %831 = arith.addf %830, %681 : vector<6x32xf32>
    %c4_344 = arith.constant 4 : index
    %c0_345 = arith.constant 0 : index
    %c0_346 = arith.constant 0 : index
    %832 = vector.load %arg14[%c4_344, %c0_345, %c0_346] : memref<7x1x32xf32, #tpu.memory_space<vmem>>, vector<1x1x32xf32>
    %833 = vector.shape_cast %832 : vector<1x1x32xf32> to vector<1x32xf32>
    %c4_347 = arith.constant 4 : index
    %c0_348 = arith.constant 0 : index
    %c0_349 = arith.constant 0 : index
    %834 = vector.load %arg15[%c4_347, %c0_348, %c0_349] : memref<7x1x32xf32, #tpu.memory_space<vmem>>, vector<1x1x32xf32>
    %835 = vector.shape_cast %834 : vector<1x1x32xf32> to vector<1x32xf32>
    %cst_350 = arith.constant dense<0.000000e+00> : vector<6xf32>
    %836 = vector.multi_reduction <add>, %831, %cst_350 [1] : vector<6x32xf32> to vector<6xf32>
    %837 = vector.shape_cast %836 : vector<6xf32> to vector<6x1xf32>
    %cst_351 = arith.constant 3.200000e+01 : f32
    %838 = vector.broadcast %cst_351 : f32 to vector<6x1xf32>
    %839 = arith.divf %837, %838 : vector<6x1xf32>
    %840 = vector.broadcast %839 : vector<6x1xf32> to vector<6x32xf32>
    %841 = arith.subf %831, %840 : vector<6x32xf32>
    %842 = arith.mulf %841, %841 : vector<6x32xf32>
    %cst_352 = arith.constant dense<0.000000e+00> : vector<6xf32>
    %843 = vector.multi_reduction <add>, %842, %cst_352 [1] : vector<6x32xf32> to vector<6xf32>
    %844 = vector.shape_cast %843 : vector<6xf32> to vector<6x1xf32>
    %cst_353 = arith.constant 3.200000e+01 : f32
    %845 = vector.broadcast %cst_353 : f32 to vector<6x1xf32>
    %846 = arith.divf %844, %845 : vector<6x1xf32>
    %cst_354 = arith.constant 9.99999997E-7 : f32
    %847 = vector.broadcast %cst_354 : f32 to vector<6x1xf32>
    %848 = arith.addf %846, %847 : vector<6x1xf32>
    %849 = math.rsqrt %848 : vector<6x1xf32>
    %850 = vector.broadcast %849 : vector<6x1xf32> to vector<6x32xf32>
    %851 = arith.mulf %841, %850 : vector<6x32xf32>
    %852 = vector.broadcast %833 : vector<1x32xf32> to vector<6x32xf32>
    %853 = arith.mulf %851, %852 : vector<6x32xf32>
    %854 = vector.broadcast %835 : vector<1x32xf32> to vector<6x32xf32>
    %855 = arith.addf %853, %854 : vector<6x32xf32>
    %c4_355 = arith.constant 4 : index
    %c0_356 = arith.constant 0 : index
    %c0_357 = arith.constant 0 : index
    %856 = vector.load %arg16[%c4_355, %c0_356, %c0_357] : memref<7x32x64xf32, #tpu.memory_space<vmem>>, vector<1x32x64xf32>
    %857 = vector.shape_cast %856 : vector<1x32x64xf32> to vector<32x64xf32>
    %cst_358 = arith.constant dense<0.000000e+00> : vector<6x64xf32>
    %858 = tpu.matmul %855, %857, %cst_358 {dimension_numbers = #tpu.dot_dimension_numbers<[1], [0], [0], [1], [0, 0, 1, 1], [], []>} : vector<6x32xf32>, vector<32x64xf32>, vector<6x64xf32> -> vector<6x64xf32>
    %c4_359 = arith.constant 4 : index
    %c0_360 = arith.constant 0 : index
    %c0_361 = arith.constant 0 : index
    %859 = vector.load %arg17[%c4_359, %c0_360, %c0_361] : memref<7x1x64xf32, #tpu.memory_space<vmem>>, vector<1x1x64xf32>
    %860 = vector.shape_cast %859 : vector<1x1x64xf32> to vector<1x64xf32>
    %861 = vector.broadcast %860 : vector<1x64xf32> to vector<6x64xf32>
    %862 = arith.addf %858, %861 : vector<6x64xf32>
    %cst_362 = arith.constant 5.000000e-01 : f32
    %863 = vector.broadcast %cst_362 : f32 to vector<6x64xf32>
    %864 = arith.mulf %863, %862 : vector<6x64xf32>
    %cst_363 = arith.constant 4.471500e-02 : f32
    %865 = vector.broadcast %cst_363 : f32 to vector<6x64xf32>
    %866 = arith.mulf %865, %862 : vector<6x64xf32>
    %867 = arith.mulf %866, %862 : vector<6x64xf32>
    %868 = arith.mulf %867, %862 : vector<6x64xf32>
    %869 = arith.addf %862, %868 : vector<6x64xf32>
    %cst_364 = arith.constant 0.797884583 : f32
    %870 = vector.broadcast %cst_364 : f32 to vector<6x64xf32>
    %871 = arith.mulf %870, %869 : vector<6x64xf32>
    %872 = math.tanh %871 : vector<6x64xf32>
    %cst_365 = arith.constant 1.000000e+00 : f32
    %873 = vector.broadcast %cst_365 : f32 to vector<6x64xf32>
    %874 = arith.addf %873, %872 : vector<6x64xf32>
    %875 = arith.mulf %864, %874 : vector<6x64xf32>
    %c4_366 = arith.constant 4 : index
    %c0_367 = arith.constant 0 : index
    %c0_368 = arith.constant 0 : index
    %876 = vector.load %arg18[%c4_366, %c0_367, %c0_368] : memref<7x64x32xf32, #tpu.memory_space<vmem>>, vector<1x64x32xf32>
    %877 = vector.shape_cast %876 : vector<1x64x32xf32> to vector<64x32xf32>
    %cst_369 = arith.constant dense<0.000000e+00> : vector<6x32xf32>
    %878 = tpu.matmul %875, %877, %cst_369 {dimension_numbers = #tpu.dot_dimension_numbers<[1], [0], [0], [1], [0, 0, 1, 1], [], []>} : vector<6x64xf32>, vector<64x32xf32>, vector<6x32xf32> -> vector<6x32xf32>
    %c4_370 = arith.constant 4 : index
    %c0_371 = arith.constant 0 : index
    %c0_372 = arith.constant 0 : index
    %879 = vector.load %arg19[%c4_370, %c0_371, %c0_372] : memref<7x1x32xf32, #tpu.memory_space<vmem>>, vector<1x1x32xf32>
    %880 = vector.shape_cast %879 : vector<1x1x32xf32> to vector<1x32xf32>
    %881 = vector.broadcast %880 : vector<1x32xf32> to vector<6x32xf32>
    %882 = arith.addf %878, %881 : vector<6x32xf32>
    %883 = arith.addf %882, %831 : vector<6x32xf32>
    %c0_373 = arith.constant 0 : index
    %c0_374 = arith.constant 0 : index
    %884 = vector.load %arg22[%c0_373, %c0_374] : memref<32x1xf32, #tpu.memory_space<vmem>>, vector<32x1xf32>
    %cst_375 = arith.constant dense<0.000000e+00> : vector<6x1xf32>
    %885 = tpu.matmul %883, %884, %cst_375 {dimension_numbers = #tpu.dot_dimension_numbers<[1], [0], [0], [1], [0, 0, 1, 1], [], []>} : vector<6x32xf32>, vector<32x1xf32>, vector<6x1xf32> -> vector<6x1xf32>
    %c0_376 = arith.constant 0 : index
    %c0_377 = arith.constant 0 : index
    %886 = vector.load %arg23[%c0_376, %c0_377] : memref<1x1xf32, #tpu.memory_space<vmem>>, vector<1x1xf32>
    %887 = vector.broadcast %886 : vector<1x1xf32> to vector<6x1xf32>
    %888 = arith.addf %885, %887 : vector<6x1xf32>
    %889 = arith.negf %888 : vector<6x1xf32>
    %890 = math.exp %889 : vector<6x1xf32>
    %cst_378 = arith.constant 1.000000e+00 : f32
    %891 = vector.broadcast %cst_378 : f32 to vector<6x1xf32>
    %892 = arith.addf %891, %890 : vector<6x1xf32>
    %893 = arith.divf %891, %892 : vector<6x1xf32>
    %894 = vector.broadcast %893 : vector<6x1xf32> to vector<6x32xf32>
    %895 = arith.mulf %527, %894 : vector<6x32xf32>
    %cst_379 = arith.constant dense<0.000000e+00> : vector<6xf32>
    %896 = vector.multi_reduction <add>, %895, %cst_379 [1] : vector<6x32xf32> to vector<6xf32>
    %897 = vector.shape_cast %896 : vector<6xf32> to vector<6x1xf32>
    %cst_380 = arith.constant 3.200000e+01 : f32
    %898 = vector.broadcast %cst_380 : f32 to vector<6x1xf32>
    %899 = arith.divf %897, %898 : vector<6x1xf32>
    %900 = vector.broadcast %899 : vector<6x1xf32> to vector<6x32xf32>
    %901 = arith.subf %895, %900 : vector<6x32xf32>
    %902 = arith.mulf %901, %901 : vector<6x32xf32>
    %cst_381 = arith.constant dense<0.000000e+00> : vector<6xf32>
    %903 = vector.multi_reduction <add>, %902, %cst_381 [1] : vector<6x32xf32> to vector<6xf32>
    %904 = vector.shape_cast %903 : vector<6xf32> to vector<6x1xf32>
    %cst_382 = arith.constant 3.200000e+01 : f32
    %905 = vector.broadcast %cst_382 : f32 to vector<6x1xf32>
    %906 = arith.divf %904, %905 : vector<6x1xf32>
    %cst_383 = arith.constant 9.99999997E-7 : f32
    %907 = vector.broadcast %cst_383 : f32 to vector<6x1xf32>
    %908 = arith.addf %906, %907 : vector<6x1xf32>
    %909 = math.rsqrt %908 : vector<6x1xf32>
    %910 = vector.broadcast %909 : vector<6x1xf32> to vector<6x32xf32>
    %911 = arith.mulf %901, %910 : vector<6x32xf32>
    %912 = vector.broadcast %0 : vector<1x32xf32> to vector<6x32xf32>
    %913 = arith.mulf %911, %912 : vector<6x32xf32>
    %914 = vector.broadcast %1 : vector<1x32xf32> to vector<6x32xf32>
    %915 = arith.addf %913, %914 : vector<6x32xf32>
    %c5 = arith.constant 5 : index
    %c0_384 = arith.constant 0 : index
    %c0_385 = arith.constant 0 : index
    %916 = vector.load %arg10[%c5, %c0_384, %c0_385] : memref<7x32x96xf32, #tpu.memory_space<vmem>>, vector<1x32x96xf32>
    %917 = vector.shape_cast %916 : vector<1x32x96xf32> to vector<32x96xf32>
    %c5_386 = arith.constant 5 : index
    %c0_387 = arith.constant 0 : index
    %c0_388 = arith.constant 0 : index
    %918 = vector.load %arg11[%c5_386, %c0_387, %c0_388] : memref<7x1x96xf32, #tpu.memory_space<vmem>>, vector<1x1x96xf32>
    %919 = vector.shape_cast %918 : vector<1x1x96xf32> to vector<1x96xf32>
    %920 = vector.extract_strided_slice %917 {offsets = [0, 0], sizes = [32, 32], strides = [1, 1]} : vector<32x96xf32> to vector<32x32xf32>
    %cst_389 = arith.constant dense<0.000000e+00> : vector<8x32xf32>
    %921 = tpu.matmul %181, %920, %cst_389 {dimension_numbers = #tpu.dot_dimension_numbers<[1], [0], [0], [1], [0, 0, 1, 1], [], []>} : vector<8x32xf32>, vector<32x32xf32>, vector<8x32xf32> -> vector<8x32xf32>
    %922 = vector.extract_strided_slice %919 {offsets = [0, 0], sizes = [1, 32], strides = [1, 1]} : vector<1x96xf32> to vector<1x32xf32>
    %923 = vector.broadcast %922 : vector<1x32xf32> to vector<8x32xf32>
    %924 = arith.addf %921, %923 : vector<8x32xf32>
    %925 = vector.extract_strided_slice %917 {offsets = [0, 32], sizes = [32, 64], strides = [1, 1]} : vector<32x96xf32> to vector<32x64xf32>
    %cst_390 = arith.constant dense<0.000000e+00> : vector<6x64xf32>
    %926 = tpu.matmul %915, %925, %cst_390 {dimension_numbers = #tpu.dot_dimension_numbers<[1], [0], [0], [1], [0, 0, 1, 1], [], []>} : vector<6x32xf32>, vector<32x64xf32>, vector<6x64xf32> -> vector<6x64xf32>
    %927 = vector.extract_strided_slice %919 {offsets = [0, 32], sizes = [1, 64], strides = [1, 1]} : vector<1x96xf32> to vector<1x64xf32>
    %928 = vector.broadcast %927 : vector<1x64xf32> to vector<6x64xf32>
    %929 = arith.addf %926, %928 : vector<6x64xf32>
    %930 = vector.extract_strided_slice %929 {offsets = [0, 0], sizes = [6, 32], strides = [1, 1]} : vector<6x64xf32> to vector<6x32xf32>
    %931 = vector.extract_strided_slice %929 {offsets = [0, 32], sizes = [6, 32], strides = [1, 1]} : vector<6x64xf32> to vector<6x32xf32>
    %c5_391 = arith.constant 5 : index
    %c0_392 = arith.constant 0 : index
    %c0_393 = arith.constant 0 : index
    %932 = vector.load %arg12[%c5_391, %c0_392, %c0_393] : memref<7x32x32xf32, #tpu.memory_space<vmem>>, vector<1x32x32xf32>
    %933 = vector.shape_cast %932 : vector<1x32x32xf32> to vector<32x32xf32>
    %934 = vector.extract_strided_slice %924 {offsets = [0, 0], sizes = [8, 8], strides = [1, 1]} : vector<8x32xf32> to vector<8x8xf32>
    %935 = vector.extract_strided_slice %930 {offsets = [0, 0], sizes = [6, 8], strides = [1, 1]} : vector<6x32xf32> to vector<6x8xf32>
    %cst_394 = arith.constant dense<0.000000e+00> : vector<8x6xf32>
    %936 = tpu.matmul %934, %935, %cst_394 {dimension_numbers = #tpu.dot_dimension_numbers<[1], [1], [0], [0], [0, 0, 1, 0], [], []>} : vector<8x8xf32>, vector<6x8xf32>, vector<8x6xf32> -> vector<8x6xf32>
    %937 = vector.broadcast %5 : vector<1x6xf32> to vector<8x6xf32>
    %938 = arith.addf %936, %937 : vector<8x6xf32>
    %cst_395 = arith.constant dense<0xFF800000> : vector<8xf32>
    %939 = vector.multi_reduction <maximumf>, %938, %cst_395 [1] : vector<8x6xf32> to vector<8xf32>
    %940 = vector.shape_cast %939 : vector<8xf32> to vector<8x1xf32>
    %941 = vector.broadcast %940 : vector<8x1xf32> to vector<8x6xf32>
    %942 = arith.subf %938, %941 : vector<8x6xf32>
    %943 = math.exp %942 : vector<8x6xf32>
    %cst_396 = arith.constant dense<0.000000e+00> : vector<8xf32>
    %944 = vector.multi_reduction <add>, %943, %cst_396 [1] : vector<8x6xf32> to vector<8xf32>
    %945 = vector.shape_cast %944 : vector<8xf32> to vector<8x1xf32>
    %946 = tpu.reciprocal %945 {approx = true} : vector<8x1xf32> -> vector<8x1xf32>
    %947 = vector.broadcast %946 : vector<8x1xf32> to vector<8x6xf32>
    %948 = arith.mulf %943, %947 : vector<8x6xf32>
    %949 = vector.extract_strided_slice %931 {offsets = [0, 0], sizes = [6, 8], strides = [1, 1]} : vector<6x32xf32> to vector<6x8xf32>
    %cst_397 = arith.constant dense<0.000000e+00> : vector<8x8xf32>
    %950 = tpu.matmul %948, %949, %cst_397 {dimension_numbers = #tpu.dot_dimension_numbers<[1], [0], [0], [1], [0, 0, 1, 1], [], []>} : vector<8x6xf32>, vector<6x8xf32>, vector<8x8xf32> -> vector<8x8xf32>
    %951 = vector.extract_strided_slice %933 {offsets = [0, 0], sizes = [8, 32], strides = [1, 1]} : vector<32x32xf32> to vector<8x32xf32>
    %cst_398 = arith.constant dense<0.000000e+00> : vector<8x32xf32>
    %952 = tpu.matmul %950, %951, %cst_398 {dimension_numbers = #tpu.dot_dimension_numbers<[1], [0], [0], [1], [0, 0, 1, 1], [], []>} : vector<8x8xf32>, vector<8x32xf32>, vector<8x32xf32> -> vector<8x32xf32>
    %953 = vector.extract_strided_slice %924 {offsets = [0, 8], sizes = [8, 8], strides = [1, 1]} : vector<8x32xf32> to vector<8x8xf32>
    %954 = vector.extract_strided_slice %930 {offsets = [0, 8], sizes = [6, 8], strides = [1, 1]} : vector<6x32xf32> to vector<6x8xf32>
    %cst_399 = arith.constant dense<0.000000e+00> : vector<8x6xf32>
    %955 = tpu.matmul %953, %954, %cst_399 {dimension_numbers = #tpu.dot_dimension_numbers<[1], [1], [0], [0], [0, 0, 1, 0], [], []>} : vector<8x8xf32>, vector<6x8xf32>, vector<8x6xf32> -> vector<8x6xf32>
    %956 = vector.broadcast %5 : vector<1x6xf32> to vector<8x6xf32>
    %957 = arith.addf %955, %956 : vector<8x6xf32>
    %cst_400 = arith.constant dense<0xFF800000> : vector<8xf32>
    %958 = vector.multi_reduction <maximumf>, %957, %cst_400 [1] : vector<8x6xf32> to vector<8xf32>
    %959 = vector.shape_cast %958 : vector<8xf32> to vector<8x1xf32>
    %960 = vector.broadcast %959 : vector<8x1xf32> to vector<8x6xf32>
    %961 = arith.subf %957, %960 : vector<8x6xf32>
    %962 = math.exp %961 : vector<8x6xf32>
    %cst_401 = arith.constant dense<0.000000e+00> : vector<8xf32>
    %963 = vector.multi_reduction <add>, %962, %cst_401 [1] : vector<8x6xf32> to vector<8xf32>
    %964 = vector.shape_cast %963 : vector<8xf32> to vector<8x1xf32>
    %965 = tpu.reciprocal %964 {approx = true} : vector<8x1xf32> -> vector<8x1xf32>
    %966 = vector.broadcast %965 : vector<8x1xf32> to vector<8x6xf32>
    %967 = arith.mulf %962, %966 : vector<8x6xf32>
    %968 = vector.extract_strided_slice %931 {offsets = [0, 8], sizes = [6, 8], strides = [1, 1]} : vector<6x32xf32> to vector<6x8xf32>
    %cst_402 = arith.constant dense<0.000000e+00> : vector<8x8xf32>
    %969 = tpu.matmul %967, %968, %cst_402 {dimension_numbers = #tpu.dot_dimension_numbers<[1], [0], [0], [1], [0, 0, 1, 1], [], []>} : vector<8x6xf32>, vector<6x8xf32>, vector<8x8xf32> -> vector<8x8xf32>
    %970 = vector.extract_strided_slice %933 {offsets = [8, 0], sizes = [8, 32], strides = [1, 1]} : vector<32x32xf32> to vector<8x32xf32>
    %cst_403 = arith.constant dense<0.000000e+00> : vector<8x32xf32>
    %971 = tpu.matmul %969, %970, %cst_403 {dimension_numbers = #tpu.dot_dimension_numbers<[1], [0], [0], [1], [0, 0, 1, 1], [], []>} : vector<8x8xf32>, vector<8x32xf32>, vector<8x32xf32> -> vector<8x32xf32>
    %972 = arith.addf %952, %971 : vector<8x32xf32>
    %973 = vector.extract_strided_slice %924 {offsets = [0, 16], sizes = [8, 8], strides = [1, 1]} : vector<8x32xf32> to vector<8x8xf32>
    %974 = vector.extract_strided_slice %930 {offsets = [0, 16], sizes = [6, 8], strides = [1, 1]} : vector<6x32xf32> to vector<6x8xf32>
    %cst_404 = arith.constant dense<0.000000e+00> : vector<8x6xf32>
    %975 = tpu.matmul %973, %974, %cst_404 {dimension_numbers = #tpu.dot_dimension_numbers<[1], [1], [0], [0], [0, 0, 1, 0], [], []>} : vector<8x8xf32>, vector<6x8xf32>, vector<8x6xf32> -> vector<8x6xf32>
    %976 = vector.broadcast %5 : vector<1x6xf32> to vector<8x6xf32>
    %977 = arith.addf %975, %976 : vector<8x6xf32>
    %cst_405 = arith.constant dense<0xFF800000> : vector<8xf32>
    %978 = vector.multi_reduction <maximumf>, %977, %cst_405 [1] : vector<8x6xf32> to vector<8xf32>
    %979 = vector.shape_cast %978 : vector<8xf32> to vector<8x1xf32>
    %980 = vector.broadcast %979 : vector<8x1xf32> to vector<8x6xf32>
    %981 = arith.subf %977, %980 : vector<8x6xf32>
    %982 = math.exp %981 : vector<8x6xf32>
    %cst_406 = arith.constant dense<0.000000e+00> : vector<8xf32>
    %983 = vector.multi_reduction <add>, %982, %cst_406 [1] : vector<8x6xf32> to vector<8xf32>
    %984 = vector.shape_cast %983 : vector<8xf32> to vector<8x1xf32>
    %985 = tpu.reciprocal %984 {approx = true} : vector<8x1xf32> -> vector<8x1xf32>
    %986 = vector.broadcast %985 : vector<8x1xf32> to vector<8x6xf32>
    %987 = arith.mulf %982, %986 : vector<8x6xf32>
    %988 = vector.extract_strided_slice %931 {offsets = [0, 16], sizes = [6, 8], strides = [1, 1]} : vector<6x32xf32> to vector<6x8xf32>
    %cst_407 = arith.constant dense<0.000000e+00> : vector<8x8xf32>
    %989 = tpu.matmul %987, %988, %cst_407 {dimension_numbers = #tpu.dot_dimension_numbers<[1], [0], [0], [1], [0, 0, 1, 1], [], []>} : vector<8x6xf32>, vector<6x8xf32>, vector<8x8xf32> -> vector<8x8xf32>
    %990 = vector.extract_strided_slice %933 {offsets = [16, 0], sizes = [8, 32], strides = [1, 1]} : vector<32x32xf32> to vector<8x32xf32>
    %cst_408 = arith.constant dense<0.000000e+00> : vector<8x32xf32>
    %991 = tpu.matmul %989, %990, %cst_408 {dimension_numbers = #tpu.dot_dimension_numbers<[1], [0], [0], [1], [0, 0, 1, 1], [], []>} : vector<8x8xf32>, vector<8x32xf32>, vector<8x32xf32> -> vector<8x32xf32>
    %992 = arith.addf %972, %991 : vector<8x32xf32>
    %993 = vector.extract_strided_slice %924 {offsets = [0, 24], sizes = [8, 8], strides = [1, 1]} : vector<8x32xf32> to vector<8x8xf32>
    %994 = vector.extract_strided_slice %930 {offsets = [0, 24], sizes = [6, 8], strides = [1, 1]} : vector<6x32xf32> to vector<6x8xf32>
    %cst_409 = arith.constant dense<0.000000e+00> : vector<8x6xf32>
    %995 = tpu.matmul %993, %994, %cst_409 {dimension_numbers = #tpu.dot_dimension_numbers<[1], [1], [0], [0], [0, 0, 1, 0], [], []>} : vector<8x8xf32>, vector<6x8xf32>, vector<8x6xf32> -> vector<8x6xf32>
    %996 = vector.broadcast %5 : vector<1x6xf32> to vector<8x6xf32>
    %997 = arith.addf %995, %996 : vector<8x6xf32>
    %cst_410 = arith.constant dense<0xFF800000> : vector<8xf32>
    %998 = vector.multi_reduction <maximumf>, %997, %cst_410 [1] : vector<8x6xf32> to vector<8xf32>
    %999 = vector.shape_cast %998 : vector<8xf32> to vector<8x1xf32>
    %1000 = vector.broadcast %999 : vector<8x1xf32> to vector<8x6xf32>
    %1001 = arith.subf %997, %1000 : vector<8x6xf32>
    %1002 = math.exp %1001 : vector<8x6xf32>
    %cst_411 = arith.constant dense<0.000000e+00> : vector<8xf32>
    %1003 = vector.multi_reduction <add>, %1002, %cst_411 [1] : vector<8x6xf32> to vector<8xf32>
    %1004 = vector.shape_cast %1003 : vector<8xf32> to vector<8x1xf32>
    %1005 = tpu.reciprocal %1004 {approx = true} : vector<8x1xf32> -> vector<8x1xf32>
    %1006 = vector.broadcast %1005 : vector<8x1xf32> to vector<8x6xf32>
    %1007 = arith.mulf %1002, %1006 : vector<8x6xf32>
    %1008 = vector.extract_strided_slice %931 {offsets = [0, 24], sizes = [6, 8], strides = [1, 1]} : vector<6x32xf32> to vector<6x8xf32>
    %cst_412 = arith.constant dense<0.000000e+00> : vector<8x8xf32>
    %1009 = tpu.matmul %1007, %1008, %cst_412 {dimension_numbers = #tpu.dot_dimension_numbers<[1], [0], [0], [1], [0, 0, 1, 1], [], []>} : vector<8x6xf32>, vector<6x8xf32>, vector<8x8xf32> -> vector<8x8xf32>
    %1010 = vector.extract_strided_slice %933 {offsets = [24, 0], sizes = [8, 32], strides = [1, 1]} : vector<32x32xf32> to vector<8x32xf32>
    %cst_413 = arith.constant dense<0.000000e+00> : vector<8x32xf32>
    %1011 = tpu.matmul %1009, %1010, %cst_413 {dimension_numbers = #tpu.dot_dimension_numbers<[1], [0], [0], [1], [0, 0, 1, 1], [], []>} : vector<8x8xf32>, vector<8x32xf32>, vector<8x32xf32> -> vector<8x32xf32>
    %1012 = arith.addf %992, %1011 : vector<8x32xf32>
    %c5_414 = arith.constant 5 : index
    %c0_415 = arith.constant 0 : index
    %c0_416 = arith.constant 0 : index
    %1013 = vector.load %arg13[%c5_414, %c0_415, %c0_416] : memref<7x1x32xf32, #tpu.memory_space<vmem>>, vector<1x1x32xf32>
    %1014 = vector.shape_cast %1013 : vector<1x1x32xf32> to vector<1x32xf32>
    %1015 = vector.broadcast %1014 : vector<1x32xf32> to vector<8x32xf32>
    %1016 = arith.addf %1012, %1015 : vector<8x32xf32>
    %1017 = arith.addf %1016, %181 : vector<8x32xf32>
    %c5_417 = arith.constant 5 : index
    %c0_418 = arith.constant 0 : index
    %c0_419 = arith.constant 0 : index
    %1018 = vector.load %arg14[%c5_417, %c0_418, %c0_419] : memref<7x1x32xf32, #tpu.memory_space<vmem>>, vector<1x1x32xf32>
    %1019 = vector.shape_cast %1018 : vector<1x1x32xf32> to vector<1x32xf32>
    %c5_420 = arith.constant 5 : index
    %c0_421 = arith.constant 0 : index
    %c0_422 = arith.constant 0 : index
    %1020 = vector.load %arg15[%c5_420, %c0_421, %c0_422] : memref<7x1x32xf32, #tpu.memory_space<vmem>>, vector<1x1x32xf32>
    %1021 = vector.shape_cast %1020 : vector<1x1x32xf32> to vector<1x32xf32>
    %cst_423 = arith.constant dense<0.000000e+00> : vector<8xf32>
    %1022 = vector.multi_reduction <add>, %1017, %cst_423 [1] : vector<8x32xf32> to vector<8xf32>
    %1023 = vector.shape_cast %1022 : vector<8xf32> to vector<8x1xf32>
    %cst_424 = arith.constant 3.200000e+01 : f32
    %1024 = vector.broadcast %cst_424 : f32 to vector<8x1xf32>
    %1025 = arith.divf %1023, %1024 : vector<8x1xf32>
    %1026 = vector.broadcast %1025 : vector<8x1xf32> to vector<8x32xf32>
    %1027 = arith.subf %1017, %1026 : vector<8x32xf32>
    %1028 = arith.mulf %1027, %1027 : vector<8x32xf32>
    %cst_425 = arith.constant dense<0.000000e+00> : vector<8xf32>
    %1029 = vector.multi_reduction <add>, %1028, %cst_425 [1] : vector<8x32xf32> to vector<8xf32>
    %1030 = vector.shape_cast %1029 : vector<8xf32> to vector<8x1xf32>
    %cst_426 = arith.constant 3.200000e+01 : f32
    %1031 = vector.broadcast %cst_426 : f32 to vector<8x1xf32>
    %1032 = arith.divf %1030, %1031 : vector<8x1xf32>
    %cst_427 = arith.constant 9.99999997E-7 : f32
    %1033 = vector.broadcast %cst_427 : f32 to vector<8x1xf32>
    %1034 = arith.addf %1032, %1033 : vector<8x1xf32>
    %1035 = math.rsqrt %1034 : vector<8x1xf32>
    %1036 = vector.broadcast %1035 : vector<8x1xf32> to vector<8x32xf32>
    %1037 = arith.mulf %1027, %1036 : vector<8x32xf32>
    %1038 = vector.broadcast %1019 : vector<1x32xf32> to vector<8x32xf32>
    %1039 = arith.mulf %1037, %1038 : vector<8x32xf32>
    %1040 = vector.broadcast %1021 : vector<1x32xf32> to vector<8x32xf32>
    %1041 = arith.addf %1039, %1040 : vector<8x32xf32>
    %c5_428 = arith.constant 5 : index
    %c0_429 = arith.constant 0 : index
    %c0_430 = arith.constant 0 : index
    %1042 = vector.load %arg16[%c5_428, %c0_429, %c0_430] : memref<7x32x64xf32, #tpu.memory_space<vmem>>, vector<1x32x64xf32>
    %1043 = vector.shape_cast %1042 : vector<1x32x64xf32> to vector<32x64xf32>
    %cst_431 = arith.constant dense<0.000000e+00> : vector<8x64xf32>
    %1044 = tpu.matmul %1041, %1043, %cst_431 {dimension_numbers = #tpu.dot_dimension_numbers<[1], [0], [0], [1], [0, 0, 1, 1], [], []>} : vector<8x32xf32>, vector<32x64xf32>, vector<8x64xf32> -> vector<8x64xf32>
    %c5_432 = arith.constant 5 : index
    %c0_433 = arith.constant 0 : index
    %c0_434 = arith.constant 0 : index
    %1045 = vector.load %arg17[%c5_432, %c0_433, %c0_434] : memref<7x1x64xf32, #tpu.memory_space<vmem>>, vector<1x1x64xf32>
    %1046 = vector.shape_cast %1045 : vector<1x1x64xf32> to vector<1x64xf32>
    %1047 = vector.broadcast %1046 : vector<1x64xf32> to vector<8x64xf32>
    %1048 = arith.addf %1044, %1047 : vector<8x64xf32>
    %cst_435 = arith.constant 5.000000e-01 : f32
    %1049 = vector.broadcast %cst_435 : f32 to vector<8x64xf32>
    %1050 = arith.mulf %1049, %1048 : vector<8x64xf32>
    %cst_436 = arith.constant 4.471500e-02 : f32
    %1051 = vector.broadcast %cst_436 : f32 to vector<8x64xf32>
    %1052 = arith.mulf %1051, %1048 : vector<8x64xf32>
    %1053 = arith.mulf %1052, %1048 : vector<8x64xf32>
    %1054 = arith.mulf %1053, %1048 : vector<8x64xf32>
    %1055 = arith.addf %1048, %1054 : vector<8x64xf32>
    %cst_437 = arith.constant 0.797884583 : f32
    %1056 = vector.broadcast %cst_437 : f32 to vector<8x64xf32>
    %1057 = arith.mulf %1056, %1055 : vector<8x64xf32>
    %1058 = math.tanh %1057 : vector<8x64xf32>
    %cst_438 = arith.constant 1.000000e+00 : f32
    %1059 = vector.broadcast %cst_438 : f32 to vector<8x64xf32>
    %1060 = arith.addf %1059, %1058 : vector<8x64xf32>
    %1061 = arith.mulf %1050, %1060 : vector<8x64xf32>
    %c5_439 = arith.constant 5 : index
    %c0_440 = arith.constant 0 : index
    %c0_441 = arith.constant 0 : index
    %1062 = vector.load %arg18[%c5_439, %c0_440, %c0_441] : memref<7x64x32xf32, #tpu.memory_space<vmem>>, vector<1x64x32xf32>
    %1063 = vector.shape_cast %1062 : vector<1x64x32xf32> to vector<64x32xf32>
    %cst_442 = arith.constant dense<0.000000e+00> : vector<8x32xf32>
    %1064 = tpu.matmul %1061, %1063, %cst_442 {dimension_numbers = #tpu.dot_dimension_numbers<[1], [0], [0], [1], [0, 0, 1, 1], [], []>} : vector<8x64xf32>, vector<64x32xf32>, vector<8x32xf32> -> vector<8x32xf32>
    %c5_443 = arith.constant 5 : index
    %c0_444 = arith.constant 0 : index
    %c0_445 = arith.constant 0 : index
    %1065 = vector.load %arg19[%c5_443, %c0_444, %c0_445] : memref<7x1x32xf32, #tpu.memory_space<vmem>>, vector<1x1x32xf32>
    %1066 = vector.shape_cast %1065 : vector<1x1x32xf32> to vector<1x32xf32>
    %1067 = vector.broadcast %1066 : vector<1x32xf32> to vector<8x32xf32>
    %1068 = arith.addf %1064, %1067 : vector<8x32xf32>
    %1069 = arith.addf %1068, %1017 : vector<8x32xf32>
    %c6 = arith.constant 6 : index
    %c0_446 = arith.constant 0 : index
    %c0_447 = arith.constant 0 : index
    %1070 = vector.load %arg8[%c6, %c0_446, %c0_447] : memref<7x1x32xf32, #tpu.memory_space<vmem>>, vector<1x1x32xf32>
    %1071 = vector.shape_cast %1070 : vector<1x1x32xf32> to vector<1x32xf32>
    %c6_448 = arith.constant 6 : index
    %c0_449 = arith.constant 0 : index
    %c0_450 = arith.constant 0 : index
    %1072 = vector.load %arg9[%c6_448, %c0_449, %c0_450] : memref<7x1x32xf32, #tpu.memory_space<vmem>>, vector<1x1x32xf32>
    %1073 = vector.shape_cast %1072 : vector<1x1x32xf32> to vector<1x32xf32>
    %cst_451 = arith.constant dense<0.000000e+00> : vector<6xf32>
    %1074 = vector.multi_reduction <add>, %915, %cst_451 [1] : vector<6x32xf32> to vector<6xf32>
    %1075 = vector.shape_cast %1074 : vector<6xf32> to vector<6x1xf32>
    %cst_452 = arith.constant 3.200000e+01 : f32
    %1076 = vector.broadcast %cst_452 : f32 to vector<6x1xf32>
    %1077 = arith.divf %1075, %1076 : vector<6x1xf32>
    %1078 = vector.broadcast %1077 : vector<6x1xf32> to vector<6x32xf32>
    %1079 = arith.subf %915, %1078 : vector<6x32xf32>
    %1080 = arith.mulf %1079, %1079 : vector<6x32xf32>
    %cst_453 = arith.constant dense<0.000000e+00> : vector<6xf32>
    %1081 = vector.multi_reduction <add>, %1080, %cst_453 [1] : vector<6x32xf32> to vector<6xf32>
    %1082 = vector.shape_cast %1081 : vector<6xf32> to vector<6x1xf32>
    %cst_454 = arith.constant 3.200000e+01 : f32
    %1083 = vector.broadcast %cst_454 : f32 to vector<6x1xf32>
    %1084 = arith.divf %1082, %1083 : vector<6x1xf32>
    %cst_455 = arith.constant 9.99999997E-7 : f32
    %1085 = vector.broadcast %cst_455 : f32 to vector<6x1xf32>
    %1086 = arith.addf %1084, %1085 : vector<6x1xf32>
    %1087 = math.rsqrt %1086 : vector<6x1xf32>
    %1088 = vector.broadcast %1087 : vector<6x1xf32> to vector<6x32xf32>
    %1089 = arith.mulf %1079, %1088 : vector<6x32xf32>
    %1090 = vector.broadcast %1071 : vector<1x32xf32> to vector<6x32xf32>
    %1091 = arith.mulf %1089, %1090 : vector<6x32xf32>
    %1092 = vector.broadcast %1073 : vector<1x32xf32> to vector<6x32xf32>
    %1093 = arith.addf %1091, %1092 : vector<6x32xf32>
    %c6_456 = arith.constant 6 : index
    %c0_457 = arith.constant 0 : index
    %c0_458 = arith.constant 0 : index
    %1094 = vector.load %arg8[%c6_456, %c0_457, %c0_458] : memref<7x1x32xf32, #tpu.memory_space<vmem>>, vector<1x1x32xf32>
    %1095 = vector.shape_cast %1094 : vector<1x1x32xf32> to vector<1x32xf32>
    %c6_459 = arith.constant 6 : index
    %c0_460 = arith.constant 0 : index
    %c0_461 = arith.constant 0 : index
    %1096 = vector.load %arg9[%c6_459, %c0_460, %c0_461] : memref<7x1x32xf32, #tpu.memory_space<vmem>>, vector<1x1x32xf32>
    %1097 = vector.shape_cast %1096 : vector<1x1x32xf32> to vector<1x32xf32>
    %cst_462 = arith.constant dense<0.000000e+00> : vector<8xf32>
    %1098 = vector.multi_reduction <add>, %1069, %cst_462 [1] : vector<8x32xf32> to vector<8xf32>
    %1099 = vector.shape_cast %1098 : vector<8xf32> to vector<8x1xf32>
    %cst_463 = arith.constant 3.200000e+01 : f32
    %1100 = vector.broadcast %cst_463 : f32 to vector<8x1xf32>
    %1101 = arith.divf %1099, %1100 : vector<8x1xf32>
    %1102 = vector.broadcast %1101 : vector<8x1xf32> to vector<8x32xf32>
    %1103 = arith.subf %1069, %1102 : vector<8x32xf32>
    %1104 = arith.mulf %1103, %1103 : vector<8x32xf32>
    %cst_464 = arith.constant dense<0.000000e+00> : vector<8xf32>
    %1105 = vector.multi_reduction <add>, %1104, %cst_464 [1] : vector<8x32xf32> to vector<8xf32>
    %1106 = vector.shape_cast %1105 : vector<8xf32> to vector<8x1xf32>
    %cst_465 = arith.constant 3.200000e+01 : f32
    %1107 = vector.broadcast %cst_465 : f32 to vector<8x1xf32>
    %1108 = arith.divf %1106, %1107 : vector<8x1xf32>
    %cst_466 = arith.constant 9.99999997E-7 : f32
    %1109 = vector.broadcast %cst_466 : f32 to vector<8x1xf32>
    %1110 = arith.addf %1108, %1109 : vector<8x1xf32>
    %1111 = math.rsqrt %1110 : vector<8x1xf32>
    %1112 = vector.broadcast %1111 : vector<8x1xf32> to vector<8x32xf32>
    %1113 = arith.mulf %1103, %1112 : vector<8x32xf32>
    %1114 = vector.broadcast %1095 : vector<1x32xf32> to vector<8x32xf32>
    %1115 = arith.mulf %1113, %1114 : vector<8x32xf32>
    %1116 = vector.broadcast %1097 : vector<1x32xf32> to vector<8x32xf32>
    %1117 = arith.addf %1115, %1116 : vector<8x32xf32>
    %c6_467 = arith.constant 6 : index
    %c0_468 = arith.constant 0 : index
    %c0_469 = arith.constant 0 : index
    %1118 = vector.load %arg10[%c6_467, %c0_468, %c0_469] : memref<7x32x96xf32, #tpu.memory_space<vmem>>, vector<1x32x96xf32>
    %1119 = vector.shape_cast %1118 : vector<1x32x96xf32> to vector<32x96xf32>
    %c6_470 = arith.constant 6 : index
    %c0_471 = arith.constant 0 : index
    %c0_472 = arith.constant 0 : index
    %1120 = vector.load %arg11[%c6_470, %c0_471, %c0_472] : memref<7x1x96xf32, #tpu.memory_space<vmem>>, vector<1x1x96xf32>
    %1121 = vector.shape_cast %1120 : vector<1x1x96xf32> to vector<1x96xf32>
    %1122 = vector.extract_strided_slice %1119 {offsets = [0, 0], sizes = [32, 32], strides = [1, 1]} : vector<32x96xf32> to vector<32x32xf32>
    %cst_473 = arith.constant dense<0.000000e+00> : vector<8x32xf32>
    %1123 = tpu.matmul %1117, %1122, %cst_473 {dimension_numbers = #tpu.dot_dimension_numbers<[1], [0], [0], [1], [0, 0, 1, 1], [], []>} : vector<8x32xf32>, vector<32x32xf32>, vector<8x32xf32> -> vector<8x32xf32>
    %1124 = vector.extract_strided_slice %1121 {offsets = [0, 0], sizes = [1, 32], strides = [1, 1]} : vector<1x96xf32> to vector<1x32xf32>
    %1125 = vector.broadcast %1124 : vector<1x32xf32> to vector<8x32xf32>
    %1126 = arith.addf %1123, %1125 : vector<8x32xf32>
    %1127 = vector.extract_strided_slice %1119 {offsets = [0, 32], sizes = [32, 64], strides = [1, 1]} : vector<32x96xf32> to vector<32x64xf32>
    %cst_474 = arith.constant dense<0.000000e+00> : vector<6x64xf32>
    %1128 = tpu.matmul %1093, %1127, %cst_474 {dimension_numbers = #tpu.dot_dimension_numbers<[1], [0], [0], [1], [0, 0, 1, 1], [], []>} : vector<6x32xf32>, vector<32x64xf32>, vector<6x64xf32> -> vector<6x64xf32>
    %1129 = vector.extract_strided_slice %1121 {offsets = [0, 32], sizes = [1, 64], strides = [1, 1]} : vector<1x96xf32> to vector<1x64xf32>
    %1130 = vector.broadcast %1129 : vector<1x64xf32> to vector<6x64xf32>
    %1131 = arith.addf %1128, %1130 : vector<6x64xf32>
    %1132 = vector.extract_strided_slice %1131 {offsets = [0, 0], sizes = [6, 32], strides = [1, 1]} : vector<6x64xf32> to vector<6x32xf32>
    %1133 = vector.extract_strided_slice %1131 {offsets = [0, 32], sizes = [6, 32], strides = [1, 1]} : vector<6x64xf32> to vector<6x32xf32>
    %c6_475 = arith.constant 6 : index
    %c0_476 = arith.constant 0 : index
    %c0_477 = arith.constant 0 : index
    %1134 = vector.load %arg12[%c6_475, %c0_476, %c0_477] : memref<7x32x32xf32, #tpu.memory_space<vmem>>, vector<1x32x32xf32>
    %1135 = vector.shape_cast %1134 : vector<1x32x32xf32> to vector<32x32xf32>
    %1136 = vector.extract_strided_slice %1126 {offsets = [0, 0], sizes = [8, 8], strides = [1, 1]} : vector<8x32xf32> to vector<8x8xf32>
    %1137 = vector.extract_strided_slice %1132 {offsets = [0, 0], sizes = [6, 8], strides = [1, 1]} : vector<6x32xf32> to vector<6x8xf32>
    %cst_478 = arith.constant dense<0.000000e+00> : vector<8x6xf32>
    %1138 = tpu.matmul %1136, %1137, %cst_478 {dimension_numbers = #tpu.dot_dimension_numbers<[1], [1], [0], [0], [0, 0, 1, 0], [], []>} : vector<8x8xf32>, vector<6x8xf32>, vector<8x6xf32> -> vector<8x6xf32>
    %1139 = vector.broadcast %5 : vector<1x6xf32> to vector<8x6xf32>
    %1140 = arith.addf %1138, %1139 : vector<8x6xf32>
    %cst_479 = arith.constant dense<0xFF800000> : vector<8xf32>
    %1141 = vector.multi_reduction <maximumf>, %1140, %cst_479 [1] : vector<8x6xf32> to vector<8xf32>
    %1142 = vector.shape_cast %1141 : vector<8xf32> to vector<8x1xf32>
    %1143 = vector.broadcast %1142 : vector<8x1xf32> to vector<8x6xf32>
    %1144 = arith.subf %1140, %1143 : vector<8x6xf32>
    %1145 = math.exp %1144 : vector<8x6xf32>
    %cst_480 = arith.constant dense<0.000000e+00> : vector<8xf32>
    %1146 = vector.multi_reduction <add>, %1145, %cst_480 [1] : vector<8x6xf32> to vector<8xf32>
    %1147 = vector.shape_cast %1146 : vector<8xf32> to vector<8x1xf32>
    %1148 = tpu.reciprocal %1147 {approx = true} : vector<8x1xf32> -> vector<8x1xf32>
    %1149 = vector.broadcast %1148 : vector<8x1xf32> to vector<8x6xf32>
    %1150 = arith.mulf %1145, %1149 : vector<8x6xf32>
    %1151 = vector.extract_strided_slice %1133 {offsets = [0, 0], sizes = [6, 8], strides = [1, 1]} : vector<6x32xf32> to vector<6x8xf32>
    %cst_481 = arith.constant dense<0.000000e+00> : vector<8x8xf32>
    %1152 = tpu.matmul %1150, %1151, %cst_481 {dimension_numbers = #tpu.dot_dimension_numbers<[1], [0], [0], [1], [0, 0, 1, 1], [], []>} : vector<8x6xf32>, vector<6x8xf32>, vector<8x8xf32> -> vector<8x8xf32>
    %1153 = vector.extract_strided_slice %1135 {offsets = [0, 0], sizes = [8, 32], strides = [1, 1]} : vector<32x32xf32> to vector<8x32xf32>
    %cst_482 = arith.constant dense<0.000000e+00> : vector<8x32xf32>
    %1154 = tpu.matmul %1152, %1153, %cst_482 {dimension_numbers = #tpu.dot_dimension_numbers<[1], [0], [0], [1], [0, 0, 1, 1], [], []>} : vector<8x8xf32>, vector<8x32xf32>, vector<8x32xf32> -> vector<8x32xf32>
    %1155 = vector.extract_strided_slice %1126 {offsets = [0, 8], sizes = [8, 8], strides = [1, 1]} : vector<8x32xf32> to vector<8x8xf32>
    %1156 = vector.extract_strided_slice %1132 {offsets = [0, 8], sizes = [6, 8], strides = [1, 1]} : vector<6x32xf32> to vector<6x8xf32>
    %cst_483 = arith.constant dense<0.000000e+00> : vector<8x6xf32>
    %1157 = tpu.matmul %1155, %1156, %cst_483 {dimension_numbers = #tpu.dot_dimension_numbers<[1], [1], [0], [0], [0, 0, 1, 0], [], []>} : vector<8x8xf32>, vector<6x8xf32>, vector<8x6xf32> -> vector<8x6xf32>
    %1158 = vector.broadcast %5 : vector<1x6xf32> to vector<8x6xf32>
    %1159 = arith.addf %1157, %1158 : vector<8x6xf32>
    %cst_484 = arith.constant dense<0xFF800000> : vector<8xf32>
    %1160 = vector.multi_reduction <maximumf>, %1159, %cst_484 [1] : vector<8x6xf32> to vector<8xf32>
    %1161 = vector.shape_cast %1160 : vector<8xf32> to vector<8x1xf32>
    %1162 = vector.broadcast %1161 : vector<8x1xf32> to vector<8x6xf32>
    %1163 = arith.subf %1159, %1162 : vector<8x6xf32>
    %1164 = math.exp %1163 : vector<8x6xf32>
    %cst_485 = arith.constant dense<0.000000e+00> : vector<8xf32>
    %1165 = vector.multi_reduction <add>, %1164, %cst_485 [1] : vector<8x6xf32> to vector<8xf32>
    %1166 = vector.shape_cast %1165 : vector<8xf32> to vector<8x1xf32>
    %1167 = tpu.reciprocal %1166 {approx = true} : vector<8x1xf32> -> vector<8x1xf32>
    %1168 = vector.broadcast %1167 : vector<8x1xf32> to vector<8x6xf32>
    %1169 = arith.mulf %1164, %1168 : vector<8x6xf32>
    %1170 = vector.extract_strided_slice %1133 {offsets = [0, 8], sizes = [6, 8], strides = [1, 1]} : vector<6x32xf32> to vector<6x8xf32>
    %cst_486 = arith.constant dense<0.000000e+00> : vector<8x8xf32>
    %1171 = tpu.matmul %1169, %1170, %cst_486 {dimension_numbers = #tpu.dot_dimension_numbers<[1], [0], [0], [1], [0, 0, 1, 1], [], []>} : vector<8x6xf32>, vector<6x8xf32>, vector<8x8xf32> -> vector<8x8xf32>
    %1172 = vector.extract_strided_slice %1135 {offsets = [8, 0], sizes = [8, 32], strides = [1, 1]} : vector<32x32xf32> to vector<8x32xf32>
    %cst_487 = arith.constant dense<0.000000e+00> : vector<8x32xf32>
    %1173 = tpu.matmul %1171, %1172, %cst_487 {dimension_numbers = #tpu.dot_dimension_numbers<[1], [0], [0], [1], [0, 0, 1, 1], [], []>} : vector<8x8xf32>, vector<8x32xf32>, vector<8x32xf32> -> vector<8x32xf32>
    %1174 = arith.addf %1154, %1173 : vector<8x32xf32>
    %1175 = vector.extract_strided_slice %1126 {offsets = [0, 16], sizes = [8, 8], strides = [1, 1]} : vector<8x32xf32> to vector<8x8xf32>
    %1176 = vector.extract_strided_slice %1132 {offsets = [0, 16], sizes = [6, 8], strides = [1, 1]} : vector<6x32xf32> to vector<6x8xf32>
    %cst_488 = arith.constant dense<0.000000e+00> : vector<8x6xf32>
    %1177 = tpu.matmul %1175, %1176, %cst_488 {dimension_numbers = #tpu.dot_dimension_numbers<[1], [1], [0], [0], [0, 0, 1, 0], [], []>} : vector<8x8xf32>, vector<6x8xf32>, vector<8x6xf32> -> vector<8x6xf32>
    %1178 = vector.broadcast %5 : vector<1x6xf32> to vector<8x6xf32>
    %1179 = arith.addf %1177, %1178 : vector<8x6xf32>
    %cst_489 = arith.constant dense<0xFF800000> : vector<8xf32>
    %1180 = vector.multi_reduction <maximumf>, %1179, %cst_489 [1] : vector<8x6xf32> to vector<8xf32>
    %1181 = vector.shape_cast %1180 : vector<8xf32> to vector<8x1xf32>
    %1182 = vector.broadcast %1181 : vector<8x1xf32> to vector<8x6xf32>
    %1183 = arith.subf %1179, %1182 : vector<8x6xf32>
    %1184 = math.exp %1183 : vector<8x6xf32>
    %cst_490 = arith.constant dense<0.000000e+00> : vector<8xf32>
    %1185 = vector.multi_reduction <add>, %1184, %cst_490 [1] : vector<8x6xf32> to vector<8xf32>
    %1186 = vector.shape_cast %1185 : vector<8xf32> to vector<8x1xf32>
    %1187 = tpu.reciprocal %1186 {approx = true} : vector<8x1xf32> -> vector<8x1xf32>
    %1188 = vector.broadcast %1187 : vector<8x1xf32> to vector<8x6xf32>
    %1189 = arith.mulf %1184, %1188 : vector<8x6xf32>
    %1190 = vector.extract_strided_slice %1133 {offsets = [0, 16], sizes = [6, 8], strides = [1, 1]} : vector<6x32xf32> to vector<6x8xf32>
    %cst_491 = arith.constant dense<0.000000e+00> : vector<8x8xf32>
    %1191 = tpu.matmul %1189, %1190, %cst_491 {dimension_numbers = #tpu.dot_dimension_numbers<[1], [0], [0], [1], [0, 0, 1, 1], [], []>} : vector<8x6xf32>, vector<6x8xf32>, vector<8x8xf32> -> vector<8x8xf32>
    %1192 = vector.extract_strided_slice %1135 {offsets = [16, 0], sizes = [8, 32], strides = [1, 1]} : vector<32x32xf32> to vector<8x32xf32>
    %cst_492 = arith.constant dense<0.000000e+00> : vector<8x32xf32>
    %1193 = tpu.matmul %1191, %1192, %cst_492 {dimension_numbers = #tpu.dot_dimension_numbers<[1], [0], [0], [1], [0, 0, 1, 1], [], []>} : vector<8x8xf32>, vector<8x32xf32>, vector<8x32xf32> -> vector<8x32xf32>
    %1194 = arith.addf %1174, %1193 : vector<8x32xf32>
    %1195 = vector.extract_strided_slice %1126 {offsets = [0, 24], sizes = [8, 8], strides = [1, 1]} : vector<8x32xf32> to vector<8x8xf32>
    %1196 = vector.extract_strided_slice %1132 {offsets = [0, 24], sizes = [6, 8], strides = [1, 1]} : vector<6x32xf32> to vector<6x8xf32>
    %cst_493 = arith.constant dense<0.000000e+00> : vector<8x6xf32>
    %1197 = tpu.matmul %1195, %1196, %cst_493 {dimension_numbers = #tpu.dot_dimension_numbers<[1], [1], [0], [0], [0, 0, 1, 0], [], []>} : vector<8x8xf32>, vector<6x8xf32>, vector<8x6xf32> -> vector<8x6xf32>
    %1198 = vector.broadcast %5 : vector<1x6xf32> to vector<8x6xf32>
    %1199 = arith.addf %1197, %1198 : vector<8x6xf32>
    %cst_494 = arith.constant dense<0xFF800000> : vector<8xf32>
    %1200 = vector.multi_reduction <maximumf>, %1199, %cst_494 [1] : vector<8x6xf32> to vector<8xf32>
    %1201 = vector.shape_cast %1200 : vector<8xf32> to vector<8x1xf32>
    %1202 = vector.broadcast %1201 : vector<8x1xf32> to vector<8x6xf32>
    %1203 = arith.subf %1199, %1202 : vector<8x6xf32>
    %1204 = math.exp %1203 : vector<8x6xf32>
    %cst_495 = arith.constant dense<0.000000e+00> : vector<8xf32>
    %1205 = vector.multi_reduction <add>, %1204, %cst_495 [1] : vector<8x6xf32> to vector<8xf32>
    %1206 = vector.shape_cast %1205 : vector<8xf32> to vector<8x1xf32>
    %1207 = tpu.reciprocal %1206 {approx = true} : vector<8x1xf32> -> vector<8x1xf32>
    %1208 = vector.broadcast %1207 : vector<8x1xf32> to vector<8x6xf32>
    %1209 = arith.mulf %1204, %1208 : vector<8x6xf32>
    %1210 = vector.extract_strided_slice %1133 {offsets = [0, 24], sizes = [6, 8], strides = [1, 1]} : vector<6x32xf32> to vector<6x8xf32>
    %cst_496 = arith.constant dense<0.000000e+00> : vector<8x8xf32>
    %1211 = tpu.matmul %1209, %1210, %cst_496 {dimension_numbers = #tpu.dot_dimension_numbers<[1], [0], [0], [1], [0, 0, 1, 1], [], []>} : vector<8x6xf32>, vector<6x8xf32>, vector<8x8xf32> -> vector<8x8xf32>
    %1212 = vector.extract_strided_slice %1135 {offsets = [24, 0], sizes = [8, 32], strides = [1, 1]} : vector<32x32xf32> to vector<8x32xf32>
    %cst_497 = arith.constant dense<0.000000e+00> : vector<8x32xf32>
    %1213 = tpu.matmul %1211, %1212, %cst_497 {dimension_numbers = #tpu.dot_dimension_numbers<[1], [0], [0], [1], [0, 0, 1, 1], [], []>} : vector<8x8xf32>, vector<8x32xf32>, vector<8x32xf32> -> vector<8x32xf32>
    %1214 = arith.addf %1194, %1213 : vector<8x32xf32>
    %c6_498 = arith.constant 6 : index
    %c0_499 = arith.constant 0 : index
    %c0_500 = arith.constant 0 : index
    %1215 = vector.load %arg13[%c6_498, %c0_499, %c0_500] : memref<7x1x32xf32, #tpu.memory_space<vmem>>, vector<1x1x32xf32>
    %1216 = vector.shape_cast %1215 : vector<1x1x32xf32> to vector<1x32xf32>
    %1217 = vector.broadcast %1216 : vector<1x32xf32> to vector<8x32xf32>
    %1218 = arith.addf %1214, %1217 : vector<8x32xf32>
    %1219 = arith.addf %1218, %1069 : vector<8x32xf32>
    %c6_501 = arith.constant 6 : index
    %c0_502 = arith.constant 0 : index
    %c0_503 = arith.constant 0 : index
    %1220 = vector.load %arg14[%c6_501, %c0_502, %c0_503] : memref<7x1x32xf32, #tpu.memory_space<vmem>>, vector<1x1x32xf32>
    %1221 = vector.shape_cast %1220 : vector<1x1x32xf32> to vector<1x32xf32>
    %c6_504 = arith.constant 6 : index
    %c0_505 = arith.constant 0 : index
    %c0_506 = arith.constant 0 : index
    %1222 = vector.load %arg15[%c6_504, %c0_505, %c0_506] : memref<7x1x32xf32, #tpu.memory_space<vmem>>, vector<1x1x32xf32>
    %1223 = vector.shape_cast %1222 : vector<1x1x32xf32> to vector<1x32xf32>
    %cst_507 = arith.constant dense<0.000000e+00> : vector<8xf32>
    %1224 = vector.multi_reduction <add>, %1219, %cst_507 [1] : vector<8x32xf32> to vector<8xf32>
    %1225 = vector.shape_cast %1224 : vector<8xf32> to vector<8x1xf32>
    %cst_508 = arith.constant 3.200000e+01 : f32
    %1226 = vector.broadcast %cst_508 : f32 to vector<8x1xf32>
    %1227 = arith.divf %1225, %1226 : vector<8x1xf32>
    %1228 = vector.broadcast %1227 : vector<8x1xf32> to vector<8x32xf32>
    %1229 = arith.subf %1219, %1228 : vector<8x32xf32>
    %1230 = arith.mulf %1229, %1229 : vector<8x32xf32>
    %cst_509 = arith.constant dense<0.000000e+00> : vector<8xf32>
    %1231 = vector.multi_reduction <add>, %1230, %cst_509 [1] : vector<8x32xf32> to vector<8xf32>
    %1232 = vector.shape_cast %1231 : vector<8xf32> to vector<8x1xf32>
    %cst_510 = arith.constant 3.200000e+01 : f32
    %1233 = vector.broadcast %cst_510 : f32 to vector<8x1xf32>
    %1234 = arith.divf %1232, %1233 : vector<8x1xf32>
    %cst_511 = arith.constant 9.99999997E-7 : f32
    %1235 = vector.broadcast %cst_511 : f32 to vector<8x1xf32>
    %1236 = arith.addf %1234, %1235 : vector<8x1xf32>
    %1237 = math.rsqrt %1236 : vector<8x1xf32>
    %1238 = vector.broadcast %1237 : vector<8x1xf32> to vector<8x32xf32>
    %1239 = arith.mulf %1229, %1238 : vector<8x32xf32>
    %1240 = vector.broadcast %1221 : vector<1x32xf32> to vector<8x32xf32>
    %1241 = arith.mulf %1239, %1240 : vector<8x32xf32>
    %1242 = vector.broadcast %1223 : vector<1x32xf32> to vector<8x32xf32>
    %1243 = arith.addf %1241, %1242 : vector<8x32xf32>
    %c6_512 = arith.constant 6 : index
    %c0_513 = arith.constant 0 : index
    %c0_514 = arith.constant 0 : index
    %1244 = vector.load %arg16[%c6_512, %c0_513, %c0_514] : memref<7x32x64xf32, #tpu.memory_space<vmem>>, vector<1x32x64xf32>
    %1245 = vector.shape_cast %1244 : vector<1x32x64xf32> to vector<32x64xf32>
    %cst_515 = arith.constant dense<0.000000e+00> : vector<8x64xf32>
    %1246 = tpu.matmul %1243, %1245, %cst_515 {dimension_numbers = #tpu.dot_dimension_numbers<[1], [0], [0], [1], [0, 0, 1, 1], [], []>} : vector<8x32xf32>, vector<32x64xf32>, vector<8x64xf32> -> vector<8x64xf32>
    %c6_516 = arith.constant 6 : index
    %c0_517 = arith.constant 0 : index
    %c0_518 = arith.constant 0 : index
    %1247 = vector.load %arg17[%c6_516, %c0_517, %c0_518] : memref<7x1x64xf32, #tpu.memory_space<vmem>>, vector<1x1x64xf32>
    %1248 = vector.shape_cast %1247 : vector<1x1x64xf32> to vector<1x64xf32>
    %1249 = vector.broadcast %1248 : vector<1x64xf32> to vector<8x64xf32>
    %1250 = arith.addf %1246, %1249 : vector<8x64xf32>
    %cst_519 = arith.constant 5.000000e-01 : f32
    %1251 = vector.broadcast %cst_519 : f32 to vector<8x64xf32>
    %1252 = arith.mulf %1251, %1250 : vector<8x64xf32>
    %cst_520 = arith.constant 4.471500e-02 : f32
    %1253 = vector.broadcast %cst_520 : f32 to vector<8x64xf32>
    %1254 = arith.mulf %1253, %1250 : vector<8x64xf32>
    %1255 = arith.mulf %1254, %1250 : vector<8x64xf32>
    %1256 = arith.mulf %1255, %1250 : vector<8x64xf32>
    %1257 = arith.addf %1250, %1256 : vector<8x64xf32>
    %cst_521 = arith.constant 0.797884583 : f32
    %1258 = vector.broadcast %cst_521 : f32 to vector<8x64xf32>
    %1259 = arith.mulf %1258, %1257 : vector<8x64xf32>
    %1260 = math.tanh %1259 : vector<8x64xf32>
    %cst_522 = arith.constant 1.000000e+00 : f32
    %1261 = vector.broadcast %cst_522 : f32 to vector<8x64xf32>
    %1262 = arith.addf %1261, %1260 : vector<8x64xf32>
    %1263 = arith.mulf %1252, %1262 : vector<8x64xf32>
    %c6_523 = arith.constant 6 : index
    %c0_524 = arith.constant 0 : index
    %c0_525 = arith.constant 0 : index
    %1264 = vector.load %arg18[%c6_523, %c0_524, %c0_525] : memref<7x64x32xf32, #tpu.memory_space<vmem>>, vector<1x64x32xf32>
    %1265 = vector.shape_cast %1264 : vector<1x64x32xf32> to vector<64x32xf32>
    %cst_526 = arith.constant dense<0.000000e+00> : vector<8x32xf32>
    %1266 = tpu.matmul %1263, %1265, %cst_526 {dimension_numbers = #tpu.dot_dimension_numbers<[1], [0], [0], [1], [0, 0, 1, 1], [], []>} : vector<8x64xf32>, vector<64x32xf32>, vector<8x32xf32> -> vector<8x32xf32>
    %c6_527 = arith.constant 6 : index
    %c0_528 = arith.constant 0 : index
    %c0_529 = arith.constant 0 : index
    %1267 = vector.load %arg19[%c6_527, %c0_528, %c0_529] : memref<7x1x32xf32, #tpu.memory_space<vmem>>, vector<1x1x32xf32>
    %1268 = vector.shape_cast %1267 : vector<1x1x32xf32> to vector<1x32xf32>
    %1269 = vector.broadcast %1268 : vector<1x32xf32> to vector<8x32xf32>
    %1270 = arith.addf %1266, %1269 : vector<8x32xf32>
    %1271 = arith.addf %1270, %1219 : vector<8x32xf32>
    %c0_530 = arith.constant 0 : index
    %c0_531 = arith.constant 0 : index
    %1272 = vector.load %arg24[%c0_530, %c0_531] : memref<32x1xf32, #tpu.memory_space<vmem>>, vector<32x1xf32>
    %cst_532 = arith.constant dense<0.000000e+00> : vector<8x1xf32>
    %1273 = tpu.matmul %1271, %1272, %cst_532 {dimension_numbers = #tpu.dot_dimension_numbers<[1], [0], [0], [1], [0, 0, 1, 1], [], []>} : vector<8x32xf32>, vector<32x1xf32>, vector<8x1xf32> -> vector<8x1xf32>
    %c0_533 = arith.constant 0 : index
    %c0_534 = arith.constant 0 : index
    %1274 = vector.load %arg25[%c0_533, %c0_534] : memref<1x1xf32, #tpu.memory_space<vmem>>, vector<1x1xf32>
    %1275 = vector.broadcast %1274 : vector<1x1xf32> to vector<8x1xf32>
    %1276 = arith.addf %1273, %1275 : vector<8x1xf32>
    %1277 = arith.negf %1276 : vector<8x1xf32>
    %1278 = math.exp %1277 : vector<8x1xf32>
    %cst_535 = arith.constant 1.000000e+00 : f32
    %1279 = vector.broadcast %cst_535 : f32 to vector<8x1xf32>
    %1280 = arith.addf %1279, %1278 : vector<8x1xf32>
    %1281 = arith.divf %1279, %1280 : vector<8x1xf32>
    %1282 = vector.broadcast %1281 : vector<8x1xf32> to vector<8x32xf32>
    %1283 = arith.mulf %1271, %1282 : vector<8x32xf32>
    %1284 = arith.addf %181, %1283 : vector<8x32xf32>
    %cst_536 = arith.constant dense<0.000000e+00> : vector<8xf32>
    %1285 = vector.multi_reduction <add>, %1284, %cst_536 [1] : vector<8x32xf32> to vector<8xf32>
    %1286 = vector.shape_cast %1285 : vector<8xf32> to vector<8x1xf32>
    %cst_537 = arith.constant 3.200000e+01 : f32
    %1287 = vector.broadcast %cst_537 : f32 to vector<8x1xf32>
    %1288 = arith.divf %1286, %1287 : vector<8x1xf32>
    %1289 = vector.broadcast %1288 : vector<8x1xf32> to vector<8x32xf32>
    %1290 = arith.subf %1284, %1289 : vector<8x32xf32>
    %1291 = arith.mulf %1290, %1290 : vector<8x32xf32>
    %cst_538 = arith.constant dense<0.000000e+00> : vector<8xf32>
    %1292 = vector.multi_reduction <add>, %1291, %cst_538 [1] : vector<8x32xf32> to vector<8xf32>
    %1293 = vector.shape_cast %1292 : vector<8xf32> to vector<8x1xf32>
    %cst_539 = arith.constant 3.200000e+01 : f32
    %1294 = vector.broadcast %cst_539 : f32 to vector<8x1xf32>
    %1295 = arith.divf %1293, %1294 : vector<8x1xf32>
    %cst_540 = arith.constant 9.99999997E-7 : f32
    %1296 = vector.broadcast %cst_540 : f32 to vector<8x1xf32>
    %1297 = arith.addf %1295, %1296 : vector<8x1xf32>
    %1298 = math.rsqrt %1297 : vector<8x1xf32>
    %1299 = vector.broadcast %1298 : vector<8x1xf32> to vector<8x32xf32>
    %1300 = arith.mulf %1290, %1299 : vector<8x32xf32>
    %1301 = vector.broadcast %0 : vector<1x32xf32> to vector<8x32xf32>
    %1302 = arith.mulf %1300, %1301 : vector<8x32xf32>
    %1303 = vector.broadcast %1 : vector<1x32xf32> to vector<8x32xf32>
    %1304 = arith.addf %1302, %1303 : vector<8x32xf32>
    %c0_541 = arith.constant 0 : index
    %c0_542 = arith.constant 0 : index
    %1305 = vector.load %arg26[%c0_541, %c0_542] : memref<32x1xf32, #tpu.memory_space<vmem>>, vector<32x1xf32>
    %cst_543 = arith.constant dense<0.000000e+00> : vector<8x1xf32>
    %1306 = tpu.matmul %1304, %1305, %cst_543 {dimension_numbers = #tpu.dot_dimension_numbers<[1], [0], [0], [1], [0, 0, 1, 1], [], []>} : vector<8x32xf32>, vector<32x1xf32>, vector<8x1xf32> -> vector<8x1xf32>
    %c0_544 = arith.constant 0 : index
    %c0_545 = arith.constant 0 : index
    %1307 = vector.load %arg27[%c0_544, %c0_545] : memref<1x1xf32, #tpu.memory_space<vmem>>, vector<1x1xf32>
    %1308 = vector.broadcast %1307 : vector<1x1xf32> to vector<8x1xf32>
    %1309 = arith.addf %1306, %1308 : vector<8x1xf32>
    %1310 = arith.negf %1309 : vector<8x1xf32>
    %1311 = math.exp %1310 : vector<8x1xf32>
    %cst_546 = arith.constant 1.000000e+00 : f32
    %1312 = vector.broadcast %cst_546 : f32 to vector<8x1xf32>
    %1313 = arith.addf %1312, %1311 : vector<8x1xf32>
    %1314 = arith.divf %1312, %1313 : vector<8x1xf32>
    %c0_547 = arith.constant 0 : index
    %c0_548 = arith.constant 0 : index
    %c0_549 = arith.constant 0 : index
    %1315 = vector.load %arg2[%c0_547, %c0_548, %c0_549] : memref<1x8x1xf32, #tpu.memory_space<vmem>>, vector<1x8x1xf32>
    %1316 = vector.shape_cast %1315 : vector<1x8x1xf32> to vector<8x1xf32>
    %1317 = arith.mulf %1314, %1316 : vector<8x1xf32>
    %c0_550 = arith.constant 0 : index
    %c0_551 = arith.constant 0 : index
    %c0_552 = arith.constant 0 : index
    %1318 = vector.load %arg28[%c0_550, %c0_551, %c0_552] : memref<1x8x1xf32, #tpu.memory_space<vmem>>, vector<1x8x1xf32>
    %1319 = vector.shape_cast %1318 : vector<1x8x1xf32> to vector<8x1xf32>
    %1320 = vector.shape_cast %1317 : vector<8x1xf32> to vector<1x8x1xf32>
    tpu.vector_store %arg28[%c0_550, %c0_551, %c0_552], %1320 {strides = array<i32>} : memref<1x8x1xf32, #tpu.memory_space<vmem>>, vector<1x8x1xf32>,
    return
  }
  func.func @transform_0(%arg0: i32) -> (i32, i32, i32) {
    %c0_i32 = arith.constant 0 : i32
    %c0_i32_0 = arith.constant 0 : i32
    %c0_i32_1 = arith.constant 0 : i32
    return %arg0, %c0_i32, %c0_i32_0 : i32, i32, i32
  }
  func.func @transform_1(%arg0: i32) -> (i32, i32, i32) {
    %c0_i32 = arith.constant 0 : i32
    %c0_i32_0 = arith.constant 0 : i32
    %c0_i32_1 = arith.constant 0 : i32
    return %arg0, %c0_i32, %c0_i32_0 : i32, i32, i32
  }
  func.func @transform_2(%arg0: i32) -> (i32, i32, i32) {
    %c0_i32 = arith.constant 0 : i32
    %c0_i32_0 = arith.constant 0 : i32
    %c0_i32_1 = arith.constant 0 : i32
    return %arg0, %c0_i32, %c0_i32_0 : i32, i32, i32
  }
  func.func @transform_3(%arg0: i32) -> (i32, i32, i32) {
    %c0_i32 = arith.constant 0 : i32
    %c0_i32_0 = arith.constant 0 : i32
    %c0_i32_1 = arith.constant 0 : i32
    return %arg0, %c0_i32, %c0_i32_0 : i32, i32, i32
  }
  func.func @transform_4(%arg0: i32) -> (i32, i32, i32) {
    %c0_i32 = arith.constant 0 : i32
    %c0_i32_0 = arith.constant 0 : i32
    %c0_i32_1 = arith.constant 0 : i32
    return %arg0, %c0_i32, %c0_i32_0 : i32, i32, i32
  }
  func.func @transform_5(%arg0: i32) -> (i32, i32, i32) {
    %c0_i32 = arith.constant 0 : i32
    %c0_i32_0 = arith.constant 0 : i32
    %c0_i32_1 = arith.constant 0 : i32
    return %arg0, %c0_i32, %c0_i32_0 : i32, i32, i32
  }
  func.func @transform_6(%arg0: i32) -> (i32, i32) {
    %c0_i32 = arith.constant 0 : i32
    %c0_i32_0 = arith.constant 0 : i32
    %c0_i32_1 = arith.constant 0 : i32
    return %c0_i32, %c0_i32_0 : i32, i32
  }
  func.func @transform_7(%arg0: i32) -> (i32, i32, i32) {
    %c0_i32 = arith.constant 0 : i32
    %c0_i32_0 = arith.constant 0 : i32
    %c0_i32_1 = arith.constant 0 : i32
    %c0_i32_2 = arith.constant 0 : i32
    return %c0_i32, %c0_i32_0, %c0_i32_1 : i32, i32, i32
  }
  func.func @transform_8(%arg0: i32) -> (i32, i32, i32) {
    %c0_i32 = arith.constant 0 : i32
    %c0_i32_0 = arith.constant 0 : i32
    %c0_i32_1 = arith.constant 0 : i32
    %c0_i32_2 = arith.constant 0 : i32
    return %c0_i32, %c0_i32_0, %c0_i32_1 : i32, i32, i32
  }
  func.func @transform_9(%arg0: i32) -> (i32, i32, i32) {
    %c0_i32 = arith.constant 0 : i32
    %c0_i32_0 = arith.constant 0 : i32
    %c0_i32_1 = arith.constant 0 : i32
    %c0_i32_2 = arith.constant 0 : i32
    return %c0_i32, %c0_i32_0, %c0_i32_1 : i32, i32, i32
  }
  func.func @transform_10(%arg0: i32) -> (i32, i32, i32) {
    %c0_i32 = arith.constant 0 : i32
    %c0_i32_0 = arith.constant 0 : i32
    %c0_i32_1 = arith.constant 0 : i32
    %c0_i32_2 = arith.constant 0 : i32
    return %c0_i32, %c0_i32_0, %c0_i32_1 : i32, i32, i32
  }
  func.func @transform_11(%arg0: i32) -> (i32, i32, i32) {
    %c0_i32 = arith.constant 0 : i32
    %c0_i32_0 = arith.constant 0 : i32
    %c0_i32_1 = arith.constant 0 : i32
    %c0_i32_2 = arith.constant 0 : i32
    return %c0_i32, %c0_i32_0, %c0_i32_1 : i32, i32, i32
  }
  func.func @transform_12(%arg0: i32) -> (i32, i32, i32) {
    %c0_i32 = arith.constant 0 : i32
    %c0_i32_0 = arith.constant 0 : i32
    %c0_i32_1 = arith.constant 0 : i32
    %c0_i32_2 = arith.constant 0 : i32
    return %c0_i32, %c0_i32_0, %c0_i32_1 : i32, i32, i32
  }
  func.func @transform_13(%arg0: i32) -> (i32, i32, i32) {
    %c0_i32 = arith.constant 0 : i32
    %c0_i32_0 = arith.constant 0 : i32
    %c0_i32_1 = arith.constant 0 : i32
    %c0_i32_2 = arith.constant 0 : i32
    return %c0_i32, %c0_i32_0, %c0_i32_1 : i32, i32, i32
  }
  func.func @transform_14(%arg0: i32) -> (i32, i32, i32) {
    %c0_i32 = arith.constant 0 : i32
    %c0_i32_0 = arith.constant 0 : i32
    %c0_i32_1 = arith.constant 0 : i32
    %c0_i32_2 = arith.constant 0 : i32
    return %c0_i32, %c0_i32_0, %c0_i32_1 : i32, i32, i32
  }
  func.func @transform_15(%arg0: i32) -> (i32, i32, i32) {
    %c0_i32 = arith.constant 0 : i32
    %c0_i32_0 = arith.constant 0 : i32
    %c0_i32_1 = arith.constant 0 : i32
    %c0_i32_2 = arith.constant 0 : i32
    return %c0_i32, %c0_i32_0, %c0_i32_1 : i32, i32, i32
  }
  func.func @transform_16(%arg0: i32) -> (i32, i32, i32) {
    %c0_i32 = arith.constant 0 : i32
    %c0_i32_0 = arith.constant 0 : i32
    %c0_i32_1 = arith.constant 0 : i32
    %c0_i32_2 = arith.constant 0 : i32
    return %c0_i32, %c0_i32_0, %c0_i32_1 : i32, i32, i32
  }
  func.func @transform_17(%arg0: i32) -> (i32, i32, i32) {
    %c0_i32 = arith.constant 0 : i32
    %c0_i32_0 = arith.constant 0 : i32
    %c0_i32_1 = arith.constant 0 : i32
    %c0_i32_2 = arith.constant 0 : i32
    return %c0_i32, %c0_i32_0, %c0_i32_1 : i32, i32, i32
  }
  func.func @transform_18(%arg0: i32) -> (i32, i32, i32) {
    %c0_i32 = arith.constant 0 : i32
    %c0_i32_0 = arith.constant 0 : i32
    %c0_i32_1 = arith.constant 0 : i32
    %c0_i32_2 = arith.constant 0 : i32
    return %c0_i32, %c0_i32_0, %c0_i32_1 : i32, i32, i32
  }
  func.func @transform_19(%arg0: i32) -> (i32, i32) {
    %c0_i32 = arith.constant 0 : i32
    %c0_i32_0 = arith.constant 0 : i32
    %c0_i32_1 = arith.constant 0 : i32
    return %c0_i32, %c0_i32_0 : i32, i32
  }
  func.func @transform_20(%arg0: i32) -> (i32, i32) {
    %c0_i32 = arith.constant 0 : i32
    %c0_i32_0 = arith.constant 0 : i32
    %c0_i32_1 = arith.constant 0 : i32
    return %c0_i32, %c0_i32_0 : i32, i32
  }
  func.func @transform_21(%arg0: i32) -> (i32, i32) {
    %c0_i32 = arith.constant 0 : i32
    %c0_i32_0 = arith.constant 0 : i32
    %c0_i32_1 = arith.constant 0 : i32
    return %c0_i32, %c0_i32_0 : i32, i32
  }
  func.func @transform_22(%arg0: i32) -> (i32, i32) {
    %c0_i32 = arith.constant 0 : i32
    %c0_i32_0 = arith.constant 0 : i32
    %c0_i32_1 = arith.constant 0 : i32
    return %c0_i32, %c0_i32_0 : i32, i32
  }
  func.func @transform_23(%arg0: i32) -> (i32, i32) {
    %c0_i32 = arith.constant 0 : i32
    %c0_i32_0 = arith.constant 0 : i32
    %c0_i32_1 = arith.constant 0 : i32
    return %c0_i32, %c0_i32_0 : i32, i32
  }
  func.func @transform_24(%arg0: i32) -> (i32, i32) {
    %c0_i32 = arith.constant 0 : i32
    %c0_i32_0 = arith.constant 0 : i32
    %c0_i32_1 = arith.constant 0 : i32
    return %c0_i32, %c0_i32_0 : i32, i32
  }
  func.func @transform_25(%arg0: i32) -> (i32, i32) {
    %c0_i32 = arith.constant 0 : i32
    %c0_i32_0 = arith.constant 0 : i32
    %c0_i32_1 = arith.constant 0 : i32
    return %c0_i32, %c0_i32_0 : i32, i32
  }
  func.func @transform_26(%arg0: i32) -> (i32, i32) {
    %c0_i32 = arith.constant 0 : i32
    %c0_i32_0 = arith.constant 0 : i32
    %c0_i32_1 = arith.constant 0 : i32
    return %c0_i32, %c0_i32_0 : i32, i32
  }
  func.func @transform_27(%arg0: i32) -> (i32, i32, i32) {
    %c0_i32 = arith.constant 0 : i32
    %c0_i32_0 = arith.constant 0 : i32
    %c0_i32_1 = arith.constant 0 : i32
    return %arg0, %c0_i32, %c0_i32_0 : i32, i32, i32
  }
}

</mosaic_0001>

<bundles_post_ra>
// kernel: _lambda_.1
= control target key start
LH: loop header
LB: loop body
LE: loop exit
PB: predicated region body
PF: predicated region fallthrough
CT: control target
= control target key end

     0   :  { %s6018_s28 = smov 0   ;;  %s7274_s0 = inlined_call_operand.vmem [shape: f32[2,8,32], index: 0, kind: input, shape index: {}]   ;;  %s7275_s1 = inlined_call_operand.vmem [shape: f32[2,8,1], index: 1, kind: input, shape index: {}]   ;;  %s7276_s2 = inlined_call_operand.vmem [shape: f32[2,1,8], index: 2, kind: input, shape index: {}]   ;;  %s7277_s3 = inlined_call_operand.vmem [shape: f32[2,6,32], index: 3, kind: input, shape index: {}]   ;;  %s7278_s4 = inlined_call_operand.vmem [shape: f32[2,6,1], index: 4, kind: input, shape index: {}]   ;;  %s7279_s5 = inlined_call_operand.vmem [shape: f32[2,1,6], index: 5, kind: input, shape index: {}]   ;;  %s7280_s6 = inlined_call_operand.vmem [shape: f32[8,32], index: 6, kind: input, shape index: {}]   ;;  %s7281_s7 = inlined_call_operand.vmem [shape: f32[7,1,32], index: 7, kind: input, shape index: {}]   ;;  %s7282_s8 = inlined_call_operand.vmem [shape: f32[7,1,32], index: 8, kind: input, shape index: {}]   ;;  %s7283_s9 = inlined_call_operand.vmem [shape: f32[7,32,96], index: 9, kind: input, shape index: {}]   ;;  %s7284_s10 = inlined_call_operand.vmem [shape: f32[7,1,96], index: 10, kind: input, shape index: {}]   ;;  %s7285_s11 = inlined_call_operand.vmem [shape: f32[7,32,32], index: 11, kind: input, shape index: {}]   ;;  %s7286_s12 = inlined_call_operand.vmem [shape: f32[7,1,32], index: 12, kind: input, shape index: {}]   ;;  %s7287_s13 = inlined_call_operand.vmem [shape: f32[7,1,32], index: 13, kind: input, shape index: {}]   ;;  %s7288_s14 = inlined_call_operand.vmem [shape: f32[7,1,32], index: 14, kind: input, shape index: {}]   ;;  %s7289_s15 = inlined_call_operand.vmem [shape: f32[7,32,64], index: 15, kind: input, shape index: {}]   ;;  %s7290_s16 = inlined_call_operand.vmem [shape: f32[7,1,64], index: 16, kind: input, shape index: {}]   ;;  %s7291_s17 = inlined_call_operand.vmem [shape: f32[7,64,32], index: 17, kind: input, shape index: {}]   ;;  %s7292_s18 = inlined_call_operand.vmem [shape: f32[7,1,32], index: 18, kind: input, shape index: {}]   ;;  %s7293_s19 = inlined_call_operand.vmem [shape: f32[1,32], index: 19, kind: input, shape index: {}]   ;;  %s7294_s20 = inlined_call_operand.vmem [shape: f32[1,32], index: 20, kind: input, shape index: {}]   ;;  %s7295_s21 = inlined_call_operand.vmem [shape: f32[32,1], index: 21, kind: input, shape index: {}]   ;;  %s7296_s22 = inlined_call_operand.<no memory space> [shape: f32[1,1], index: 22, kind: input, shape index: {}]   ;;  %s7297_s23 = inlined_call_operand.vmem [shape: f32[32,1], index: 23, kind: input, shape index: {}]   ;;  %s7298_s25 = inlined_call_operand.vmem [shape: f32[32,1], index: 25, kind: input, shape index: {}]   ;;  %s7299_s27 = inlined_call_operand.vmem [shape: f32[2,8,1], index: 27, kind: output, shape index: {}]   ;;  %s7300_s24 = inlined_call_operand.<no memory space> [shape: f32[1,1], index: 24, kind: input, shape index: {}]   ;;  %s7301_s26 = inlined_call_operand.<no memory space> [shape: f32[1,1], index: 26, kind: input, shape index: {}]  }
   0x1   :  { %7340 = sst [smem:[#allocation10_spill]] %s7274_s0  ;;  %v32_v0 = vstv %s7296_s22  ;;  %v34_v1 = vstv %s7300_s24  ;;  %v36_v2 = vstv %s7301_s26 }
   0x2   :  { %7341 = sst [smem:[#allocation11_spill]] %s7275_s1  ;;  %33 = vst [vmem:[#allocation2] sm:$0x1] %v32_v0 }
   0x3   :  { %7342 = sst [smem:[#allocation12_spill]] %s7276_s2  ;;  %35 = vst [vmem:[#allocation3] sm:$0x1] %v34_v1 }
   0x4   :  { %7343 = sst [smem:[#allocation13_spill]] %s7277_s3  ;;  %37 = vst [vmem:[#allocation4] sm:$0x1] %v36_v2 }
   0x5   :  { %7344 = sst [smem:[#allocation14_spill]] %s7278_s4 }
   0x6   :  { %7345 = sst [smem:[#allocation15_spill]] %s7279_s5 }
   0x7   :  { %7346 = sst [smem:[#allocation16_spill]] %s7280_s6 }
   0x8   :  { %7347 = sst [smem:[#allocation17_spill]] %s7281_s7 }
   0x9   :  { %7348 = sst [smem:[#allocation18_spill]] %s7282_s8 }
   0xa   :  { %7349 = sst [smem:[#allocation19_spill]] %s7283_s9 }
   0xb   :  { %7350 = sst [smem:[#allocation20_spill]] %s7284_s10 }
   0xc   :  { %7351 = sst [smem:[#allocation21_spill]] %s7285_s11 }
   0xd   :  { %7352 = sst [smem:[#allocation22_spill]] %s7293_s19 }
   0xe   :  { %7353 = sst [smem:[#allocation23_spill]] %s7294_s20 }
   0xf   :  { %7354 = sst [smem:[#allocation24_spill]] %s7295_s21 }
  0x10   :  { %7355 = sst [smem:[#allocation25_spill]] %s7297_s23 }
  0x11   :  { %7356 = sst [smem:[#allocation26_spill]] %s7298_s25 }
  0x12   :  { %7357 = sst [smem:[#allocation27_spill]] %s7299_s27 }
  0x13 LB: > { %7358 = sst [smem:[#allocation5_spill]] %s5854_s28  ;;  %s5218_s22 = sadd.s32 4294967295, %s5854_s28   ;;  %s5854_s28 = sphi %s6018_s28, %s43_s28  }
  0x14   : > { %p5222_p0 = scmp.ge.s32.totalorder %s5854_s28, 1  ;;  %p785_p1 = scmp.lt.s32.totalorder %s5854_s28, 3 }
  0x16   : > { %p786_p2 = pnand %p5222_p0, %p785_p1 }
  0x18   : > { %789 = sbr.rel (%p786_p2) target bundleno = 15066 (0x3ada), region = 128 }
  0x1d   : > { %p873_p3 = scmp.lt.s32.totalorder %s5218_s22, 1  ;;  %s7359_s0 = sld [smem:[#allocation19_spill]]  ;;  %v5856_v5 = vmov 0   ;;  %vm921_vm0 = vcmask 261120   ;;  %vm955_vm1 = vcmask 64512   ;;  %vm1534_vm3 = vcmask 46080  }
  0x1e   : > { %5572 = vset.pattern.permute.xlu0 %v5856_v5  ;;  %5613 = vset.pattern.permute.xlu1 %v5856_v5  ;;  %s7361_s2 = sld [smem:[#allocation12_spill]]  ;;  %s7321_s6 = smov 64   ;;  %vm1552_vm4 = vcmask 1045504   ;;  %vm1548_vm8 = vcmask 48128   ;;  %vm1403_vm9 = vcmask 523264   ;;  %vm1878_vm10 = vcmask 259072  }
  0x1f   : > { %s7398_s22 = smov (!%p873_p3, %s5218_s22), 1  ;;  %s7363_s8 = sld [smem:[#allocation11_spill]] }
  0x20   : > { %s6032_s1 = sshll.u32 %s7398_s22, 3  ;;  %s7365_s24 = sld [smem:[#allocation15_spill]] }
  0x21   : > { %7360 = sst [smem:[#allocation6_spill]] %s6032_s1  ;;  %s7325_s11 = smov 96  }
  0x22   : > { %s7367_s4 = sld [smem:[#allocation10_spill]]  ;;  %s7313_s7 = smov 120  }
  0x23   : > { %v916_v3 = vld [vmem:[%s7359_s0 + $0x18] sm:$0xff]  ;;  %v915_v4 = vld [vmem:[%s7359_s0 + $0x10] sm:$0xff]  ;;  %v914_v7 = vld [vmem:[%s7359_s0 + $0x8] sm:$0xff]  ;;  %s7368_s5 = sld [smem:[#allocation16_spill]]  ;;  %s7307_s9 = smov 104  }
  0x24   : > { %937 = vmatpush.msra.mxu0 %v916_v3  ;;  %s6037_s3 = scalar_lea.vmem %s7361_s2, %s7398_s22  ;;  %v913_v8 = vld [vmem:[%s7359_s0] sm:$0xff]  ;;  %s7369_s29 = sld [smem:[#allocation20_spill]] }
  0x25   : > { %7362 = sst [smem:[#allocation7_spill]] %s6037_s3  ;;  %s6043_s30 = scalar_lea.vmem %s7363_s8, %s6032_s1  ;;  %v5614_v21 = vld [vmem:[%s6037_s3] ss:$0 sm:$0xff] }
  0x26   : > { %938 = vmatpush.msra.mxu0 %v915_v4  ;;  %7364 = sst [smem:[#allocation8_spill]] %s6043_s30  ;;  %s6048_s26 = scalar_lea.vmem %s7365_s24, %s7398_s22  ;;  %v904_v6 = vld [vmem:[%s6043_s30] sm:$0xff] }
  0x27   : > { %7366 = sst [smem:[#allocation9_spill]] %s6048_s26  ;;  %907 = vperm.xlu0 %5572, %v904_v6   ;;  %s7323_s2 = smov 88   ;;  %v5250_v6 = vld [vmem:[%s7359_s0 + $0x38] sm:$0xff] }
  0x28   : > { %939 = vmatpush.msra.mxu0 %v914_v7  ;;  %s876_s8 = scalar_lea.vmem %s7367_s4, %s6032_s1  ;;  %s7315_s4 = smov 112   ;;  %v5249_v7 = vld [vmem:[%s7359_s0 + $0x30] sm:$0xff] }
  0x29   : > { %v903_v9 = vld [vmem:[%s876_s8] sm:$0xff]  ;;  %s7317_s8 = smov 72   ;;  %s7311_s22 = smov 56  }
  0x2a   : > { %940 = vmatpush.msra.mxu0 %v913_v8  ;;  %v911_v10 = vld [vmem:[%s7368_s5] sm:$0xff]  ;;  %s7319_s5 = smov 80   ;;  %s7309_s24 = smov 40   ;;  %v5248_v8 = vld [vmem:[%s7359_s0 + $0x28] sm:$0xff] }
  0x2b   : > { %v5616_v14 = vld [vmem:[%s7369_s29] ss:$0 sm:$0xff]  ;;  %s7373_s28 = smov 96   ;;  %s7380_s10 = smov 104  }
  0x2c   : > { %s7381_s27 = smov 56   ;;  %s7383_s30 = smov 40  }
  0x2d   : > { %s7385_s25 = sld [smem:[#allocation18_spill]] }
  0x2e   : > { %s7388_s21 = sld [smem:[#allocation7_spill]] }
  0x2f   : > { %s7394_s19 = sld [smem:[#allocation8_spill]] }
  0x99   : > { %v908_v11 = vpop.permute.xlu0 %907 }
  0x9a   : > { %v910_v12 = vmul.f32 %v908_v11, %v903_v9 }
  0x9c   : > { %v6064_v13 = vadd.f32 %v911_v10, %v910_v12  ;;  %v5247_v10 = vld [vmem:[%s7359_s0 + $0x20] sm:$0xff] }
  0x9e   : > { %5228 = vmatmul.msk.f32.vlgmr.msra.gmra.mxu0 %vm921_vm0, %v6064_v13 }
 0x11b   : > { %v942_v15 = vpop.f32.mrf.mxu0 }
 0x11c   : > { %v6071_v16 = vadd.f32 %v5616_v14, %v942_v15 }
 0x11e   : > { %991 = vrot.lane.b32.xlu2 %v6071_v16, %s7321_s6  ;;  %953 = vrot.lane.b32.xlu0 %v6071_v16, %s7325_s11  ;;  %s7372_s11 = sld [smem:[#allocation13_spill]] }
 0x11f   : > { %s7384_s6 = sld [smem:[#allocation17_spill]] }
 0x126   : > { %1019 = vrot.lane.b32.xlu2 %v6071_v16, %s7323_s2  ;;  %1017 = vrot.lane.b32.xlu0 %v6071_v16, %s7313_s7  ;;  %s887_s2 = scalar_lea.vmem %s7372_s11, %s6032_s1  ;;  %s7389_s11 = sld [smem:[#allocation24_spill]] }
 0x12e   : > { %1128 = vrot.lane.b32.xlu2 %v6071_v16, %s7315_s4  ;;  %1219 = vrot.lane.b32.xlu0 %v6071_v16, %s7317_s8  ;;  %s7328_s4 = smov 48   ;;  %s7375_s8 = smov 64  }
 0x136   : > { %1217 = vrot.lane.b32.xlu2 %v6071_v16, %s7307_s9  ;;  %s7370_s9 = sld [smem:[#allocation21_spill]] }
 0x13c   : > { %v945_v36 = vld [vmem:[%s7370_s9] sm:$0xff]  ;;  %v946_v9 = vld [vmem:[%s7370_s9 + $0x8] sm:$0xff] }
 0x178   : > { %v992_v17 = vpop.permute.xlu2 %991 }
 0x179   : > { %1012 = vmatpush.msra.mxu2 %v992_v17 }
 0x180   : > { %v1020_v18 = vpop.permute.xlu2 %1019 }
 0x181   : > { %5232 = vmatpush.xpose.msk.msra.mxu3 %vm955_vm1, %v1020_v18 }
 0x185   : > { %1123 = vmatpush.msrb.mxu3 %v945_v36 }
 0x188   : > { %v1129_v42 = vpop.permute.xlu2 %1128 }
 0x190   : > { %v954_v19 = vpop.permute.xlu0 %953  ;;  %v1218_v43 = vpop.permute.xlu2 %1217 }
 0x191   : > { %5229 = vmatpush.xpose.msk.msra.mxu1 %vm955_vm1, %v954_v19  ;;  %v1458_v19 = vld [vmem:[%s887_s2] sm:$0x3f]  ;;  %s7374_s2 = smov 88  }
 0x194   : > { %5230 = vmatmul.msk.f32.vlgmr.msra.gmra.mxu1 %vm955_vm1, %v6071_v16 }
 0x195   : > { %1100 = vmatpush.msrb.mxu1 %v946_v9 }
 0x198   : > { %v1018_v20 = vpop.permute.xlu0 %1017 }
 0x199   : > { %5233 = vmatmul.msk.f32.vlgmr.msra.gmra.mxu3 %vm955_vm1, %v1018_v20 }
 0x1a0   : > { %v1220_v33 = vpop.permute.xlu0 %1219 }
 0x211   : > { %v977_v22 = vpop.f32.mrf.mxu1 }
 0x212   : > { %v978_v23 = vadd.f32 %v5614_v21, %v977_v22 }
 0x214   : > { %v980_v24 = vsel %vm955_vm1, %v978_v23, -inf }
 0x215   : > { %981 = vmax.xlane.f32.xlu1 %v980_v24  ;;  %v948_v24 = vld [vmem:[%s7370_s9 + $0x18] sm:$0xff] }
 0x21c   : > { %v1042_v25 = vpop.f32.mrf.mxu3 }
 0x21d   : > { %v1043_v26 = vadd.f32 %v5614_v21, %v1042_v25 }
 0x21f   : > { %v1045_v27 = vsel %vm955_vm1, %v1043_v26, -inf }
 0x220   : > { %1046 = vmax.xlane.f32.xlu0 %v1045_v27  ;;  %v5617_v27 = vld [vmem:[%s7369_s29 + $0x1] ss:$0 sm:$0xff] }
 0x234   : > { %1056 = vrot.lane.b32.xlu0 %v6071_v16, %s7311_s22  ;;  %s7371_s22 = sld [smem:[#allocation14_spill]] }
 0x23a   : > { %s891_s7 = scalar_lea.vmem %s7371_s22, %s6032_s1  ;;  %s7377_s22 = smov 72  }
 0x23b   : > { %v1459_v5 = vld [vmem:[%s891_s7] sm:$0x3f]  ;;  %s7379_s7 = smov 120   ;;  %s7382_s1 = smov 48  }
 0x288   : > { %v982_v28 = vpop.xlane.xlu1 %981 }
 0x289   : > { %v983_v29 = vsub.f32 %v978_v23, %v982_v28  ;;  %v947_v23 = vld [vmem:[%s7370_s9 + $0x10] sm:$0xff] }
 0x28a   : > { %1211 = vmatpush.msra.mxu1 %v947_v23 }
 0x28b   : > { %v984_v30 = vmul.f32 1.442695, %v983_v29 }
 0x28d   : > { %5669 = vpow2.f32 %v984_v30 }
 0x293   : > { %v5670_v31 = vpop.eup %5669  ;;  %v1047_v34 = vpop.xlane.xlu0 %1046 }
 0x294   : > { %v986_v32 = vsel %vm955_vm1, %v5670_v31, 0.0  ;;  %v1048_v47 = vsub.f32 %v1043_v26, %v1047_v34 }
 0x295   : > { %987 = vadd.xlane.f32.xlu1 %v986_v32 }
 0x296   : > { %v1049_v49 = vmul.f32 1.442695, %v1048_v47 }
 0x2a6   : > { %v1057_v35 = vpop.permute.xlu0 %1056 }
 0x2a7   : > { %1077 = vmatpush.msrb.mxu2 %v1057_v35  ;;  %v5618_v35 = vld [vmem:[%s7286_s12] ss:$0 sm:$0xff] }
 0x2ae   : > { %1130 = vrot.lane.b32.xlu1 %v6071_v16, %s7319_s5  ;;  %s7376_s5 = smov 80  }
 0x308   : > { %v988_v37 = vpop.xlane.xlu1 %987 }
 0x309   : > { %5671 = vrcp.f32 %v988_v37 }
 0x30a   : > { %5673 = vpow2.f32 %v1049_v49 }
 0x30f   : > { %v5672_v38 = vpop.eup %5671 }
 0x310   : > { %v990_v39 = vmul.f32 %v5672_v38, %v5670_v31  ;;  %v5674_v53 = vpop.eup %5673 }
 0x311   : > { %v1051_v54 = vsel %vm955_vm1, %v5674_v53, 0.0 }
 0x312   : > { %5231 = vmatmul.msk.f32.vlgmr.msra.gmra.mxu2 %vm955_vm1, %v990_v39 }
 0x320   : > { %v1131_v40 = vpop.permute.xlu1 %1130 }
 0x321   : > { %5237 = vmatpush.xpose.msk.msra.mxu3 %vm955_vm1, %v1131_v40 }
 0x395   : > { %v1014_v41 = vpop.f32.mrf.mxu2 }
 0x396   : > { %5236 = vmatmul.msk.f32.vlgmr.msrb.gmra.mxu3 %vm955_vm1, %v1014_v41  ;;  %v5868_v41 = vmov 32.0  }
 0x397   : > { %5241 = vmatpush.xpose.msk.msrb.mxu3 %vm955_vm1, %v1220_v33 }
 0x39e   : > { %5238 = vmatmul.msk.f32.vlgmr.msra.gmra.mxu3 %vm955_vm1, %v1129_v42 }
 0x3a6   : > { %5242 = vmatmul.msk.f32.vlgmr.msrb.gmra.mxu3 %vm955_vm1, %v1218_v43 }
 0x419   : > { %v6109_v44 = vpop.f32.mrf.mxu3 }
 0x421   : > { %v1153_v45 = vpop.f32.mrf.mxu3 }
 0x422   : > { %v1154_v46 = vadd.f32 %v5614_v21, %v1153_v45 }
 0x424   : > { %v1156_v48 = vsel %vm955_vm1, %v1154_v46, -inf }
 0x425   : > { %1157 = vmax.xlane.f32.xlu1 %v1156_v48 }
 0x429   : > { %v1242_v50 = vpop.f32.mrf.mxu3 }
 0x42a   : > { %v1243_v51 = vadd.f32 %v5614_v21, %v1242_v50 }
 0x42c   : > { %v1245_v52 = vsel %vm955_vm1, %v1243_v51, -inf }
 0x42d   : > { %1246 = vmax.xlane.f32.xlu2 %v1245_v52 }
 0x435   : > { %1052 = vadd.xlane.f32.xlu2 %v1051_v54 }
 0x43e   : > { %1256 = vrot.lane.b32.xlu1 %v6071_v16, %s7309_s24  ;;  %s7378_s24 = smov 112  }
 0x498   : > { %v1158_v55 = vpop.xlane.xlu1 %1157 }
 0x499   : > { %v1159_v56 = vsub.f32 %v1154_v46, %v1158_v55 }
 0x49b   : > { %v1160_v57 = vmul.f32 1.442695, %v1159_v56  ;;  %v1354_v56 = vld [vmem:[%s7289_s15 + $0x18] sm:$0xff] }
 0x49d   : > { %5675 = vpow2.f32 %v1160_v57  ;;  %v1353_v57 = vld [vmem:[%s7289_s15 + $0x10] sm:$0xff] }
 0x4a0   : > { %v1247_v58 = vpop.xlane.xlu2 %1246 }
 0x4a1   : > { %v1248_v59 = vsub.f32 %v1243_v51, %v1247_v58  ;;  %v6183_v51 = vld [vmem:[%s6048_s26] ss:$0 sm:$0xff]  ;;  %v1352_v58 = vld [vmem:[%s7289_s15 + $0x8] sm:$0xff] }
 0x4a3   : > { %v5676_v60 = vpop.eup %5675  ;;  %v1249_v61 = vmul.f32 1.442695, %v1248_v59  ;;  %v1351_v59 = vld [vmem:[%s7289_s15] sm:$0xff] }
 0x4a4   : > { %v1162_v62 = vsel %vm955_vm1, %v5676_v60, 0.0 }
 0x4a5   : > { %5677 = vpow2.f32 %v1249_v61  ;;  %1163 = vadd.xlane.f32.xlu2 %v1162_v62 }
 0x4a8   : > { %v1053_v63 = vpop.xlane.xlu2 %1052 }
 0x4a9   : > { %5679 = vrcp.f32 %v1053_v63 }
 0x4ab   : > { %v5678_v0 = vpop.eup %5677 }
 0x4ac   : > { %v1251_v1 = vsel %vm955_vm1, %v5678_v0, 0.0 }
 0x4ad   : > { %1252 = vadd.xlane.f32.xlu0 %v1251_v1 }
 0x4af   : > { %v5680_v2 = vpop.eup %5679 }
 0x4b0   : > { %v1257_v3 = vpop.permute.xlu1 %1256  ;;  %v1055_v4 = vmul.f32 %v5680_v2, %v5674_v53 }
 0x4b1   : > { %1277 = vmatpush.msrb.mxu0 %v1257_v3 }
 0x4b2   : > { %5234 = vmatmul.msk.f32.vlgmr.msrb.gmra.mxu2 %vm955_vm1, %v1055_v4 }
 0x4b3   : > { %1491 = vmatpush.msra.mxu0 %v5250_v6 }
 0x4b5   : > { %1492 = vmatpush.msra.mxu0 %v5249_v7 }
 0x4b7   : > { %1493 = vmatpush.msra.mxu0 %v5248_v8 }
 0x4b9   : > { %1494 = vmatpush.msra.mxu0 %v5247_v10 }
 0x4bd   : > { %1167 = vrot.lane.b32.xlu2 %v6071_v16, %s7328_s4  ;;  %s7387_s4 = sld [smem:[#allocation23_spill]] }
 0x4c1   : > { %1462 = vperm.xlu0 %5572, %v1459_v5  }
 0x518   : > { %v1164_v11 = vpop.xlane.xlu2 %1163 }
 0x519   : > { %5681 = vrcp.f32 %v1164_v11  ;;  %v5619_v11 = vld [vmem:[%s7287_s13] ss:$0 sm:$0xff] }
 0x51f   : > { %v5682_v12 = vpop.eup %5681 }
 0x520   : > { %v1166_v14 = vmul.f32 %v5682_v12, %v5676_v60  ;;  %v1168_v15 = vpop.permute.xlu2 %1167  ;;  %v1253_v16 = vpop.xlane.xlu0 %1252 }
 0x521   : > { %5683 = vrcp.f32 %v1253_v16  ;;  %1188 = vmatpush.msra.mxu2 %v1168_v15  ;;  %v5620_v15 = vld [vmem:[%s7288_s14] ss:$0 sm:$0xff] }
 0x522   : > { %5239 = vmatmul.msk.f32.vlgmr.msra.gmra.mxu2 %vm955_vm1, %v1166_v14  ;;  %5685 = vrcp.f32 %v5868_v41 }
 0x523   : > { %1300 = vmatpush.msrb.mxu2 %v948_v24  ;;  %v1396_v24 = vld [vmem:[%s7291_s17 + $0x28] sm:$0xff] }
 0x527   : > { %v5684_v17 = vpop.eup %5683 }
 0x528   : > { %v1255_v18 = vmul.f32 %v5684_v17, %v5678_v0  ;;  %v5686_v42 = vpop.eup %5685 }
 0x529   : > { %v1318_v43 = vmul.f32 32.0, %v5686_v42  ;;  %vm1322_vm2 = vweird.f32 %v5686_v42 }
 0x52a   : > { %5243 = vmatmul.msk.f32.vlgmr.msrb.gmra.mxu0 %vm955_vm1, %v1255_v18 }
 0x533   : > { %v1463_v20 = vpop.permute.xlu0 %1462 }
 0x534   : > { %v6146_v21 = vmul.f32 %v1463_v20, %v1458_v19  ;;  %v1398_v20 = vld [vmem:[%s7291_s17 + $0x38] sm:$0xff] }
 0x535   : > { %v1079_v22 = vpop.f32.mrf.mxu2  ;;  %1415 = vmatpush.msra.mxu3 %v1398_v20 }
 0x536   : > { %5235 = vmatmul.msk.f32.vlgmr.msrb.gmra.mxu1 %vm955_vm1, %v1079_v22  ;;  %5252 = vmatmul.msk.f32.vlgmr.msra.gmra.mxu0 %vm921_vm0, %v6146_v21  ;;  %v1397_v22 = vld [vmem:[%s7291_s17 + $0x30] sm:$0xff] }
 0x537   : > { %1374 = vmatpush.msrb.mxu1 %v1354_v56  ;;  %1416 = vmatpush.msra.mxu3 %v1397_v22 }
 0x539   : > { %1375 = vmatpush.msrb.mxu1 %v1353_v57  ;;  %1417 = vmatpush.msra.mxu3 %v1396_v24 }
 0x53b   : > { %1376 = vmatpush.msrb.mxu1 %v1352_v58 }
 0x53d   : > { %1377 = vmatpush.msrb.mxu1 %v1351_v59 }
 0x5a5   : > { %v1190_v25 = vpop.f32.mrf.mxu2 }
 0x5a6   : > { %5240 = vmatmul.msk.f32.vlgmr.msra.gmra.mxu1 %vm955_vm1, %v1190_v25  ;;  %v1395_v25 = vld [vmem:[%s7291_s17 + $0x20] sm:$0xff] }
 0x5a7   : > { %v1279_v26 = vpop.f32.mrf.mxu0  ;;  %1418 = vmatpush.msra.mxu3 %v1395_v25  ;;  %v5254_v25 = vld [vmem:[%s7370_s9 + $0x28] sm:$0xff] }
 0x5a8   : > { %5244 = vmatmul.msk.f32.vlgmr.msrb.gmra.mxu2 %vm955_vm1, %v1279_v26  ;;  %v1394_v26 = vld [vmem:[%s7291_s17 + $0x18] sm:$0xff] }
 0x5a9   : > { %1419 = vmatpush.msra.mxu3 %v1394_v26  ;;  %v5255_v26 = vld [vmem:[%s7370_s9 + $0x30] sm:$0xff] }
 0x5b3   : > { %v1496_v28 = vpop.f32.mrf.mxu0  ;;  %v1102_v30 = vpop.f32.mrf.mxu1 }
 0x5b4   : > { %v6162_v29 = vadd.f32 %v5617_v27, %v1496_v28  ;;  %v1126_v32 = vadd.f32 %v6109_v44, %v1102_v30  ;;  %v1319_v44 = vsub.f32 1.0, %v1318_v43  ;;  %v1393_v27 = vld [vmem:[%s7291_s17 + $0x10] sm:$0xff]  ;;  %v1392_v30 = vld [vmem:[%s7291_s17 + $0x8] sm:$0xff] }
 0x5b5   : > { %1420 = vmatpush.msra.mxu3 %v1393_v27 }
 0x5b6   : > { %1508 = vrot.lane.b32.xlu1 %v6162_v29, %s7373_s28  ;;  %v1320_v45 = vmul.f32 %v5686_v42, %v1319_v44 }
 0x5b7   : > { %1421 = vmatpush.msra.mxu3 %v1392_v30 }
 0x5b8   : > { %v1321_v46 = vadd.f32 %v5686_v42, %v1320_v45 }
 0x5ba   : > { %v6178_v47 = vsel %vm1322_vm2, %v5686_v42, %v1321_v46 }
 0x623   : > { %v1213_v31 = vpop.f32.mrf.mxu1 }
 0x624   : > { %v1216_v34 = vadd.f32 %v1213_v31, %v1126_v32  ;;  %v1391_v32 = vld [vmem:[%s7291_s17] sm:$0xff] }
 0x625   : > { %1422 = vmatpush.msra.mxu3 %v1391_v32 }
 0x628   : > { %v1509_v33 = vpop.permute.xlu1 %1508 }
 0x629   : > { %5257 = vmatpush.xpose.msk.msra.mxu2 %vm955_vm1, %v1509_v33  ;;  %v5253_v33 = vld [vmem:[%s7370_s9 + $0x20] sm:$0xff] }
 0x62a   : > { %1682 = vmatpush.msrb.mxu3 %v5253_v33  ;;  %v5256_v33 = vld [vmem:[%s7370_s9 + $0x38] sm:$0xff] }
 0x62b   : > { %v1302_v36 = vpop.f32.mrf.mxu2 }
 0x62c   : > { %v1305_v37 = vadd.f32 %v1302_v36, %v1216_v34  ;;  %5258 = vmatmul.msk.f32.vlgmr.msra.gmra.mxu2 %vm955_vm1, %v6162_v29 }
 0x62e   : > { %v1310_v38 = vadd.f32 %v5618_v35, %v1305_v37  ;;  %v5621_v35 = vld [vmem:[%s7290_s16] ss:$0 sm:$0xff] }
 0x630   : > { %v6174_v39 = vadd.f32 %v1310_v38, %v6064_v13 }
 0x632   : > { %v1314_v40 = vsel %vm921_vm0, %v6174_v39, 0.0 }
 0x633   : > { %1315 = vadd.xlane.f32.xlu0 %v1314_v40 }
 0x6a6   : > { %v1316_v48 = vpop.xlane.xlu0 %1315 }
 0x6a7   : > { %v1324_v49 = vmul.f32 %v6178_v47, %v1316_v48 }
 0x6a9   : > { %v1325_v13 = vsub.f32 %v6174_v39, %v1324_v49 }
 0x6ab   : > { %v1326_v50 = vmul.f32 %v1325_v13, %v1325_v13 }
 0x6ad   : > { %v1327_v52 = vsel %vm921_vm0, %v1326_v50, 0.0 }
 0x6ae   : > { %1328 = vadd.xlane.f32.xlu1 %v1327_v52 }
 0x6af   : > { %v1531_v53 = vpop.f32.mrf.mxu2 }
 0x6b0   : > { %v1532_v54 = vadd.f32 %v6183_v51, %v1531_v53 }
 0x6b2   : > { %v1535_v55 = vsel %vm1534_vm3, %v1532_v54, -inf }
 0x6b3   : > { %1536 = vmax.xlane.f32.xlu2 %v1535_v55 }
 0x6c7   : > { %1577 = vrot.lane.b32.xlu1 %v6162_v29, %s7374_s2 }
 0x6cb   : > { %1546 = vrot.lane.b32.xlu2 %v6162_v29, %s7375_s8 }
 0x6cf   : > { %1689 = vrot.lane.b32.xlu1 %v6162_v29, %s7376_s5 }
 0x6d3   : > { %1779 = vrot.lane.b32.xlu2 %v6162_v29, %s7377_s22 }
 0x6db   : > { %1687 = vrot.lane.b32.xlu2 %v6162_v29, %s7378_s24 }
 0x721   : > { %v1329_v60 = vpop.xlane.xlu1 %1328 }
 0x722   : > { %v1330_v61 = vmul.f32 %v1329_v60, %v6178_v47 }
 0x724   : > { %v1331_v62 = vadd.f32 1e-06, %v1330_v61 }
 0x726   : > { %5687 = vrsqrt.f32 %v1331_v62  ;;  %v1537_v63 = vpop.xlane.xlu2 %1536  ;;  %vm1338_vm6 = vweird.f32 %v1331_v62 }
 0x727   : > { %v1538_v0 = vsub.f32 %v1532_v54, %v1537_v63 }
 0x729   : > { %v1539_v1 = vmul.f32 1.442695, %v1538_v0 }
 0x72b   : > { %5689 = vpow2.f32 %v1539_v1 }
 0x72c   : > { %v5688_v2 = vpop.eup %5687 }
 0x72d   : > { %v1333_v3 = vmul.f32 %v5688_v2, %v1331_v62  ;;  %vm1339_vm5 = vweird.f32 %v5688_v2 }
 0x72e   : > { %v1547_v4 = vpop.permute.xlu2 %1546  ;;  %vm1340_vm7 = vmor %vm1338_vm6, %vm1339_vm5 }
 0x72f   : > { %v1334_v5 = vmul.f32 %v5688_v2, %v1333_v3  ;;  %5259 = vmatpush.msk.msra.mxu1 %vm1552_vm4, %v1547_v4 }
 0x731   : > { %v5690_v6 = vpop.eup %5689  ;;  %v1335_v7 = vmul.f32 0.5, %v1334_v5 }
 0x732   : > { %v1541_v8 = vsel %vm1534_vm3, %v5690_v6, 0.0 }
 0x733   : > { %v1336_v9 = vsub.f32 1.5, %v1335_v7  ;;  %1542 = vadd.xlane.f32.xlu0 %v1541_v8 }
 0x735   : > { %v1337_v10 = vmul.f32 %v5688_v2, %v1336_v9 }
 0x736   : > { %v1780_v34 = vpop.permute.xlu2 %1779 }
 0x737   : > { %v1341_v12 = vsel %vm1340_vm7, %v5688_v2, %v1337_v10 }
 0x738   : > { %v1342_v14 = vmul.f32 %v1341_v12, %v1325_v13 }
 0x739   : > { %v1578_v16 = vpop.permute.xlu1 %1577 }
 0x73a   : > { %v1346_v17 = vmul.f32 %v5619_v11, %v1342_v14  ;;  %5261 = vmatpush.xpose.msk.msrb.mxu0 %vm955_vm1, %v1578_v16 }
 0x73c   : > { %v1350_v18 = vadd.f32 %v5620_v15, %v1346_v17 }
 0x73e   : > { %5245 = vmatmul.msk.f32.vlgmr.msrb.gmra.mxu1 %vm921_vm0, %v1350_v18  ;;  %v1688_v42 = vpop.permute.xlu2 %1687 }
 0x73f   : > { %1659 = vmatpush.msrb.mxu1 %v5254_v25 }
 0x741   : > { %v1690_v19 = vpop.permute.xlu1 %1689 }
 0x742   : > { %5267 = vmatpush.xpose.msk.msra.mxu0 %vm955_vm1, %v1690_v19 }
 0x747   : > { %1575 = vrot.lane.b32.xlu0 %v6162_v29, %s7379_s7 }
 0x74f   : > { %1777 = vrot.lane.b32.xlu0 %v6162_v29, %s7380_s10 }
 0x7a6   : > { %v1543_v23 = vpop.xlane.xlu0 %1542 }
 0x7a7   : > { %5691 = vrcp.f32 %v1543_v23 }
 0x7ad   : > { %v5692_v28 = vpop.eup %5691 }
 0x7ae   : > { %v1545_v31 = vmul.f32 %v5692_v28, %v5690_v6 }
 0x7b0   : > { %5260 = vmatmul.msk.f32.vlgmr.msra.gmra.mxu1 %vm1548_vm8, %v1545_v31 }
 0x7b1   : > { %1771 = vmatpush.msra.mxu1 %v5255_v26 }
 0x7b9   : > { %v1576_v36 = vpop.permute.xlu0 %1575 }
 0x7ba   : > { %5262 = vmatmul.msk.f32.vlgmr.msrb.gmra.mxu0 %vm955_vm1, %v1576_v36 }
 0x7bb   : > { %v1379_v37 = vpop.f32.mrf.mxu1 }
 0x7bc   : > { %v1380_v38 = vadd.f32 %v5621_v35, %v1379_v37 }
 0x7be   : > { %v1383_v40 = vmul.f32 0.044715, %v1380_v38  ;;  %v1382_v48 = vmul.f32 0.5, %v1380_v38 }
 0x7c0   : > { %v1384_v41 = vmul.f32 %v1383_v40, %v1380_v38  ;;  %v5623_v40 = vld [vmem:[%s7286_s12 + $0x1] ss:$0 sm:$0xff] }
 0x7c1   : > { %v1778_v52 = vpop.permute.xlu0 %1777 }
 0x7c2   : > { %v1385_v43 = vmul.f32 %v1384_v41, %v1380_v38  ;;  %5268 = vmatmul.msk.f32.vlgmr.msra.gmra.mxu0 %vm955_vm1, %v1688_v42 }
 0x7c4   : > { %v1386_v44 = vadd.f32 %v1385_v43, %v1380_v38 }
 0x7c6   : > { %v1387_v45 = vmul.f32 0.7978846, %v1386_v44 }
 0x7c8   : > { %5693 = vtanh.f32 %v1387_v45 }
 0x7ce   : > { %v5694_v46 = vpop.eup %5693 }
 0x7cf   : > { %v1389_v49 = vadd.f32 1.0, %v5694_v46 }
 0x7d1   : > { %v1390_v13 = vmul.f32 %v1389_v49, %v1382_v48 }
 0x7d3   : > { %5246 = vmatmul.msk.f32.vlgmr.msra.gmra.mxu3 %vm1403_vm9, %v1390_v13 }
 0x7d4   : > { %5272 = vmatpush.xpose.msk.msra.mxu3 %vm955_vm1, %v1780_v34 }
 0x82d   : > { %v1572_v50 = vpop.f32.mrf.mxu1 }
 0x82e   : > { %5266 = vmatmul.msk.f32.vlgmr.msrb.gmra.mxu3 %vm955_vm1, %v1572_v50 }
 0x836   : > { %5273 = vmatmul.msk.f32.vlgmr.msra.gmra.mxu3 %vm955_vm1, %v1778_v52  ;;  %v5283_v52 = vld [vmem:[%s7289_s15 + $0x38] sm:$0xff] }
 0x837   : > { %v1600_v53 = vpop.f32.mrf.mxu0 }
 0x838   : > { %v1601_v54 = vadd.f32 %v6183_v51, %v1600_v53  ;;  %v5281_v53 = vld [vmem:[%s7289_s15 + $0x28] sm:$0xff] }
 0x83a   : > { %v1603_v55 = vsel %vm1534_vm3, %v1601_v54, -inf }
 0x83b   : > { %1604 = vmax.xlane.f32.xlu0 %v1603_v55 }
 0x83f   : > { %v1712_v56 = vpop.f32.mrf.mxu0 }
 0x840   : > { %v1713_v57 = vadd.f32 %v6183_v51, %v1712_v56 }
 0x842   : > { %v1715_v58 = vsel %vm1534_vm3, %v1713_v57, -inf }
 0x843   : > { %1716 = vmax.xlane.f32.xlu1 %v1715_v58 }
 0x856   : > { %v6267_v59 = vpop.f32.mrf.mxu3 }
 0x8ae   : > { %v1605_v60 = vpop.xlane.xlu0 %1604 }
 0x8af   : > { %v1606_v61 = vsub.f32 %v1601_v54, %v1605_v60  ;;  %v5280_v54 = vld [vmem:[%s7289_s15 + $0x20] sm:$0xff] }
 0x8b1   : > { %v1607_v62 = vmul.f32 1.442695, %v1606_v61  ;;  %v1684_v63 = vpop.f32.mrf.mxu3 }
 0x8b3   : > { %5695 = vpow2.f32 %v1607_v62 }
 0x8b6   : > { %v1717_v0 = vpop.xlane.xlu1 %1716 }
 0x8b7   : > { %v1718_v1 = vsub.f32 %v1713_v57, %v1717_v0 }
 0x8b9   : > { %v5696_v2 = vpop.eup %5695  ;;  %v1719_v3 = vmul.f32 1.442695, %v1718_v1  ;;  %v1802_v4 = vpop.f32.mrf.mxu3  ;;  %v5624_v1 = vld [vmem:[%s7287_s13 + $0x1] ss:$0 sm:$0xff] }
 0x8ba   : > { %v1803_v5 = vadd.f32 %v6183_v51, %v1802_v4  ;;  %v1609_v6 = vsel %vm1534_vm3, %v5696_v2, 0.0  ;;  %v5625_v4 = vld [vmem:[%s7288_s14 + $0x1] ss:$0 sm:$0xff] }
 0x8bb   : > { %5697 = vpow2.f32 %v1719_v3  ;;  %1610 = vadd.xlane.f32.xlu0 %v1609_v6 }
 0x8bc   : > { %v1805_v7 = vsel %vm1534_vm3, %v1803_v5, -inf }
 0x8bd   : > { %1806 = vmax.xlane.f32.xlu2 %v1805_v7  ;;  %v5293_v7 = vld [vmem:[%s7291_s17 + $0x78] sm:$0xff] }
 0x8be   : > { %1976 = vmatpush.msrb.mxu3 %v5293_v7 }
 0x8c1   : > { %v5698_v8 = vpop.eup %5697 }
 0x8c2   : > { %v1721_v9 = vsel %vm1534_vm3, %v5698_v8, 0.0 }
 0x8c3   : > { %1722 = vadd.xlane.f32.xlu1 %v1721_v9  ;;  %v5291_v9 = vld [vmem:[%s7291_s17 + $0x68] sm:$0xff] }
 0x8d5   : > { %1614 = vrot.lane.b32.xlu2 %v6162_v29, %s7381_s27 }
 0x8dc   : > { %1726 = vrot.lane.b32.xlu1 %v6162_v29, %s7382_s1 }
 0x92e   : > { %v1611_v10 = vpop.xlane.xlu0 %1610 }
 0x92f   : > { %5699 = vrcp.f32 %v1611_v10  ;;  %v5290_v10 = vld [vmem:[%s7291_s17 + $0x60] sm:$0xff] }
 0x930   : > { %v1807_v11 = vpop.xlane.xlu2 %1806 }
 0x931   : > { %v1808_v12 = vsub.f32 %v1803_v5, %v1807_v11  ;;  %v5289_v11 = vld [vmem:[%s7291_s17 + $0x58] sm:$0xff] }
 0x933   : > { %v1809_v14 = vmul.f32 1.442695, %v1808_v12  ;;  %v5288_v12 = vld [vmem:[%s7291_s17 + $0x50] sm:$0xff] }
 0x935   : > { %v5700_v15 = vpop.eup %5699  ;;  %5701 = vpow2.f32 %v1809_v14  ;;  %v5287_v14 = vld [vmem:[%s7291_s17 + $0x48] sm:$0xff] }
 0x936   : > { %v1613_v16 = vmul.f32 %v5700_v15, %v5696_v2  ;;  %v1723_v20 = vpop.xlane.xlu1 %1722  ;;  %v5286_v15 = vld [vmem:[%s7291_s17 + $0x40] sm:$0xff] }
 0x937   : > { %5703 = vrcp.f32 %v1723_v20 }
 0x938   : > { %v1615_v17 = vpop.permute.xlu2 %1614 }
 0x939   : > { %5263 = vmatpush.msk.msrb.mxu2 %vm1552_vm4, %v1615_v17 }
 0x93a   : > { %5264 = vmatmul.msk.f32.vlgmr.msrb.gmra.mxu2 %vm1548_vm8, %v1613_v16  ;;  %v5626_v16 = vld [vmem:[%s7290_s16 + $0x1] ss:$0 sm:$0xff] }
 0x93b   : > { %v5702_v18 = vpop.eup %5701 }
 0x93c   : > { %v1811_v19 = vsel %vm1534_vm3, %v5702_v18, 0.0 }
 0x93d   : > { %1812 = vadd.xlane.f32.xlu0 %v1811_v19  ;;  %v5704_v22 = vpop.eup %5703 }
 0x93e   : > { %v1725_v23 = vmul.f32 %v5704_v22, %v5698_v8  ;;  %v5292_v8 = vld [vmem:[%s7291_s17 + $0x70] sm:$0xff] }
 0x93f   : > { %1977 = vmatpush.msrb.mxu3 %v5292_v8 }
 0x941   : > { %1978 = vmatpush.msrb.mxu3 %v5291_v9 }
 0x943   : > { %1979 = vmatpush.msrb.mxu3 %v5290_v10 }
 0x945   : > { %1980 = vmatpush.msrb.mxu3 %v5289_v11 }
 0x947   : > { %1981 = vmatpush.msrb.mxu3 %v5288_v12 }
 0x949   : > { %1982 = vmatpush.msrb.mxu3 %v5287_v14 }
 0x94b   : > { %1983 = vmatpush.msrb.mxu3 %v5286_v15 }
 0x94e   : > { %v1727_v24 = vpop.permute.xlu1 %1726 }
 0x94f   : > { %5269 = vmatpush.msk.msra.mxu2 %vm1552_vm4, %v1727_v24 }
 0x950   : > { %5270 = vmatmul.msk.f32.vlgmr.msra.gmra.mxu2 %vm1548_vm8, %v1725_v23 }
 0x951   : > { %1816 = vrot.lane.b32.xlu0 %v6162_v29, %s7383_s30  ;;  %1861 = vmatpush.msrb.mxu2 %v5256_v33 }
 0x9b0   : > { %v1813_v27 = vpop.xlane.xlu0 %1812 }
 0x9b1   : > { %5705 = vrcp.f32 %v1813_v27 }
 0x9b7   : > { %v5706_v30 = vpop.eup %5705 }
 0x9b8   : > { %v1815_v31 = vmul.f32 %v5706_v30, %v5702_v18  ;;  %v5627_v30 = vld [vmem:[%s7292_s18 + $0x1] ss:$0 sm:$0xff] }
 0x9bd   : > { %v1638_v28 = vpop.f32.mrf.mxu2 }
 0x9be   : > { %5265 = vmatmul.msk.f32.vlgmr.msrb.gmra.mxu1 %vm955_vm1, %v1638_v28 }
 0x9bf   : > { %1934 = vmatpush.msrb.mxu1 %v5283_v52 }
 0x9c3   : > { %v1817_v32 = vpop.permute.xlu0 %1816 }
 0x9c4   : > { %5274 = vmatpush.msk.msrb.mxu0 %vm1552_vm4, %v1817_v32 }
 0x9c5   : > { %5275 = vmatmul.msk.f32.vlgmr.msrb.gmra.mxu0 %vm1548_vm8, %v1815_v31 }
 0x9d3   : > { %v1750_v29 = vpop.f32.mrf.mxu2 }
 0x9d4   : > { %5271 = vmatmul.msk.f32.vlgmr.msra.gmra.mxu1 %vm955_vm1, %v1750_v29 }
 0xa3b   : > { %v1661_v35 = vpop.f32.mrf.mxu1 }
 0xa3c   : > { %v1685_v37 = vadd.f32 %v1684_v63, %v1661_v35 }
 0xa42   : > { %v1840_v34 = vpop.f32.mrf.mxu0 }
 0xa43   : > { %5276 = vmatmul.msk.f32.vlgmr.msrb.gmra.mxu2 %vm955_vm1, %v1840_v34 }
 0xa51   : > { %v1773_v36 = vpop.f32.mrf.mxu1 }
 0xa52   : > { %v1776_v38 = vadd.f32 %v1773_v36, %v1685_v37 }
 0xac6   : > { %v1863_v41 = vpop.f32.mrf.mxu2 }
 0xac7   : > { %v1866_v42 = vadd.f32 %v1863_v41, %v1776_v38  ;;  %v5300_v41 = vld [vmem:[%s7359_s0 + $0x50] sm:$0xff] }
 0xac9   : > { %v1872_v43 = vadd.f32 %v5623_v40, %v1866_v42  ;;  %v5301_v40 = vld [vmem:[%s7359_s0 + $0x58] sm:$0xff]  ;;  %v5299_v42 = vld [vmem:[%s7359_s0 + $0x48] sm:$0xff] }
 0xaca   : > { %2048 = vmatpush.msra.mxu0 %v5301_v40 }
 0xacb   : > { %v6302_v44 = vadd.f32 %v1872_v43, %v6146_v21  ;;  %v5282_v21 = vld [vmem:[%s7289_s15 + $0x30] sm:$0xff]  ;;  %v5298_v43 = vld [vmem:[%s7359_s0 + $0x40] sm:$0xff] }
 0xacc   : > { %1935 = vmatpush.msrb.mxu1 %v5282_v21  ;;  %2049 = vmatpush.msra.mxu0 %v5300_v41 }
 0xacd   : > { %v1879_v45 = vsel %vm1878_vm10, %v6302_v44, 0.0 }
 0xace   : > { %1880 = vadd.xlane.f32.xlu2 %v1879_v45  ;;  %1936 = vmatpush.msrb.mxu1 %v5281_v53  ;;  %v5628_v53 = vld [vmem:[%s7384_s6 + $0x2] ss:$0 sm:$0xff] }
 0xacf   : > { %2050 = vmatpush.msra.mxu0 %v5299_v42 }
 0xad0   : > { %1937 = vmatpush.msrb.mxu1 %v5280_v54 }
 0xad1   : > { %2051 = vmatpush.msra.mxu0 %v5298_v43 }
 0xb41   : > { %v1881_v46 = vpop.xlane.xlu2 %1880 }
 0xb42   : > { %v1882_v48 = vmul.f32 %v1881_v46, %v6178_v47 }
 0xb44   : > { %v1883_v49 = vsub.f32 %v6302_v44, %v1882_v48 }
 0xb46   : > { %v1884_v13 = vmul.f32 %v1883_v49, %v1883_v49 }
 0xb48   : > { %v1885_v50 = vsel %vm1878_vm10, %v1884_v13, 0.0 }
 0xb49   : > { %1886 = vadd.xlane.f32.xlu0 %v1885_v50 }
 0xbbc   : > { %v1887_v55 = vpop.xlane.xlu0 %1886 }
 0xbbd   : > { %v1888_v56 = vmul.f32 %v1887_v55, %v6178_v47 }
 0xbbf   : > { %v1889_v57 = vadd.f32 1e-06, %v1888_v56  ;;  %v5629_v56 = vld [vmem:[%s7385_s25 + $0x2] ss:$0 sm:$0xff] }
 0xbc1   : > { %5707 = vrsqrt.f32 %v1889_v57  ;;  %vm1896_vm12 = vweird.f32 %v1889_v57 }
 0xbc7   : > { %v5708_v58 = vpop.eup %5707 }
 0xbc8   : > { %v1891_v60 = vmul.f32 %v5708_v58, %v1889_v57  ;;  %vm1897_vm11 = vweird.f32 %v5708_v58 }
 0xbc9   : > { %vm1898_vm13 = vmor %vm1896_vm12, %vm1897_vm11 }
 0xbca   : > { %v1892_v61 = vmul.f32 %v5708_v58, %v1891_v60  ;;  %v5630_v60 = vld [vmem:[%s7369_s29 + $0x2] ss:$0 sm:$0xff] }
 0xbcc   : > { %v1893_v62 = vmul.f32 0.5, %v1892_v61 }
 0xbce   : > { %v1894_v63 = vsub.f32 1.5, %v1893_v62 }
 0xbd0   : > { %v1895_v0 = vmul.f32 %v5708_v58, %v1894_v63  ;;  %v5304_v63 = vld [vmem:[%s7370_s9 + $0x40] sm:$0xff] }
 0xbd1   : > { %2233 = vmatpush.msra.mxu3 %v5304_v63 }
 0xbd2   : > { %v1899_v2 = vsel %vm1898_vm13, %v5708_v58, %v1895_v0 }
 0xbd3   : > { %v1900_v3 = vmul.f32 %v1899_v2, %v1883_v49 }
 0xbd5   : > { %v1904_v5 = vmul.f32 %v5624_v1, %v1900_v3 }
 0xbd7   : > { %v1908_v6 = vadd.f32 %v5625_v4, %v1904_v5 }
 0xbd9   : > { %5285 = vmatmul.msk.f32.vlgmr.msrb.gmra.mxu1 %vm921_vm0, %v1908_v6 }
 0xc56   : > { %v1939_v17 = vpop.f32.mrf.mxu1 }
 0xc57   : > { %v1940_v18 = vadd.f32 %v5626_v16, %v1939_v17 }
 0xc59   : > { %v1943_v19 = vmul.f32 0.044715, %v1940_v18  ;;  %v1942_v26 = vmul.f32 0.5, %v1940_v18 }
 0xc5b   : > { %v1944_v20 = vmul.f32 %v1943_v19, %v1940_v18 }
 0xc5d   : > { %v1945_v22 = vmul.f32 %v1944_v20, %v1940_v18 }
 0xc5f   : > { %v1946_v23 = vadd.f32 %v1945_v22, %v1940_v18 }
 0xc61   : > { %v1947_v24 = vmul.f32 0.7978846, %v1946_v23 }
 0xc63   : > { %5709 = vtanh.f32 %v1947_v24 }
 0xc69   : > { %v5710_v25 = vpop.eup %5709 }
 0xc6a   : > { %v1949_v27 = vadd.f32 1.0, %v5710_v25 }
 0xc6c   : > { %v1950_v28 = vmul.f32 %v1949_v27, %v1942_v26 }
 0xc6e   : > { %5295 = vmatmul.msk.f32.vlgmr.msrb.gmra.mxu3 %vm1403_vm9, %v1950_v28 }
 0xcf1   : > { %v1985_v31 = vpop.f32.mrf.mxu3 }
 0xcf2   : > { %v1986_v32 = vadd.f32 %v5627_v30, %v1985_v31 }
 0xcf4   : > { %v6361_v29 = vadd.f32 %v1986_v32, %v6302_v44 }
 0xcf6   : > { %v1993_v33 = vsel %vm1878_vm10, %v6361_v29, 0.0 }
 0xcf7   : > { %1994 = vadd.xlane.f32.xlu1 %v1993_v33 }
 0xd6a   : > { %v1995_v34 = vpop.xlane.xlu1 %1994 }
 0xd6b   : > { %v1996_v35 = vmul.f32 %v1995_v34, %v6178_v47 }
 0xd6d   : > { %v1997_v36 = vsub.f32 %v6361_v29, %v1996_v35 }
 0xd6f   : > { %v1998_v37 = vmul.f32 %v1997_v36, %v1997_v36 }
 0xd71   : > { %v1999_v38 = vsel %vm1878_vm10, %v1998_v37, 0.0 }
 0xd72   : > { %2000 = vadd.xlane.f32.xlu2 %v1999_v38 }
 0xde5   : > { %v2001_v44 = vpop.xlane.xlu2 %2000 }
 0xde6   : > { %v2002_v45 = vmul.f32 %v2001_v44, %v6178_v47 }
 0xde8   : > { %v2003_v46 = vadd.f32 1e-06, %v2002_v45 }
 0xdea   : > { %5711 = vrsqrt.f32 %v2003_v46  ;;  %vm2010_vm15 = vweird.f32 %v2003_v46 }
 0xdf0   : > { %v5712_v48 = vpop.eup %5711 }
 0xdf1   : > { %v2005_v49 = vmul.f32 %v5712_v48, %v2003_v46  ;;  %vm2011_vm14 = vweird.f32 %v5712_v48 }
 0xdf2   : > { %vm2012_vm2 = vmor %vm2010_vm15, %vm2011_vm14 }
 0xdf3   : > { %v2006_v13 = vmul.f32 %v5712_v48, %v2005_v49 }
 0xdf5   : > { %v2007_v50 = vmul.f32 0.5, %v2006_v13 }
 0xdf7   : > { %v2008_v52 = vsub.f32 1.5, %v2007_v50 }
 0xdf9   : > { %v2009_v21 = vmul.f32 %v5712_v48, %v2008_v52 }
 0xdfb   : > { %v2013_v54 = vsel %vm2012_vm2, %v5712_v48, %v2009_v21  ;;  %vm2669_vm2 = vcmask 62464  }
 0xdfc   : > { %v2014_v55 = vmul.f32 %v2013_v54, %v1997_v36 }
 0xdfe   : > { %v2018_v57 = vmul.f32 %v5628_v53, %v2014_v55 }
 0xe00   : > { %v2022_v58 = vadd.f32 %v5629_v56, %v2018_v57  ;;  %v5622_v56 = vld [vmem:[%s7292_s18] ss:$0 sm:$0xff] }
 0xe01   : > { %v1425_v57 = vadd.f32 %v5622_v56, %v6267_v59 }
 0xe02   : > { %5303 = vmatmul.msk.f32.vlgmr.msra.gmra.mxu0 %vm921_vm0, %v2022_v58 }
 0xe03   : > { %v6451_v58 = vadd.f32 %v1425_v57, %v6174_v39 }
 0xe7f   : > { %v2053_v61 = vpop.f32.mrf.mxu0 }
 0xe80   : > { %v6391_v62 = vadd.f32 %v5630_v60, %v2053_v61  ;;  %v1428_v60 = vsel %vm921_vm0, %v6451_v58, 0.0  ;;  %v5305_v61 = vld [vmem:[%s7370_s9 + $0x48] sm:$0xff] }
 0xe82   : > { %2062 = vrot.lane.b32.xlu0 %v6391_v62, %s7373_s28 }
 0xe8a   : > { %2126 = vrot.lane.b32.xlu0 %v6391_v62, %s7379_s7 }
 0xe92   : > { %2330 = vrot.lane.b32.xlu0 %v6391_v62, %s7377_s22 }
 0xe9a   : > { %2238 = vrot.lane.b32.xlu0 %v6391_v62, %s7378_s24 }
 0xef4   : > { %v2063_v0 = vpop.permute.xlu0 %2062 }
 0xef5   : > { %5308 = vmatpush.xpose.msk.msra.mxu2 %vm955_vm1, %v2063_v0 }
 0xef8   : > { %5309 = vmatmul.msk.f32.vlgmr.msra.gmra.mxu2 %vm955_vm1, %v6391_v62 }
 0xefc   : > { %v2127_v1 = vpop.permute.xlu0 %2126 }
 0xf04   : > { %v2331_v2 = vpop.permute.xlu0 %2330 }
 0xf05   : > { %5323 = vmatpush.xpose.msk.msrb.mxu3 %vm955_vm1, %v2331_v2 }
 0xf0c   : > { %v2239_v18 = vpop.permute.xlu0 %2238 }
 0xf7b   : > { %v2085_v3 = vpop.f32.mrf.mxu2 }
 0xf7c   : > { %v2086_v4 = vadd.f32 %v6183_v51, %v2085_v3  ;;  %v5307_v3 = vld [vmem:[%s7370_s9 + $0x58] sm:$0xff] }
 0xf7e   : > { %v2088_v5 = vsel %vm1534_vm3, %v2086_v4, -inf }
 0xf7f   : > { %2089 = vmax.xlane.f32.xlu1 %v2088_v5 }
 0xf98   : > { %2099 = vrot.lane.b32.xlu1 %v6391_v62, %s7375_s8 }
 0xfa0   : > { %2240 = vrot.lane.b32.xlu1 %v6391_v62, %s7376_s5 }
 0xff2   : > { %v2090_v6 = vpop.xlane.xlu1 %2089 }
 0xff3   : > { %v2091_v7 = vsub.f32 %v2086_v4, %v2090_v6 }
 0xff5   : > { %v2092_v8 = vmul.f32 1.442695, %v2091_v7 }
 0xff7   : > { %5713 = vpow2.f32 %v2092_v8 }
 0xffd   : > { %v5714_v9 = vpop.eup %5713 }
 0xffe   : > { %v2094_v10 = vsel %vm1534_vm3, %v5714_v9, 0.0 }
 0xfff   : > { %2095 = vadd.xlane.f32.xlu2 %v2094_v10 }
0x100a   : > { %v2100_v11 = vpop.permute.xlu1 %2099 }
0x100b   : > { %5310 = vmatpush.msk.msra.mxu1 %vm1552_vm4, %v2100_v11 }
0x100d   : > { %2210 = vmatpush.msrb.mxu1 %v5305_v61 }
0x1012   : > { %v2241_v17 = vpop.permute.xlu1 %2240 }
0x1017   : > { %2128 = vrot.lane.b32.xlu2 %v6391_v62, %s7374_s2 }
0x101f   : > { %2328 = vrot.lane.b32.xlu2 %v6391_v62, %s7380_s10 }
0x1072   : > { %v2096_v12 = vpop.xlane.xlu2 %2095 }
0x1073   : > { %5715 = vrcp.f32 %v2096_v12 }
0x1079   : > { %v5716_v14 = vpop.eup %5715 }
0x107a   : > { %v2098_v15 = vmul.f32 %v5716_v14, %v5714_v9  ;;  %v2129_v16 = vpop.permute.xlu2 %2128  ;;  %v5631_v9 = vld [vmem:[%s7286_s12 + $0x2] ss:$0 sm:$0xff] }
0x107b   : > { %5312 = vmatpush.xpose.msk.msrb.mxu0 %vm955_vm1, %v2129_v16 }
0x107c   : > { %5311 = vmatmul.msk.f32.vlgmr.msra.gmra.mxu1 %vm1548_vm8, %v2098_v15 }
0x107e   : > { %5313 = vmatmul.msk.f32.vlgmr.msrb.gmra.mxu0 %vm955_vm1, %v2127_v1 }
0x107f   : > { %5318 = vmatpush.xpose.msk.msra.mxu0 %vm955_vm1, %v2241_v17 }
0x1082   : > { %v2329_v24 = vpop.permute.xlu2 %2328 }
0x1086   : > { %5319 = vmatmul.msk.f32.vlgmr.msra.gmra.mxu0 %vm955_vm1, %v2239_v18 }
0x10f9   : > { %v2123_v19 = vpop.f32.mrf.mxu1 }
0x10fa   : > { %5317 = vmatmul.msk.f32.vlgmr.msra.gmra.mxu3 %vm955_vm1, %v2123_v19 }
0x10fb   : > { %v2151_v20 = vpop.f32.mrf.mxu0 }
0x10fc   : > { %v2152_v22 = vadd.f32 %v6183_v51, %v2151_v20 }
0x10fe   : > { %v2154_v23 = vsel %vm1534_vm3, %v2152_v22, -inf }
0x10ff   : > { %2155 = vmax.xlane.f32.xlu2 %v2154_v23  ;;  %v5332_v23 = vld [vmem:[%s7289_s15 + $0x48] sm:$0xff] }
0x1102   : > { %5324 = vmatmul.msk.f32.vlgmr.msrb.gmra.mxu3 %vm955_vm1, %v2329_v24  ;;  %v5331_v24 = vld [vmem:[%s7289_s15 + $0x40] sm:$0xff] }
0x1103   : > { %v2263_v25 = vpop.f32.mrf.mxu0 }
0x1104   : > { %v2264_v26 = vadd.f32 %v6183_v51, %v2263_v25 }
0x1106   : > { %v2266_v27 = vsel %vm1534_vm3, %v2264_v26, -inf }
0x1107   : > { %2267 = vmax.xlane.f32.xlu1 %v2266_v27 }
0x1172   : > { %v2156_v28 = vpop.xlane.xlu2 %2155 }
0x1173   : > { %v2157_v30 = vsub.f32 %v2152_v22, %v2156_v28  ;;  %v5334_v22 = vld [vmem:[%s7289_s15 + $0x58] sm:$0xff] }
0x1175   : > { %v2158_v31 = vmul.f32 1.442695, %v2157_v30 }
0x1177   : > { %5717 = vpow2.f32 %v2158_v31 }
0x117a   : > { %v2268_v32 = vpop.xlane.xlu1 %2267 }
0x117b   : > { %v2269_v33 = vsub.f32 %v2264_v26, %v2268_v32 }
0x117d   : > { %v5718_v34 = vpop.eup %5717  ;;  %v2270_v35 = vmul.f32 1.442695, %v2269_v33  ;;  %v2235_v36 = vpop.f32.mrf.mxu3 }
0x117e   : > { %v2160_v37 = vsel %vm1534_vm3, %v5718_v34, 0.0 }
0x117f   : > { %5719 = vpow2.f32 %v2270_v35  ;;  %2161 = vadd.xlane.f32.xlu2 %v2160_v37  ;;  %v5632_v35 = vld [vmem:[%s7287_s13 + $0x2] ss:$0 sm:$0xff] }
0x1185   : > { %v5720_v38 = vpop.eup %5719  ;;  %v2353_v40 = vpop.f32.mrf.mxu3 }
0x1186   : > { %v2354_v41 = vadd.f32 %v6183_v51, %v2353_v40  ;;  %v2272_v42 = vsel %vm1534_vm3, %v5720_v38, 0.0 }
0x1187   : > { %2273 = vadd.xlane.f32.xlu1 %v2272_v42  ;;  %v5344_v42 = vld [vmem:[%s7291_s17 + $0xb8] sm:$0xff] }
0x1188   : > { %v2356_v43 = vsel %vm1534_vm3, %v2354_v41, -inf  ;;  %2526 = vmatpush.msra.mxu3 %v5344_v42 }
0x1189   : > { %2357 = vmax.xlane.f32.xlu0 %v2356_v43  ;;  %v5343_v43 = vld [vmem:[%s7291_s17 + $0xb0] sm:$0xff] }
0x118a   : > { %2527 = vmatpush.msra.mxu3 %v5343_v43 }
0x119d   : > { %2165 = vrot.lane.b32.xlu0 %v6391_v62, %s7381_s27  ;;  %s7390_s27 = sld [smem:[#allocation9_spill]] }
0x11a0   : > { %2277 = vrot.lane.b32.xlu1 %v6391_v62, %s7382_s1 }
0x11f2   : > { %v2162_v48 = vpop.xlane.xlu2 %2161 }
0x11fa   : > { %v2274_v13 = vpop.xlane.xlu1 %2273 }
0x11fc   : > { %v2358_v44 = vpop.xlane.xlu0 %2357 }
0x11fd   : > { %v2359_v45 = vsub.f32 %v2354_v41, %v2358_v44  ;;  %v5342_v44 = vld [vmem:[%s7291_s17 + $0xa8] sm:$0xff] }
0x11fe   : > { %2528 = vmatpush.msra.mxu3 %v5342_v44 }
0x11ff   : > { %v2360_v46 = vmul.f32 1.442695, %v2359_v45  ;;  %v5341_v45 = vld [vmem:[%s7291_s17 + $0xa0] sm:$0xff] }
0x1200   : > { %2529 = vmatpush.msra.mxu3 %v5341_v45 }
0x1201   : > { %5721 = vpow2.f32 %v2360_v46  ;;  %v5340_v46 = vld [vmem:[%s7291_s17 + $0x98] sm:$0xff] }
0x1202   : > { %5723 = vrcp.f32 %v2162_v48  ;;  %v5339_v48 = vld [vmem:[%s7291_s17 + $0x90] sm:$0xff]  ;;  %2530 = vmatpush.msra.mxu3 %v5340_v46 }
0x1203   : > { %5725 = vrcp.f32 %v2274_v13  ;;  %v5634_v13 = vld [vmem:[%s7290_s16 + $0x2] ss:$0 sm:$0xff] }
0x1204   : > { %2531 = vmatpush.msra.mxu3 %v5339_v48 }
0x1207   : > { %v5722_v49 = vpop.eup %5721 }
0x1208   : > { %v2362_v51 = vsel %vm1534_vm3, %v5722_v49, 0.0  ;;  %v5724_v50 = vpop.eup %5723 }
0x1209   : > { %2363 = vadd.xlane.f32.xlu2 %v2362_v51  ;;  %v2164_v52 = vmul.f32 %v5724_v50, %v5718_v34  ;;  %v5726_v54 = vpop.eup %5725  ;;  %v5337_v51 = vld [vmem:[%s7291_s17 + $0x80] sm:$0xff] }
0x120a   : > { %v2276_v55 = vmul.f32 %v5726_v54, %v5720_v38  ;;  %v5633_v38 = vld [vmem:[%s7288_s14 + $0x2] ss:$0 sm:$0xff] }
0x120f   : > { %v2166_v21 = vpop.permute.xlu0 %2165 }
0x1210   : > { %5314 = vmatpush.msk.msrb.mxu2 %vm1552_vm4, %v2166_v21 }
0x1211   : > { %5315 = vmatmul.msk.f32.vlgmr.msrb.gmra.mxu2 %vm1548_vm8, %v2164_v52 }
0x1212   : > { %v2278_v53 = vpop.permute.xlu1 %2277 }
0x1213   : > { %5320 = vmatpush.msk.msra.mxu2 %vm1552_vm4, %v2278_v53 }
0x1215   : > { %2412 = vmatpush.msrb.mxu2 %v5307_v3  ;;  %v5350_v3 = vld [vmem:[%s7359_s0 + $0x78] sm:$0xff] }
0x1219   : > { %5321 = vmatmul.msk.f32.vlgmr.msra.gmra.mxu2 %vm1548_vm8, %v2276_v55 }
0x1221   : > { %2367 = vrot.lane.b32.xlu2 %v6391_v62, %s7383_s30  ;;  %v5306_v62 = vld [vmem:[%s7370_s9 + $0x50] sm:$0xff]  ;;  %s7386_s30 = sld [smem:[#allocation22_spill]] }
0x1222   : > { %2322 = vmatpush.msra.mxu1 %v5306_v62  ;;  %v5635_v62 = vld [vmem:[%s7292_s18 + $0x2] ss:$0 sm:$0xff] }
0x124a   : > { %1429 = vadd.xlane.f32.xlu2 %v1428_v60 }
0x127c   : > { %v2364_v63 = vpop.xlane.xlu2 %2363 }
0x127d   : > { %5727 = vrcp.f32 %v2364_v63 }
0x1283   : > { %v5728_v59 = vpop.eup %5727 }
0x1284   : > { %v2366_v0 = vmul.f32 %v5728_v59, %v5722_v49  ;;  %v2368_v39 = vpop.permute.xlu2 %2367  ;;  %v5338_v49 = vld [vmem:[%s7291_s17 + $0x88] sm:$0xff] }
0x1285   : > { %5325 = vmatpush.msk.msrb.mxu0 %vm1552_vm4, %v2368_v39  ;;  %2532 = vmatpush.msra.mxu3 %v5338_v49 }
0x1286   : > { %5326 = vmatmul.msk.f32.vlgmr.msrb.gmra.mxu0 %vm1548_vm8, %v2366_v0 }
0x1287   : > { %2533 = vmatpush.msra.mxu3 %v5337_v51  ;;  %2588 = vmatpush.msra.mxu0 %v5350_v3 }
0x1294   : > { %v2189_v1 = vpop.f32.mrf.mxu2 }
0x1295   : > { %5316 = vmatmul.msk.f32.vlgmr.msrb.gmra.mxu1 %vm955_vm1, %v2189_v1 }
0x1296   : > { %2484 = vmatpush.msrb.mxu1 %v5334_v22 }
0x129c   : > { %v2301_v2 = vpop.f32.mrf.mxu2 }
0x129d   : > { %5322 = vmatmul.msk.f32.vlgmr.msra.gmra.mxu1 %vm955_vm1, %v2301_v2  ;;  %v5349_v2 = vld [vmem:[%s7359_s0 + $0x70] sm:$0xff] }
0x129e   : > { %2589 = vmatpush.msra.mxu0 %v5349_v2 }
0x12bd   : > { %v1430_v59 = vpop.xlane.xlu2 %1429 }
0x12be   : > { %v1431_v39 = vmul.f32 %v1430_v59, %v6178_v47 }
0x1303   : > { %v2391_v4 = vpop.f32.mrf.mxu0 }
0x1304   : > { %5327 = vmatmul.msk.f32.vlgmr.msrb.gmra.mxu2 %vm955_vm1, %v2391_v4 }
0x1312   : > { %v2212_v5 = vpop.f32.mrf.mxu1 }
0x1313   : > { %v2236_v7 = vadd.f32 %v2235_v36, %v2212_v5  ;;  %v5573_v5 = vpack.i.bf16 %v5349_v2, %v5350_v3 }
0x1315   : > { %5574 = vrot.lane.b32.xlu2 %v5573_v5, %s7373_s28 }
0x131a   : > { %v2324_v6 = vpop.f32.mrf.mxu1 }
0x131b   : > { %v2327_v8 = vadd.f32 %v2324_v6, %v2236_v7  ;;  %v1432_v6 = vsub.f32 %v6451_v58, %v1431_v39  ;;  %v6589_v39 = vld [vmem:[%s7388_s21] ss:$0 sm:$0xff]  ;;  %s7393_s21 = sld [smem:[#allocation6_spill]] }
0x1387   : > { %v2414_v10 = vpop.f32.mrf.mxu2 }
0x1388   : > { %v2417_v11 = vadd.f32 %v2414_v10, %v2327_v8  ;;  %v5348_v8 = vld [vmem:[%s7359_s0 + $0x68] sm:$0xff]  ;;  %v1433_v10 = vmul.f32 %v1432_v6, %v1432_v6 }
0x1389   : > { %2590 = vmatpush.msra.mxu0 %v5348_v8 }
0x138a   : > { %v2423_v12 = vadd.f32 %v5631_v9, %v2417_v11  ;;  %v5347_v9 = vld [vmem:[%s7359_s0 + $0x60] sm:$0xff]  ;;  %v1434_v11 = vsel %vm921_vm0, %v1433_v10, 0.0 }
0x138b   : > { %2591 = vmatpush.msra.mxu0 %v5347_v9  ;;  %v5578_v58 = vpack.i.bf16 %v5347_v9, %v5348_v8 }
0x138c   : > { %v6473_v14 = vadd.f32 %v2423_v12, %v6361_v29  ;;  %v5333_v29 = vld [vmem:[%s7289_s15 + $0x50] sm:$0xff]  ;;  %v5575_v12 = vpop.permute.xlu2 %5574 }
0x138d   : > { %2485 = vmatpush.msrb.mxu1 %v5333_v29 }
0x138e   : > { %v2429_v15 = vsel %vm1878_vm10, %v6473_v14, 0.0 }
0x138f   : > { %2430 = vadd.xlane.f32.xlu0 %v2429_v15  ;;  %2486 = vmatpush.msrb.mxu1 %v5332_v23  ;;  %v5577_v15 = vunpack.i.h.bf16 %v5575_v12 }
0x1391   : > { %2487 = vmatpush.msrb.mxu1 %v5331_v24 }
0x1402   : > { %v2431_v16 = vpop.xlane.xlu0 %2430 }
0x1403   : > { %v2432_v17 = vmul.f32 %v2431_v16, %v6178_v47 }
0x1405   : > { %v2433_v18 = vsub.f32 %v6473_v14, %v2432_v17 }
0x1407   : > { %v2434_v19 = vmul.f32 %v2433_v18, %v2433_v18 }
0x1409   : > { %v2435_v20 = vsel %vm1878_vm10, %v2434_v19, 0.0 }
0x140a   : > { %2436 = vadd.xlane.f32.xlu1 %v2435_v20 }
0x147d   : > { %v2437_v25 = vpop.xlane.xlu1 %2436 }
0x147e   : > { %v2438_v26 = vmul.f32 %v2437_v25, %v6178_v47 }
0x1480   : > { %v2439_v27 = vadd.f32 1e-06, %v2438_v26 }
0x1482   : > { %5729 = vrsqrt.f32 %v2439_v27  ;;  %vm2446_vm5 = vweird.f32 %v2439_v27 }
0x1488   : > { %v5730_v28 = vpop.eup %5729 }
0x1489   : > { %v2441_v30 = vmul.f32 %v5730_v28, %v2439_v27  ;;  %vm2447_vm3 = vweird.f32 %v5730_v28 }
0x148a   : > { %vm2448_vm6 = vmor %vm2446_vm5, %vm2447_vm3 }
0x148b   : > { %v2442_v31 = vmul.f32 %v5730_v28, %v2441_v30 }
0x148d   : > { %v2443_v32 = vmul.f32 0.5, %v2442_v31 }
0x148f   : > { %v2444_v33 = vsub.f32 1.5, %v2443_v32 }
0x1491   : > { %v2445_v34 = vmul.f32 %v5730_v28, %v2444_v33 }
0x1493   : > { %v2449_v36 = vsel %vm2448_vm6, %v5730_v28, %v2445_v34  ;;  %v5636_v34 = vld [vmem:[%s7386_s30] ss:$0 sm:$0xff] }
0x1494   : > { %v2450_v37 = vmul.f32 %v2449_v36, %v2433_v18 }
0x1496   : > { %v2454_v40 = vmul.f32 %v5632_v35, %v2450_v37  ;;  %v5638_v35 = vld [vmem:[%s7369_s29 + $0x3] ss:$0 sm:$0xff]  ;;  %v5637_v37 = vld [vmem:[%s7387_s4] ss:$0 sm:$0xff] }
0x1498   : > { %v2458_v41 = vadd.f32 %v5633_v38, %v2454_v40 }
0x149a   : > { %5336 = vmatmul.msk.f32.vlgmr.msrb.gmra.mxu1 %vm921_vm0, %v2458_v41 }
0x1517   : > { %v2489_v50 = vpop.f32.mrf.mxu1 }
0x1518   : > { %v2490_v52 = vadd.f32 %v5634_v13, %v2489_v50 }
0x151a   : > { %v2493_v21 = vmul.f32 0.044715, %v2490_v52  ;;  %v2492_v60 = vmul.f32 0.5, %v2490_v52 }
0x151c   : > { %v2494_v53 = vmul.f32 %v2493_v21, %v2490_v52 }
0x151e   : > { %v2495_v54 = vmul.f32 %v2494_v53, %v2490_v52 }
0x1520   : > { %v2496_v55 = vadd.f32 %v2495_v54, %v2490_v52 }
0x1522   : > { %v2497_v56 = vmul.f32 0.7978846, %v2496_v55 }
0x1524   : > { %5731 = vtanh.f32 %v2497_v56 }
0x152a   : > { %v5732_v57 = vpop.eup %5731 }
0x152b   : > { %v2499_v61 = vadd.f32 1.0, %v5732_v57 }
0x152d   : > { %v2500_v63 = vmul.f32 %v2499_v61, %v2492_v60 }
0x152f   : > { %5346 = vmatmul.msk.f32.vlgmr.msra.gmra.mxu3 %vm1403_vm9, %v2500_v63 }
0x15b2   : > { %v2535_v0 = vpop.f32.mrf.mxu3 }
0x15b3   : > { %v2536_v1 = vadd.f32 %v5635_v62, %v2535_v0 }
0x15b5   : > { %v2538_v4 = vadd.f32 %v2536_v1, %v6473_v14  ;;  %v5576_v14 = vunpack.i.l.bf16 %v5575_v12 }
0x15b7   : > { %v2539_v7 = vsel %vm1878_vm10, %v2538_v4, 0.0  ;;  %2630 = vmatpush.msra.mxu2 %v5576_v14 }
0x15b8   : > { %2540 = vadd.xlane.f32.xlu0 %v2539_v7 }
0x15b9   : > { %2631 = vmatpush.msra.mxu2 %v5577_v15  ;;  %v5354_v15 = vld [vmem:[%s7370_s9 + $0x60] sm:$0xff] }
0x15c0   : > { %1435 = vadd.xlane.f32.xlu0 %v1434_v11 }
0x15d4   : > { %5579 = vrot.lane.b32.xlu0 %v5578_v58, %s7373_s28 }
0x162b   : > { %v2541_v16 = vpop.xlane.xlu0 %2540 }
0x162c   : > { %v2542_v17 = vmul.f32 %v2541_v16, %v6178_v47 }
0x162e   : > { %v2543_v18 = vsub.f32 %v2538_v4, %v2542_v17 }
0x1630   : > { %v2544_v19 = vmul.f32 %v2543_v18, %v2543_v18 }
0x1632   : > { %v2545_v20 = vsel %vm1878_vm10, %v2544_v19, 0.0 }
0x1633   : > { %2546 = vadd.xlane.f32.xlu1 %v2545_v20  ;;  %v1436_v22 = vpop.xlane.xlu0 %1435 }
0x1634   : > { %v1437_v29 = vmul.f32 %v1436_v22, %v6178_v47 }
0x1636   : > { %v1438_v23 = vadd.f32 1e-06, %v1437_v29 }
0x1638   : > { %5733 = vrsqrt.f32 %v1438_v23  ;;  %vm1445_vm11 = vweird.f32 %v1438_v23 }
0x163e   : > { %v5734_v24 = vpop.eup %5733 }
0x163f   : > { %v1440_v25 = vmul.f32 %v5734_v24, %v1438_v23  ;;  %vm1446_vm7 = vweird.f32 %v5734_v24 }
0x1640   : > { %vm1447_vm12 = vmor %vm1445_vm11, %vm1446_vm7 }
0x1641   : > { %v1441_v26 = vmul.f32 %v5734_v24, %v1440_v25 }
0x1643   : > { %v1442_v27 = vmul.f32 0.5, %v1441_v26 }
0x1645   : > { %v1443_v28 = vsub.f32 1.5, %v1442_v27 }
0x1646   : > { %v5580_v30 = vpop.permute.xlu0 %5579 }
0x1647   : > { %v1444_v31 = vmul.f32 %v5734_v24, %v1443_v28  ;;  %v5582_v32 = vunpack.i.h.bf16 %v5580_v30  ;;  %v5581_v33 = vunpack.i.l.bf16 %v5580_v30 }
0x1649   : > { %v1448_v36 = vsel %vm1447_vm12, %v5734_v24, %v1444_v31  ;;  %2632 = vmatpush.msra.mxu2 %v5581_v33 }
0x164a   : > { %v1449_v38 = vmul.f32 %v1448_v36, %v1432_v6 }
0x164b   : > { %2633 = vmatpush.msra.mxu2 %v5582_v32 }
0x164c   : > { %v1453_v40 = vmul.f32 %v5636_v34, %v1449_v38  ;;  %2612 = vrot.lane.b32.xlu1 %v5638_v35, %s7373_s28 }
0x164e   : > { %v6563_v41 = vadd.f32 %v5637_v37, %v1453_v40 }
0x1650   : > { %5353 = vmatmul.msk.f32.vlgmr.msra.gmra.mxu2 %vm921_vm0, %v6563_v41 }
0x16a6   : > { %v2547_v42 = vpop.xlane.xlu1 %2546 }
0x16a7   : > { %v2548_v43 = vmul.f32 %v2547_v42, %v6178_v47 }
0x16a9   : > { %v2549_v44 = vadd.f32 1e-06, %v2548_v43 }
0x16ab   : > { %5735 = vrsqrt.f32 %v2549_v44  ;;  %vm2556_vm14 = vweird.f32 %v2549_v44 }
0x16b1   : > { %v5736_v45 = vpop.eup %5735 }
0x16b2   : > { %v2551_v46 = vmul.f32 %v5736_v45, %v2549_v44  ;;  %vm2557_vm13 = vweird.f32 %v5736_v45 }
0x16b3   : > { %vm2558_vm15 = vmor %vm2556_vm14, %vm2557_vm13 }
0x16b4   : > { %v2552_v48 = vmul.f32 %v5736_v45, %v2551_v46 }
0x16b6   : > { %v2553_v49 = vmul.f32 0.5, %v2552_v48 }
0x16b8   : > { %v2554_v51 = vsub.f32 1.5, %v2553_v49 }
0x16ba   : > { %v2555_v13 = vmul.f32 %v5736_v45, %v2554_v51 }
0x16bc   : > { %v2559_v50 = vsel %vm2558_vm15, %v5736_v45, %v2555_v13 }
0x16bd   : > { %v2560_v52 = vmul.f32 %v2559_v50, %v2543_v18 }
0x16be   : > { %v2613_v54 = vpop.permute.xlu1 %2612 }
0x16bf   : > { %v2561_v21 = vmul.f32 %v5636_v34, %v2560_v52 }
0x16c1   : > { %v6568_v53 = vadd.f32 %v5637_v37, %v2561_v21  ;;  %v5355_v37 = vld [vmem:[%s7370_s9 + $0x68] sm:$0xff] }
0x16c2   : > { %2790 = vmatpush.msrb.mxu3 %v5355_v37  ;;  %v5642_v37 = vld [vmem:[%s7288_s14 + $0x3] ss:$0 sm:$0xff] }
0x16c3   : > { %5352 = vmatmul.msk.f32.vlgmr.msra.gmra.mxu0 %vm921_vm0, %v6568_v53 }
0x16d3   : > { %v2635_v55 = vpop.f32.mrf.mxu2 }
0x16d4   : > { %v6572_v56 = vadd.f32 %v2635_v55, %v2613_v54  ;;  %v5356_v54 = vld [vmem:[%s7370_s9 + $0x70] sm:$0xff] }
0x16d5   : > { %2901 = vmatpush.msra.mxu3 %v5356_v54 }
0x16d6   : > { %2681 = vrot.lane.b32.xlu1 %v6572_v56, %s7373_s28  ;;  %5358 = vmatpush.xpose.msk.msra.mxu1 %vm955_vm1, %v6572_v56 }
0x16de   : > { %2709 = vrot.lane.b32.xlu1 %v6572_v56, %s7379_s7 }
0x1740   : > { %v2593_v57 = vpop.f32.mrf.mxu0 }
0x1741   : > { %v2594_v60 = vadd.f32 %v5638_v35, %v2593_v57 }
0x1743   : > { %2707 = vrot.lane.b32.xlu1 %v2594_v60, %s7379_s7  ;;  %5359 = vmatmul.msk.f32.vlgmr.msra.gmra.mxu1 %vm955_vm1, %v2594_v60 }
0x1748   : > { %v2682_v61 = vpop.permute.xlu1 %2681 }
0x1749   : > { %2702 = vmatpush.msrb.mxu0 %v2682_v61 }
0x174b   : > { %2820 = vrot.lane.b32.xlu1 %v6572_v56, %s7378_s24  ;;  %2813 = vmatpush.msra.mxu0 %v5354_v15 }
0x1750   : > { %v2710_v63 = vpop.permute.xlu1 %2709 }
0x1751   : > { %5361 = vmatpush.xpose.msk.msrb.mxu2 %vm955_vm1, %v2710_v63 }
0x1753   : > { %2818 = vrot.lane.b32.xlu1 %v2594_v60, %s7378_s24 }
0x17b5   : > { %v2708_v62 = vpop.permute.xlu1 %2707 }
0x17b6   : > { %5362 = vmatmul.msk.f32.vlgmr.msrb.gmra.mxu2 %vm955_vm1, %v2708_v62 }
0x17bd   : > { %v2821_v59 = vpop.permute.xlu1 %2820 }
0x17be   : > { %5366 = vmatpush.xpose.msk.msra.mxu2 %vm955_vm1, %v2821_v59 }
0x17c0   : > { %v2666_v0 = vpop.f32.mrf.mxu1 }
0x17c1   : > { %v2667_v1 = vadd.f32 %v6589_v39, %v2666_v0 }
0x17c3   : > { %v2670_v2 = vsel %vm2669_vm2, %v2667_v1, -inf }
0x17c4   : > { %2671 = vmax.xlane.f32.xlu0 %v2670_v2 }
0x17c5   : > { %v2819_v3 = vpop.permute.xlu1 %2818 }
0x17c6   : > { %5367 = vmatmul.msk.f32.vlgmr.msra.gmra.mxu2 %vm955_vm1, %v2819_v3  ;;  %v5639_v3 = vld [vmem:[%s7286_s12 + $0x3] ss:$0 sm:$0xff] }
0x17d8   : > { %2909 = vrot.lane.b32.xlu0 %v6572_v56, %s7380_s10 }
0x1837   : > { %v2672_v4 = vpop.xlane.xlu0 %2671 }
0x1838   : > { %v2673_v5 = vsub.f32 %v2667_v1, %v2672_v4 }
0x1839   : > { %v2732_v6 = vpop.f32.mrf.mxu2 }
0x183a   : > { %v2674_v7 = vmul.f32 1.442695, %v2673_v5  ;;  %v2733_v8 = vadd.f32 %v6589_v39, %v2732_v6 }
0x183c   : > { %5737 = vpow2.f32 %v2674_v7  ;;  %v2735_v9 = vsel %vm2669_vm2, %v2733_v8, -inf }
0x183d   : > { %2736 = vmax.xlane.f32.xlu1 %v2735_v9  ;;  %v3121_v9 = vsel %vm921_vm0, %v6563_v41, 0.0 }
0x1842   : > { %v5738_v10 = vpop.eup %5737 }
0x1843   : > { %v2676_v11 = vsel %vm2669_vm2, %v5738_v10, 0.0 }
0x1844   : > { %2677 = vadd.xlane.f32.xlu2 %v2676_v11 }
0x1849   : > { %v2843_v58 = vpop.f32.mrf.mxu2 }
0x184a   : > { %v2844_v12 = vadd.f32 %v6589_v39, %v2843_v58  ;;  %v2910_v20 = vpop.permute.xlu0 %2909 }
0x184c   : > { %v2846_v14 = vsel %vm2669_vm2, %v2844_v12, -inf }
0x184d   : > { %2847 = vmax.xlane.f32.xlu0 %v2846_v14 }
0x185c   : > { %2907 = vrot.lane.b32.xlu2 %v2594_v60, %s7380_s10 }
0x1861   : > { %2746 = vrot.lane.b32.xlu0 %v6572_v56, %s7374_s2 }
0x18b0   : > { %v2737_v16 = vpop.xlane.xlu1 %2736 }
0x18b1   : > { %v2738_v17 = vsub.f32 %v2733_v8, %v2737_v16 }
0x18b3   : > { %v2739_v18 = vmul.f32 1.442695, %v2738_v17 }
0x18b5   : > { %5739 = vpow2.f32 %v2739_v18 }
0x18b7   : > { %v2678_v19 = vpop.xlane.xlu2 %2677 }
0x18b8   : > { %5741 = vrcp.f32 %v2678_v19 }
0x18bb   : > { %v5740_v22 = vpop.eup %5739 }
0x18bc   : > { %v2741_v29 = vsel %vm2669_vm2, %v5740_v22, 0.0 }
0x18bd   : > { %2742 = vadd.xlane.f32.xlu1 %v2741_v29  ;;  %v5378_v29 = vld [vmem:[%s7289_s15 + $0x68] sm:$0xff] }
0x18be   : > { %v5742_v23 = vpop.eup %5741 }
0x18bf   : > { %v2680_v24 = vmul.f32 %v5742_v23, %v5738_v10  ;;  %v2908_v36 = vpop.permute.xlu2 %2907  ;;  %v5377_v23 = vld [vmem:[%s7289_s15 + $0x60] sm:$0xff] }
0x18c0   : > { %v2848_v25 = vpop.xlane.xlu0 %2847 }
0x18c1   : > { %v2849_v26 = vsub.f32 %v2844_v12, %v2848_v25  ;;  %5360 = vmatmul.msk.f32.vlgmr.msrb.gmra.mxu0 %vm955_vm1, %v2680_v24 }
0x18c2   : > { %5370 = vmatpush.xpose.msk.msrb.mxu0 %vm955_vm1, %v2910_v20  ;;  %v5380_v20 = vld [vmem:[%s7289_s15 + $0x78] sm:$0xff] }
0x18c3   : > { %v2850_v27 = vmul.f32 1.442695, %v2849_v26 }
0x18c5   : > { %5743 = vpow2.f32 %v2850_v27 }
0x18cb   : > { %v5744_v28 = vpop.eup %5743 }
0x18cc   : > { %v2852_v30 = vsel %vm2669_vm2, %v5744_v28, 0.0 }
0x18cd   : > { %2853 = vadd.xlane.f32.xlu1 %v2852_v30 }
0x18d3   : > { %v2747_v31 = vpop.permute.xlu0 %2746 }
0x18d4   : > { %2767 = vmatpush.msrb.mxu1 %v2747_v31 }
0x1930   : > { %v2743_v32 = vpop.xlane.xlu1 %2742 }
0x1931   : > { %5745 = vrcp.f32 %v2743_v32 }
0x1937   : > { %v5746_v33 = vpop.eup %5745 }
0x1938   : > { %v2745_v34 = vmul.f32 %v5746_v33, %v5740_v22  ;;  %v5379_v22 = vld [vmem:[%s7289_s15 + $0x70] sm:$0xff] }
0x193a   : > { %5363 = vmatmul.msk.f32.vlgmr.msrb.gmra.mxu1 %vm955_vm1, %v2745_v34  ;;  %v5640_v34 = vld [vmem:[%s7287_s13 + $0x3] ss:$0 sm:$0xff] }
0x193e   : > { %v2704_v35 = vpop.f32.mrf.mxu0 }
0x193f   : > { %5365 = vmatmul.msk.f32.vlgmr.msra.gmra.mxu0 %vm955_vm1, %v2704_v35 }
0x1940   : > { %v2854_v45 = vpop.xlane.xlu1 %2853 }
0x1941   : > { %5747 = vrcp.f32 %v2854_v45  ;;  %v5387_v45 = vld [vmem:[%s7291_s17 + $0xe0] sm:$0xff] }
0x1947   : > { %5371 = vmatmul.msk.f32.vlgmr.msrb.gmra.mxu0 %vm955_vm1, %v2908_v36  ;;  %v5748_v51 = vpop.eup %5747 }
0x1948   : > { %v2856_v13 = vmul.f32 %v5748_v51, %v5744_v28  ;;  %v5383_v51 = vld [vmem:[%s7291_s17 + $0xc0] sm:$0xff] }
0x19b7   : > { %v2769_v38 = vpop.f32.mrf.mxu1 }
0x19b8   : > { %5364 = vmatmul.msk.f32.vlgmr.msrb.gmra.mxu3 %vm955_vm1, %v2769_v38 }
0x19b9   : > { %3062 = vmatpush.msrb.mxu3 %v5380_v20 }
0x19bb   : > { %3063 = vmatpush.msrb.mxu3 %v5379_v22 }
0x19bc   : > { %v2815_v40 = vpop.f32.mrf.mxu0 }
0x19bd   : > { %3064 = vmatpush.msrb.mxu3 %v5378_v29 }
0x19bf   : > { %3065 = vmatpush.msrb.mxu3 %v5377_v23 }
0x19c4   : > { %v2932_v42 = vpop.f32.mrf.mxu0 }
0x19c5   : > { %v2933_v43 = vadd.f32 %v6589_v39, %v2932_v42  ;;  %v5390_v42 = vld [vmem:[%s7291_s17 + $0xf8] sm:$0xff] }
0x19c6   : > { %3104 = vmatpush.msra.mxu0 %v5390_v42 }
0x19c7   : > { %v2935_v44 = vsel %vm2669_vm2, %v2933_v43, -inf }
0x19c8   : > { %2936 = vmax.xlane.f32.xlu2 %v2935_v44  ;;  %v5388_v44 = vld [vmem:[%s7291_s17 + $0xe8] sm:$0xff] }
0x19e0   : > { %2857 = vrot.lane.b32.xlu2 %v6572_v56, %s7376_s5 }
0x1a3b   : > { %v2937_v46 = vpop.xlane.xlu2 %2936  ;;  %v2792_v59 = vpop.f32.mrf.mxu3 }
0x1a3c   : > { %v2938_v48 = vsub.f32 %v2933_v43, %v2937_v46  ;;  %v2816_v1 = vadd.f32 %v2815_v40, %v2792_v59  ;;  %v5389_v43 = vld [vmem:[%s7291_s17 + $0xf0] sm:$0xff]  ;;  %v5386_v46 = vld [vmem:[%s7291_s17 + $0xd8] sm:$0xff]  ;;  %v5644_v59 = vld [vmem:[%s7292_s18 + $0x3] ss:$0 sm:$0xff] }
0x1a3d   : > { %3105 = vmatpush.msra.mxu0 %v5389_v43 }
0x1a3e   : > { %v2939_v49 = vmul.f32 1.442695, %v2938_v48  ;;  %v5385_v48 = vld [vmem:[%s7291_s17 + $0xd0] sm:$0xff] }
0x1a3f   : > { %3106 = vmatpush.msra.mxu0 %v5388_v44 }
0x1a40   : > { %5749 = vpow2.f32 %v2939_v49  ;;  %v5384_v49 = vld [vmem:[%s7291_s17 + $0xc8] sm:$0xff] }
0x1a41   : > { %3107 = vmatpush.msra.mxu0 %v5387_v45 }
0x1a43   : > { %v2858_v50 = vpop.permute.xlu2 %2857  ;;  %3108 = vmatpush.msra.mxu0 %v5386_v46 }
0x1a44   : > { %2878 = vmatpush.msra.mxu1 %v2858_v50 }
0x1a45   : > { %5368 = vmatmul.msk.f32.vlgmr.msra.gmra.mxu1 %vm955_vm1, %v2856_v13  ;;  %3109 = vmatpush.msra.mxu0 %v5385_v48  ;;  %v5643_v13 = vld [vmem:[%s7290_s16 + $0x3] ss:$0 sm:$0xff] }
0x1a46   : > { %v5750_v52 = vpop.eup %5749 }
0x1a47   : > { %v2941_v21 = vsel %vm2669_vm2, %v5750_v52, 0.0  ;;  %3110 = vmatpush.msra.mxu0 %v5384_v49 }
0x1a48   : > { %2942 = vadd.xlane.f32.xlu1 %v2941_v21 }
0x1a49   : > { %3111 = vmatpush.msra.mxu0 %v5383_v51 }
0x1a61   : > { %2946 = vrot.lane.b32.xlu1 %v6572_v56, %s7377_s22  ;;  %v5357_v56 = vld [vmem:[%s7370_s9 + $0x78] sm:$0xff] }
0x1a62   : > { %2990 = vmatpush.msrb.mxu1 %v5357_v56 }
0x1abb   : > { %v2943_v57 = vpop.xlane.xlu1 %2942 }
0x1abc   : > { %5751 = vrcp.f32 %v2943_v57 }
0x1ac2   : > { %v2880_v55 = vpop.f32.mrf.mxu1  ;;  %v5752_v60 = vpop.eup %5751 }
0x1ac3   : > { %5369 = vmatmul.msk.f32.vlgmr.msra.gmra.mxu3 %vm955_vm1, %v2880_v55  ;;  %v2945_v61 = vmul.f32 %v5752_v60, %v5750_v52 }
0x1ad3   : > { %v2947_v63 = vpop.permute.xlu1 %2946 }
0x1ad4   : > { %2967 = vmatpush.msrb.mxu2 %v2947_v63 }
0x1ad5   : > { %5372 = vmatmul.msk.f32.vlgmr.msrb.gmra.mxu2 %vm955_vm1, %v2945_v61 }
0x1b46   : > { %v2903_v0 = vpop.f32.mrf.mxu3 }
0x1b47   : > { %v2906_v2 = vadd.f32 %v2903_v0, %v2816_v1 }
0x1b58   : > { %v2969_v62 = vpop.f32.mrf.mxu2 }
0x1b59   : > { %5373 = vmatmul.msk.f32.vlgmr.msrb.gmra.mxu1 %vm955_vm1, %v2969_v62 }
0x1bd6   : > { %v2992_v4 = vpop.f32.mrf.mxu1 }
0x1bd7   : > { %v2995_v5 = vadd.f32 %v2992_v4, %v2906_v2  ;;  %v5397_v4 = vld [vmem:[%s7359_s0 + $0x90] sm:$0xff] }
0x1bd9   : > { %v3001_v6 = vadd.f32 %v5639_v3, %v2995_v5  ;;  %v5398_v5 = vld [vmem:[%s7359_s0 + $0x98] sm:$0xff] }
0x1bda   : > { %3200 = vmatpush.msra.mxu2 %v5398_v5 }
0x1bdb   : > { %v6639_v7 = vadd.f32 %v3001_v6, %v6568_v53  ;;  %v5583_v6 = vpack.i.bf16 %v5397_v4, %v5398_v5 }
0x1bdc   : > { %3201 = vmatpush.msra.mxu2 %v5397_v4 }
0x1bdd   : > { %v3007_v8 = vsel %vm1878_vm10, %v6639_v7, 0.0 }
0x1bde   : > { %3008 = vadd.xlane.f32.xlu0 %v3007_v8  ;;  %v5395_v8 = vld [vmem:[%s7359_s0 + $0x80] sm:$0xff] }
0x1be6   : > { %3122 = vadd.xlane.f32.xlu0 %v3121_v9 }
0x1c51   : > { %v3009_v10 = vpop.xlane.xlu0 %3008 }
0x1c52   : > { %v3010_v11 = vmul.f32 %v3009_v10, %v6178_v47 }
0x1c54   : > { %v3011_v58 = vsub.f32 %v6639_v7, %v3010_v11 }
0x1c56   : > { %v3012_v12 = vmul.f32 %v3011_v58, %v3011_v58 }
0x1c58   : > { %v3013_v14 = vsel %vm1878_vm10, %v3012_v12, 0.0 }
0x1c59   : > { %3014 = vadd.xlane.f32.xlu2 %v3013_v14  ;;  %v3123_v15 = vpop.xlane.xlu0 %3122 }
0x1c5a   : > { %v3124_v16 = vmul.f32 %v3123_v15, %v6178_v47 }
0x1c5c   : > { %v6650_v17 = vsub.f32 %v6563_v41, %v3124_v16 }
0x1c5e   : > { %v3126_v18 = vmul.f32 %v6650_v17, %v6650_v17 }
0x1c60   : > { %v3127_v19 = vsel %vm921_vm0, %v3126_v18, 0.0 }
0x1c61   : > { %3128 = vadd.xlane.f32.xlu0 %v3127_v19 }
0x1ccc   : > { %v3015_v24 = vpop.xlane.xlu2 %3014 }
0x1ccd   : > { %v3016_v25 = vmul.f32 %v3015_v24, %v6178_v47 }
0x1ccf   : > { %v3017_v26 = vadd.f32 1e-06, %v3016_v25 }
0x1cd1   : > { %5753 = vrsqrt.f32 %v3017_v26  ;;  %vm3024_vm5 = vweird.f32 %v3017_v26 }
0x1cd4   : > { %v3129_v15 = vpop.xlane.xlu0 %3128 }
0x1cd5   : > { %v3130_v16 = vmul.f32 %v3129_v15, %v6178_v47 }
0x1cd7   : > { %v5754_v27 = vpop.eup %5753  ;;  %v3131_v18 = vadd.f32 1e-06, %v3130_v16 }
0x1cd8   : > { %v3019_v28 = vmul.f32 %v5754_v27, %v3017_v26  ;;  %vm3025_vm3 = vweird.f32 %v5754_v27  ;;  %v5646_v26 = vld [vmem:[%s7369_s29 + $0x4] ss:$0 sm:$0xff] }
0x1cd9   : > { %vm3026_vm6 = vmor %vm3024_vm5, %vm3025_vm3  ;;  %3224 = vrot.lane.b32.xlu0 %v5646_v26, %s7373_s28  ;;  %vm3138_vm11 = vweird.f32 %v3131_v18 }
0x1cda   : > { %v3020_v30 = vmul.f32 %v5754_v27, %v3019_v28 }
0x1cdc   : > { %v3021_v31 = vmul.f32 0.5, %v3020_v30 }
0x1cde   : > { %v3022_v32 = vsub.f32 1.5, %v3021_v31 }
0x1ce0   : > { %v3023_v33 = vmul.f32 %v5754_v27, %v3022_v32 }
0x1ce2   : > { %v3027_v35 = vsel %vm3026_vm6, %v5754_v27, %v3023_v33 }
0x1ce3   : > { %v3028_v36 = vmul.f32 %v3027_v35, %v3011_v58 }
0x1ce5   : > { %v3032_v38 = vmul.f32 %v5640_v34, %v3028_v36  ;;  %v5641_v34 = vld [vmem:[%s7384_s6 + $0x4] ss:$0 sm:$0xff] }
0x1ce7   : > { %v3036_v40 = vadd.f32 %v5642_v37, %v3032_v38  ;;  %v5645_v38 = vld [vmem:[%s7385_s25 + $0x4] ss:$0 sm:$0xff] }
0x1ce9   : > { %5382 = vmatmul.msk.f32.vlgmr.msrb.gmra.mxu3 %vm921_vm0, %v3036_v40 }
0x1d6c   : > { %v3067_v50 = vpop.f32.mrf.mxu3 }
0x1d6d   : > { %v3068_v52 = vadd.f32 %v5643_v13, %v3067_v50 }
0x1d6f   : > { %v3071_v21 = vmul.f32 0.044715, %v3068_v52  ;;  %v3070_v63 = vmul.f32 0.5, %v3068_v52 }
0x1d71   : > { %v3072_v54 = vmul.f32 %v3071_v21, %v3068_v52  ;;  %v3225_v21 = vpop.permute.xlu0 %3224 }
0x1d73   : > { %v3073_v55 = vmul.f32 %v3072_v54, %v3068_v52 }
0x1d75   : > { %v3074_v57 = vadd.f32 %v3073_v55, %v3068_v52 }
0x1d77   : > { %v3075_v60 = vmul.f32 0.7978846, %v3074_v57 }
0x1d79   : > { %5755 = vtanh.f32 %v3075_v60 }
0x1d7a   : > { %5757 = vrsqrt.f32 %v3131_v18 }
0x1d7f   : > { %v5756_v61 = vpop.eup %5755 }
0x1d80   : > { %v3077_v56 = vadd.f32 1.0, %v5756_v61  ;;  %v5758_v29 = vpop.eup %5757 }
0x1d81   : > { %v3133_v23 = vmul.f32 %v5758_v29, %v3131_v18  ;;  %vm3139_vm7 = vweird.f32 %v5758_v29 }
0x1d82   : > { %v3078_v62 = vmul.f32 %v3077_v56, %v3070_v63  ;;  %vm3140_vm12 = vmor %vm3138_vm11, %vm3139_vm7 }
0x1d83   : > { %v3134_v24 = vmul.f32 %v5758_v29, %v3133_v23 }
0x1d84   : > { %5392 = vmatmul.msk.f32.vlgmr.msra.gmra.mxu0 %vm1403_vm9, %v3078_v62 }
0x1d85   : > { %v3135_v25 = vmul.f32 0.5, %v3134_v24 }
0x1d87   : > { %v3136_v27 = vsub.f32 1.5, %v3135_v25 }
0x1d89   : > { %v3137_v28 = vmul.f32 %v5758_v29, %v3136_v27 }
0x1d8b   : > { %v3141_v31 = vsel %vm3140_vm12, %v5758_v29, %v3137_v28 }
0x1d8c   : > { %v3142_v35 = vmul.f32 %v3141_v31, %v6650_v17 }
0x1d8e   : > { %v3146_v36 = vmul.f32 %v5641_v34, %v3142_v35 }
0x1d90   : > { %v3150_v45 = vadd.f32 %v5645_v38, %v3146_v36 }
0x1e01   : > { %v3113_v0 = vpop.f32.mrf.mxu0 }
0x1e02   : > { %v3114_v1 = vadd.f32 %v5644_v59, %v3113_v0 }
0x1e04   : > { %v6707_v2 = vadd.f32 %v3114_v1, %v6639_v7  ;;  %v5396_v7 = vld [vmem:[%s7359_s0 + $0x88] sm:$0xff] }
0x1e05   : > { %3202 = vmatpush.msra.mxu2 %v5396_v7  ;;  %v5588_v14 = vpack.i.bf16 %v5395_v8, %v5396_v7 }
0x1e06   : > { %v3151_v3 = vsel %vm1878_vm10, %v6707_v2, 0.0 }
0x1e07   : > { %3152 = vadd.xlane.f32.xlu1 %v3151_v3  ;;  %3203 = vmatpush.msra.mxu2 %v5395_v8 }
0x1e20   : > { %5584 = vrot.lane.b32.xlu1 %v5583_v6, %s7373_s28 }
0x1e7a   : > { %v3153_v9 = vpop.xlane.xlu1 %3152 }
0x1e7b   : > { %v3154_v10 = vmul.f32 %v3153_v9, %v6178_v47 }
0x1e7d   : > { %v3155_v11 = vsub.f32 %v6707_v2, %v3154_v10 }
0x1e7f   : > { %v3156_v58 = vmul.f32 %v3155_v11, %v3155_v11 }
0x1e81   : > { %v3157_v12 = vsel %vm1878_vm10, %v3156_v58, 0.0 }
0x1e82   : > { %3158 = vadd.xlane.f32.xlu2 %v3157_v12 }
0x1e92   : > { %v5585_v19 = vpop.permute.xlu1 %5584 }
0x1e93   : > { %v5586_v20 = vunpack.i.l.bf16 %v5585_v19  ;;  %v5587_v22 = vunpack.i.h.bf16 %v5585_v19 }
0x1e95   : > { %3242 = vmatpush.msra.mxu1 %v5586_v20 }
0x1e97   : > { %3243 = vmatpush.msra.mxu1 %v5587_v22 }
0x1e9a   : > { %5589 = vrot.lane.b32.xlu2 %v5588_v14, %s7373_s28  ;;  %v5402_v14 = vld [vmem:[%s7370_s9 + $0x80] sm:$0xff] }
0x1ef5   : > { %v3159_v30 = vpop.xlane.xlu2 %3158 }
0x1ef6   : > { %v3160_v32 = vmul.f32 %v3159_v30, %v6178_v47 }
0x1ef8   : > { %v3161_v33 = vadd.f32 1e-06, %v3160_v32 }
0x1efa   : > { %5759 = vrsqrt.f32 %v3161_v33  ;;  %vm3168_vm14 = vweird.f32 %v3161_v33 }
0x1efd   : > { %v5590_v37 = vpop.permute.xlu2 %5589 }
0x1efe   : > { %v5592_v40 = vunpack.i.h.bf16 %v5590_v37  ;;  %v5591_v42 = vunpack.i.l.bf16 %v5590_v37 }
0x1f00   : > { %v5760_v43 = vpop.eup %5759  ;;  %3244 = vmatpush.msra.mxu1 %v5591_v42 }
0x1f01   : > { %v3163_v44 = vmul.f32 %v5760_v43, %v3161_v33  ;;  %vm3169_vm13 = vweird.f32 %v5760_v43 }
0x1f02   : > { %3245 = vmatpush.msra.mxu1 %v5592_v40  ;;  %vm3170_vm15 = vmor %vm3168_vm14, %vm3169_vm13 }
0x1f03   : > { %v3164_v46 = vmul.f32 %v5760_v43, %v3163_v44  ;;  %5401 = vmatmul.msk.f32.vlgmr.msra.gmra.mxu1 %vm921_vm0, %v3150_v45 }
0x1f05   : > { %v3165_v48 = vmul.f32 0.5, %v3164_v46 }
0x1f07   : > { %v3166_v49 = vsub.f32 1.5, %v3165_v48 }
0x1f09   : > { %v3167_v17 = vmul.f32 %v5760_v43, %v3166_v49 }
0x1f0b   : > { %v3171_v51 = vsel %vm3170_vm15, %v5760_v43, %v3167_v17 }
0x1f0c   : > { %v3172_v13 = vmul.f32 %v3171_v51, %v3155_v11 }
0x1f0e   : > { %v3173_v50 = vmul.f32 %v5641_v34, %v3172_v13 }
0x1f10   : > { %v3174_v52 = vadd.f32 %v5645_v38, %v3173_v50 }
0x1f12   : > { %5400 = vmatmul.msk.f32.vlgmr.msra.gmra.mxu2 %vm921_vm0, %v3174_v52  ;;  %v5403_v52 = vld [vmem:[%s7370_s9 + $0x88] sm:$0xff] }
0x1f13   : > { %3401 = vmatpush.msrb.mxu0 %v5403_v52 }
0x1f80   : > { %v3247_v54 = vpop.f32.mrf.mxu1 }
0x1f81   : > { %v6743_v55 = vadd.f32 %v3247_v54, %v3225_v21 }
0x1f83   : > { %3292 = vrot.lane.b32.xlu2 %v6743_v55, %s7373_s28  ;;  %5406 = vmatpush.xpose.msk.msra.mxu3 %vm955_vm1, %v6743_v55 }
0x1f8b   : > { %3320 = vrot.lane.b32.xlu2 %v6743_v55, %s7379_s7 }
0x1f95   : > { %v3205_v57 = vpop.f32.mrf.mxu2 }
0x1f96   : > { %v3206_v60 = vadd.f32 %v5646_v26, %v3205_v57 }
0x1f98   : > { %3318 = vrot.lane.b32.xlu2 %v3206_v60, %s7379_s7  ;;  %5407 = vmatmul.msk.f32.vlgmr.msra.gmra.mxu3 %vm955_vm1, %v3206_v60 }
0x1fa0   : > { %3520 = vrot.lane.b32.xlu2 %v6743_v55, %s7380_s10 }
0x1fa8   : > { %3518 = vrot.lane.b32.xlu2 %v3206_v60, %s7380_s10 }
0x1fb0   : > { %3429 = vrot.lane.b32.xlu2 %v3206_v60, %s7378_s24 }
0x1fdd   : > { %v3293_v61 = vpop.permute.xlu2 %3292 }
0x1fde   : > { %3313 = vmatpush.msrb.mxu2 %v3293_v61 }
0x1fe0   : > { %3424 = vmatpush.msra.mxu2 %v5402_v14 }
0x1fe5   : > { %v3321_v63 = vpop.permute.xlu2 %3320 }
0x1fe6   : > { %5409 = vmatpush.xpose.msk.msrb.mxu1 %vm955_vm1, %v3321_v63  ;;  %v5405_v63 = vld [vmem:[%s7370_s9 + $0x98] sm:$0xff] }
0x1ff2   : > { %v3319_v56 = vpop.permute.xlu2 %3318 }
0x1ff3   : > { %5410 = vmatmul.msk.f32.vlgmr.msrb.gmra.mxu1 %vm955_vm1, %v3319_v56  ;;  %v5446_v56 = vld [vmem:[%s7359_s0 + $0xb8] sm:$0xff] }
0x1ffa   : > { %v3521_v4 = vpop.permute.xlu2 %3520 }
0x2002   : > { %v3519_v7 = vpop.permute.xlu2 %3518 }
0x200a   : > { %v3430_v12 = vpop.permute.xlu2 %3429 }
0x201b   : > { %v3278_v62 = vpop.f32.mrf.mxu3 }
0x201c   : > { %v3279_v59 = vadd.f32 %v6589_v39, %v3278_v62  ;;  %v5445_v62 = vld [vmem:[%s7359_s0 + $0xb0] sm:$0xff] }
0x201e   : > { %v3281_v0 = vsel %vm2669_vm2, %v3279_v59, -inf }
0x201f   : > { %3282 = vmax.xlane.f32.xlu0 %v3281_v0  ;;  %v6813_v0 = vld [vmem:[%s7359_s0 + $0xa8] sm:$0xff] }
0x2033   : > { %3431 = vrot.lane.b32.xlu0 %v6743_v55, %s7378_s24 }
0x2070   : > { %v3343_v9 = vpop.f32.mrf.mxu1 }
0x2071   : > { %v3344_v10 = vadd.f32 %v6589_v39, %v3343_v9  ;;  %v5647_v9 = vld [vmem:[%s7286_s12 + $0x4] ss:$0 sm:$0xff] }
0x2073   : > { %v3346_v58 = vsel %vm2669_vm2, %v3344_v10, -inf }
0x2092   : > { %v3283_v1 = vpop.xlane.xlu0 %3282 }
0x2093   : > { %v3284_v3 = vsub.f32 %v3279_v59, %v3283_v1  ;;  %v5593_v59 = vpack.i.bf16 %v5445_v62, %v5446_v56  ;;  %v6818_v1 = vld [vmem:[%s7359_s0 + $0xa0] sm:$0xff] }
0x2095   : > { %v3285_v5 = vmul.f32 1.442695, %v3284_v3  ;;  %v5598_v3 = vpack.i.bf16 %v6818_v1, %v6813_v0 }
0x2097   : > { %5761 = vpow2.f32 %v3285_v5 }
0x209d   : > { %v5762_v6 = vpop.eup %5761 }
0x209e   : > { %v3287_v8 = vsel %vm2669_vm2, %v5762_v6, 0.0 }
0x209f   : > { %3288 = vadd.xlane.f32.xlu1 %v3287_v8 }
0x20a5   : > { %v3432_v11 = vpop.permute.xlu0 %3431 }
0x20a6   : > { %5414 = vmatpush.xpose.msk.msra.mxu1 %vm955_vm1, %v3432_v11 }
0x20a7   : > { %3347 = vmax.xlane.f32.xlu1 %v3346_v58 }
0x20a9   : > { %5415 = vmatmul.msk.f32.vlgmr.msra.gmra.mxu1 %vm955_vm1, %v3430_v12 }
0x2112   : > { %v3289_v15 = vpop.xlane.xlu1 %3288 }
0x2113   : > { %5763 = vrcp.f32 %v3289_v15  ;;  %v6840_v15 = vld [vmem:[%s7369_s29 + $0x5] ss:$0 sm:$0xff] }
0x2119   : > { %v5764_v16 = vpop.eup %5763 }
0x211a   : > { %v3291_v18 = vmul.f32 %v5764_v16, %v5762_v6  ;;  %v3348_v28 = vpop.xlane.xlu1 %3347 }
0x211b   : > { %v3349_v31 = vsub.f32 %v3344_v10, %v3348_v28 }
0x211c   : > { %5408 = vmatmul.msk.f32.vlgmr.msrb.gmra.mxu2 %vm955_vm1, %v3291_v18 }
0x211d   : > { %5418 = vmatpush.xpose.msk.msrb.mxu2 %vm955_vm1, %v3521_v4  ;;  %v3350_v32 = vmul.f32 1.442695, %v3349_v31 }
0x2126   : > { %v3454_v19 = vpop.f32.mrf.mxu1 }
0x2127   : > { %v3455_v20 = vadd.f32 %v6589_v39, %v3454_v19 }
0x2129   : > { %v3457_v22 = vsel %vm2669_vm2, %v3455_v20, -inf }
0x212a   : > { %3458 = vmax.xlane.f32.xlu2 %v3457_v22  ;;  %v5428_v22 = vld [vmem:[%s7289_s15 + $0x98] sm:$0xff] }
0x219d   : > { %v3459_v29 = vpop.xlane.xlu2 %3458 }
0x219e   : > { %v3460_v23 = vsub.f32 %v3455_v20, %v3459_v29  ;;  %v5427_v29 = vld [vmem:[%s7289_s15 + $0x90] sm:$0xff] }
0x219f   : > { %v3315_v24 = vpop.f32.mrf.mxu2 }
0x21a0   : > { %v3461_v25 = vmul.f32 1.442695, %v3460_v23  ;;  %5413 = vmatmul.msk.f32.vlgmr.msra.gmra.mxu2 %vm955_vm1, %v3315_v24  ;;  %v5426_v23 = vld [vmem:[%s7289_s15 + $0x88] sm:$0xff]  ;;  %v5425_v24 = vld [vmem:[%s7289_s15 + $0x80] sm:$0xff] }
0x21a2   : > { %5765 = vpow2.f32 %v3461_v25 }
0x21a3   : > { %5767 = vpow2.f32 %v3350_v32 }
0x21a8   : > { %v5766_v26 = vpop.eup %5765  ;;  %5419 = vmatmul.msk.f32.vlgmr.msrb.gmra.mxu2 %vm955_vm1, %v3519_v7 }
0x21a9   : > { %v3463_v27 = vsel %vm2669_vm2, %v5766_v26, 0.0  ;;  %v5768_v36 = vpop.eup %5767 }
0x21aa   : > { %3464 = vadd.xlane.f32.xlu0 %v3463_v27  ;;  %v3352_v37 = vsel %vm2669_vm2, %v5768_v36, 0.0 }
0x221d   : > { %v3465_v45 = vpop.xlane.xlu0 %3464 }
0x2223   : > { %v6778_v30 = vpop.f32.mrf.mxu2 }
0x222b   : > { %v3543_v33 = vpop.f32.mrf.mxu2 }
0x222c   : > { %v3544_v34 = vadd.f32 %v6589_v39, %v3543_v33 }
0x222e   : > { %v3546_v35 = vsel %vm2669_vm2, %v3544_v34, -inf }
0x222f   : > { %3547 = vmax.xlane.f32.xlu1 %v3546_v35  ;;  %v5649_v35 = vld [vmem:[%s7287_s13 + $0x4] ss:$0 sm:$0xff] }
0x2237   : > { %3353 = vadd.xlane.f32.xlu1 %v3352_v37 }
0x2250   : > { %3357 = vrot.lane.b32.xlu1 %v6743_v55, %s7374_s2 }
0x2258   : > { %3468 = vrot.lane.b32.xlu1 %v6743_v55, %s7376_s5 }
0x22a2   : > { %v3548_v38 = vpop.xlane.xlu1 %3547 }
0x22a3   : > { %v3549_v40 = vsub.f32 %v3544_v34, %v3548_v38  ;;  %v5650_v38 = vld [vmem:[%s7288_s14 + $0x4] ss:$0 sm:$0xff] }
0x22a5   : > { %v3550_v42 = vmul.f32 1.442695, %v3549_v40 }
0x22a7   : > { %5769 = vpow2.f32 %v3550_v42 }
0x22aa   : > { %v3354_v44 = vpop.xlane.xlu1 %3353 }
0x22ab   : > { %5771 = vrcp.f32 %v3354_v44  ;;  %v5436_v44 = vld [vmem:[%s7291_s17 + $0x128] sm:$0xff] }
0x22ac   : > { %5773 = vrcp.f32 %v3465_v45  ;;  %v5435_v45 = vld [vmem:[%s7291_s17 + $0x120] sm:$0xff] }
0x22ad   : > { %v5770_v43 = vpop.eup %5769 }
0x22ae   : > { %v3552_v39 = vsel %vm2669_vm2, %v5770_v43, 0.0 }
0x22af   : > { %3553 = vadd.xlane.f32.xlu2 %v3552_v39  ;;  %v5437_v39 = vld [vmem:[%s7291_s17 + $0x130] sm:$0xff] }
0x22b1   : > { %v5772_v46 = vpop.eup %5771 }
0x22b2   : > { %v3356_v48 = vmul.f32 %v5772_v46, %v5768_v36  ;;  %v5774_v17 = vpop.eup %5773  ;;  %v5434_v46 = vld [vmem:[%s7291_s17 + $0x118] sm:$0xff] }
0x22b3   : > { %v3467_v51 = vmul.f32 %v5774_v17, %v5766_v26  ;;  %v5431_v17 = vld [vmem:[%s7291_s17 + $0x100] sm:$0xff] }
0x22c2   : > { %v3358_v49 = vpop.permute.xlu1 %3357 }
0x22c3   : > { %3378 = vmatpush.msrb.mxu3 %v3358_v49  ;;  %v5432_v49 = vld [vmem:[%s7291_s17 + $0x108] sm:$0xff] }
0x22c4   : > { %5411 = vmatmul.msk.f32.vlgmr.msrb.gmra.mxu3 %vm955_vm1, %v3356_v48  ;;  %v5433_v48 = vld [vmem:[%s7291_s17 + $0x110] sm:$0xff] }
0x22c7   : > { %3557 = vrot.lane.b32.xlu2 %v6743_v55, %s7377_s22  ;;  %v5404_v55 = vld [vmem:[%s7370_s9 + $0x90] sm:$0xff] }
0x22c8   : > { %3512 = vmatpush.msra.mxu0 %v5404_v55 }
0x22ca   : > { %v3469_v13 = vpop.permute.xlu1 %3468 }
0x22cb   : > { %3489 = vmatpush.msra.mxu3 %v3469_v13  ;;  %v5651_v13 = vld [vmem:[%s7290_s16 + $0x4] ss:$0 sm:$0xff] }
0x22cc   : > { %5416 = vmatmul.msk.f32.vlgmr.msra.gmra.mxu3 %vm955_vm1, %v3467_v51  ;;  %v3731_v51 = vld [vmem:[%s7389_s11 + $0x18] sm:$0xff] }
0x22cd   : > { %3601 = vmatpush.msrb.mxu3 %v5405_v63 }
0x22cf   : > { %3830 = vmatpush.msra.mxu3 %v5446_v56 }
0x22d1   : > { %3831 = vmatpush.msra.mxu3 %v5445_v62 }
0x22d3   : > { %3832 = vmatpush.msra.mxu3 %v6813_v0 }
0x22d5   : > { %3833 = vmatpush.msra.mxu3 %v6818_v1 }
0x2322   : > { %v3554_v50 = vpop.xlane.xlu2 %3553 }
0x2323   : > { %5775 = vrcp.f32 %v3554_v50 }
0x2329   : > { %v5776_v21 = vpop.eup %5775 }
0x232a   : > { %v3556_v54 = vmul.f32 %v5776_v21, %v5770_v43  ;;  %v3558_v57 = vpop.permute.xlu2 %3557  ;;  %v5438_v43 = vld [vmem:[%s7291_s17 + $0x138] sm:$0xff] }
0x232b   : > { %3578 = vmatpush.msrb.mxu1 %v3558_v57  ;;  %3715 = vmatpush.msra.mxu2 %v5438_v43 }
0x232c   : > { %5420 = vmatmul.msk.f32.vlgmr.msrb.gmra.mxu1 %vm955_vm1, %v3556_v54 }
0x232d   : > { %3716 = vmatpush.msra.mxu2 %v5437_v39  ;;  %3751 = vmatpush.msra.mxu1 %v3731_v51  ;;  %v5842_v51 = vld [vmem:[%s7386_s30] ss:$0 sm:$0xff] }
0x232f   : > { %3717 = vmatpush.msra.mxu2 %v5436_v44 }
0x2331   : > { %3718 = vmatpush.msra.mxu2 %v5435_v45 }
0x2333   : > { %3719 = vmatpush.msra.mxu2 %v5434_v46 }
0x2335   : > { %3720 = vmatpush.msra.mxu2 %v5433_v48 }
0x2337   : > { %3721 = vmatpush.msra.mxu2 %v5432_v49 }
0x2339   : > { %3722 = vmatpush.msra.mxu2 %v5431_v17 }
0x2347   : > { %v3380_v60 = vpop.f32.mrf.mxu3 }
0x2348   : > { %5412 = vmatmul.msk.f32.vlgmr.msrb.gmra.mxu0 %vm955_vm1, %v3380_v60 }
0x2349   : > { %3673 = vmatpush.msrb.mxu0 %v5428_v22 }
0x234b   : > { %3674 = vmatpush.msrb.mxu0 %v5427_v29 }
0x234d   : > { %3675 = vmatpush.msrb.mxu0 %v5426_v23 }
0x234f   : > { %v3491_v61 = vpop.f32.mrf.mxu3  ;;  %3676 = vmatpush.msrb.mxu0 %v5425_v24 }
0x2350   : > { %5417 = vmatmul.msk.f32.vlgmr.msra.gmra.mxu0 %vm955_vm1, %v3491_v61 }
0x23a9   : > { %v3580_v4 = vpop.f32.mrf.mxu1 }
0x23aa   : > { %5421 = vmatmul.msk.f32.vlgmr.msrb.gmra.mxu3 %vm955_vm1, %v3580_v4  ;;  %v3729_v4 = vld [vmem:[%s7389_s11 + $0x8] sm:$0xff] }
0x23b2   : > { %5448 = vmatmul.msk.f32.vlgmr.msra.gmra.mxu3 %vm921_vm0, %v6563_v41 }
0x23c5   : > { %v3403_v5 = vpop.f32.mrf.mxu0 }
0x23c6   : > { %v3427_v7 = vadd.f32 %v6778_v30, %v3403_v5  ;;  %v3728_v5 = vld [vmem:[%s7389_s11] sm:$0xff] }
0x23cd   : > { %v3514_v6 = vpop.f32.mrf.mxu0 }
0x23ce   : > { %v3517_v8 = vadd.f32 %v3514_v6, %v3427_v7  ;;  %v5652_v6 = vld [vmem:[%s7292_s18 + $0x4] ss:$0 sm:$0xff] }
0x242d   : > { %v3603_v10 = vpop.f32.mrf.mxu3 }
0x242e   : > { %v3606_v11 = vadd.f32 %v3603_v10, %v3517_v8  ;;  %v5653_v10 = vld [vmem:[#allocation2] ss:$0 sm:$0xff] }
0x2430   : > { %v3612_v58 = vadd.f32 %v5647_v9, %v3606_v11 }
0x2432   : > { %v6832_v12 = vadd.f32 %v3612_v58, %v6707_v2 }
0x2434   : > { %v3618_v14 = vsel %vm1878_vm10, %v6832_v12, 0.0 }
0x2435   : > { %3619 = vadd.xlane.f32.xlu1 %v3618_v14 }
0x244e   : > { %5594 = vrot.lane.b32.xlu1 %v5593_v59, %s7373_s28  ;;  %v3730_v59 = vld [vmem:[%s7389_s11 + $0x10] sm:$0xff] }
0x244f   : > { %3752 = vmatpush.msra.mxu1 %v3730_v59 }
0x2451   : > { %3753 = vmatpush.msra.mxu1 %v3729_v4 }
0x2453   : > { %3754 = vmatpush.msra.mxu1 %v3728_v5 }
0x2456   : > { %3854 = vrot.lane.b32.xlu1 %v6840_v15, %s7373_s28 }
0x24a8   : > { %v3620_v16 = vpop.xlane.xlu1 %3619 }
0x24a9   : > { %v3621_v18 = vmul.f32 %v3620_v16, %v6178_v47 }
0x24ab   : > { %v3622_v2 = vsub.f32 %v6832_v12, %v3621_v18 }
0x24ad   : > { %v3623_v19 = vmul.f32 %v3622_v2, %v3622_v2 }
0x24af   : > { %v3624_v20 = vsel %vm1878_vm10, %v3623_v19, 0.0 }
0x24b0   : > { %3625 = vadd.xlane.f32.xlu0 %v3624_v20 }
0x2523   : > { %v3626_v25 = vpop.xlane.xlu0 %3625 }
0x2524   : > { %v3627_v26 = vmul.f32 %v3626_v25, %v6178_v47 }
0x2526   : > { %v3628_v27 = vadd.f32 1e-06, %v3627_v26 }
0x2528   : > { %5777 = vrsqrt.f32 %v3628_v27  ;;  %vm3635_vm3 = vweird.f32 %v3628_v27 }
0x252e   : > { %v5778_v28 = vpop.eup %5777 }
0x252f   : > { %v3630_v30 = vmul.f32 %v5778_v28, %v3628_v27  ;;  %vm3636_vm2 = vweird.f32 %v5778_v28 }
0x2530   : > { %vm3637_vm5 = vmor %vm3635_vm3, %vm3636_vm2 }
0x2531   : > { %v3631_v31 = vmul.f32 %v5778_v28, %v3630_v30 }
0x2533   : > { %v3632_v32 = vmul.f32 0.5, %v3631_v31 }
0x2535   : > { %v3633_v33 = vsub.f32 1.5, %v3632_v32 }
0x2537   : > { %v3634_v34 = vmul.f32 %v5778_v28, %v3633_v33 }
0x2539   : > { %v3638_v36 = vsel %vm3637_vm5, %v5778_v28, %v3634_v34 }
0x253a   : > { %v3639_v37 = vmul.f32 %v3638_v36, %v3622_v2  ;;  %v5595_v36 = vpop.permute.xlu1 %5594 }
0x253c   : > { %v3643_v40 = vmul.f32 %v5649_v35, %v3639_v37  ;;  %v5596_v37 = vunpack.i.l.bf16 %v5595_v36 }
0x253e   : > { %v3647_v42 = vadd.f32 %v5650_v38, %v3643_v40  ;;  %v5597_v38 = vunpack.i.h.bf16 %v5595_v36  ;;  %3872 = vmatpush.msra.mxu0 %v5596_v37 }
0x2540   : > { %5430 = vmatmul.msk.f32.vlgmr.msrb.gmra.mxu0 %vm921_vm0, %v3647_v42 }
0x2541   : > { %3873 = vmatpush.msra.mxu0 %v5597_v38 }
0x25bd   : > { %v3678_v50 = vpop.f32.mrf.mxu0 }
0x25be   : > { %v3679_v52 = vadd.f32 %v5651_v13, %v3678_v50  ;;  %v5843_v50 = vld [vmem:[%s7387_s4] ss:$0 sm:$0xff] }
0x25c0   : > { %v3682_v21 = vmul.f32 0.044715, %v3679_v52  ;;  %v3681_v63 = vmul.f32 0.5, %v3679_v52 }
0x25c2   : > { %v3683_v54 = vmul.f32 %v3682_v21, %v3679_v52  ;;  %v3855_v21 = vpop.permute.xlu1 %3854 }
0x25c4   : > { %v3684_v57 = vmul.f32 %v3683_v54, %v3679_v52 }
0x25c6   : > { %v3685_v55 = vadd.f32 %v3684_v57, %v3679_v52  ;;  %v3835_v57 = vpop.f32.mrf.mxu3 }
0x25c8   : > { %v3686_v60 = vmul.f32 0.7978846, %v3685_v55 }
0x25ca   : > { %5779 = vtanh.f32 %v3686_v60  ;;  %v3836_v60 = vadd.f32 %v6840_v15, %v3835_v57 }
0x25d0   : > { %v5780_v61 = vpop.eup %5779 }
0x25d1   : > { %v3688_v56 = vadd.f32 1.0, %v5780_v61 }
0x25d3   : > { %v3689_v62 = vmul.f32 %v3688_v56, %v3681_v63 }
0x25d5   : > { %5440 = vmatmul.msk.f32.vlgmr.msra.gmra.mxu2 %vm1403_vm9, %v3689_v62  ;;  %v6945_v62 = vld [vmem:[%s7390_s27] ss:$0 sm:$0xff]  ;;  %s7391_s27 = sld [smem:[#allocation25_spill]] }
0x2658   : > { %v3724_v7 = vpop.f32.mrf.mxu2 }
0x2659   : > { %v3725_v8 = vadd.f32 %v5652_v6, %v3724_v7 }
0x265b   : > { %v3727_v9 = vadd.f32 %v3725_v8, %v6832_v12 }
0x265d   : > { %5441 = vmatmul.msk.f32.vlgmr.msra.gmra.mxu1 %vm921_vm0, %v3727_v9 }
0x26da   : > { %v3756_v11 = vpop.f32.mrf.mxu1 }
0x26db   : > { %v3757_v58 = vadd.f32 %v5653_v10, %v3756_v11 }
0x26dd   : > { %v5442_v14 = vmul.f32 -1.442695, %v3757_v58 }
0x26df   : > { %5781 = vpow2.f32 %v5442_v14 }
0x26e5   : > { %v5782_v16 = vpop.eup %5781 }
0x26e6   : > { %v3762_v18 = vadd.f32 1.0, %v5782_v16 }
0x26e8   : > { %5783 = vrcp.f32 %v3762_v18  ;;  %v3774_v22 = vand.u32 2147483648, %v3762_v18  ;;  %v3772_v23 = vand.u32 2147483647, %v3762_v18  ;;  %vm3768_vm7 = vweird.f32 %v3762_v18 }
0x26ea   : > { %v3775_v12 = vor.u32 1.1754944e-38, %v3774_v22  ;;  %vm3773_vm12 = vcmp.eq.f32.partialorder %v3772_v23, 8.507059e+37 }
0x26ee   : > { %v5784_v2 = vpop.eup %5783 }
0x26ef   : > { %v3764_v19 = vmul.f32 %v5784_v2, %v3762_v18  ;;  %vm3769_vm6 = vweird.f32 %v5784_v2 }
0x26f0   : > { %vm3770_vm11 = vmor %vm3768_vm7, %vm3769_vm6 }
0x26f1   : > { %v3765_v20 = vsub.f32 1.0, %v3764_v19  ;;  %v5450_v19 = vld [vmem:[%s7370_s9 + $0xa0] sm:$0xff] }
0x26f3   : > { %v3766_v29 = vmul.f32 %v5784_v2, %v3765_v20 }
0x26f5   : > { %v3767_v24 = vadd.f32 %v5784_v2, %v3766_v29 }
0x26f7   : > { %v3771_v25 = vsel %vm3770_vm11, %v5784_v2, %v3767_v24 }
0x26f8   : > { %v3776_v26 = vsel %vm3773_vm12, %v3775_v12, %v3771_v25 }
0x26f9   : > { %3780 = vperm.xlu0 %5572, %v3776_v26  }
0x276b   : > { %v3781_v27 = vpop.permute.xlu0 %3780 }
0x276c   : > { %v3783_v28 = vmul.f32 %v3781_v27, %v6568_v53 }
0x276e   : > { %v3784_v30 = vsel %vm1878_vm10, %v3783_v28, 0.0 }
0x276f   : > { %3785 = vadd.xlane.f32.xlu2 %v3784_v30 }
0x2787   : > { %5599 = vrot.lane.b32.xlu2 %v5598_v3, %s7373_s28 }
0x27e2   : > { %v3786_v31 = vpop.xlane.xlu2 %3785 }
0x27e3   : > { %v3787_v32 = vmul.f32 %v3786_v31, %v6178_v47 }
0x27e5   : > { %v3788_v33 = vsub.f32 %v3783_v28, %v3787_v32 }
0x27e7   : > { %v3789_v34 = vmul.f32 %v3788_v33, %v3788_v33 }
0x27e9   : > { %v3790_v35 = vsel %vm1878_vm10, %v3789_v34, 0.0 }
0x27ea   : > { %3791 = vadd.xlane.f32.xlu0 %v3790_v35  ;;  %v5600_v53 = vpop.permute.xlu2 %5599 }
0x27eb   : > { %v5601_v40 = vunpack.i.l.bf16 %v5600_v53  ;;  %v5602_v42 = vunpack.i.h.bf16 %v5600_v53 }
0x27ed   : > { %3874 = vmatpush.msra.mxu0 %v5601_v40 }
0x27ef   : > { %3875 = vmatpush.msra.mxu0 %v5602_v42 }
0x285d   : > { %v3792_v0 = vpop.xlane.xlu0 %3791 }
0x285e   : > { %v3793_v1 = vmul.f32 %v3792_v0, %v6178_v47 }
0x2860   : > { %v3794_v3 = vadd.f32 1e-06, %v3793_v1 }
0x2862   : > { %5785 = vrsqrt.f32 %v3794_v3  ;;  %vm3801_vm14 = vweird.f32 %v3794_v3 }
0x2868   : > { %v5786_v43 = vpop.eup %5785 }
0x2869   : > { %v3796_v39 = vmul.f32 %v5786_v43, %v3794_v3  ;;  %vm3802_vm13 = vweird.f32 %v5786_v43 }
0x286a   : > { %vm3803_vm15 = vmor %vm3801_vm14, %vm3802_vm13 }
0x286b   : > { %v3797_v44 = vmul.f32 %v5786_v43, %v3796_v39 }
0x286d   : > { %v3798_v45 = vmul.f32 0.5, %v3797_v44 }
0x286f   : > { %v3799_v46 = vsub.f32 1.5, %v3798_v45 }
0x2871   : > { %v3800_v48 = vmul.f32 %v5786_v43, %v3799_v46 }
0x2873   : > { %v3804_v49 = vsel %vm3803_vm15, %v5786_v43, %v3800_v48 }
0x2874   : > { %v3805_v17 = vmul.f32 %v3804_v49, %v3788_v33 }
0x2876   : > { %v3806_v13 = vmul.f32 %v5842_v51, %v3805_v17  ;;  %v5451_v17 = vld [vmem:[%s7370_s9 + $0xa8] sm:$0xff] }
0x2878   : > { %v6927_v52 = vadd.f32 %v5843_v50, %v3806_v13 }
0x287a   : > { %5449 = vmatmul.msk.f32.vlgmr.msra.gmra.mxu0 %vm921_vm0, %v6927_v52 }
0x28f7   : > { %v3877_v54 = vpop.f32.mrf.mxu0 }
0x28f8   : > { %v6931_v55 = vadd.f32 %v3877_v54, %v3855_v21  ;;  %v4366_v21 = vsel %vm1878_vm10, %v6927_v52, 0.0  ;;  %v5452_v54 = vld [vmem:[%s7370_s9 + $0xb0] sm:$0xff] }
0x28fa   : > { %3951 = vrot.lane.b32.xlu2 %v6931_v55, %s7379_s7  ;;  %5454 = vmatpush.xpose.msk.msrb.mxu1 %vm955_vm1, %v6931_v55 }
0x28fd   : > { %5455 = vmatmul.msk.f32.vlgmr.msrb.gmra.mxu1 %vm955_vm1, %v3836_v60 }
0x28fe   : > { %4033 = vmatpush.msra.mxu1 %v5451_v17 }
0x2900   : > { %4145 = vmatpush.msrb.mxu1 %v5452_v54 }
0x2902   : > { %3949 = vrot.lane.b32.xlu2 %v3836_v60, %s7379_s7 }
0x290a   : > { %4151 = vrot.lane.b32.xlu2 %v3836_v60, %s7380_s10 }
0x2912   : > { %4061 = vrot.lane.b32.xlu2 %v3836_v60, %s7378_s24 }
0x2954   : > { %v3952_v61 = vpop.permute.xlu2 %3951 }
0x2955   : > { %5458 = vmatpush.xpose.msk.msrb.mxu0 %vm955_vm1, %v3952_v61 }
0x295c   : > { %v3950_v63 = vpop.permute.xlu2 %3949 }
0x295d   : > { %5459 = vmatmul.msk.f32.vlgmr.msrb.gmra.mxu0 %vm955_vm1, %v3950_v63 }
0x2964   : > { %v4152_v16 = vpop.permute.xlu2 %4151 }
0x296c   : > { %v4062_v2 = vpop.permute.xlu2 %4061 }
0x297a   : > { %v3908_v56 = vpop.f32.mrf.mxu1 }
0x297b   : > { %v3909_v59 = vadd.f32 %v6945_v62, %v3908_v56  ;;  %v5453_v56 = vld [vmem:[%s7370_s9 + $0xb8] sm:$0xff] }
0x297d   : > { %v3911_v15 = vsel %vm1548_vm8, %v3909_v59, -inf }
0x297e   : > { %3912 = vmax.xlane.f32.xlu0 %v3911_v15 }
0x2992   : > { %3922 = vrot.lane.b32.xlu0 %v6931_v55, %s7373_s28 }
0x299a   : > { %4153 = vrot.lane.b32.xlu0 %v6931_v55, %s7380_s10 }
0x29a2   : > { %4063 = vrot.lane.b32.xlu0 %v6931_v55, %s7378_s24 }
0x29da   : > { %v3974_v4 = vpop.f32.mrf.mxu0 }
0x29db   : > { %v3975_v5 = vadd.f32 %v6945_v62, %v3974_v4 }
0x29dd   : > { %v3977_v6 = vsel %vm1548_vm8, %v3975_v5, -inf }
0x29de   : > { %3978 = vmax.xlane.f32.xlu0 %v3977_v6 }
0x29f1   : > { %v3913_v7 = vpop.xlane.xlu0 %3912 }
0x29f2   : > { %v3914_v8 = vsub.f32 %v3909_v59, %v3913_v7  ;;  %v5654_v7 = vld [vmem:[%s7286_s12 + $0x5] ss:$0 sm:$0xff] }
0x29f4   : > { %v3915_v9 = vmul.f32 1.442695, %v3914_v8 }
0x29f6   : > { %5787 = vpow2.f32 %v3915_v9 }
0x29fc   : > { %v5788_v10 = vpop.eup %5787 }
0x29fd   : > { %v3917_v11 = vsel %vm1548_vm8, %v5788_v10, 0.0 }
0x29fe   : > { %3918 = vadd.xlane.f32.xlu1 %v3917_v11 }
0x2a04   : > { %v3923_v58 = vpop.permute.xlu0 %3922 }
0x2a05   : > { %5456 = vmatpush.msk.msrb.mxu3 %vm1552_vm4, %v3923_v58 }
0x2a07   : > { %4056 = vmatpush.msra.mxu3 %v5450_v19 }
0x2a0c   : > { %v4154_v14 = vpop.permute.xlu0 %4153 }
0x2a14   : > { %v4064_v18 = vpop.permute.xlu0 %4063 }
0x2a15   : > { %5464 = vmatpush.xpose.msk.msra.mxu0 %vm955_vm1, %v4064_v18 }
0x2a18   : > { %5465 = vmatmul.msk.f32.vlgmr.msra.gmra.mxu0 %vm955_vm1, %v4062_v2 }
0x2a51   : > { %v3979_v23 = vpop.xlane.xlu0 %3978 }
0x2a52   : > { %v3980_v24 = vsub.f32 %v3975_v5, %v3979_v23  ;;  %v5477_v23 = vld [vmem:[%s7289_s15 + $0xa0] sm:$0xff] }
0x2a54   : > { %v3981_v12 = vmul.f32 1.442695, %v3980_v24 }
0x2a71   : > { %v3919_v20 = vpop.xlane.xlu1 %3918 }
0x2a72   : > { %5789 = vrcp.f32 %v3919_v20  ;;  %v5480_v20 = vld [vmem:[%s7289_s15 + $0xb8] sm:$0xff] }
0x2a73   : > { %5791 = vpow2.f32 %v3981_v12 }
0x2a78   : > { %v5790_v22 = vpop.eup %5789 }
0x2a79   : > { %v3921_v29 = vmul.f32 %v5790_v22, %v5788_v10  ;;  %v5792_v28 = vpop.eup %5791  ;;  %v5479_v22 = vld [vmem:[%s7289_s15 + $0xb0] sm:$0xff] }
0x2a7a   : > { %v3983_v30 = vsel %vm1548_vm8, %v5792_v28, 0.0 }
0x2a7b   : > { %5457 = vmatmul.msk.f32.vlgmr.msrb.gmra.mxu3 %vm1548_vm8, %v3921_v29  ;;  %v5478_v29 = vld [vmem:[%s7289_s15 + $0xa8] sm:$0xff] }
0x2a7c   : > { %5469 = vmatpush.xpose.msk.msrb.mxu3 %vm955_vm1, %v4154_v14 }
0x2a95   : > { %v4086_v25 = vpop.f32.mrf.mxu0 }
0x2a96   : > { %v4087_v26 = vadd.f32 %v6945_v62, %v4086_v25 }
0x2a98   : > { %v4089_v27 = vsel %vm1548_vm8, %v4087_v26, -inf }
0x2a99   : > { %4090 = vmax.xlane.f32.xlu1 %v4089_v27 }
0x2aa1   : > { %3984 = vadd.xlane.f32.xlu1 %v3983_v30 }
0x2afe   : > { %v3946_v31 = vpop.f32.mrf.mxu3 }
0x2aff   : > { %5463 = vmatmul.msk.f32.vlgmr.msra.gmra.mxu3 %vm955_vm1, %v3946_v31 }
0x2b07   : > { %5470 = vmatmul.msk.f32.vlgmr.msrb.gmra.mxu3 %vm955_vm1, %v4152_v16 }
0x2b0c   : > { %v4091_v32 = vpop.xlane.xlu1 %4090 }
0x2b0d   : > { %v4092_v33 = vsub.f32 %v4087_v26, %v4091_v32 }
0x2b0f   : > { %v4093_v34 = vmul.f32 1.442695, %v4092_v33  ;;  %v5655_v33 = vld [vmem:[%s7287_s13 + $0x5] ss:$0 sm:$0xff] }
0x2b11   : > { %5793 = vpow2.f32 %v4093_v34 }
0x2b14   : > { %v3985_v42 = vpop.xlane.xlu1 %3984 }
0x2b15   : > { %5795 = vrcp.f32 %v3985_v42  ;;  %v5488_v42 = vld [vmem:[%s7291_s17 + $0x168] sm:$0xff] }
0x2b17   : > { %v5794_v35 = vpop.eup %5793 }
0x2b18   : > { %v4095_v36 = vsel %vm1548_vm8, %v5794_v35, 0.0 }
0x2b19   : > { %4096 = vadd.xlane.f32.xlu1 %v4095_v36 }
0x2b1b   : > { %v5796_v1 = vpop.eup %5795 }
0x2b1c   : > { %v3987_v3 = vmul.f32 %v5796_v1, %v5792_v28  ;;  %v5486_v1 = vld [vmem:[%s7291_s17 + $0x158] sm:$0xff] }
0x2b32   : > { %3988 = vrot.lane.b32.xlu1 %v6931_v55, %s7374_s2 }
0x2b82   : > { %v4058_v37 = vpop.f32.mrf.mxu3 }
0x2b8a   : > { %v4176_v38 = vpop.f32.mrf.mxu3 }
0x2b8b   : > { %v4177_v53 = vadd.f32 %v6945_v62, %v4176_v38 }
0x2b8c   : > { %v4097_v0 = vpop.xlane.xlu1 %4096 }
0x2b8d   : > { %v4179_v40 = vsel %vm1548_vm8, %v4177_v53, -inf  ;;  %5797 = vrcp.f32 %v4097_v0  ;;  %v5487_v0 = vld [vmem:[%s7291_s17 + $0x160] sm:$0xff] }
0x2b8e   : > { %4180 = vmax.xlane.f32.xlu2 %v4179_v40  ;;  %v5489_v40 = vld [vmem:[%s7291_s17 + $0x170] sm:$0xff] }
0x2b93   : > { %v5798_v46 = vpop.eup %5797 }
0x2b94   : > { %v4099_v48 = vmul.f32 %v5798_v46, %v5794_v35  ;;  %v5656_v35 = vld [vmem:[%s7288_s14 + $0x5] ss:$0 sm:$0xff] }
0x2ba4   : > { %v3989_v43 = vpop.permute.xlu1 %3988 }
0x2ba5   : > { %5460 = vmatpush.msk.msrb.mxu2 %vm1552_vm4, %v3989_v43  ;;  %v5484_v43 = vld [vmem:[%s7291_s17 + $0x148] sm:$0xff] }
0x2ba6   : > { %4100 = vrot.lane.b32.xlu2 %v6931_v55, %s7376_s5  ;;  %5461 = vmatmul.msk.f32.vlgmr.msrb.gmra.mxu2 %vm1548_vm8, %v3987_v3  ;;  %v5485_v3 = vld [vmem:[%s7291_s17 + $0x150] sm:$0xff] }
0x2c01   : > { %v4181_v39 = vpop.xlane.xlu2 %4180 }
0x2c02   : > { %v4182_v44 = vsub.f32 %v4177_v53, %v4181_v39  ;;  %v5490_v53 = vld [vmem:[%s7291_s17 + $0x178] sm:$0xff]  ;;  %v5483_v39 = vld [vmem:[%s7291_s17 + $0x140] sm:$0xff] }
0x2c03   : > { %4349 = vmatpush.msra.mxu3 %v5490_v53 }
0x2c04   : > { %v4183_v45 = vmul.f32 1.442695, %v4182_v44  ;;  %v5657_v44 = vld [vmem:[%s7290_s16 + $0x5] ss:$0 sm:$0xff] }
0x2c05   : > { %4350 = vmatpush.msra.mxu3 %v5489_v40 }
0x2c06   : > { %5799 = vpow2.f32 %v4183_v45 }
0x2c07   : > { %4351 = vmatpush.msra.mxu3 %v5488_v42 }
0x2c09   : > { %v4101_v49 = vpop.permute.xlu2 %4100  ;;  %4352 = vmatpush.msra.mxu3 %v5487_v0 }
0x2c0a   : > { %5466 = vmatpush.msk.msra.mxu2 %vm1552_vm4, %v4101_v49 }
0x2c0b   : > { %5467 = vmatmul.msk.f32.vlgmr.msra.gmra.mxu2 %vm1548_vm8, %v4099_v48  ;;  %4353 = vmatpush.msra.mxu3 %v5486_v1 }
0x2c0c   : > { %v5800_v51 = vpop.eup %5799  ;;  %4235 = vmatpush.msrb.mxu2 %v5453_v56  ;;  %v5498_v56 = vld [vmem:[%s7359_s0 + $0xd8] sm:$0xff] }
0x2c0d   : > { %v4185_v13 = vsel %vm1548_vm8, %v5800_v51, 0.0  ;;  %4354 = vmatpush.msra.mxu3 %v5485_v3 }
0x2c0e   : > { %4186 = vadd.xlane.f32.xlu0 %v4185_v13 }
0x2c0f   : > { %4355 = vmatpush.msra.mxu3 %v5484_v43 }
0x2c11   : > { %4356 = vmatpush.msra.mxu3 %v5483_v39 }
0x2c22   : > { %4190 = vrot.lane.b32.xlu0 %v6931_v55, %s7377_s22 }
0x2c29   : > { %v4012_v50 = vpop.f32.mrf.mxu2 }
0x2c2a   : > { %5462 = vmatmul.msk.f32.vlgmr.msra.gmra.mxu1 %vm955_vm1, %v4012_v50 }
0x2c2b   : > { %4307 = vmatpush.msra.mxu1 %v5480_v20 }
0x2c2d   : > { %4308 = vmatpush.msra.mxu1 %v5479_v22 }
0x2c2f   : > { %4309 = vmatpush.msra.mxu1 %v5478_v29 }
0x2c31   : > { %4310 = vmatpush.msra.mxu1 %v5477_v23 }
0x2c4c   : > { %4367 = vadd.xlane.f32.xlu0 %v4366_v21 }
0x2c81   : > { %v4187_v57 = vpop.xlane.xlu0 %4186 }
0x2c82   : > { %5801 = vrcp.f32 %v4187_v57 }
0x2c88   : > { %v5802_v61 = vpop.eup %5801 }
0x2c89   : > { %v4189_v63 = vmul.f32 %v5802_v61, %v5800_v51  ;;  %v5496_v61 = vld [vmem:[%s7359_s0 + $0xc8] sm:$0xff] }
0x2c8e   : > { %v4124_v60 = vpop.f32.mrf.mxu2 }
0x2c8f   : > { %5468 = vmatmul.msk.f32.vlgmr.msrb.gmra.mxu1 %vm955_vm1, %v4124_v60  ;;  %v5495_v60 = vld [vmem:[%s7359_s0 + $0xc0] sm:$0xff] }
0x2c94   : > { %v4191_v55 = vpop.permute.xlu0 %4190 }
0x2c95   : > { %5471 = vmatpush.msk.msrb.mxu0 %vm1552_vm4, %v4191_v55  ;;  %v5608_v55 = vpack.i.bf16 %v5495_v60, %v5496_v61 }
0x2c96   : > { %5472 = vmatmul.msk.f32.vlgmr.msrb.gmra.mxu0 %vm1548_vm8, %v4189_v63  ;;  %v5497_v63 = vld [vmem:[%s7359_s0 + $0xd0] sm:$0xff] }
0x2c97   : > { %4445 = vmatpush.msra.mxu0 %v5498_v56  ;;  %5609 = vrot.lane.b32.xlu0 %v5608_v55, %s7373_s28 }
0x2c99   : > { %4446 = vmatpush.msra.mxu0 %v5497_v63 }
0x2c9b   : > { %4447 = vmatpush.msra.mxu0 %v5496_v61 }
0x2c9d   : > { %4448 = vmatpush.msra.mxu0 %v5495_v60 }
0x2ca7   : > { %v4035_v15 = vpop.f32.mrf.mxu1 }
0x2ca8   : > { %v4059_v5 = vadd.f32 %v4058_v37, %v4035_v15  ;;  %v5658_v15 = vld [vmem:[%s7292_s18 + $0x5] ss:$0 sm:$0xff] }
0x2d0c   : > { %v4147_v4 = vpop.f32.mrf.mxu1 }
0x2d0d   : > { %v4150_v6 = vadd.f32 %v4147_v4, %v4059_v5  ;;  %v4368_v4 = vpop.xlane.xlu0 %4367 }
0x2d13   : > { %v4214_v59 = vpop.f32.mrf.mxu0 }
0x2d14   : > { %5473 = vmatmul.msk.f32.vlgmr.msrb.gmra.mxu2 %vm955_vm1, %v4214_v59  ;;  %v5603_v59 = vpack.i.bf16 %v5497_v63, %v5498_v56 }
0x2d15   : > { %v5610_v20 = vpop.permute.xlu0 %5609 }
0x2d16   : > { %v5612_v29 = vunpack.i.h.bf16 %v5610_v20 }
0x2d97   : > { %v4237_v8 = vpop.f32.mrf.mxu2 }
0x2d98   : > { %v4240_v9 = vadd.f32 %v4237_v8, %v4150_v6  ;;  %v4369_v6 = vmul.f32 %v4368_v4, %v6178_v47 }
0x2d9a   : > { %v4246_v10 = vadd.f32 %v5654_v7, %v4240_v9  ;;  %v4370_v9 = vsub.f32 %v6927_v52, %v4369_v6 }
0x2d9c   : > { %v7005_v11 = vadd.f32 %v4246_v10, %v6563_v41 }
0x2d9e   : > { %v4252_v58 = vsel %vm921_vm0, %v7005_v11, 0.0 }
0x2d9f   : > { %4253 = vadd.xlane.f32.xlu1 %v4252_v58  ;;  %v4371_v58 = vmul.f32 %v4370_v9, %v4370_v9 }
0x2e12   : > { %v4254_v14 = vpop.xlane.xlu1 %4253 }
0x2e13   : > { %v4255_v16 = vmul.f32 %v4254_v14, %v6178_v47  ;;  %v4372_v14 = vsel %vm1878_vm10, %v4371_v58, 0.0 }
0x2e15   : > { %v4256_v18 = vsub.f32 %v7005_v11, %v4255_v16 }
0x2e17   : > { %v4257_v2 = vmul.f32 %v4256_v18, %v4256_v18 }
0x2e19   : > { %v4258_v19 = vsel %vm921_vm0, %v4257_v2, 0.0 }
0x2e1a   : > { %4259 = vadd.xlane.f32.xlu2 %v4258_v19 }
0x2e32   : > { %5604 = vrot.lane.b32.xlu2 %v5603_v59, %s7373_s28 }
0x2e8d   : > { %v4260_v24 = vpop.xlane.xlu2 %4259 }
0x2e8e   : > { %v4261_v12 = vmul.f32 %v4260_v24, %v6178_v47 }
0x2e90   : > { %v4262_v25 = vadd.f32 1e-06, %v4261_v12 }
0x2e92   : > { %5803 = vrsqrt.f32 %v4262_v25  ;;  %vm4269_vm3 = vweird.f32 %v4262_v25 }
0x2e95   : > { %v5605_v16 = vpop.permute.xlu2 %5604 }
0x2e96   : > { %v5607_v2 = vunpack.i.h.bf16 %v5605_v16 }
0x2e98   : > { %v5804_v26 = vpop.eup %5803 }
0x2e99   : > { %v4264_v27 = vmul.f32 %v5804_v26, %v4262_v25  ;;  %vm4270_vm2 = vweird.f32 %v5804_v26 }
0x2e9a   : > { %vm4271_vm5 = vmor %vm4269_vm3, %vm4270_vm2 }
0x2e9b   : > { %v4265_v28 = vmul.f32 %v5804_v26, %v4264_v27 }
0x2e9d   : > { %v4266_v30 = vmul.f32 0.5, %v4265_v28 }
0x2e9f   : > { %v4267_v31 = vsub.f32 1.5, %v4266_v30 }
0x2ea1   : > { %v4268_v32 = vmul.f32 %v5804_v26, %v4267_v31 }
0x2ea3   : > { %v4272_v34 = vsel %vm4271_vm5, %v5804_v26, %v4268_v32 }
0x2ea4   : > { %v4273_v36 = vmul.f32 %v4272_v34, %v4256_v18  ;;  %v5606_v18 = vunpack.i.l.bf16 %v5605_v16  ;;  %v5659_v34 = vld [vmem:[%s7384_s6 + $0x6] ss:$0 sm:$0xff] }
0x2ea6   : > { %v4277_v37 = vmul.f32 %v5655_v33, %v4273_v36  ;;  %4487 = vmatpush.msra.mxu2 %v5606_v18 }
0x2ea8   : > { %v4281_v38 = vadd.f32 %v5656_v35, %v4277_v37  ;;  %4488 = vmatpush.msra.mxu2 %v5607_v2  ;;  %v5661_v35 = vld [vmem:[%s7369_s29 + $0x6] ss:$0 sm:$0xff] }
0x2ea9   : > { %v5660_v37 = vld [vmem:[%s7385_s25 + $0x6] ss:$0 sm:$0xff] }
0x2eaa   : > { %5482 = vmatmul.msk.f32.vlgmr.msra.gmra.mxu1 %vm921_vm0, %v4281_v38 }
0x2f27   : > { %v4312_v45 = vpop.f32.mrf.mxu1 }
0x2f28   : > { %v4313_v46 = vadd.f32 %v5657_v44, %v4312_v45 }
0x2f2a   : > { %v4316_v48 = vmul.f32 0.044715, %v4313_v46  ;;  %v4315_v21 = vmul.f32 0.5, %v4313_v46 }
0x2f2c   : > { %v4317_v49 = vmul.f32 %v4316_v48, %v4313_v46 }
0x2f2e   : > { %v4318_v17 = vmul.f32 %v4317_v49, %v4313_v46 }
0x2f30   : > { %v4319_v51 = vadd.f32 %v4318_v17, %v4313_v46 }
0x2f32   : > { %v4320_v13 = vmul.f32 0.7978846, %v4319_v51 }
0x2f34   : > { %5805 = vtanh.f32 %v4320_v13 }
0x2f3a   : > { %v5806_v50 = vpop.eup %5805 }
0x2f3b   : > { %v4322_v54 = vadd.f32 1.0, %v5806_v50 }
0x2f3d   : > { %v4323_v57 = vmul.f32 %v4322_v54, %v4315_v21 }
0x2f3f   : > { %5492 = vmatmul.msk.f32.vlgmr.msra.gmra.mxu3 %vm1403_vm9, %v4323_v57 }
0x2fc2   : > { %v4358_v5 = vpop.f32.mrf.mxu3 }
0x2fc3   : > { %v4359_v7 = vadd.f32 %v5658_v15, %v4358_v5 }
0x2fc5   : > { %v7079_v8 = vadd.f32 %v4359_v7, %v7005_v11  ;;  %v5611_v11 = vunpack.i.l.bf16 %v5610_v20  ;;  %v5502_v20 = vld [vmem:[%s7370_s9 + $0xc0] sm:$0xff] }
0x2fc7   : > { %v4396_v10 = vsel %vm921_vm0, %v7079_v8, 0.0  ;;  %4489 = vmatpush.msra.mxu2 %v5611_v11 }
0x2fc8   : > { %4397 = vadd.xlane.f32.xlu1 %v4396_v10 }
0x2fc9   : > { %4490 = vmatpush.msra.mxu2 %v5612_v29 }
0x2fd0   : > { %4373 = vadd.xlane.f32.xlu1 %v4372_v14 }
0x303b   : > { %v4398_v19 = vpop.xlane.xlu1 %4397 }
0x303c   : > { %v4399_v22 = vmul.f32 %v4398_v19, %v6178_v47 }
0x303e   : > { %v4400_v52 = vsub.f32 %v7079_v8, %v4399_v22 }
0x3040   : > { %v4401_v23 = vmul.f32 %v4400_v52, %v4400_v52 }
0x3042   : > { %v4402_v24 = vsel %vm921_vm0, %v4401_v23, 0.0 }
0x3043   : > { %4403 = vadd.xlane.f32.xlu1 %v4402_v24  ;;  %v4374_v12 = vpop.xlane.xlu1 %4373 }
0x3044   : > { %v4375_v25 = vmul.f32 %v4374_v12, %v6178_v47 }
0x3046   : > { %v4376_v26 = vadd.f32 1e-06, %v4375_v25 }
0x3048   : > { %5807 = vrsqrt.f32 %v4376_v26  ;;  %vm4383_vm6 = vweird.f32 %v4376_v26 }
0x304e   : > { %v5808_v27 = vpop.eup %5807 }
0x304f   : > { %v4378_v28 = vmul.f32 %v5808_v27, %v4376_v26  ;;  %vm4384_vm10 = vweird.f32 %v5808_v27 }
0x3050   : > { %vm4385_vm7 = vmor %vm4383_vm6, %vm4384_vm10 }
0x3051   : > { %v4379_v30 = vmul.f32 %v5808_v27, %v4378_v28 }
0x3053   : > { %v4380_v31 = vmul.f32 0.5, %v4379_v30 }
0x3055   : > { %v4381_v32 = vsub.f32 1.5, %v4380_v31 }
0x3057   : > { %v4382_v33 = vmul.f32 %v5808_v27, %v4381_v32 }
0x3059   : > { %v4386_v36 = vsel %vm4385_vm7, %v5808_v27, %v4382_v33 }
0x305a   : > { %v4387_v38 = vmul.f32 %v4386_v36, %v4370_v9 }
0x305c   : > { %v4391_v53 = vmul.f32 %v5659_v34, %v4387_v38  ;;  %4469 = vrot.lane.b32.xlu1 %v5661_v35, %s7373_s28 }
0x305e   : > { %v4395_v40 = vadd.f32 %v5660_v37, %v4391_v53  ;;  %v5503_v53 = vld [vmem:[%s7370_s9 + $0xc8] sm:$0xff] }
0x305f   : > { %4648 = vmatpush.msrb.mxu3 %v5503_v53  ;;  %v5537_v53 = vld [vmem:[%s7291_s17 + $0x190] sm:$0xff] }
0x3060   : > { %5501 = vmatmul.msk.f32.vlgmr.msra.gmra.mxu2 %vm921_vm0, %v4395_v40 }
0x30b6   : > { %v4404_v42 = vpop.xlane.xlu1 %4403 }
0x30b7   : > { %v4405_v0 = vmul.f32 %v4404_v42, %v6178_v47 }
0x30b9   : > { %v4406_v1 = vadd.f32 1e-06, %v4405_v0 }
0x30bb   : > { %5809 = vrsqrt.f32 %v4406_v1  ;;  %vm4413_vm12 = vweird.f32 %v4406_v1 }
0x30c1   : > { %v5810_v3 = vpop.eup %5809 }
0x30c2   : > { %v4408_v43 = vmul.f32 %v5810_v3, %v4406_v1  ;;  %vm4414_vm11 = vweird.f32 %v5810_v3 }
0x30c3   : > { %vm4415_vm13 = vmor %vm4413_vm12, %vm4414_vm11  ;;  %vm5109_vm12 = vcmask 7168  }
0x30c4   : > { %v4409_v39 = vmul.f32 %v5810_v3, %v4408_v43 }
0x30c6   : > { %v4410_v44 = vmul.f32 0.5, %v4409_v39 }
0x30c8   : > { %v4411_v45 = vsub.f32 1.5, %v4410_v44 }
0x30ca   : > { %v4412_v46 = vmul.f32 %v5810_v3, %v4411_v45 }
0x30cc   : > { %v4416_v48 = vsel %vm4415_vm13, %v5810_v3, %v4412_v46 }
0x30cd   : > { %v4417_v49 = vmul.f32 %v4416_v48, %v4400_v52 }
0x30ce   : > { %v4470_v13 = vpop.permute.xlu1 %4469 }
0x30cf   : > { %v4418_v17 = vmul.f32 %v5659_v34, %v4417_v49 }
0x30d1   : > { %v4419_v51 = vadd.f32 %v5660_v37, %v4418_v17 }
0x30d3   : > { %5500 = vmatmul.msk.f32.vlgmr.msra.gmra.mxu0 %vm921_vm0, %v4419_v51  ;;  %v5504_v51 = vld [vmem:[%s7370_s9 + $0xd0] sm:$0xff] }
0x30d4   : > { %4760 = vmatpush.msra.mxu3 %v5504_v51 }
0x30e3   : > { %v4492_v50 = vpop.f32.mrf.mxu2 }
0x30e4   : > { %v7102_v21 = vadd.f32 %v4492_v50, %v4470_v13 }
0x30e6   : > { %4537 = vrot.lane.b32.xlu1 %v7102_v21, %s7373_s28  ;;  %5506 = vmatpush.xpose.msk.msrb.mxu1 %vm955_vm1, %v7102_v21 }
0x30ee   : > { %4566 = vrot.lane.b32.xlu1 %v7102_v21, %s7379_s7 }
0x3150   : > { %v4450_v54 = vpop.f32.mrf.mxu0 }
0x3151   : > { %v4451_v57 = vadd.f32 %v5661_v35, %v4450_v54 }
0x3153   : > { %4564 = vrot.lane.b32.xlu1 %v4451_v57, %s7379_s7  ;;  %5507 = vmatmul.msk.f32.vlgmr.msrb.gmra.mxu1 %vm955_vm1, %v4451_v57 }
0x3158   : > { %v4538_v60 = vpop.permute.xlu1 %4537 }
0x3159   : > { %5508 = vmatpush.msk.msrb.mxu0 %vm1552_vm4, %v4538_v60 }
0x315b   : > { %4678 = vrot.lane.b32.xlu1 %v7102_v21, %s7378_s24  ;;  %4671 = vmatpush.msra.mxu0 %v5502_v20  ;;  %v5529_v20 = vld [vmem:[%s7289_s15 + $0xc0] sm:$0xff] }
0x3160   : > { %v4567_v61 = vpop.permute.xlu1 %4566 }
0x3161   : > { %5510 = vmatpush.xpose.msk.msrb.mxu2 %vm955_vm1, %v4567_v61 }
0x3163   : > { %4676 = vrot.lane.b32.xlu1 %v4451_v57, %s7378_s24  ;;  %s7395_s24 = sld [smem:[#allocation27_spill]] }
0x3169   : > { %s898_s7 = scalar_lea.vmem %s7395_s24, %s7393_s21 }
0x31c5   : > { %v4565_v63 = vpop.permute.xlu1 %4564 }
0x31c6   : > { %5511 = vmatmul.msk.f32.vlgmr.msrb.gmra.mxu2 %vm955_vm1, %v4565_v63 }
0x31cd   : > { %v4679_v55 = vpop.permute.xlu1 %4678 }
0x31ce   : > { %5516 = vmatpush.xpose.msk.msra.mxu2 %vm955_vm1, %v4679_v55 }
0x31d0   : > { %v4523_v56 = vpop.f32.mrf.mxu1 }
0x31d1   : > { %v4524_v59 = vadd.f32 %v6945_v62, %v4523_v56 }
0x31d3   : > { %v4526_v15 = vsel %vm1548_vm8, %v4524_v59, -inf }
0x31d4   : > { %4527 = vmax.xlane.f32.xlu0 %v4526_v15  ;;  %v5662_v15 = vld [vmem:[%s7286_s12 + $0x6] ss:$0 sm:$0xff] }
0x31d5   : > { %v4677_v4 = vpop.permute.xlu1 %4676 }
0x31d6   : > { %5517 = vmatmul.msk.f32.vlgmr.msra.gmra.mxu2 %vm955_vm1, %v4677_v4 }
0x31e8   : > { %4768 = vrot.lane.b32.xlu0 %v7102_v21, %s7380_s10 }
0x3247   : > { %v4528_v5 = vpop.xlane.xlu0 %4527 }
0x3248   : > { %v4529_v6 = vsub.f32 %v4524_v59, %v4528_v5 }
0x3249   : > { %v4589_v7 = vpop.f32.mrf.mxu2 }
0x324a   : > { %v4530_v9 = vmul.f32 1.442695, %v4529_v6  ;;  %v4590_v10 = vadd.f32 %v6945_v62, %v4589_v7 }
0x324c   : > { %5811 = vpow2.f32 %v4530_v9  ;;  %v4592_v58 = vsel %vm1548_vm8, %v4590_v10, -inf }
0x324d   : > { %4593 = vmax.xlane.f32.xlu1 %v4592_v58 }
0x3252   : > { %v5812_v14 = vpop.eup %5811 }
0x3253   : > { %v4532_v16 = vsel %vm1548_vm8, %v5812_v14, 0.0 }
0x3254   : > { %4533 = vadd.xlane.f32.xlu2 %v4532_v16 }
0x3259   : > { %v4701_v18 = vpop.f32.mrf.mxu2 }
0x325a   : > { %v4702_v2 = vadd.f32 %v6945_v62, %v4701_v18  ;;  %v4769_v23 = vpop.permute.xlu0 %4768 }
0x325c   : > { %v4704_v19 = vsel %vm1548_vm8, %v4702_v2, -inf }
0x325d   : > { %4705 = vmax.xlane.f32.xlu0 %v4704_v19  ;;  %v5530_v19 = vld [vmem:[%s7289_s15 + $0xc8] sm:$0xff] }
0x326c   : > { %4766 = vrot.lane.b32.xlu2 %v4451_v57, %s7380_s10 }
0x3271   : > { %4603 = vrot.lane.b32.xlu0 %v7102_v21, %s7374_s2  ;;  %s7392_s2 = sld [smem:[#allocation26_spill]] }
0x32c0   : > { %v4594_v22 = vpop.xlane.xlu1 %4593 }
0x32c1   : > { %v4595_v11 = vsub.f32 %v4590_v10, %v4594_v22 }
0x32c3   : > { %v4596_v52 = vmul.f32 1.442695, %v4595_v11 }
0x32c5   : > { %5813 = vpow2.f32 %v4596_v52 }
0x32c7   : > { %v4534_v29 = vpop.xlane.xlu2 %4533 }
0x32c8   : > { %5815 = vrcp.f32 %v4534_v29 }
0x32cb   : > { %v5814_v24 = vpop.eup %5813 }
0x32cc   : > { %v4598_v12 = vsel %vm1548_vm8, %v5814_v24, 0.0 }
0x32cd   : > { %4599 = vadd.xlane.f32.xlu1 %v4598_v12 }
0x32ce   : > { %v5816_v25 = vpop.eup %5815 }
0x32cf   : > { %v4536_v26 = vmul.f32 %v5816_v25, %v5812_v14  ;;  %v4767_v38 = vpop.permute.xlu2 %4766 }
0x32d0   : > { %v4706_v27 = vpop.xlane.xlu0 %4705 }
0x32d1   : > { %v4707_v28 = vsub.f32 %v4702_v2, %v4706_v27  ;;  %5509 = vmatmul.msk.f32.vlgmr.msrb.gmra.mxu0 %vm1548_vm8, %v4536_v26  ;;  %v5532_v2 = vld [vmem:[%s7289_s15 + $0xd8] sm:$0xff]  ;;  %v5663_v27 = vld [vmem:[%s7287_s13 + $0x6] ss:$0 sm:$0xff] }
0x32d2   : > { %5521 = vmatpush.xpose.msk.msrb.mxu0 %vm955_vm1, %v4769_v23 }
0x32d3   : > { %v4708_v30 = vmul.f32 1.442695, %v4707_v28 }
0x32d5   : > { %5817 = vpow2.f32 %v4708_v30  ;;  %v5664_v30 = vld [vmem:[%s7288_s14 + $0x6] ss:$0 sm:$0xff] }
0x32db   : > { %v5818_v31 = vpop.eup %5817 }
0x32dc   : > { %v4710_v32 = vsel %vm1548_vm8, %v5818_v31, 0.0 }
0x32dd   : > { %4711 = vadd.xlane.f32.xlu1 %v4710_v32 }
0x32e3   : > { %v4604_v33 = vpop.permute.xlu0 %4603 }
0x32e4   : > { %5512 = vmatpush.msk.msra.mxu1 %vm1552_vm4, %v4604_v33 }
0x3340   : > { %v4600_v34 = vpop.xlane.xlu1 %4599 }
0x3341   : > { %5819 = vrcp.f32 %v4600_v34  ;;  %v5542_v34 = vld [vmem:[%s7291_s17 + $0x1b8] sm:$0xff] }
0x3347   : > { %v5820_v35 = vpop.eup %5819 }
0x3348   : > { %v4602_v36 = vmul.f32 %v5820_v35, %v5814_v24  ;;  %v5541_v35 = vld [vmem:[%s7291_s17 + $0x1b0] sm:$0xff] }
0x334a   : > { %5513 = vmatmul.msk.f32.vlgmr.msra.gmra.mxu1 %vm1548_vm8, %v4602_v36  ;;  %v5540_v36 = vld [vmem:[%s7291_s17 + $0x1a8] sm:$0xff] }
0x334e   : > { %v4561_v37 = vpop.f32.mrf.mxu0 }
0x334f   : > { %5515 = vmatmul.msk.f32.vlgmr.msra.gmra.mxu0 %vm955_vm1, %v4561_v37  ;;  %v5539_v37 = vld [vmem:[%s7291_s17 + $0x1a0] sm:$0xff] }
0x3350   : > { %v4712_v43 = vpop.xlane.xlu1 %4711  ;;  %4964 = vmatpush.msra.mxu0 %v5542_v34 }
0x3351   : > { %5821 = vrcp.f32 %v4712_v43 }
0x3352   : > { %4965 = vmatpush.msra.mxu0 %v5541_v35 }
0x3354   : > { %4966 = vmatpush.msra.mxu0 %v5540_v36 }
0x3356   : > { %4967 = vmatpush.msra.mxu0 %v5539_v37 }
0x3357   : > { %5522 = vmatmul.msk.f32.vlgmr.msrb.gmra.mxu0 %vm955_vm1, %v4767_v38  ;;  %v5822_v46 = vpop.eup %5821  ;;  %v5538_v38 = vld [vmem:[%s7291_s17 + $0x198] sm:$0xff] }
0x3358   : > { %v4714_v48 = vmul.f32 %v5822_v46, %v5818_v31  ;;  %4968 = vmatpush.msra.mxu0 %v5538_v38 }
0x335a   : > { %4969 = vmatpush.msra.mxu0 %v5537_v53  ;;  %v5845_v53 = vld [vmem:[%s7386_s30] ss:$0 sm:$0xff] }
0x33c7   : > { %v4627_v40 = vpop.f32.mrf.mxu1 }
0x33c8   : > { %5514 = vmatmul.msk.f32.vlgmr.msrb.gmra.mxu3 %vm955_vm1, %v4627_v40  ;;  %v5536_v40 = vld [vmem:[%s7291_s17 + $0x188] sm:$0xff] }
0x33c9   : > { %4922 = vmatpush.msrb.mxu3 %v5532_v2  ;;  %4970 = vmatpush.msra.mxu0 %v5536_v40 }
0x33cc   : > { %v4673_v42 = vpop.f32.mrf.mxu0 }
0x33d4   : > { %v4791_v0 = vpop.f32.mrf.mxu0 }
0x33d5   : > { %v4792_v1 = vadd.f32 %v6945_v62, %v4791_v0  ;;  %v4980_v0 = vld [vmem:[%s7391_s27 + $0x18] sm:$0xff] }
0x33d7   : > { %v4794_v3 = vsel %vm1548_vm8, %v4792_v1, -inf }
0x33d8   : > { %4795 = vmax.xlane.f32.xlu2 %v4794_v3 }
0x33f0   : > { %4715 = vrot.lane.b32.xlu2 %v7102_v21, %s7376_s5 }
0x344b   : > { %v4796_v39 = vpop.xlane.xlu2 %4795  ;;  %v4650_v63 = vpop.f32.mrf.mxu3 }
0x344c   : > { %v4797_v44 = vsub.f32 %v4792_v1, %v4796_v39  ;;  %v4674_v56 = vadd.f32 %v4673_v42, %v4650_v63  ;;  %v5535_v42 = vld [vmem:[%s7291_s17 + $0x180] sm:$0xff] }
0x344d   : > { %4971 = vmatpush.msra.mxu0 %v5535_v42  ;;  %v5665_v1 = vld [vmem:[%s7290_s16 + $0x6] ss:$0 sm:$0xff]  ;;  %v5667_v63 = vld [vmem:[#allocation3] ss:$0 sm:$0xff] }
0x344e   : > { %v4798_v45 = vmul.f32 1.442695, %v4797_v44 }
0x3450   : > { %5823 = vpow2.f32 %v4798_v45 }
0x3453   : > { %v4716_v49 = vpop.permute.xlu2 %4715 }
0x3454   : > { %5518 = vmatpush.msk.msrb.mxu1 %vm1552_vm4, %v4716_v49 }
0x3455   : > { %5519 = vmatmul.msk.f32.vlgmr.msrb.gmra.mxu1 %vm1548_vm8, %v4714_v48 }
0x3456   : > { %v5824_v62 = vpop.eup %5823 }
0x3457   : > { %v4800_v17 = vsel %vm1548_vm8, %v5824_v62, 0.0 }
0x3458   : > { %4801 = vadd.xlane.f32.xlu1 %v4800_v17 }
0x3471   : > { %4805 = vrot.lane.b32.xlu1 %v7102_v21, %s7377_s22  ;;  %v5505_v21 = vld [vmem:[%s7370_s9 + $0xd8] sm:$0xff] }
0x3472   : > { %4850 = vmatpush.msra.mxu1 %v5505_v21 }
0x34cb   : > { %v4802_v50 = vpop.xlane.xlu1 %4801 }
0x34cc   : > { %5825 = vrcp.f32 %v4802_v50  ;;  %v4978_v50 = vld [vmem:[%s7391_s27 + $0x8] sm:$0xff] }
0x34d2   : > { %v4739_v13 = vpop.f32.mrf.mxu1  ;;  %v5826_v54 = vpop.eup %5825 }
0x34d3   : > { %5520 = vmatmul.msk.f32.vlgmr.msra.gmra.mxu3 %vm955_vm1, %v4739_v13  ;;  %v4804_v57 = vmul.f32 %v5826_v54, %v5824_v62  ;;  %v4979_v13 = vld [vmem:[%s7391_s27 + $0x10] sm:$0xff]  ;;  %v4977_v54 = vld [vmem:[%s7391_s27] sm:$0xff] }
0x34e3   : > { %v4806_v60 = vpop.permute.xlu1 %4805 }
0x34e4   : > { %5523 = vmatpush.msk.msrb.mxu2 %vm1552_vm4, %v4806_v60 }
0x34e5   : > { %5524 = vmatmul.msk.f32.vlgmr.msrb.gmra.mxu2 %vm1548_vm8, %v4804_v57  ;;  %v5666_v57 = vld [vmem:[%s7292_s18 + $0x6] ss:$0 sm:$0xff] }
0x34e6   : > { %5000 = vmatpush.msra.mxu2 %v4980_v0  ;;  %v5668_v0 = vld [vmem:[#allocation4] ss:$0 sm:$0xff] }
0x34e8   : > { %5001 = vmatpush.msra.mxu2 %v4979_v13 }
0x34ea   : > { %5002 = vmatpush.msra.mxu2 %v4978_v50 }
0x34ec   : > { %5003 = vmatpush.msra.mxu2 %v4977_v54 }
0x3556   : > { %v4762_v55 = vpop.f32.mrf.mxu3 }
0x3557   : > { %v4765_v59 = vadd.f32 %v4762_v55, %v4674_v56 }
0x3568   : > { %v4829_v61 = vpop.f32.mrf.mxu2 }
0x3569   : > { %5525 = vmatmul.msk.f32.vlgmr.msra.gmra.mxu1 %vm955_vm1, %v4829_v61 }
0x35e6   : > { %v4852_v4 = vpop.f32.mrf.mxu1 }
0x35e7   : > { %v4855_v5 = vadd.f32 %v4852_v4, %v4765_v59 }
0x35e9   : > { %v4861_v6 = vadd.f32 %v5662_v15, %v4855_v5 }
0x35eb   : > { %v7170_v7 = vadd.f32 %v4861_v6, %v7079_v8  ;;  %v5531_v8 = vld [vmem:[%s7289_s15 + $0xd0] sm:$0xff] }
0x35ec   : > { %4923 = vmatpush.msrb.mxu3 %v5531_v8 }
0x35ed   : > { %v4867_v9 = vsel %vm921_vm0, %v7170_v7, 0.0 }
0x35ee   : > { %4868 = vadd.xlane.f32.xlu0 %v4867_v9  ;;  %4924 = vmatpush.msrb.mxu3 %v5530_v19 }
0x35f0   : > { %4925 = vmatpush.msrb.mxu3 %v5529_v20 }
0x3661   : > { %v4869_v10 = vpop.xlane.xlu0 %4868 }
0x3662   : > { %v4870_v58 = vmul.f32 %v4869_v10, %v6178_v47 }
0x3664   : > { %v4871_v14 = vsub.f32 %v7170_v7, %v4870_v58 }
0x3666   : > { %v4872_v16 = vmul.f32 %v4871_v14, %v4871_v14 }
0x3668   : > { %v4873_v18 = vsel %vm921_vm0, %v4872_v16, 0.0 }
0x3669   : > { %4874 = vadd.xlane.f32.xlu2 %v4873_v18 }
0x36dc   : > { %v4875_v22 = vpop.xlane.xlu2 %4874 }
0x36dd   : > { %v4876_v11 = vmul.f32 %v4875_v22, %v6178_v47 }
0x36df   : > { %v4877_v52 = vadd.f32 1e-06, %v4876_v11 }
0x36e1   : > { %5827 = vrsqrt.f32 %v4877_v52  ;;  %vm4884_vm4 = vweird.f32 %v4877_v52 }
0x36e7   : > { %v5828_v29 = vpop.eup %5827 }
0x36e8   : > { %v4879_v23 = vmul.f32 %v5828_v29, %v4877_v52  ;;  %vm4885_vm1 = vweird.f32 %v5828_v29 }
0x36e9   : > { %vm4886_vm8 = vmor %vm4884_vm4, %vm4885_vm1 }
0x36ea   : > { %v4880_v24 = vmul.f32 %v5828_v29, %v4879_v23 }
0x36ec   : > { %v4881_v12 = vmul.f32 0.5, %v4880_v24 }
0x36ee   : > { %v4882_v25 = vsub.f32 1.5, %v4881_v12  ;;  %v5061_v12 = vld [vmem:[%s7392_s2 + $0x18] sm:$0xff] }
0x36ef   : > { %5081 = vmatpush.msrb.mxu1 %v5061_v12 }
0x36f0   : > { %v4883_v26 = vmul.f32 %v5828_v29, %v4882_v25  ;;  %v5059_v25 = vld [vmem:[%s7392_s2 + $0x8] sm:$0xff] }
0x36f2   : > { %v4887_v28 = vsel %vm4886_vm8, %v5828_v29, %v4883_v26  ;;  %v5058_v26 = vld [vmem:[%s7392_s2] sm:$0xff] }
0x36f3   : > { %v4888_v31 = vmul.f32 %v4887_v28, %v4871_v14 }
0x36f5   : > { %v4892_v32 = vmul.f32 %v5663_v27, %v4888_v31 }
0x36f7   : > { %v4896_v33 = vadd.f32 %v5664_v30, %v4892_v32 }
0x36f9   : > { %5534 = vmatmul.msk.f32.vlgmr.msrb.gmra.mxu3 %vm921_vm0, %v4896_v33 }
0x377c   : > { %v4927_v3 = vpop.f32.mrf.mxu3 }
0x377d   : > { %v4928_v43 = vadd.f32 %v5665_v1, %v4927_v3 }
0x377f   : > { %v4931_v39 = vmul.f32 0.044715, %v4928_v43  ;;  %v4930_v62 = vmul.f32 0.5, %v4928_v43 }
0x3781   : > { %v4932_v44 = vmul.f32 %v4931_v39, %v4928_v43 }
0x3783   : > { %v4933_v45 = vmul.f32 %v4932_v44, %v4928_v43 }
0x3785   : > { %v4934_v46 = vadd.f32 %v4933_v45, %v4928_v43 }
0x3787   : > { %v4935_v48 = vmul.f32 0.7978846, %v4934_v46 }
0x3789   : > { %5829 = vtanh.f32 %v4935_v48 }
0x378f   : > { %v5830_v49 = vpop.eup %5829 }
0x3790   : > { %v4937_v17 = vadd.f32 1.0, %v5830_v49 }
0x3792   : > { %v4938_v51 = vmul.f32 %v4937_v17, %v4930_v62 }
0x3794   : > { %5544 = vmatmul.msk.f32.vlgmr.msra.gmra.mxu0 %vm1403_vm9, %v4938_v51 }
0x3811   : > { %v4973_v60 = vpop.f32.mrf.mxu0 }
0x3812   : > { %v4974_v21 = vadd.f32 %v5666_v57, %v4973_v60  ;;  %v5847_v57 = vld [vmem:[%s7394_s19] sm:$0xff] }
0x3814   : > { %v4976_v61 = vadd.f32 %v4974_v21, %v7170_v7 }
0x3816   : > { %5545 = vmatmul.msk.f32.vlgmr.msra.gmra.mxu2 %vm921_vm0, %v4976_v61 }
0x3899   : > { %v5005_v55 = vpop.f32.mrf.mxu2 }
0x389a   : > { %v5006_v56 = vadd.f32 %v5667_v63, %v5005_v55 }
0x389c   : > { %v5546_v59 = vmul.f32 -1.442695, %v5006_v56 }
0x389e   : > { %5831 = vpow2.f32 %v5546_v59 }
0x38a4   : > { %v5832_v15 = vpop.eup %5831 }
0x38a5   : > { %v5011_v4 = vadd.f32 1.0, %v5832_v15 }
0x38a7   : > { %5833 = vrcp.f32 %v5011_v4  ;;  %v5023_v10 = vand.u32 2147483648, %v5011_v4  ;;  %v5021_v14 = vand.u32 2147483647, %v5011_v4  ;;  %vm5017_vm14 = vweird.f32 %v5011_v4 }
0x38a9   : > { %v5024_v7 = vor.u32 1.1754944e-38, %v5023_v10  ;;  %vm5022_vm2 = vcmp.eq.f32.partialorder %v5021_v14, 8.507059e+37 }
0x38ad   : > { %v5834_v5 = vpop.eup %5833 }
0x38ae   : > { %v5013_v6 = vmul.f32 %v5834_v5, %v5011_v4  ;;  %vm5018_vm9 = vweird.f32 %v5834_v5 }
0x38af   : > { %vm5019_vm15 = vmor %vm5017_vm14, %vm5018_vm9 }
0x38b0   : > { %v5014_v9 = vsub.f32 1.0, %v5013_v6 }
0x38b2   : > { %v5015_v58 = vmul.f32 %v5834_v5, %v5014_v9 }
0x38b4   : > { %v5016_v16 = vadd.f32 %v5834_v5, %v5015_v58 }
0x38b6   : > { %v5020_v18 = vsel %vm5019_vm15, %v5834_v5, %v5016_v16 }
0x38b7   : > { %v5025_v2 = vsel %vm5022_vm2, %v5024_v7, %v5020_v18 }
0x38b8   : > { %5029 = vperm.xlu1 %5613, %v5025_v2  }
0x392a   : > { %v5030_v8 = vpop.permute.xlu1 %5029 }
0x392b   : > { %v5032_v19 = vmul.f32 %v5030_v8, %v4976_v61 }
0x392d   : > { %v5033_v20 = vadd.f32 %v5032_v19, %v6563_v41  ;;  %v5060_v41 = vld [vmem:[%s7392_s2 + $0x10] sm:$0xff] }
0x392e   : > { %5082 = vmatpush.msrb.mxu1 %v5060_v41 }
0x392f   : > { %v5034_v22 = vsel %vm921_vm0, %v5033_v20, 0.0 }
0x3930   : > { %5035 = vadd.xlane.f32.xlu1 %v5034_v22  ;;  %5083 = vmatpush.msrb.mxu1 %v5059_v25 }
0x3932   : > { %5084 = vmatpush.msrb.mxu1 %v5058_v26 }
0x39a3   : > { %v5036_v11 = vpop.xlane.xlu1 %5035 }
0x39a4   : > { %v5037_v52 = vmul.f32 %v5036_v11, %v6178_v47 }
0x39a6   : > { %v5038_v29 = vsub.f32 %v5033_v20, %v5037_v52 }
0x39a8   : > { %v5039_v23 = vmul.f32 %v5038_v29, %v5038_v29 }
0x39aa   : > { %v5040_v24 = vsel %vm921_vm0, %v5039_v23, 0.0 }
0x39ab   : > { %5041 = vadd.xlane.f32.xlu0 %v5040_v24 }
0x3a1e   : > { %v5042_v27 = vpop.xlane.xlu0 %5041 }
0x3a1f   : > { %v5043_v28 = vmul.f32 %v5042_v27, %v6178_v47  ;;  %v5846_v47 = vld [vmem:[%s7387_s4] ss:$0 sm:$0xff] }
0x3a21   : > { %v5044_v30 = vadd.f32 1e-06, %v5043_v28 }
0x3a23   : > { %5835 = vrsqrt.f32 %v5044_v30  ;;  %vm5051_vm5 = vweird.f32 %v5044_v30 }
0x3a29   : > { %v5836_v31 = vpop.eup %5835 }
0x3a2a   : > { %v5046_v32 = vmul.f32 %v5836_v31, %v5044_v30  ;;  %vm5052_vm3 = vweird.f32 %v5836_v31 }
0x3a2b   : > { %vm5053_vm10 = vmor %vm5051_vm5, %vm5052_vm3 }
0x3a2c   : > { %v5047_v33 = vmul.f32 %v5836_v31, %v5046_v32 }
0x3a2e   : > { %v5048_v34 = vmul.f32 0.5, %v5047_v33 }
0x3a30   : > { %v5049_v35 = vsub.f32 1.5, %v5048_v34 }
0x3a32   : > { %v5050_v36 = vmul.f32 %v5836_v31, %v5049_v35 }
0x3a34   : > { %v5054_v37 = vsel %vm5053_vm10, %v5836_v31, %v5050_v36 }
0x3a35   : > { %v5055_v38 = vmul.f32 %v5054_v37, %v5038_v29 }
0x3a37   : > { %v5056_v40 = vmul.f32 %v5845_v53, %v5055_v38 }
0x3a39   : > { %v5057_v42 = vadd.f32 %v5846_v47, %v5056_v40 }
0x3a3b   : > { %5547 = vmatmul.msk.f32.vlgmr.msrb.gmra.mxu1 %vm921_vm0, %v5057_v42 }
0x3ab8   : > { %v5086_v1 = vpop.f32.mrf.mxu1 }
0x3ab9   : > { %v5087_v3 = vadd.f32 %v5668_v0, %v5086_v1 }
0x3abb   : > { %v5548_v43 = vmul.f32 -1.442695, %v5087_v3 }
0x3abd   : > { %5837 = vpow2.f32 %v5548_v43 }
0x3ac3   : > { %v5838_v39 = vpop.eup %5837 }
0x3ac4   : > { %v5092_v44 = vadd.f32 1.0, %v5838_v39 }
0x3ac6   : > { %5839 = vrcp.f32 %v5092_v44  ;;  %v5104_v49 = vand.u32 2147483648, %v5092_v44  ;;  %v5102_v17 = vand.u32 2147483647, %v5092_v44  ;;  %vm5098_vm7 = vweird.f32 %v5092_v44 }
0x3ac8   : > { %v5105_v13 = vor.u32 1.1754944e-38, %v5104_v49  ;;  %vm5103_vm11 = vcmp.eq.f32.partialorder %v5102_v17, 8.507059e+37 }
0x3acc   : > { %v5840_v45 = vpop.eup %5839 }
0x3acd   : > { %v5094_v46 = vmul.f32 %v5840_v45, %v5092_v44  ;;  %vm5099_vm6 = vweird.f32 %v5840_v45 }
0x3ace   : > { %vm5100_vm0 = vmor %vm5098_vm7, %vm5099_vm6 }
0x3acf   : > { %v5095_v48 = vsub.f32 1.0, %v5094_v46 }
0x3ad1   : > { %v5096_v62 = vmul.f32 %v5840_v45, %v5095_v48 }
0x3ad3   : > { %v5097_v51 = vadd.f32 %v5840_v45, %v5096_v62 }
0x3ad5   : > { %v5101_v50 = vsel %vm5100_vm0, %v5840_v45, %v5097_v51 }
0x3ad6   : > { %v5106_v54 = vsel %vm5103_vm11, %v5105_v13, %v5101_v50 }
0x3ad7   : > { %v5108_v60 = vmul.f32 %v5847_v57, %v5106_v54 }
0x3ad9   : > { %5110 = vst.msk [vmem:[%s898_s7] sm:$0xff] %vm5109_vm12, %v5108_v60 }
0x3ada PF: > { %s7396_s5 = sld [smem:[#allocation5_spill]] }
0x3ae0   : > { %s43_s28 = sadd.s32 1, %s7396_s5  }
0x3ae1   : > { %p40_p4 = scmp.ge.s32.totalorder %s43_s28, 4  }
0x3ae3   :  { %42 = sbr.rel (!%p40_p4) target bundleno = 19 (0x13), region = 239 }

</bundles_post_ra>
